<compile_context>
chip_gen: v5e
topology: v5e:2x2
jax: 0.10.0
libtpu: 0.0.40
codegen_flags: <defaults>
</compile_context>

<pallas_src>
import math

import numpy as np
import jax
import jax.numpy as jnp
from jax import lax
from jax.experimental import pallas as pl
from jax.experimental.pallas import tpu as pltpu

# ---- model config (small shapes, consistent with the SigmaVAE module) ----
INPUT_CHANNELS = 1
INPUT_HW = 16
LATENT_DIM = 8
HIDDEN_DIMS = [8, 16, 32, 32]
LEAKY_SLOPE = 0.01     # nn.LeakyReLU default
BN_EPS = 1e-5          # nn.BatchNorm2d default
MXU_DTYPE = jnp.bfloat16   # bf16 at the MXU inputs (native on v6e/v7x, fine on v5e)

CONV_HW = INPUT_HW // (2 ** len(HIDDEN_DIMS))   # -> 1 (encoder output is 1x1)
FLAT_SIZE = HIDDEN_DIMS[-1] * CONV_HW * CONV_HW
OUT_N = INPUT_HW * INPUT_HW * INPUT_CHANNELS    # lane-dense recon width (256)
GB_STRIDE = 128                                 # per-BN-layer lane stride in the gamma/beta slab


# ------------------------- static layer plan -------------------------

def _layer_plans():
    """Geometry of every conv-type layer, in forward order (9 layers)."""
    plans = []
    hw, in_ch = INPUT_HW, INPUT_CHANNELS
    for h_dim in HIDDEN_DIMS:                      # encoder: Conv2d(k3,s2,p1)+BN+LReLU
        plans.append(dict(kind="conv", hw=hw, ic=in_ch, ohw=hw // 2, oc=h_dim))
        hw //= 2
        in_ch = h_dim
    rev = HIDDEN_DIMS[::-1]
    for i in range(len(rev) - 1):                  # decoder: ConvT(k3,s2,p1,op1)+BN+LReLU
        plans.append(dict(kind="convT", hw=hw, ic=rev[i], ohw=hw * 2, oc=rev[i + 1]))
        hw *= 2
    plans.append(dict(kind="convT", hw=hw, ic=rev[-1], ohw=hw * 2, oc=rev[-1]))
    hw *= 2
    plans.append(dict(kind="conv1", hw=hw, ic=rev[-1], ohw=hw, oc=INPUT_CHANNELS))
    return plans


def _bn_layout():
    """Static offsets of every BN layer inside the packed pool/tile/gb slabs."""
    plans = _layer_plans()
    info, p_off, t_off = [], 0, 0
    for l, p in enumerate(plans[:-1]):             # all conv-type layers except final conv
        s = p["ohw"] * p["ohw"]
        oc = p["oc"]
        n = s * oc
        info.append(dict(n=n, oc=oc, s=s, pool_off=p_off, tile_off=t_off,
                         gb_off=l * GB_STRIDE))
        p_off += n
        t_off += oc
    return info, p_off, t_off


def _bias_layout():
    """Static lane offsets inside the packed bias slab (all 128-aligned)."""
    plans = _layer_plans()
    dec1_n = plans[4]["ohw"] ** 2 * plans[4]["oc"]     # 128
    out_n = plans[8]["ohw"] ** 2 * plans[8]["oc"]      # 256
    rnd = lambda x: max(128, ((x + 127) // 128) * 128)
    dec1_off = rnd(2 * LATENT_DIM)
    fin_off = dec1_off + rnd(dec1_n)
    width = fin_off + rnd(out_n)
    return dict(dec1_off=dec1_off, dec1_n=dec1_n, fin_off=fin_off, out_n=out_n,
                width=width)


# ------------------------- selection-matrix builders (host-side, static) -------------------------

def _sel_conv(n_in, n_out, stride, k):
    """S[i, o] = 1 iff i == stride*o + k - 1 (padding=1)."""
    s = np.zeros((n_in, n_out), np.float32)
    for o in range(n_out):
        i = stride * o + k - 1
        if 0 <= i < n_in:
            s[i, o] = 1.0
    return s


def _sel_convT(n_in, n_out, k):
    """ConvTranspose2d(k=3, s=2, p=1, op=1): in[i] contributes to out[o] with tap k
    iff o == 2*i - 1 + k."""
    s = np.zeros((n_in, n_out), np.float32)
    for i in range(n_in):
        o = 2 * i - 1 + k
        if 0 <= o < n_out:
            s[i, o] = 1.0
    return s


def _conv_matrix(plan, w):
    """Whole-layer linear map M: rows (h*W + w)*IC + ic -> cols (oh*OW + ow)*OC + oc,
    so that  out_flat = in_flat @ M  reproduces the (transposed) convolution."""
    H, OH = plan["hw"], plan["ohw"]
    kind = plan["kind"]
    if kind in ("conv", "conv1"):                  # torch weight: (OC, IC, 3, 3)
        stride = 2 if kind == "conv" else 1
        sel = [_sel_conv(H, OH, stride, t) for t in range(3)]

        def wmat(ky, kx):
            return jnp.transpose(w[:, :, ky, kx])  # (IC, OC)
    else:                                          # torch weight: (IC, OC, 3, 3)
        sel = [_sel_convT(H, OH, t) for t in range(3)]

        def wmat(ky, kx):
            return w[:, :, ky, kx]                 # (IC, OC)

    terms = []
    for ky in range(3):
        for kx in range(3):
            spat = jnp.asarray(np.kron(sel[ky], sel[kx]))     # (H*W, OH*OW)
            terms.append(jnp.kron(spat, wmat(ky, kx)))
    return sum(terms)                                          # (H*W*IC, OH*OW*OC)


# ------------------------- parameter plumbing (one-time, outside kernel) -------------------------

def prepare_kernel_params(params):
    """Transform PyTorch-layout parameters into the fused kernel's operand list.

    Batch-size independent; pure one-time plumbing (tiny kron / matmul / concat).
    Returns: [9 conv matrices (bf16), fc_cat_w (bf16), gb_slab, pool_slab,
              tile_slab, bias_slab] (all f32 except the MXU operands)."""
    plans = _layer_plans()
    bn_info, pool_rows, tile_rows = _bn_layout()
    bl = _bias_layout()

    # --- one matrix per conv-type layer ---
    mats = [_conv_matrix(p, layer["w"]) for p, layer in zip(plans[:4], params["enc"])]
    m_dec1 = _conv_matrix(plans[4], params["dec"][0]["w"])            # (FLAT, 128)
    mats.append(jnp.dot(params["dec_in_w"], m_dec1))                  # decoder_input fused in
    dec1_const = jnp.dot(params["dec_in_b"], m_dec1)                  # (1, 128) spatial constant
    mats.append(_conv_matrix(plans[5], params["dec"][1]["w"]))
    mats.append(_conv_matrix(plans[6], params["dec"][2]["w"]))
    mats.append(_conv_matrix(plans[7], params["final_convT"]["w"]))
    mats.append(_conv_matrix(plans[8], params["final_conv"]["w"]))
    mats = [m.astype(MXU_DTYPE) for m in mats]

    # --- fused fc_mu | fc_var ---
    fc_w = jnp.concatenate([params["fc_mu_w"], params["fc_var_w"]], axis=1).astype(MXU_DTYPE)
    fc_b = jnp.concatenate([params["fc_mu_b"], params["fc_var_b"]], axis=1)   # (1, 16) f32

    # --- packed BN gamma/beta slab + pooling / tiling slabs (stats stay f32) ---
    bn_layers = params["enc"] + params["dec"] + [params["final_convT"]]
    gb = jnp.zeros((2, len(bn_info) * GB_STRIDE), jnp.float32)
    pool = np.zeros((pool_rows, 32), np.float32)        # max OC = 32
    tile = np.zeros((tile_rows, 2048), np.float32)      # max N  = 2048
    for meta, layer in zip(bn_info, bn_layers):
        oc, n, s = meta["oc"], meta["n"], meta["s"]
        gb = gb.at[0, meta["gb_off"]:meta["gb_off"] + oc].set(layer["gamma"])
        gb = gb.at[1, meta["gb_off"]:meta["gb_off"] + oc].set(layer["beta"])
        p = np.kron(np.ones((s, 1), np.float32), np.eye(oc, dtype=np.float32))  # (n, oc)
        pool[meta["pool_off"]:meta["pool_off"] + n, :oc] = p
        tile[meta["tile_off"]:meta["tile_off"] + oc, :n] = p.T
    pool = jnp.asarray(pool)
    tile = jnp.asarray(tile)

    # --- packed bias slab: [fc_cat_b | dec1 spatial const | final conv bias], 128-aligned ---
    bias = jnp.zeros((1, bl["width"]), jnp.float32)
    bias = bias.at[:, 0:2 * LATENT_DIM].set(fc_b)
    bias = bias.at[:, bl["dec1_off"]:bl["dec1_off"] + bl["dec1_n"]].set(dec1_const)
    fin_b = jnp.tile(params["final_conv"]["b"].reshape(1, -1), (1, plans[8]["ohw"] ** 2))
    bias = bias.at[:, bl["fin_off"]:bl["fin_off"] + bl["out_n"]].set(fin_b)
    # NOTE: conv / convT biases of BN layers are intentionally dropped: training-mode
    # BatchNorm subtracts the batch mean, which cancels a per-channel constant exactly.

    return mats + [fc_w, gb, pool, tile, bias]


# ------------------------- the fused Pallas kernel -------------------------

def _make_fused_kernel(bn_info, bias_layout, batch):
    bl = bias_layout

    def conv(h, m_ref):
        # One MXU matmul per (transposed) conv layer; bf16 inputs, f32 accumulate.
        return jnp.dot(h.astype(MXU_DTYPE), m_ref[...],
                       preferred_element_type=jnp.float32)

    def bn_lrelu(acc, meta, gb_ref, pool_ref, tile_ref):
        # Training-mode BatchNorm2d (batch stats, biased variance) + LeakyReLU(0.01).
        n, oc = meta["n"], meta["oc"]
        inv = 1.0 / float(batch * meta["s"])
        colsum = jnp.sum(acc, axis=0, keepdims=True)              # (1, n)
        colsq = jnp.sum(acc * acc, axis=0, keepdims=True)
        stats = jnp.concatenate([colsum, colsq], axis=0)          # (2, n): one pooled dot
        pooled = jnp.dot(stats,
                         pool_ref[meta["pool_off"]:meta["pool_off"] + n, :oc],
                         preferred_element_type=jnp.float32) * inv            # (2, oc)
        mean = pooled[0:1, :]
        # One-pass variance; clamp guards the rare slightly-negative cancellation case.
        var = jnp.maximum(pooled[1:2, :] - mean * mean, 0.0)
        gbl = gb_ref[:, meta["gb_off"]:meta["gb_off"] + oc]       # (2, oc): [gamma; beta]
        scale = gbl[0:1, :] * lax.rsqrt(var + BN_EPS)
        shift = gbl[1:2, :] - mean * scale
        ss = jnp.concatenate([scale, shift], axis=0)              # (2, oc): one tiled dot
        ss_t = jnp.dot(ss,
                       tile_ref[meta["tile_off"]:meta["tile_off"] + oc, :n],
                       preferred_element_type=jnp.float32)        # (2, n)
        y = acc * ss_t[0:1, :] + ss_t[1:2, :]
        return jnp.where(y >= 0.0, y, LEAKY_SLOPE * y)

    def kernel(*refs):
        it = iter(refs)
        x_ref, eps_ref = next(it), next(it)
        m = [next(it) for _ in range(9)]
        fc_ref, gb_ref, pool_ref, tile_ref, bias_ref = (next(it) for _ in range(5))
        recon_ref, mulv_ref = next(it), next(it)

        # ---- encoder: 4x (Conv s2 + BN + LeakyReLU); each conv is ONE matmul ----
        h = x_ref[...]                                            # (B, H*W*C) f32
        for li in range(4):
            h = bn_lrelu(conv(h, m[li]), bn_info[li], gb_ref, pool_ref, tile_ref)

        # ---- fc_mu | fc_var fused into one matmul; reparameterize ----
        # (encoder output is 1x1 spatial, so (B, 32) already matches torch's flatten)
        mulv = (jnp.dot(h.astype(MXU_DTYPE), fc_ref[...],
                        preferred_element_type=jnp.float32)
                + bias_ref[0:1, 0:2 * LATENT_DIM])                # (B, 2*LATENT)
        mulv_ref[...] = mulv
        mu = mulv[:, :LATENT_DIM]
        lv = mulv[:, LATENT_DIM:]
        z = mu + eps_ref[...] * jnp.exp(0.5 * lv)

        # ---- decoder_input fused into the first ConvT; 4x (ConvT + BN + LReLU) ----
        acc = conv(z, m[4]) + bias_ref[0:1, bl["dec1_off"]:bl["dec1_off"] + bl["dec1_n"]]
        h = bn_lrelu(acc, bn_info[4], gb_ref, pool_ref, tile_ref)
        for li in range(5, 8):
            h = bn_lrelu(conv(h, m[li]), bn_info[li], gb_ref, pool_ref, tile_ref)

        # ---- final Conv2d(s1, p1) + bias + tanh; lane-dense (B, 256) output ----
        recon_ref[...] = jnp.tanh(
            conv(h, m[8]) + bias_ref[0:1, bl["fin_off"]:bl["fin_off"] + bl["out_n"]])

    return kernel


# ------------------------- forward pass -------------------------

def sigma_vae_forward(kernel_params, x_nchw, eps):
    """Returns (reconstruction NCHW, mu, log_var) — same as SigmaVAE.forward."""
    B, C, H, W = x_nchw.shape
    bn_info, _, _ = _bn_layout()
    bl = _bias_layout()

    # NCHW -> (B, H*W*C) in (h, w, c) order: batch in sublanes, lane-dense activations.
    x2d = jnp.transpose(x_nchw, (0, 2, 3, 1)).reshape(B, H * W * C)
    inputs = [x2d, eps] + list(kernel_params)

    kernel = _make_fused_kernel(bn_info, bl, B)

    out_shapes = (
        jax.ShapeDtypeStruct((B, OUT_N), jnp.float32),            # recon, (h,w,c)-flat
        jax.ShapeDtypeStruct((B, 2 * LATENT_DIM), jnp.float32),   # [mu | log_var]
    )

    def full_spec(shape):
        nd = len(shape)
        return pl.BlockSpec(tuple(int(d) for d in shape), lambda i, _nd=nd: (0,) * _nd)

    # Advisory cost hint so XLA schedules the wrapper transpose/reshape around the call.
    conv_mats = kernel_params[:9]
    mm_flops = 2 * B * sum(int(m.shape[0]) * int(m.shape[1]) for m in conv_mats)
    mm_flops += 2 * B * FLAT_SIZE * (2 * LATENT_DIM)
    bn_flops = sum(2 * 2 * info["n"] * info["oc"] * 2 for info in bn_info)
    elt_flops = sum(6 * B * info["n"] for info in bn_info)
    transcendentals = B * LATENT_DIM + B * OUT_N + sum(info["oc"] for info in bn_info)
    bytes_accessed = sum(int(np.prod(a.shape)) * a.dtype.itemsize for a in inputs)
    bytes_accessed += sum(int(np.prod(s.shape)) * 4 for s in out_shapes)
    cost = pl.CostEstimate(flops=int(mm_flops + bn_flops + elt_flops),
                           transcendentals=int(transcendentals),
                           bytes_accessed=int(bytes_accessed))

    # TODO(synk): a batch-tiled "parallel" grid axis (to use v7x's 2nd TensorCore) needs
    # a cross-tile BatchNorm-stats reduction (training-mode BN couples the whole batch),
    # so the fully-fused single-invocation form is kept here.
    recon2d, mulv = pl.pallas_call(
        kernel,
        out_shape=out_shapes,
        grid=(1,),
        in_specs=[full_spec(a.shape) for a in inputs],
        out_specs=tuple(full_spec(s.shape) for s in out_shapes),
        compiler_params=pltpu.CompilerParams(dimension_semantics=("arbitrary",)),
        cost_estimate=cost,
    )(*inputs)

    recon = recon2d.reshape(B, H, W, INPUT_CHANNELS).transpose(0, 3, 1, 2)
    mu = mulv[:, :LATENT_DIM]
    log_var = mulv[:, LATENT_DIM:]
    return recon, mu, log_var


# ------------------------- deterministic parameter init -------------------------

def _uniform(key, shape, fan_in):
    bound = 1.0 / math.sqrt(fan_in)
    return jax.random.uniform(key, shape, jnp.float32, -bound, bound)


def init_params(key):
    keys = iter(jax.random.split(key, 64))
    params = {}

    enc = []
    in_ch = INPUT_CHANNELS
    for h in HIDDEN_DIMS:
        fan_in = in_ch * 9
        enc.append({
            "w": _uniform(next(keys), (h, in_ch, 3, 3), fan_in),   # [OC, IC, 3, 3]
            "b": _uniform(next(keys), (h,), fan_in),               # (unused: BN cancels it)
            "gamma": jnp.ones((h,), jnp.float32),
            "beta": jnp.zeros((h,), jnp.float32),
        })
        in_ch = h
    params["enc"] = enc

    params["fc_mu_w"] = _uniform(next(keys), (FLAT_SIZE, LATENT_DIM), FLAT_SIZE)
    params["fc_mu_b"] = _uniform(next(keys), (1, LATENT_DIM), FLAT_SIZE)
    params["fc_var_w"] = _uniform(next(keys), (FLAT_SIZE, LATENT_DIM), FLAT_SIZE)
    params["fc_var_b"] = _uniform(next(keys), (1, LATENT_DIM), FLAT_SIZE)
    params["dec_in_w"] = _uniform(next(keys), (LATENT_DIM, FLAT_SIZE), LATENT_DIM)
    params["dec_in_b"] = _uniform(next(keys), (1, FLAT_SIZE), LATENT_DIM)

    rev = HIDDEN_DIMS[::-1]
    dec = []
    for i in range(len(rev) - 1):
        ic, oc = rev[i], rev[i + 1]
        fan_in = ic * 9
        dec.append({
            "w": _uniform(next(keys), (ic, oc, 3, 3), fan_in),     # [IC, OC, 3, 3]
            "b": _uniform(next(keys), (oc,), fan_in),
            "gamma": jnp.ones((oc,), jnp.float32),
            "beta": jnp.zeros((oc,), jnp.float32),
        })
    params["dec"] = dec

    ch = rev[-1]
    fan_in = ch * 9
    params["final_convT"] = {
        "w": _uniform(next(keys), (ch, ch, 3, 3), fan_in),
        "b": _uniform(next(keys), (ch,), fan_in),
        "gamma": jnp.ones((ch,), jnp.float32),
        "beta": jnp.zeros((ch,), jnp.float32),
    }
    params["final_conv"] = {
        "w": _uniform(next(keys), (INPUT_CHANNELS, ch, 3, 3), fan_in),
        "b": _uniform(next(keys), (INPUT_CHANNELS,), fan_in),
    }
    return params


# ------------------------- demo -------------------------

if __name__ == "__main__":
    key = jax.random.PRNGKey(0)
    k_x, k_eps, k_p = jax.random.split(key, 3)

    B = 2
    x = jax.random.normal(k_x, (B, INPUT_CHANNELS, INPUT_HW, INPUT_HW), jnp.float32)
    eps = jax.random.normal(k_eps, (B, LATENT_DIM), jnp.float32)
    params = init_params(k_p)

    # One-time, batch-independent parameter plumbing (per-layer conv matrices + slabs).
    kparams = prepare_kernel_params(params)

    fwd = jax.jit(sigma_vae_forward)
    recon, mu, log_var = fwd(kparams, x, eps)
    jax.block_until_ready((recon, mu, log_var))

    assert recon.shape == (B, INPUT_CHANNELS, INPUT_HW, INPUT_HW)
    assert mu.shape == (B, LATENT_DIM) and log_var.shape == (B, LATENT_DIM)
    assert bool(jnp.all(jnp.isfinite(recon)))
    assert bool(jnp.all(jnp.isfinite(mu))) and bool(jnp.all(jnp.isfinite(log_var)))
    print("KERNEL_OK")
</pallas_src>

<mosaic_0001>
module attributes {stable_mosaic.version = 11 : i64} {
  func.func @kernel(%arg0: i32, %arg1: memref<2x256xf32, #tpu.memory_space<vmem>>, %arg2: memref<2x8xf32, #tpu.memory_space<vmem>>, %arg3: memref<256x512xbf16, #tpu.memory_space<vmem>>, %arg4: memref<512x256xbf16, #tpu.memory_space<vmem>>, %arg5: memref<256x128xbf16, #tpu.memory_space<vmem>>, %arg6: memref<128x32xbf16, #tpu.memory_space<vmem>>, %arg7: memref<8x128xbf16, #tpu.memory_space<vmem>>, %arg8: memref<128x256xbf16, #tpu.memory_space<vmem>>, %arg9: memref<256x512xbf16, #tpu.memory_space<vmem>>, %arg10: memref<512x2048xbf16, #tpu.memory_space<vmem>>, %arg11: memref<2048x256xbf16, #tpu.memory_space<vmem>>, %arg12: memref<32x16xbf16, #tpu.memory_space<vmem>>, %arg13: memref<2x1024xf32, #tpu.memory_space<vmem>>, %arg14: memref<3872x32xf32, #tpu.memory_space<vmem>>, %arg15: memref<152x2048xf32, #tpu.memory_space<vmem>>, %arg16: memref<1x512xf32, #tpu.memory_space<vmem>>, %arg17: memref<2x256xf32, #tpu.memory_space<vmem>>, %arg18: memref<2x16xf32, #tpu.memory_space<vmem>>) attributes {dimension_semantics = [#tpu.dimension_semantics<arbitrary>], iteration_bounds = array<i64: 1>, scalar_prefetch = 0 : i64, scratch_operands = 0 : i64, tpu.core_type = #tpu.core_type<tc>, window_params = [{pipeline_mode = #tpu.pipeline_mode<synchronous>, transform_indices = @transform_0, window_bounds = array<i64: 2, 256>}, {pipeline_mode = #tpu.pipeline_mode<synchronous>, transform_indices = @transform_1, window_bounds = array<i64: 2, 8>}, {pipeline_mode = #tpu.pipeline_mode<synchronous>, transform_indices = @transform_2, window_bounds = array<i64: 256, 512>}, {pipeline_mode = #tpu.pipeline_mode<synchronous>, transform_indices = @transform_3, window_bounds = array<i64: 512, 256>}, {pipeline_mode = #tpu.pipeline_mode<synchronous>, transform_indices = @transform_4, window_bounds = array<i64: 256, 128>}, {pipeline_mode = #tpu.pipeline_mode<synchronous>, transform_indices = @transform_5, window_bounds = array<i64: 128, 32>}, {pipeline_mode = #tpu.pipeline_mode<synchronous>, transform_indices = @transform_6, window_bounds = array<i64: 8, 128>}, {pipeline_mode = #tpu.pipeline_mode<synchronous>, transform_indices = @transform_7, window_bounds = array<i64: 128, 256>}, {pipeline_mode = #tpu.pipeline_mode<synchronous>, transform_indices = @transform_8, window_bounds = array<i64: 256, 512>}, {pipeline_mode = #tpu.pipeline_mode<synchronous>, transform_indices = @transform_9, window_bounds = array<i64: 512, 2048>}, {pipeline_mode = #tpu.pipeline_mode<synchronous>, transform_indices = @transform_10, window_bounds = array<i64: 2048, 256>}, {pipeline_mode = #tpu.pipeline_mode<synchronous>, transform_indices = @transform_11, window_bounds = array<i64: 32, 16>}, {pipeline_mode = #tpu.pipeline_mode<synchronous>, transform_indices = @transform_12, window_bounds = array<i64: 2, 1024>}, {pipeline_mode = #tpu.pipeline_mode<synchronous>, transform_indices = @transform_13, window_bounds = array<i64: 3872, 32>}, {pipeline_mode = #tpu.pipeline_mode<synchronous>, transform_indices = @transform_14, window_bounds = array<i64: 152, 2048>}, {pipeline_mode = #tpu.pipeline_mode<synchronous>, transform_indices = @transform_15, window_bounds = array<i64: 1, 512>}, {pipeline_mode = #tpu.pipeline_mode<synchronous>, transform_indices = @transform_16, window_bounds = array<i64: 2, 256>}, {pipeline_mode = #tpu.pipeline_mode<synchronous>, transform_indices = @transform_17, window_bounds = array<i64: 2, 16>}]} {
    %c0 = arith.constant 0 : index
    %c0_0 = arith.constant 0 : index
    %0 = vector.load %arg1[%c0, %c0_0] : memref<2x256xf32, #tpu.memory_space<vmem>>, vector<2x256xf32>
    %1 = arith.truncf %0 : vector<2x256xf32> to vector<2x256xbf16>
    %c0_1 = arith.constant 0 : index
    %c0_2 = arith.constant 0 : index
    %2 = vector.load %arg3[%c0_1, %c0_2] : memref<256x512xbf16, #tpu.memory_space<vmem>>, vector<256x512xbf16>
    %cst = arith.constant dense<0.000000e+00> : vector<2x512xf32>
    %3 = tpu.matmul %1, %2, %cst {dimension_numbers = #tpu.dot_dimension_numbers<[1], [0], [0], [1], [0, 0, 1, 1], [], []>} : vector<2x256xbf16>, vector<256x512xbf16>, vector<2x512xf32> -> vector<2x512xf32>
    %cst_3 = arith.constant dense<0.000000e+00> : vector<512xf32>
    %4 = vector.multi_reduction <add>, %3, %cst_3 [0] : vector<2x512xf32> to vector<512xf32>
    %5 = vector.shape_cast %4 : vector<512xf32> to vector<1x512xf32>
    %6 = arith.mulf %3, %3 : vector<2x512xf32>
    %cst_4 = arith.constant dense<0.000000e+00> : vector<512xf32>
    %7 = vector.multi_reduction <add>, %6, %cst_4 [0] : vector<2x512xf32> to vector<512xf32>
    %8 = vector.shape_cast %7 : vector<512xf32> to vector<1x512xf32>
    %9 = tpu.concatenate %5, %8 in 0 : vector<1x512xf32>, vector<1x512xf32> -> vector<2x512xf32>
    %c0_5 = arith.constant 0 : index
    %c0_6 = arith.constant 0 : index
    %10 = vector.load %arg14[%c0_5, %c0_6] : memref<3872x32xf32, #tpu.memory_space<vmem>>, vector<512x8xf32>
    %cst_7 = arith.constant dense<0.000000e+00> : vector<2x8xf32>
    %11 = tpu.matmul %9, %10, %cst_7 {dimension_numbers = #tpu.dot_dimension_numbers<[1], [0], [0], [1], [0, 0, 1, 1], [], []>} : vector<2x512xf32>, vector<512x8xf32>, vector<2x8xf32> -> vector<2x8xf32>
    %cst_8 = arith.constant 7.812500e-03 : f32
    %12 = vector.broadcast %cst_8 : f32 to vector<2x8xf32>
    %13 = arith.mulf %11, %12 : vector<2x8xf32>
    %14 = vector.extract_strided_slice %13 {offsets = [0, 0], sizes = [1, 8], strides = [1, 1]} : vector<2x8xf32> to vector<1x8xf32>
    %15 = vector.extract_strided_slice %13 {offsets = [1, 0], sizes = [1, 8], strides = [1, 1]} : vector<2x8xf32> to vector<1x8xf32>
    %16 = arith.mulf %14, %14 : vector<1x8xf32>
    %17 = arith.subf %15, %16 : vector<1x8xf32>
    %cst_9 = arith.constant 0.000000e+00 : f32
    %18 = vector.broadcast %cst_9 : f32 to vector<1x8xf32>
    %19 = arith.maximumf %17, %18 : vector<1x8xf32>
    %c0_10 = arith.constant 0 : index
    %c0_11 = arith.constant 0 : index
    %20 = vector.load %arg13[%c0_10, %c0_11] : memref<2x1024xf32, #tpu.memory_space<vmem>>, vector<2x8xf32>
    %21 = vector.extract_strided_slice %20 {offsets = [0, 0], sizes = [1, 8], strides = [1, 1]} : vector<2x8xf32> to vector<1x8xf32>
    %cst_12 = arith.constant 9.99999974E-6 : f32
    %22 = vector.broadcast %cst_12 : f32 to vector<1x8xf32>
    %23 = arith.addf %19, %22 : vector<1x8xf32>
    %24 = math.rsqrt %23 : vector<1x8xf32>
    %25 = arith.mulf %21, %24 : vector<1x8xf32>
    %26 = vector.extract_strided_slice %20 {offsets = [1, 0], sizes = [1, 8], strides = [1, 1]} : vector<2x8xf32> to vector<1x8xf32>
    %27 = arith.mulf %14, %25 : vector<1x8xf32>
    %28 = arith.subf %26, %27 : vector<1x8xf32>
    %29 = tpu.concatenate %25, %28 in 0 : vector<1x8xf32>, vector<1x8xf32> -> vector<2x8xf32>
    %c0_13 = arith.constant 0 : index
    %c0_14 = arith.constant 0 : index
    %30 = vector.load %arg15[%c0_13, %c0_14] : memref<152x2048xf32, #tpu.memory_space<vmem>>, vector<8x512xf32>
    %cst_15 = arith.constant dense<0.000000e+00> : vector<2x512xf32>
    %31 = tpu.matmul %29, %30, %cst_15 {dimension_numbers = #tpu.dot_dimension_numbers<[1], [0], [0], [1], [0, 0, 1, 1], [], []>} : vector<2x8xf32>, vector<8x512xf32>, vector<2x512xf32> -> vector<2x512xf32>
    %32 = vector.extract_strided_slice %31 {offsets = [0, 0], sizes = [1, 512], strides = [1, 1]} : vector<2x512xf32> to vector<1x512xf32>
    %33 = vector.broadcast %32 : vector<1x512xf32> to vector<2x512xf32>
    %34 = arith.mulf %3, %33 : vector<2x512xf32>
    %35 = vector.extract_strided_slice %31 {offsets = [1, 0], sizes = [1, 512], strides = [1, 1]} : vector<2x512xf32> to vector<1x512xf32>
    %36 = vector.broadcast %35 : vector<1x512xf32> to vector<2x512xf32>
    %37 = arith.addf %34, %36 : vector<2x512xf32>
    %cst_16 = arith.constant 0.000000e+00 : f32
    %38 = vector.broadcast %cst_16 : f32 to vector<2x512xf32>
    %39 = arith.cmpf oge, %37, %38 : vector<2x512xf32>
    %cst_17 = arith.constant 0.00999999977 : f32
    %40 = vector.broadcast %cst_17 : f32 to vector<2x512xf32>
    %41 = arith.mulf %40, %37 : vector<2x512xf32>
    %42 = arith.select %39, %37, %41 : vector<2x512xi1>, vector<2x512xf32>
    %43 = arith.truncf %42 : vector<2x512xf32> to vector<2x512xbf16>
    %c0_18 = arith.constant 0 : index
    %c0_19 = arith.constant 0 : index
    %44 = vector.load %arg4[%c0_18, %c0_19] : memref<512x256xbf16, #tpu.memory_space<vmem>>, vector<512x256xbf16>
    %cst_20 = arith.constant dense<0.000000e+00> : vector<2x256xf32>
    %45 = tpu.matmul %43, %44, %cst_20 {dimension_numbers = #tpu.dot_dimension_numbers<[1], [0], [0], [1], [0, 0, 1, 1], [], []>} : vector<2x512xbf16>, vector<512x256xbf16>, vector<2x256xf32> -> vector<2x256xf32>
    %cst_21 = arith.constant dense<0.000000e+00> : vector<256xf32>
    %46 = vector.multi_reduction <add>, %45, %cst_21 [0] : vector<2x256xf32> to vector<256xf32>
    %47 = vector.shape_cast %46 : vector<256xf32> to vector<1x256xf32>
    %48 = arith.mulf %45, %45 : vector<2x256xf32>
    %cst_22 = arith.constant dense<0.000000e+00> : vector<256xf32>
    %49 = vector.multi_reduction <add>, %48, %cst_22 [0] : vector<2x256xf32> to vector<256xf32>
    %50 = vector.shape_cast %49 : vector<256xf32> to vector<1x256xf32>
    %51 = tpu.concatenate %47, %50 in 0 : vector<1x256xf32>, vector<1x256xf32> -> vector<2x256xf32>
    %c512 = arith.constant 512 : index
    %c0_23 = arith.constant 0 : index
    %52 = vector.load %arg14[%c512, %c0_23] : memref<3872x32xf32, #tpu.memory_space<vmem>>, vector<256x16xf32>
    %cst_24 = arith.constant dense<0.000000e+00> : vector<2x16xf32>
    %53 = tpu.matmul %51, %52, %cst_24 {dimension_numbers = #tpu.dot_dimension_numbers<[1], [0], [0], [1], [0, 0, 1, 1], [], []>} : vector<2x256xf32>, vector<256x16xf32>, vector<2x16xf32> -> vector<2x16xf32>
    %cst_25 = arith.constant 3.125000e-02 : f32
    %54 = vector.broadcast %cst_25 : f32 to vector<2x16xf32>
    %55 = arith.mulf %53, %54 : vector<2x16xf32>
    %56 = vector.extract_strided_slice %55 {offsets = [0, 0], sizes = [1, 16], strides = [1, 1]} : vector<2x16xf32> to vector<1x16xf32>
    %57 = vector.extract_strided_slice %55 {offsets = [1, 0], sizes = [1, 16], strides = [1, 1]} : vector<2x16xf32> to vector<1x16xf32>
    %58 = arith.mulf %56, %56 : vector<1x16xf32>
    %59 = arith.subf %57, %58 : vector<1x16xf32>
    %cst_26 = arith.constant 0.000000e+00 : f32
    %60 = vector.broadcast %cst_26 : f32 to vector<1x16xf32>
    %61 = arith.maximumf %59, %60 : vector<1x16xf32>
    %c0_27 = arith.constant 0 : index
    %c128 = arith.constant 128 : index
    %62 = vector.load %arg13[%c0_27, %c128] : memref<2x1024xf32, #tpu.memory_space<vmem>>, vector<2x16xf32>
    %63 = vector.extract_strided_slice %62 {offsets = [0, 0], sizes = [1, 16], strides = [1, 1]} : vector<2x16xf32> to vector<1x16xf32>
    %cst_28 = arith.constant 9.99999974E-6 : f32
    %64 = vector.broadcast %cst_28 : f32 to vector<1x16xf32>
    %65 = arith.addf %61, %64 : vector<1x16xf32>
    %66 = math.rsqrt %65 : vector<1x16xf32>
    %67 = arith.mulf %63, %66 : vector<1x16xf32>
    %68 = vector.extract_strided_slice %62 {offsets = [1, 0], sizes = [1, 16], strides = [1, 1]} : vector<2x16xf32> to vector<1x16xf32>
    %69 = arith.mulf %56, %67 : vector<1x16xf32>
    %70 = arith.subf %68, %69 : vector<1x16xf32>
    %71 = tpu.concatenate %67, %70 in 0 : vector<1x16xf32>, vector<1x16xf32> -> vector<2x16xf32>
    %c8 = arith.constant 8 : index
    %c0_29 = arith.constant 0 : index
    %72 = vector.load %arg15[%c8, %c0_29] : memref<152x2048xf32, #tpu.memory_space<vmem>>, vector<16x256xf32>
    %cst_30 = arith.constant dense<0.000000e+00> : vector<2x256xf32>
    %73 = tpu.matmul %71, %72, %cst_30 {dimension_numbers = #tpu.dot_dimension_numbers<[1], [0], [0], [1], [0, 0, 1, 1], [], []>} : vector<2x16xf32>, vector<16x256xf32>, vector<2x256xf32> -> vector<2x256xf32>
    %74 = vector.extract_strided_slice %73 {offsets = [0, 0], sizes = [1, 256], strides = [1, 1]} : vector<2x256xf32> to vector<1x256xf32>
    %75 = vector.broadcast %74 : vector<1x256xf32> to vector<2x256xf32>
    %76 = arith.mulf %45, %75 : vector<2x256xf32>
    %77 = vector.extract_strided_slice %73 {offsets = [1, 0], sizes = [1, 256], strides = [1, 1]} : vector<2x256xf32> to vector<1x256xf32>
    %78 = vector.broadcast %77 : vector<1x256xf32> to vector<2x256xf32>
    %79 = arith.addf %76, %78 : vector<2x256xf32>
    %cst_31 = arith.constant 0.000000e+00 : f32
    %80 = vector.broadcast %cst_31 : f32 to vector<2x256xf32>
    %81 = arith.cmpf oge, %79, %80 : vector<2x256xf32>
    %cst_32 = arith.constant 0.00999999977 : f32
    %82 = vector.broadcast %cst_32 : f32 to vector<2x256xf32>
    %83 = arith.mulf %82, %79 : vector<2x256xf32>
    %84 = arith.select %81, %79, %83 : vector<2x256xi1>, vector<2x256xf32>
    %85 = arith.truncf %84 : vector<2x256xf32> to vector<2x256xbf16>
    %c0_33 = arith.constant 0 : index
    %c0_34 = arith.constant 0 : index
    %86 = vector.load %arg5[%c0_33, %c0_34] : memref<256x128xbf16, #tpu.memory_space<vmem>>, vector<256x128xbf16>
    %cst_35 = arith.constant dense<0.000000e+00> : vector<2x128xf32>
    %87 = tpu.matmul %85, %86, %cst_35 {dimension_numbers = #tpu.dot_dimension_numbers<[1], [0], [0], [1], [0, 0, 1, 1], [], []>} : vector<2x256xbf16>, vector<256x128xbf16>, vector<2x128xf32> -> vector<2x128xf32>
    %cst_36 = arith.constant dense<0.000000e+00> : vector<128xf32>
    %88 = vector.multi_reduction <add>, %87, %cst_36 [0] : vector<2x128xf32> to vector<128xf32>
    %89 = vector.shape_cast %88 : vector<128xf32> to vector<1x128xf32>
    %90 = arith.mulf %87, %87 : vector<2x128xf32>
    %cst_37 = arith.constant dense<0.000000e+00> : vector<128xf32>
    %91 = vector.multi_reduction <add>, %90, %cst_37 [0] : vector<2x128xf32> to vector<128xf32>
    %92 = vector.shape_cast %91 : vector<128xf32> to vector<1x128xf32>
    %93 = tpu.concatenate %89, %92 in 0 : vector<1x128xf32>, vector<1x128xf32> -> vector<2x128xf32>
    %c768 = arith.constant 768 : index
    %c0_38 = arith.constant 0 : index
    %94 = vector.load %arg14[%c768, %c0_38] : memref<3872x32xf32, #tpu.memory_space<vmem>>, vector<128x32xf32>
    %cst_39 = arith.constant dense<0.000000e+00> : vector<2x32xf32>
    %95 = tpu.matmul %93, %94, %cst_39 {dimension_numbers = #tpu.dot_dimension_numbers<[1], [0], [0], [1], [0, 0, 1, 1], [], []>} : vector<2x128xf32>, vector<128x32xf32>, vector<2x32xf32> -> vector<2x32xf32>
    %cst_40 = arith.constant 1.250000e-01 : f32
    %96 = vector.broadcast %cst_40 : f32 to vector<2x32xf32>
    %97 = arith.mulf %95, %96 : vector<2x32xf32>
    %98 = vector.extract_strided_slice %97 {offsets = [0, 0], sizes = [1, 32], strides = [1, 1]} : vector<2x32xf32> to vector<1x32xf32>
    %99 = vector.extract_strided_slice %97 {offsets = [1, 0], sizes = [1, 32], strides = [1, 1]} : vector<2x32xf32> to vector<1x32xf32>
    %100 = arith.mulf %98, %98 : vector<1x32xf32>
    %101 = arith.subf %99, %100 : vector<1x32xf32>
    %cst_41 = arith.constant 0.000000e+00 : f32
    %102 = vector.broadcast %cst_41 : f32 to vector<1x32xf32>
    %103 = arith.maximumf %101, %102 : vector<1x32xf32>
    %c0_42 = arith.constant 0 : index
    %c256 = arith.constant 256 : index
    %104 = vector.load %arg13[%c0_42, %c256] : memref<2x1024xf32, #tpu.memory_space<vmem>>, vector<2x32xf32>
    %105 = vector.extract_strided_slice %104 {offsets = [0, 0], sizes = [1, 32], strides = [1, 1]} : vector<2x32xf32> to vector<1x32xf32>
    %cst_43 = arith.constant 9.99999974E-6 : f32
    %106 = vector.broadcast %cst_43 : f32 to vector<1x32xf32>
    %107 = arith.addf %103, %106 : vector<1x32xf32>
    %108 = math.rsqrt %107 : vector<1x32xf32>
    %109 = arith.mulf %105, %108 : vector<1x32xf32>
    %110 = vector.extract_strided_slice %104 {offsets = [1, 0], sizes = [1, 32], strides = [1, 1]} : vector<2x32xf32> to vector<1x32xf32>
    %111 = arith.mulf %98, %109 : vector<1x32xf32>
    %112 = arith.subf %110, %111 : vector<1x32xf32>
    %113 = tpu.concatenate %109, %112 in 0 : vector<1x32xf32>, vector<1x32xf32> -> vector<2x32xf32>
    %c24 = arith.constant 24 : index
    %c0_44 = arith.constant 0 : index
    %114 = vector.load %arg15[%c24, %c0_44] : memref<152x2048xf32, #tpu.memory_space<vmem>>, vector<32x128xf32>
    %cst_45 = arith.constant dense<0.000000e+00> : vector<2x128xf32>
    %115 = tpu.matmul %113, %114, %cst_45 {dimension_numbers = #tpu.dot_dimension_numbers<[1], [0], [0], [1], [0, 0, 1, 1], [], []>} : vector<2x32xf32>, vector<32x128xf32>, vector<2x128xf32> -> vector<2x128xf32>
    %116 = vector.extract_strided_slice %115 {offsets = [0, 0], sizes = [1, 128], strides = [1, 1]} : vector<2x128xf32> to vector<1x128xf32>
    %117 = vector.broadcast %116 : vector<1x128xf32> to vector<2x128xf32>
    %118 = arith.mulf %87, %117 : vector<2x128xf32>
    %119 = vector.extract_strided_slice %115 {offsets = [1, 0], sizes = [1, 128], strides = [1, 1]} : vector<2x128xf32> to vector<1x128xf32>
    %120 = vector.broadcast %119 : vector<1x128xf32> to vector<2x128xf32>
    %121 = arith.addf %118, %120 : vector<2x128xf32>
    %cst_46 = arith.constant 0.000000e+00 : f32
    %122 = vector.broadcast %cst_46 : f32 to vector<2x128xf32>
    %123 = arith.cmpf oge, %121, %122 : vector<2x128xf32>
    %cst_47 = arith.constant 0.00999999977 : f32
    %124 = vector.broadcast %cst_47 : f32 to vector<2x128xf32>
    %125 = arith.mulf %124, %121 : vector<2x128xf32>
    %126 = arith.select %123, %121, %125 : vector<2x128xi1>, vector<2x128xf32>
    %127 = arith.truncf %126 : vector<2x128xf32> to vector<2x128xbf16>
    %c0_48 = arith.constant 0 : index
    %c0_49 = arith.constant 0 : index
    %128 = vector.load %arg6[%c0_48, %c0_49] : memref<128x32xbf16, #tpu.memory_space<vmem>>, vector<128x32xbf16>
    %cst_50 = arith.constant dense<0.000000e+00> : vector<2x32xf32>
    %129 = tpu.matmul %127, %128, %cst_50 {dimension_numbers = #tpu.dot_dimension_numbers<[1], [0], [0], [1], [0, 0, 1, 1], [], []>} : vector<2x128xbf16>, vector<128x32xbf16>, vector<2x32xf32> -> vector<2x32xf32>
    %cst_51 = arith.constant dense<0.000000e+00> : vector<32xf32>
    %130 = vector.multi_reduction <add>, %129, %cst_51 [0] : vector<2x32xf32> to vector<32xf32>
    %131 = vector.shape_cast %130 : vector<32xf32> to vector<1x32xf32>
    %132 = arith.mulf %129, %129 : vector<2x32xf32>
    %cst_52 = arith.constant dense<0.000000e+00> : vector<32xf32>
    %133 = vector.multi_reduction <add>, %132, %cst_52 [0] : vector<2x32xf32> to vector<32xf32>
    %134 = vector.shape_cast %133 : vector<32xf32> to vector<1x32xf32>
    %135 = tpu.concatenate %131, %134 in 0 : vector<1x32xf32>, vector<1x32xf32> -> vector<2x32xf32>
    %c896 = arith.constant 896 : index
    %c0_53 = arith.constant 0 : index
    %136 = vector.load %arg14[%c896, %c0_53] : memref<3872x32xf32, #tpu.memory_space<vmem>>, vector<32x32xf32>
    %cst_54 = arith.constant dense<0.000000e+00> : vector<2x32xf32>
    %137 = tpu.matmul %135, %136, %cst_54 {dimension_numbers = #tpu.dot_dimension_numbers<[1], [0], [0], [1], [0, 0, 1, 1], [], []>} : vector<2x32xf32>, vector<32x32xf32>, vector<2x32xf32> -> vector<2x32xf32>
    %cst_55 = arith.constant 5.000000e-01 : f32
    %138 = vector.broadcast %cst_55 : f32 to vector<2x32xf32>
    %139 = arith.mulf %137, %138 : vector<2x32xf32>
    %140 = vector.extract_strided_slice %139 {offsets = [0, 0], sizes = [1, 32], strides = [1, 1]} : vector<2x32xf32> to vector<1x32xf32>
    %141 = vector.extract_strided_slice %139 {offsets = [1, 0], sizes = [1, 32], strides = [1, 1]} : vector<2x32xf32> to vector<1x32xf32>
    %142 = arith.mulf %140, %140 : vector<1x32xf32>
    %143 = arith.subf %141, %142 : vector<1x32xf32>
    %cst_56 = arith.constant 0.000000e+00 : f32
    %144 = vector.broadcast %cst_56 : f32 to vector<1x32xf32>
    %145 = arith.maximumf %143, %144 : vector<1x32xf32>
    %c0_57 = arith.constant 0 : index
    %c384 = arith.constant 384 : index
    %146 = vector.load %arg13[%c0_57, %c384] : memref<2x1024xf32, #tpu.memory_space<vmem>>, vector<2x32xf32>
    %147 = vector.extract_strided_slice %146 {offsets = [0, 0], sizes = [1, 32], strides = [1, 1]} : vector<2x32xf32> to vector<1x32xf32>
    %cst_58 = arith.constant 9.99999974E-6 : f32
    %148 = vector.broadcast %cst_58 : f32 to vector<1x32xf32>
    %149 = arith.addf %145, %148 : vector<1x32xf32>
    %150 = math.rsqrt %149 : vector<1x32xf32>
    %151 = arith.mulf %147, %150 : vector<1x32xf32>
    %152 = vector.extract_strided_slice %146 {offsets = [1, 0], sizes = [1, 32], strides = [1, 1]} : vector<2x32xf32> to vector<1x32xf32>
    %153 = arith.mulf %140, %151 : vector<1x32xf32>
    %154 = arith.subf %152, %153 : vector<1x32xf32>
    %155 = tpu.concatenate %151, %154 in 0 : vector<1x32xf32>, vector<1x32xf32> -> vector<2x32xf32>
    %c56 = arith.constant 56 : index
    %c0_59 = arith.constant 0 : index
    %156 = vector.load %arg15[%c56, %c0_59] : memref<152x2048xf32, #tpu.memory_space<vmem>>, vector<32x32xf32>
    %cst_60 = arith.constant dense<0.000000e+00> : vector<2x32xf32>
    %157 = tpu.matmul %155, %156, %cst_60 {dimension_numbers = #tpu.dot_dimension_numbers<[1], [0], [0], [1], [0, 0, 1, 1], [], []>} : vector<2x32xf32>, vector<32x32xf32>, vector<2x32xf32> -> vector<2x32xf32>
    %158 = vector.extract_strided_slice %157 {offsets = [0, 0], sizes = [1, 32], strides = [1, 1]} : vector<2x32xf32> to vector<1x32xf32>
    %159 = vector.broadcast %158 : vector<1x32xf32> to vector<2x32xf32>
    %160 = arith.mulf %129, %159 : vector<2x32xf32>
    %161 = vector.extract_strided_slice %157 {offsets = [1, 0], sizes = [1, 32], strides = [1, 1]} : vector<2x32xf32> to vector<1x32xf32>
    %162 = vector.broadcast %161 : vector<1x32xf32> to vector<2x32xf32>
    %163 = arith.addf %160, %162 : vector<2x32xf32>
    %cst_61 = arith.constant 0.000000e+00 : f32
    %164 = vector.broadcast %cst_61 : f32 to vector<2x32xf32>
    %165 = arith.cmpf oge, %163, %164 : vector<2x32xf32>
    %cst_62 = arith.constant 0.00999999977 : f32
    %166 = vector.broadcast %cst_62 : f32 to vector<2x32xf32>
    %167 = arith.mulf %166, %163 : vector<2x32xf32>
    %168 = arith.select %165, %163, %167 : vector<2x32xi1>, vector<2x32xf32>
    %169 = arith.truncf %168 : vector<2x32xf32> to vector<2x32xbf16>
    %c0_63 = arith.constant 0 : index
    %c0_64 = arith.constant 0 : index
    %170 = vector.load %arg12[%c0_63, %c0_64] : memref<32x16xbf16, #tpu.memory_space<vmem>>, vector<32x16xbf16>
    %cst_65 = arith.constant dense<0.000000e+00> : vector<2x16xf32>
    %171 = tpu.matmul %169, %170, %cst_65 {dimension_numbers = #tpu.dot_dimension_numbers<[1], [0], [0], [1], [0, 0, 1, 1], [], []>} : vector<2x32xbf16>, vector<32x16xbf16>, vector<2x16xf32> -> vector<2x16xf32>
    %c0_66 = arith.constant 0 : index
    %c0_67 = arith.constant 0 : index
    %172 = vector.load %arg16[%c0_66, %c0_67] : memref<1x512xf32, #tpu.memory_space<vmem>>, vector<1x16xf32>
    %173 = vector.broadcast %172 : vector<1x16xf32> to vector<2x16xf32>
    %174 = arith.addf %171, %173 : vector<2x16xf32>
    %c0_68 = arith.constant 0 : index
    %c0_69 = arith.constant 0 : index
    %175 = vector.load %arg18[%c0_68, %c0_69] : memref<2x16xf32, #tpu.memory_space<vmem>>, vector<2x16xf32>
    tpu.vector_store %arg18[%c0_68, %c0_69], %174 {strides = array<i32>} : memref<2x16xf32, #tpu.memory_space<vmem>>, vector<2x16xf32>,
    %176 = vector.extract_strided_slice %174 {offsets = [0, 0], sizes = [2, 8], strides = [1, 1]} : vector<2x16xf32> to vector<2x8xf32>
    %177 = vector.extract_strided_slice %174 {offsets = [0, 8], sizes = [2, 8], strides = [1, 1]} : vector<2x16xf32> to vector<2x8xf32>
    %c0_70 = arith.constant 0 : index
    %c0_71 = arith.constant 0 : index
    %178 = vector.load %arg2[%c0_70, %c0_71] : memref<2x8xf32, #tpu.memory_space<vmem>>, vector<2x8xf32>
    %cst_72 = arith.constant 5.000000e-01 : f32
    %179 = vector.broadcast %cst_72 : f32 to vector<2x8xf32>
    %180 = arith.mulf %179, %177 : vector<2x8xf32>
    %181 = math.exp %180 : vector<2x8xf32>
    %182 = arith.mulf %178, %181 : vector<2x8xf32>
    %183 = arith.addf %176, %182 : vector<2x8xf32>
    %184 = arith.truncf %183 : vector<2x8xf32> to vector<2x8xbf16>
    %c0_73 = arith.constant 0 : index
    %c0_74 = arith.constant 0 : index
    %185 = vector.load %arg7[%c0_73, %c0_74] : memref<8x128xbf16, #tpu.memory_space<vmem>>, vector<8x128xbf16>
    %cst_75 = arith.constant dense<0.000000e+00> : vector<2x128xf32>
    %186 = tpu.matmul %184, %185, %cst_75 {dimension_numbers = #tpu.dot_dimension_numbers<[1], [0], [0], [1], [0, 0, 1, 1], [], []>} : vector<2x8xbf16>, vector<8x128xbf16>, vector<2x128xf32> -> vector<2x128xf32>
    %c0_76 = arith.constant 0 : index
    %c128_77 = arith.constant 128 : index
    %187 = vector.load %arg16[%c0_76, %c128_77] : memref<1x512xf32, #tpu.memory_space<vmem>>, vector<1x128xf32>
    %188 = vector.broadcast %187 : vector<1x128xf32> to vector<2x128xf32>
    %189 = arith.addf %186, %188 : vector<2x128xf32>
    %cst_78 = arith.constant dense<0.000000e+00> : vector<128xf32>
    %190 = vector.multi_reduction <add>, %189, %cst_78 [0] : vector<2x128xf32> to vector<128xf32>
    %191 = vector.shape_cast %190 : vector<128xf32> to vector<1x128xf32>
    %192 = arith.mulf %189, %189 : vector<2x128xf32>
    %cst_79 = arith.constant dense<0.000000e+00> : vector<128xf32>
    %193 = vector.multi_reduction <add>, %192, %cst_79 [0] : vector<2x128xf32> to vector<128xf32>
    %194 = vector.shape_cast %193 : vector<128xf32> to vector<1x128xf32>
    %195 = tpu.concatenate %191, %194 in 0 : vector<1x128xf32>, vector<1x128xf32> -> vector<2x128xf32>
    %c928 = arith.constant 928 : index
    %c0_80 = arith.constant 0 : index
    %196 = vector.load %arg14[%c928, %c0_80] : memref<3872x32xf32, #tpu.memory_space<vmem>>, vector<128x32xf32>
    %cst_81 = arith.constant dense<0.000000e+00> : vector<2x32xf32>
    %197 = tpu.matmul %195, %196, %cst_81 {dimension_numbers = #tpu.dot_dimension_numbers<[1], [0], [0], [1], [0, 0, 1, 1], [], []>} : vector<2x128xf32>, vector<128x32xf32>, vector<2x32xf32> -> vector<2x32xf32>
    %cst_82 = arith.constant 1.250000e-01 : f32
    %198 = vector.broadcast %cst_82 : f32 to vector<2x32xf32>
    %199 = arith.mulf %197, %198 : vector<2x32xf32>
    %200 = vector.extract_strided_slice %199 {offsets = [0, 0], sizes = [1, 32], strides = [1, 1]} : vector<2x32xf32> to vector<1x32xf32>
    %201 = vector.extract_strided_slice %199 {offsets = [1, 0], sizes = [1, 32], strides = [1, 1]} : vector<2x32xf32> to vector<1x32xf32>
    %202 = arith.mulf %200, %200 : vector<1x32xf32>
    %203 = arith.subf %201, %202 : vector<1x32xf32>
    %cst_83 = arith.constant 0.000000e+00 : f32
    %204 = vector.broadcast %cst_83 : f32 to vector<1x32xf32>
    %205 = arith.maximumf %203, %204 : vector<1x32xf32>
    %c0_84 = arith.constant 0 : index
    %c512_85 = arith.constant 512 : index
    %206 = vector.load %arg13[%c0_84, %c512_85] : memref<2x1024xf32, #tpu.memory_space<vmem>>, vector<2x32xf32>
    %207 = vector.extract_strided_slice %206 {offsets = [0, 0], sizes = [1, 32], strides = [1, 1]} : vector<2x32xf32> to vector<1x32xf32>
    %cst_86 = arith.constant 9.99999974E-6 : f32
    %208 = vector.broadcast %cst_86 : f32 to vector<1x32xf32>
    %209 = arith.addf %205, %208 : vector<1x32xf32>
    %210 = math.rsqrt %209 : vector<1x32xf32>
    %211 = arith.mulf %207, %210 : vector<1x32xf32>
    %212 = vector.extract_strided_slice %206 {offsets = [1, 0], sizes = [1, 32], strides = [1, 1]} : vector<2x32xf32> to vector<1x32xf32>
    %213 = arith.mulf %200, %211 : vector<1x32xf32>
    %214 = arith.subf %212, %213 : vector<1x32xf32>
    %215 = tpu.concatenate %211, %214 in 0 : vector<1x32xf32>, vector<1x32xf32> -> vector<2x32xf32>
    %c88 = arith.constant 88 : index
    %c0_87 = arith.constant 0 : index
    %216 = vector.load %arg15[%c88, %c0_87] : memref<152x2048xf32, #tpu.memory_space<vmem>>, vector<32x128xf32>
    %cst_88 = arith.constant dense<0.000000e+00> : vector<2x128xf32>
    %217 = tpu.matmul %215, %216, %cst_88 {dimension_numbers = #tpu.dot_dimension_numbers<[1], [0], [0], [1], [0, 0, 1, 1], [], []>} : vector<2x32xf32>, vector<32x128xf32>, vector<2x128xf32> -> vector<2x128xf32>
    %218 = vector.extract_strided_slice %217 {offsets = [0, 0], sizes = [1, 128], strides = [1, 1]} : vector<2x128xf32> to vector<1x128xf32>
    %219 = vector.broadcast %218 : vector<1x128xf32> to vector<2x128xf32>
    %220 = arith.mulf %189, %219 : vector<2x128xf32>
    %221 = vector.extract_strided_slice %217 {offsets = [1, 0], sizes = [1, 128], strides = [1, 1]} : vector<2x128xf32> to vector<1x128xf32>
    %222 = vector.broadcast %221 : vector<1x128xf32> to vector<2x128xf32>
    %223 = arith.addf %220, %222 : vector<2x128xf32>
    %cst_89 = arith.constant 0.000000e+00 : f32
    %224 = vector.broadcast %cst_89 : f32 to vector<2x128xf32>
    %225 = arith.cmpf oge, %223, %224 : vector<2x128xf32>
    %cst_90 = arith.constant 0.00999999977 : f32
    %226 = vector.broadcast %cst_90 : f32 to vector<2x128xf32>
    %227 = arith.mulf %226, %223 : vector<2x128xf32>
    %228 = arith.select %225, %223, %227 : vector<2x128xi1>, vector<2x128xf32>
    %229 = arith.truncf %228 : vector<2x128xf32> to vector<2x128xbf16>
    %c0_91 = arith.constant 0 : index
    %c0_92 = arith.constant 0 : index
    %230 = vector.load %arg8[%c0_91, %c0_92] : memref<128x256xbf16, #tpu.memory_space<vmem>>, vector<128x256xbf16>
    %cst_93 = arith.constant dense<0.000000e+00> : vector<2x256xf32>
    %231 = tpu.matmul %229, %230, %cst_93 {dimension_numbers = #tpu.dot_dimension_numbers<[1], [0], [0], [1], [0, 0, 1, 1], [], []>} : vector<2x128xbf16>, vector<128x256xbf16>, vector<2x256xf32> -> vector<2x256xf32>
    %cst_94 = arith.constant dense<0.000000e+00> : vector<256xf32>
    %232 = vector.multi_reduction <add>, %231, %cst_94 [0] : vector<2x256xf32> to vector<256xf32>
    %233 = vector.shape_cast %232 : vector<256xf32> to vector<1x256xf32>
    %234 = arith.mulf %231, %231 : vector<2x256xf32>
    %cst_95 = arith.constant dense<0.000000e+00> : vector<256xf32>
    %235 = vector.multi_reduction <add>, %234, %cst_95 [0] : vector<2x256xf32> to vector<256xf32>
    %236 = vector.shape_cast %235 : vector<256xf32> to vector<1x256xf32>
    %237 = tpu.concatenate %233, %236 in 0 : vector<1x256xf32>, vector<1x256xf32> -> vector<2x256xf32>
    %c1056 = arith.constant 1056 : index
    %c0_96 = arith.constant 0 : index
    %238 = vector.load %arg14[%c1056, %c0_96] : memref<3872x32xf32, #tpu.memory_space<vmem>>, vector<256x16xf32>
    %cst_97 = arith.constant dense<0.000000e+00> : vector<2x16xf32>
    %239 = tpu.matmul %237, %238, %cst_97 {dimension_numbers = #tpu.dot_dimension_numbers<[1], [0], [0], [1], [0, 0, 1, 1], [], []>} : vector<2x256xf32>, vector<256x16xf32>, vector<2x16xf32> -> vector<2x16xf32>
    %cst_98 = arith.constant 3.125000e-02 : f32
    %240 = vector.broadcast %cst_98 : f32 to vector<2x16xf32>
    %241 = arith.mulf %239, %240 : vector<2x16xf32>
    %242 = vector.extract_strided_slice %241 {offsets = [0, 0], sizes = [1, 16], strides = [1, 1]} : vector<2x16xf32> to vector<1x16xf32>
    %243 = vector.extract_strided_slice %241 {offsets = [1, 0], sizes = [1, 16], strides = [1, 1]} : vector<2x16xf32> to vector<1x16xf32>
    %244 = arith.mulf %242, %242 : vector<1x16xf32>
    %245 = arith.subf %243, %244 : vector<1x16xf32>
    %cst_99 = arith.constant 0.000000e+00 : f32
    %246 = vector.broadcast %cst_99 : f32 to vector<1x16xf32>
    %247 = arith.maximumf %245, %246 : vector<1x16xf32>
    %c0_100 = arith.constant 0 : index
    %c640 = arith.constant 640 : index
    %248 = vector.load %arg13[%c0_100, %c640] : memref<2x1024xf32, #tpu.memory_space<vmem>>, vector<2x16xf32>
    %249 = vector.extract_strided_slice %248 {offsets = [0, 0], sizes = [1, 16], strides = [1, 1]} : vector<2x16xf32> to vector<1x16xf32>
    %cst_101 = arith.constant 9.99999974E-6 : f32
    %250 = vector.broadcast %cst_101 : f32 to vector<1x16xf32>
    %251 = arith.addf %247, %250 : vector<1x16xf32>
    %252 = math.rsqrt %251 : vector<1x16xf32>
    %253 = arith.mulf %249, %252 : vector<1x16xf32>
    %254 = vector.extract_strided_slice %248 {offsets = [1, 0], sizes = [1, 16], strides = [1, 1]} : vector<2x16xf32> to vector<1x16xf32>
    %255 = arith.mulf %242, %253 : vector<1x16xf32>
    %256 = arith.subf %254, %255 : vector<1x16xf32>
    %257 = tpu.concatenate %253, %256 in 0 : vector<1x16xf32>, vector<1x16xf32> -> vector<2x16xf32>
    %c120 = arith.constant 120 : index
    %c0_102 = arith.constant 0 : index
    %258 = vector.load %arg15[%c120, %c0_102] : memref<152x2048xf32, #tpu.memory_space<vmem>>, vector<16x256xf32>
    %cst_103 = arith.constant dense<0.000000e+00> : vector<2x256xf32>
    %259 = tpu.matmul %257, %258, %cst_103 {dimension_numbers = #tpu.dot_dimension_numbers<[1], [0], [0], [1], [0, 0, 1, 1], [], []>} : vector<2x16xf32>, vector<16x256xf32>, vector<2x256xf32> -> vector<2x256xf32>
    %260 = vector.extract_strided_slice %259 {offsets = [0, 0], sizes = [1, 256], strides = [1, 1]} : vector<2x256xf32> to vector<1x256xf32>
    %261 = vector.broadcast %260 : vector<1x256xf32> to vector<2x256xf32>
    %262 = arith.mulf %231, %261 : vector<2x256xf32>
    %263 = vector.extract_strided_slice %259 {offsets = [1, 0], sizes = [1, 256], strides = [1, 1]} : vector<2x256xf32> to vector<1x256xf32>
    %264 = vector.broadcast %263 : vector<1x256xf32> to vector<2x256xf32>
    %265 = arith.addf %262, %264 : vector<2x256xf32>
    %cst_104 = arith.constant 0.000000e+00 : f32
    %266 = vector.broadcast %cst_104 : f32 to vector<2x256xf32>
    %267 = arith.cmpf oge, %265, %266 : vector<2x256xf32>
    %cst_105 = arith.constant 0.00999999977 : f32
    %268 = vector.broadcast %cst_105 : f32 to vector<2x256xf32>
    %269 = arith.mulf %268, %265 : vector<2x256xf32>
    %270 = arith.select %267, %265, %269 : vector<2x256xi1>, vector<2x256xf32>
    %271 = arith.truncf %270 : vector<2x256xf32> to vector<2x256xbf16>
    %c0_106 = arith.constant 0 : index
    %c0_107 = arith.constant 0 : index
    %272 = vector.load %arg9[%c0_106, %c0_107] : memref<256x512xbf16, #tpu.memory_space<vmem>>, vector<256x512xbf16>
    %cst_108 = arith.constant dense<0.000000e+00> : vector<2x512xf32>
    %273 = tpu.matmul %271, %272, %cst_108 {dimension_numbers = #tpu.dot_dimension_numbers<[1], [0], [0], [1], [0, 0, 1, 1], [], []>} : vector<2x256xbf16>, vector<256x512xbf16>, vector<2x512xf32> -> vector<2x512xf32>
    %cst_109 = arith.constant dense<0.000000e+00> : vector<512xf32>
    %274 = vector.multi_reduction <add>, %273, %cst_109 [0] : vector<2x512xf32> to vector<512xf32>
    %275 = vector.shape_cast %274 : vector<512xf32> to vector<1x512xf32>
    %276 = arith.mulf %273, %273 : vector<2x512xf32>
    %cst_110 = arith.constant dense<0.000000e+00> : vector<512xf32>
    %277 = vector.multi_reduction <add>, %276, %cst_110 [0] : vector<2x512xf32> to vector<512xf32>
    %278 = vector.shape_cast %277 : vector<512xf32> to vector<1x512xf32>
    %279 = tpu.concatenate %275, %278 in 0 : vector<1x512xf32>, vector<1x512xf32> -> vector<2x512xf32>
    %c1312 = arith.constant 1312 : index
    %c0_111 = arith.constant 0 : index
    %280 = vector.load %arg14[%c1312, %c0_111] : memref<3872x32xf32, #tpu.memory_space<vmem>>, vector<512x8xf32>
    %cst_112 = arith.constant dense<0.000000e+00> : vector<2x8xf32>
    %281 = tpu.matmul %279, %280, %cst_112 {dimension_numbers = #tpu.dot_dimension_numbers<[1], [0], [0], [1], [0, 0, 1, 1], [], []>} : vector<2x512xf32>, vector<512x8xf32>, vector<2x8xf32> -> vector<2x8xf32>
    %cst_113 = arith.constant 7.812500e-03 : f32
    %282 = vector.broadcast %cst_113 : f32 to vector<2x8xf32>
    %283 = arith.mulf %281, %282 : vector<2x8xf32>
    %284 = vector.extract_strided_slice %283 {offsets = [0, 0], sizes = [1, 8], strides = [1, 1]} : vector<2x8xf32> to vector<1x8xf32>
    %285 = vector.extract_strided_slice %283 {offsets = [1, 0], sizes = [1, 8], strides = [1, 1]} : vector<2x8xf32> to vector<1x8xf32>
    %286 = arith.mulf %284, %284 : vector<1x8xf32>
    %287 = arith.subf %285, %286 : vector<1x8xf32>
    %cst_114 = arith.constant 0.000000e+00 : f32
    %288 = vector.broadcast %cst_114 : f32 to vector<1x8xf32>
    %289 = arith.maximumf %287, %288 : vector<1x8xf32>
    %c0_115 = arith.constant 0 : index
    %c768_116 = arith.constant 768 : index
    %290 = vector.load %arg13[%c0_115, %c768_116] : memref<2x1024xf32, #tpu.memory_space<vmem>>, vector<2x8xf32>
    %291 = vector.extract_strided_slice %290 {offsets = [0, 0], sizes = [1, 8], strides = [1, 1]} : vector<2x8xf32> to vector<1x8xf32>
    %cst_117 = arith.constant 9.99999974E-6 : f32
    %292 = vector.broadcast %cst_117 : f32 to vector<1x8xf32>
    %293 = arith.addf %289, %292 : vector<1x8xf32>
    %294 = math.rsqrt %293 : vector<1x8xf32>
    %295 = arith.mulf %291, %294 : vector<1x8xf32>
    %296 = vector.extract_strided_slice %290 {offsets = [1, 0], sizes = [1, 8], strides = [1, 1]} : vector<2x8xf32> to vector<1x8xf32>
    %297 = arith.mulf %284, %295 : vector<1x8xf32>
    %298 = arith.subf %296, %297 : vector<1x8xf32>
    %299 = tpu.concatenate %295, %298 in 0 : vector<1x8xf32>, vector<1x8xf32> -> vector<2x8xf32>
    %c136 = arith.constant 136 : index
    %c0_118 = arith.constant 0 : index
    %300 = vector.load %arg15[%c136, %c0_118] : memref<152x2048xf32, #tpu.memory_space<vmem>>, vector<8x512xf32>
    %cst_119 = arith.constant dense<0.000000e+00> : vector<2x512xf32>
    %301 = tpu.matmul %299, %300, %cst_119 {dimension_numbers = #tpu.dot_dimension_numbers<[1], [0], [0], [1], [0, 0, 1, 1], [], []>} : vector<2x8xf32>, vector<8x512xf32>, vector<2x512xf32> -> vector<2x512xf32>
    %302 = vector.extract_strided_slice %301 {offsets = [0, 0], sizes = [1, 512], strides = [1, 1]} : vector<2x512xf32> to vector<1x512xf32>
    %303 = vector.broadcast %302 : vector<1x512xf32> to vector<2x512xf32>
    %304 = arith.mulf %273, %303 : vector<2x512xf32>
    %305 = vector.extract_strided_slice %301 {offsets = [1, 0], sizes = [1, 512], strides = [1, 1]} : vector<2x512xf32> to vector<1x512xf32>
    %306 = vector.broadcast %305 : vector<1x512xf32> to vector<2x512xf32>
    %307 = arith.addf %304, %306 : vector<2x512xf32>
    %cst_120 = arith.constant 0.000000e+00 : f32
    %308 = vector.broadcast %cst_120 : f32 to vector<2x512xf32>
    %309 = arith.cmpf oge, %307, %308 : vector<2x512xf32>
    %cst_121 = arith.constant 0.00999999977 : f32
    %310 = vector.broadcast %cst_121 : f32 to vector<2x512xf32>
    %311 = arith.mulf %310, %307 : vector<2x512xf32>
    %312 = arith.select %309, %307, %311 : vector<2x512xi1>, vector<2x512xf32>
    %313 = arith.truncf %312 : vector<2x512xf32> to vector<2x512xbf16>
    %c0_122 = arith.constant 0 : index
    %c0_123 = arith.constant 0 : index
    %314 = vector.load %arg10[%c0_122, %c0_123] : memref<512x2048xbf16, #tpu.memory_space<vmem>>, vector<512x2048xbf16>
    %cst_124 = arith.constant dense<0.000000e+00> : vector<2x2048xf32>
    %315 = tpu.matmul %313, %314, %cst_124 {dimension_numbers = #tpu.dot_dimension_numbers<[1], [0], [0], [1], [0, 0, 1, 1], [], []>} : vector<2x512xbf16>, vector<512x2048xbf16>, vector<2x2048xf32> -> vector<2x2048xf32>
    %cst_125 = arith.constant dense<0.000000e+00> : vector<2048xf32>
    %316 = vector.multi_reduction <add>, %315, %cst_125 [0] : vector<2x2048xf32> to vector<2048xf32>
    %317 = vector.shape_cast %316 : vector<2048xf32> to vector<1x2048xf32>
    %318 = arith.mulf %315, %315 : vector<2x2048xf32>
    %cst_126 = arith.constant dense<0.000000e+00> : vector<2048xf32>
    %319 = vector.multi_reduction <add>, %318, %cst_126 [0] : vector<2x2048xf32> to vector<2048xf32>
    %320 = vector.shape_cast %319 : vector<2048xf32> to vector<1x2048xf32>
    %321 = tpu.concatenate %317, %320 in 0 : vector<1x2048xf32>, vector<1x2048xf32> -> vector<2x2048xf32>
    %c1824 = arith.constant 1824 : index
    %c0_127 = arith.constant 0 : index
    %322 = vector.load %arg14[%c1824, %c0_127] : memref<3872x32xf32, #tpu.memory_space<vmem>>, vector<2048x8xf32>
    %cst_128 = arith.constant dense<0.000000e+00> : vector<2x8xf32>
    %323 = tpu.matmul %321, %322, %cst_128 {dimension_numbers = #tpu.dot_dimension_numbers<[1], [0], [0], [1], [0, 0, 1, 1], [], []>} : vector<2x2048xf32>, vector<2048x8xf32>, vector<2x8xf32> -> vector<2x8xf32>
    %cst_129 = arith.constant 0.001953125 : f32
    %324 = vector.broadcast %cst_129 : f32 to vector<2x8xf32>
    %325 = arith.mulf %323, %324 : vector<2x8xf32>
    %326 = vector.extract_strided_slice %325 {offsets = [0, 0], sizes = [1, 8], strides = [1, 1]} : vector<2x8xf32> to vector<1x8xf32>
    %327 = vector.extract_strided_slice %325 {offsets = [1, 0], sizes = [1, 8], strides = [1, 1]} : vector<2x8xf32> to vector<1x8xf32>
    %328 = arith.mulf %326, %326 : vector<1x8xf32>
    %329 = arith.subf %327, %328 : vector<1x8xf32>
    %cst_130 = arith.constant 0.000000e+00 : f32
    %330 = vector.broadcast %cst_130 : f32 to vector<1x8xf32>
    %331 = arith.maximumf %329, %330 : vector<1x8xf32>
    %c0_131 = arith.constant 0 : index
    %c896_132 = arith.constant 896 : index
    %332 = vector.load %arg13[%c0_131, %c896_132] : memref<2x1024xf32, #tpu.memory_space<vmem>>, vector<2x8xf32>
    %333 = vector.extract_strided_slice %332 {offsets = [0, 0], sizes = [1, 8], strides = [1, 1]} : vector<2x8xf32> to vector<1x8xf32>
    %cst_133 = arith.constant 9.99999974E-6 : f32
    %334 = vector.broadcast %cst_133 : f32 to vector<1x8xf32>
    %335 = arith.addf %331, %334 : vector<1x8xf32>
    %336 = math.rsqrt %335 : vector<1x8xf32>
    %337 = arith.mulf %333, %336 : vector<1x8xf32>
    %338 = vector.extract_strided_slice %332 {offsets = [1, 0], sizes = [1, 8], strides = [1, 1]} : vector<2x8xf32> to vector<1x8xf32>
    %339 = arith.mulf %326, %337 : vector<1x8xf32>
    %340 = arith.subf %338, %339 : vector<1x8xf32>
    %341 = tpu.concatenate %337, %340 in 0 : vector<1x8xf32>, vector<1x8xf32> -> vector<2x8xf32>
    %c144 = arith.constant 144 : index
    %c0_134 = arith.constant 0 : index
    %342 = vector.load %arg15[%c144, %c0_134] : memref<152x2048xf32, #tpu.memory_space<vmem>>, vector<8x2048xf32>
    %cst_135 = arith.constant dense<0.000000e+00> : vector<2x2048xf32>
    %343 = tpu.matmul %341, %342, %cst_135 {dimension_numbers = #tpu.dot_dimension_numbers<[1], [0], [0], [1], [0, 0, 1, 1], [], []>} : vector<2x8xf32>, vector<8x2048xf32>, vector<2x2048xf32> -> vector<2x2048xf32>
    %344 = vector.extract_strided_slice %343 {offsets = [0, 0], sizes = [1, 2048], strides = [1, 1]} : vector<2x2048xf32> to vector<1x2048xf32>
    %345 = vector.broadcast %344 : vector<1x2048xf32> to vector<2x2048xf32>
    %346 = arith.mulf %315, %345 : vector<2x2048xf32>
    %347 = vector.extract_strided_slice %343 {offsets = [1, 0], sizes = [1, 2048], strides = [1, 1]} : vector<2x2048xf32> to vector<1x2048xf32>
    %348 = vector.broadcast %347 : vector<1x2048xf32> to vector<2x2048xf32>
    %349 = arith.addf %346, %348 : vector<2x2048xf32>
    %cst_136 = arith.constant 0.000000e+00 : f32
    %350 = vector.broadcast %cst_136 : f32 to vector<2x2048xf32>
    %351 = arith.cmpf oge, %349, %350 : vector<2x2048xf32>
    %cst_137 = arith.constant 0.00999999977 : f32
    %352 = vector.broadcast %cst_137 : f32 to vector<2x2048xf32>
    %353 = arith.mulf %352, %349 : vector<2x2048xf32>
    %354 = arith.select %351, %349, %353 : vector<2x2048xi1>, vector<2x2048xf32>
    %355 = arith.truncf %354 : vector<2x2048xf32> to vector<2x2048xbf16>
    %c0_138 = arith.constant 0 : index
    %c0_139 = arith.constant 0 : index
    %356 = vector.load %arg11[%c0_138, %c0_139] : memref<2048x256xbf16, #tpu.memory_space<vmem>>, vector<2048x256xbf16>
    %cst_140 = arith.constant dense<0.000000e+00> : vector<2x256xf32>
    %357 = tpu.matmul %355, %356, %cst_140 {dimension_numbers = #tpu.dot_dimension_numbers<[1], [0], [0], [1], [0, 0, 1, 1], [], []>} : vector<2x2048xbf16>, vector<2048x256xbf16>, vector<2x256xf32> -> vector<2x256xf32>
    %c0_141 = arith.constant 0 : index
    %c256_142 = arith.constant 256 : index
    %358 = vector.load %arg16[%c0_141, %c256_142] : memref<1x512xf32, #tpu.memory_space<vmem>>, vector<1x256xf32>
    %359 = vector.broadcast %358 : vector<1x256xf32> to vector<2x256xf32>
    %360 = arith.addf %357, %359 : vector<2x256xf32>
    %361 = math.tanh %360 : vector<2x256xf32>
    %c0_143 = arith.constant 0 : index
    %c0_144 = arith.constant 0 : index
    %362 = vector.load %arg17[%c0_143, %c0_144] : memref<2x256xf32, #tpu.memory_space<vmem>>, vector<2x256xf32>
    tpu.vector_store %arg17[%c0_143, %c0_144], %361 {strides = array<i32>} : memref<2x256xf32, #tpu.memory_space<vmem>>, vector<2x256xf32>,
    return
  }
  func.func @transform_0(%arg0: i32) -> (i32, i32) {
    %c0_i32 = arith.constant 0 : i32
    %c0_i32_0 = arith.constant 0 : i32
    %c0_i32_1 = arith.constant 0 : i32
    return %c0_i32, %c0_i32_0 : i32, i32
  }
  func.func @transform_1(%arg0: i32) -> (i32, i32) {
    %c0_i32 = arith.constant 0 : i32
    %c0_i32_0 = arith.constant 0 : i32
    %c0_i32_1 = arith.constant 0 : i32
    return %c0_i32, %c0_i32_0 : i32, i32
  }
  func.func @transform_2(%arg0: i32) -> (i32, i32) {
    %c0_i32 = arith.constant 0 : i32
    %c0_i32_0 = arith.constant 0 : i32
    %c0_i32_1 = arith.constant 0 : i32
    return %c0_i32, %c0_i32_0 : i32, i32
  }
  func.func @transform_3(%arg0: i32) -> (i32, i32) {
    %c0_i32 = arith.constant 0 : i32
    %c0_i32_0 = arith.constant 0 : i32
    %c0_i32_1 = arith.constant 0 : i32
    return %c0_i32, %c0_i32_0 : i32, i32
  }
  func.func @transform_4(%arg0: i32) -> (i32, i32) {
    %c0_i32 = arith.constant 0 : i32
    %c0_i32_0 = arith.constant 0 : i32
    %c0_i32_1 = arith.constant 0 : i32
    return %c0_i32, %c0_i32_0 : i32, i32
  }
  func.func @transform_5(%arg0: i32) -> (i32, i32) {
    %c0_i32 = arith.constant 0 : i32
    %c0_i32_0 = arith.constant 0 : i32
    %c0_i32_1 = arith.constant 0 : i32
    return %c0_i32, %c0_i32_0 : i32, i32
  }
  func.func @transform_6(%arg0: i32) -> (i32, i32) {
    %c0_i32 = arith.constant 0 : i32
    %c0_i32_0 = arith.constant 0 : i32
    %c0_i32_1 = arith.constant 0 : i32
    return %c0_i32, %c0_i32_0 : i32, i32
  }
  func.func @transform_7(%arg0: i32) -> (i32, i32) {
    %c0_i32 = arith.constant 0 : i32
    %c0_i32_0 = arith.constant 0 : i32
    %c0_i32_1 = arith.constant 0 : i32
    return %c0_i32, %c0_i32_0 : i32, i32
  }
  func.func @transform_8(%arg0: i32) -> (i32, i32) {
    %c0_i32 = arith.constant 0 : i32
    %c0_i32_0 = arith.constant 0 : i32
    %c0_i32_1 = arith.constant 0 : i32
    return %c0_i32, %c0_i32_0 : i32, i32
  }
  func.func @transform_9(%arg0: i32) -> (i32, i32) {
    %c0_i32 = arith.constant 0 : i32
    %c0_i32_0 = arith.constant 0 : i32
    %c0_i32_1 = arith.constant 0 : i32
    return %c0_i32, %c0_i32_0 : i32, i32
  }
  func.func @transform_10(%arg0: i32) -> (i32, i32) {
    %c0_i32 = arith.constant 0 : i32
    %c0_i32_0 = arith.constant 0 : i32
    %c0_i32_1 = arith.constant 0 : i32
    return %c0_i32, %c0_i32_0 : i32, i32
  }
  func.func @transform_11(%arg0: i32) -> (i32, i32) {
    %c0_i32 = arith.constant 0 : i32
    %c0_i32_0 = arith.constant 0 : i32
    %c0_i32_1 = arith.constant 0 : i32
    return %c0_i32, %c0_i32_0 : i32, i32
  }
  func.func @transform_12(%arg0: i32) -> (i32, i32) {
    %c0_i32 = arith.constant 0 : i32
    %c0_i32_0 = arith.constant 0 : i32
    %c0_i32_1 = arith.constant 0 : i32
    return %c0_i32, %c0_i32_0 : i32, i32
  }
  func.func @transform_13(%arg0: i32) -> (i32, i32) {
    %c0_i32 = arith.constant 0 : i32
    %c0_i32_0 = arith.constant 0 : i32
    %c0_i32_1 = arith.constant 0 : i32
    return %c0_i32, %c0_i32_0 : i32, i32
  }
  func.func @transform_14(%arg0: i32) -> (i32, i32) {
    %c0_i32 = arith.constant 0 : i32
    %c0_i32_0 = arith.constant 0 : i32
    %c0_i32_1 = arith.constant 0 : i32
    return %c0_i32, %c0_i32_0 : i32, i32
  }
  func.func @transform_15(%arg0: i32) -> (i32, i32) {
    %c0_i32 = arith.constant 0 : i32
    %c0_i32_0 = arith.constant 0 : i32
    %c0_i32_1 = arith.constant 0 : i32
    return %c0_i32, %c0_i32_0 : i32, i32
  }
  func.func @transform_16(%arg0: i32) -> (i32, i32) {
    %c0_i32 = arith.constant 0 : i32
    %c0_i32_0 = arith.constant 0 : i32
    %c0_i32_1 = arith.constant 0 : i32
    return %c0_i32, %c0_i32_0 : i32, i32
  }
  func.func @transform_17(%arg0: i32) -> (i32, i32) {
    %c0_i32 = arith.constant 0 : i32
    %c0_i32_0 = arith.constant 0 : i32
    %c0_i32_1 = arith.constant 0 : i32
    return %c0_i32, %c0_i32_0 : i32, i32
  }
}

</mosaic_0001>

<bundles_post_ra>
// kernel: sigma_vae_forward.1
= control target key start
LH: loop header
LB: loop body
LE: loop exit
PB: predicated region body
PF: predicated region fallthrough
CT: control target
= control target key end

     0   :  { %s21767_s0 = inlined_call_operand.vmem [shape: f32[2,256], index: 0, kind: input, shape index: {}]   ;;  %s21768_s1 = inlined_call_operand.vmem [shape: f32[2,8], index: 1, kind: input, shape index: {}]   ;;  %s21769_s2 = inlined_call_operand.vmem [shape: bf16[256,512], index: 2, kind: input, shape index: {}]   ;;  %s21770_s3 = inlined_call_operand.hbm [shape: bf16[512,256], index: 3, kind: input, shape index: {}]   ;;  %s21771_s4 = inlined_call_operand.vmem [shape: bf16[256,128], index: 4, kind: input, shape index: {}]   ;;  %s21772_s5 = inlined_call_operand.vmem [shape: bf16[128,32], index: 5, kind: input, shape index: {}]   ;;  %s21773_s6 = inlined_call_operand.vmem [shape: bf16[8,128], index: 6, kind: input, shape index: {}]   ;;  %s21774_s7 = inlined_call_operand.vmem [shape: bf16[128,256], index: 7, kind: input, shape index: {}]   ;;  %s21775_s8 = inlined_call_operand.hbm [shape: bf16[256,512], index: 8, kind: input, shape index: {}]   ;;  %s21776_s9 = inlined_call_operand.vmem [shape: bf16[512,2048], index: 9, kind: input, shape index: {}]   ;;  %s21777_s10 = inlined_call_operand.hbm [shape: bf16[2048,256], index: 10, kind: input, shape index: {}]   ;;  %s21778_s11 = inlined_call_operand.vmem [shape: bf16[32,16], index: 11, kind: input, shape index: {}]   ;;  %s21779_s12 = inlined_call_operand.vmem [shape: f32[2,1024], index: 12, kind: input, shape index: {}]   ;;  %s21780_s13 = inlined_call_operand.vmem [shape: f32[3872,32], index: 13, kind: input, shape index: {}]   ;;  %s21781_s14 = inlined_call_operand.hbm [shape: f32[152,2048], index: 14, kind: input, shape index: {}]   ;;  %s21782_s15 = inlined_call_operand.vmem [shape: f32[1,512], index: 15, kind: input, shape index: {}]   ;;  %s21783_s16 = inlined_call_operand.vmem [shape: f32[2,256], index: 16, kind: output, shape index: {0}]   ;;  %s21784_s17 = inlined_call_operand.vmem [shape: f32[2,16], index: 17, kind: output, shape index: {1}]  }
   0x1   :  { %21785 = sst [smem:[#allocation12_spill]] %s21767_s0 }
   0x2   :  { %21786 = sst [smem:[#allocation13_spill]] %s21768_s1 }
   0x3   :  { %23 = vsyncpa [#allocation3], 0 }
   0x4   :  { %24 = vsyncpa [#allocation5], 0  ;;  %s57_s26 = sshll.u32 %s21775_s8, 4  ;;  %s58_s26 = int_to_ptr.hbm [resolvable:$true] %s57_s26 }
   0x5   :  { %25 = vsyncpa [#allocation8], 0  ;;  %s15873_s27 = smov [#allocation4]   ;;  %s36_s30 = sshll.u32 %s21770_s3, 4  ;;  %s37_s30 = int_to_ptr.hbm [resolvable:$true] %s36_s30 }
   0x6   :  { %s59_s28 = sshll.u32 %s15873_s27, 4  ;;  %s15874_s18 = smov 256   ;;  %s60_s28 = int_to_ptr.vmem [resolvable:$true] %s59_s28 }
   0x7   :  { %s15875_s19 = smov 16   ;;  %s15876_s1 = smov [#allocation2]  }
   0x8   :  { %65 = dma.hbm_to_vmem [thread:$0]  %s58_s26, 8192, %s60_s28, [#allocation5], %s15874_s18, %s15874_s18, %s15875_s19  }
   0x9   :  { %s38_s20 = sshll.u32 %s15876_s1, 4  ;;  %s15877_s21 = smov 128   ;;  %s39_s20 = int_to_ptr.vmem [resolvable:$true] %s38_s20 }
   0xa   :  { %s15878_s22 = smov 8   ;;  %s72_s24 = sshll.u32 %s21777_s10, 4  ;;  %s73_s24 = int_to_ptr.hbm [resolvable:$true] %s72_s24 }
   0xb   :  { %44 = dma.hbm_to_vmem [thread:$0]  %s37_s30, 8192, %s39_s20, [#allocation3], %s15877_s21, %s15877_s21, %s15878_s22  }
   0xc   :  { %s15879_s25 = smov [#allocation6]   ;;  %s91_s0 = sshll.u32 %s21781_s14, 4  ;;  %s92_s0 = int_to_ptr.hbm [resolvable:$true] %s91_s0 }
   0xd   :  { %s74_s27 = sshll.u32 %s15879_s25, 4  ;;  %s15880_s26 = smov [#allocation7]   ;;  %s75_s27 = int_to_ptr.vmem [resolvable:$true] %s74_s27 }
   0xe   :  { %80 = dma.hbm_to_vmem [thread:$0]  %s73_s24, 32768, %s75_s27, [#allocation5], %s15877_s21, %s15877_s21, %s15878_s22  }
   0xf   :  { %s93_s28 = sshll.u32 %s15880_s26, 4  ;;  %s15881_s18 = smov 2048   ;;  %s94_s28 = int_to_ptr.vmem [resolvable:$true] %s93_s28 }
  0x10   :  { %99 = dma.hbm_to_vmem [thread:$0]  %s92_s0, 38912, %s94_s28, [#allocation8], %s15881_s18, %s15881_s18, %s15877_s21  }
  0x11   :  { %15867 = dma.done.wait [#allocation3], 8192  }
  0x12   :  { %15868 = vsyncadd [#allocation3], 4294959104 }
  0x13   :  { %15869 = dma.done.wait [#allocation5], 40960  }
  0x14   :  { %15870 = vsyncadd [#allocation5], 4294926336 }
  0x15   :  { %15871 = dma.done.wait [#allocation8], 38912  }
  0x16   :  { %15872 = vsyncadd [#allocation8], 4294928384  ;;  %v10799_v0 = vld [vmem:[%s21769_s2 + $0xe0] sm:$0xf]  ;;  %v14765_v1 = vld [vmem:[%s21769_s2 + $0xec] sm:$0xf0] }
  0x17   :  { %v10927_v2 = vld [vmem:[%s21769_s2 + $0x1e0] sm:$0xf]  ;;  %v10800_v3 = vor.u32 %v14765_v1, %v10799_v0  ;;  %v14797_v4 = vld [vmem:[%s21769_s2 + $0x1ec] sm:$0xf0]  ;;  %v14763_v5 = vld [vmem:[%s21769_s2 + $0xe4] sm:$0xf] }
  0x18   :  { %v10801_v6 = vld [vmem:[%s21769_s2 + $0xf0] sm:$0xf0]  ;;  %v10928_v7 = vor.u32 %v14797_v4, %v10927_v2  ;;  %v14795_v9 = vld [vmem:[%s21769_s2 + $0x1e4] sm:$0xf]  ;;  %v10783_v11 = vld [vmem:[%s21769_s2 + $0xc0] sm:$0xf] }
  0x19   :  { %v10804_v8 = vor.u32 %v14763_v5, %v10801_v6  ;;  %v10929_v10 = vld [vmem:[%s21769_s2 + $0x1f0] sm:$0xf0]  ;;  %512 = vmatpush.bf16.msra.mxu0 %v10800_v3  ;;  %v14761_v13 = vld [vmem:[%s21769_s2 + $0xcc] sm:$0xf0]  ;;  %v10911_v14 = vld [vmem:[%s21769_s2 + $0x1c0] sm:$0xf] }
  0x1a   :  { %v10932_v12 = vor.u32 %v14795_v9, %v10929_v10  ;;  %v14793_v15 = vld [vmem:[%s21769_s2 + $0x1cc] sm:$0xf0]  ;;  %525 = vmatpush.bf16.msra.mxu1 %v10928_v7  ;;  %v10784_v16 = vor.u32 %v14761_v13, %v10783_v11  ;;  %v14759_v18 = vld [vmem:[%s21769_s2 + $0xc4] sm:$0xf]  ;;  %v10785_v19 = vld [vmem:[%s21769_s2 + $0xd0] sm:$0xf0] }
  0x1b   :  { %538 = vmatpush.bf16.msra.mxu2 %v10804_v8  ;;  %v10912_v17 = vor.u32 %v14793_v15, %v10911_v14  ;;  %v14791_v20 = vld [vmem:[%s21769_s2 + $0x1c4] sm:$0xf]  ;;  %v10788_v21 = vor.u32 %v14759_v18, %v10785_v19  ;;  %v10913_v22 = vld [vmem:[%s21769_s2 + $0x1d0] sm:$0xf0]  ;;  %v10767_v23 = vld [vmem:[%s21769_s2 + $0xa0] sm:$0xf] }
  0x1c   :  { %551 = vmatpush.bf16.msra.mxu3 %v10932_v12  ;;  %v14757_v24 = vld [vmem:[%s21769_s2 + $0xac] sm:$0xf0]  ;;  %v10916_v25 = vor.u32 %v14791_v20, %v10913_v22  ;;  %v10895_v26 = vld [vmem:[%s21769_s2 + $0x1a0] sm:$0xf]  ;;  %v14755_v28 = vld [vmem:[%s21769_s2 + $0xa4] sm:$0xf] }
  0x1d   :  { %v14789_v27 = vld [vmem:[%s21769_s2 + $0x1ac] sm:$0xf0]  ;;  %513 = vmatpush.bf16.msra.mxu0 %v10784_v16  ;;  %v10768_v29 = vor.u32 %v14757_v24, %v10767_v23  ;;  %v10769_v30 = vld [vmem:[%s21769_s2 + $0xb0] sm:$0xf0]  ;;  %v14787_v31 = vld [vmem:[%s21769_s2 + $0x1a4] sm:$0xf] }
  0x1e   :  { %v10897_v32 = vld [vmem:[%s21769_s2 + $0x1b0] sm:$0xf0]  ;;  %526 = vmatpush.bf16.msra.mxu1 %v10912_v17  ;;  %v10896_v33 = vor.u32 %v14789_v27, %v10895_v26  ;;  %v10772_v34 = vor.u32 %v14755_v28, %v10769_v30  ;;  %v10751_v35 = vld [vmem:[%s21769_s2 + $0x80] sm:$0xf]  ;;  %v14753_v36 = vld [vmem:[%s21769_s2 + $0x8c] sm:$0xf0] }
  0x1f   :  { %539 = vmatpush.bf16.msra.mxu2 %v10788_v21  ;;  %v10879_v37 = vld [vmem:[%s21769_s2 + $0x180] sm:$0xf]  ;;  %v10900_v38 = vor.u32 %v14787_v31, %v10897_v32  ;;  %v14785_v39 = vld [vmem:[%s21769_s2 + $0x18c] sm:$0xf0]  ;;  %v14751_v40 = vld [vmem:[%s21769_s2 + $0x84] sm:$0xf]  ;;  %v10752_v44 = vor.u32 %v14753_v36, %v10751_v35 }
  0x20   :  { %552 = vmatpush.bf16.msra.mxu3 %v10916_v25  ;;  %v10753_v41 = vld [vmem:[%s21769_s2 + $0x90] sm:$0xf0]  ;;  %v14783_v42 = vld [vmem:[%s21769_s2 + $0x184] sm:$0xf]  ;;  %v10880_v45 = vor.u32 %v14785_v39, %v10879_v37  ;;  %v10735_v47 = vld [vmem:[%s21769_s2 + $0x60] sm:$0xf] }
  0x21   :  { %v10881_v43 = vld [vmem:[%s21769_s2 + $0x190] sm:$0xf0]  ;;  %514 = vmatpush.bf16.msra.mxu0 %v10768_v29  ;;  %v10756_v46 = vor.u32 %v14751_v40, %v10753_v41  ;;  %v14749_v48 = vld [vmem:[%s21769_s2 + $0x6c] sm:$0xf0]  ;;  %v10863_v49 = vld [vmem:[%s21769_s2 + $0x160] sm:$0xf] }
  0x22   :  { %527 = vmatpush.bf16.msra.mxu1 %v10896_v33  ;;  %v10884_v50 = vor.u32 %v14783_v42, %v10881_v43  ;;  %v14781_v51 = vld [vmem:[%s21769_s2 + $0x16c] sm:$0xf0]  ;;  %v14747_v52 = vld [vmem:[%s21769_s2 + $0x64] sm:$0xf]  ;;  %v10737_v53 = vld [vmem:[%s21769_s2 + $0x70] sm:$0xf0]  ;;  %v10736_v56 = vor.u32 %v14749_v48, %v10735_v47 }
  0x23   :  { %540 = vmatpush.bf16.msra.mxu2 %v10772_v34  ;;  %v14779_v54 = vld [vmem:[%s21769_s2 + $0x164] sm:$0xf]  ;;  %v10865_v55 = vld [vmem:[%s21769_s2 + $0x170] sm:$0xf0]  ;;  %v10864_v57 = vor.u32 %v14781_v51, %v10863_v49  ;;  %v10740_v58 = vor.u32 %v14747_v52, %v10737_v53  ;;  %v10719_v59 = vld [vmem:[%s21769_s2 + $0x40] sm:$0xf] }
  0x24   :  { %553 = vmatpush.bf16.msra.mxu3 %v10900_v38  ;;  %v14745_v60 = vld [vmem:[%s21769_s2 + $0x4c] sm:$0xf0]  ;;  %v10847_v61 = vld [vmem:[%s21769_s2 + $0x140] sm:$0xf]  ;;  %v10868_v62 = vor.u32 %v14779_v54, %v10865_v55  ;;  %v14743_v0 = vld [vmem:[%s21769_s2 + $0x44] sm:$0xf] }
  0x25   :  { %515 = vmatpush.bf16.msra.mxu0 %v10752_v44  ;;  %v14777_v63 = vld [vmem:[%s21769_s2 + $0x14c] sm:$0xf0]  ;;  %v10721_v1 = vld [vmem:[%s21769_s2 + $0x50] sm:$0xf0]  ;;  %v14775_v2 = vld [vmem:[%s21769_s2 + $0x144] sm:$0xf]  ;;  %v10720_v4 = vor.u32 %v14745_v60, %v10719_v59 }
  0x26   :  { %528 = vmatpush.bf16.msra.mxu1 %v10880_v45  ;;  %v10849_v3 = vld [vmem:[%s21769_s2 + $0x150] sm:$0xf0]  ;;  %v10848_v5 = vor.u32 %v14777_v63, %v10847_v61  ;;  %v10724_v6 = vor.u32 %v14743_v0, %v10721_v1  ;;  %v10703_v7 = vld [vmem:[%s21769_s2 + $0x20] sm:$0xf]  ;;  %v14741_v8 = vld [vmem:[%s21769_s2 + $0x2c] sm:$0xf0] }
  0x27   :  { %541 = vmatpush.bf16.msra.mxu2 %v10756_v46  ;;  %v10831_v9 = vld [vmem:[%s21769_s2 + $0x120] sm:$0xf]  ;;  %v10852_v10 = vor.u32 %v14775_v2, %v10849_v3  ;;  %v14773_v11 = vld [vmem:[%s21769_s2 + $0x12c] sm:$0xf0]  ;;  %v14739_v12 = vld [vmem:[%s21769_s2 + $0x24] sm:$0xf]  ;;  %v10704_v17 = vor.u32 %v14741_v8, %v10703_v7 }
  0x28   :  { %554 = vmatpush.bf16.msra.mxu3 %v10884_v50  ;;  %v10705_v13 = vld [vmem:[%s21769_s2 + $0x30] sm:$0xf0]  ;;  %v14771_v14 = vld [vmem:[%s21769_s2 + $0x124] sm:$0xf]  ;;  %v10687_v16 = vld [vmem:[%s21769_s2] sm:$0xf]  ;;  %v10832_v21 = vor.u32 %v14773_v11, %v10831_v9 }
  0x29   :  { %516 = vmatpush.bf16.msra.mxu0 %v10736_v56  ;;  %v10833_v15 = vld [vmem:[%s21769_s2 + $0x130] sm:$0xf0]  ;;  %v14737_v18 = vld [vmem:[%s21769_s2 + $0xc] sm:$0xf0]  ;;  %v10815_v19 = vld [vmem:[%s21769_s2 + $0x100] sm:$0xf]  ;;  %v10708_v22 = vor.u32 %v14739_v12, %v10705_v13 }
  0x2a   :  { %529 = vmatpush.bf16.msra.mxu1 %v10864_v57  ;;  %v14769_v20 = vld [vmem:[%s21769_s2 + $0x10c] sm:$0xf0]  ;;  %v14735_v23 = vld [vmem:[%s21769_s2 + $0x4] sm:$0xf]  ;;  %v10689_v24 = vld [vmem:[%s21769_s2 + $0x10] sm:$0xf0]  ;;  %v10836_v26 = vor.u32 %v14771_v14, %v10833_v15  ;;  %v10688_v33 = vor.u32 %v14737_v18, %v10687_v16 }
  0x2b   :  { %542 = vmatpush.bf16.msra.mxu2 %v10740_v58  ;;  %v14767_v25 = vld [vmem:[%s21769_s2 + $0x104] sm:$0xf]  ;;  %v10817_v27 = vld [vmem:[%s21769_s2 + $0x110] sm:$0xf0]  ;;  %v10807_v28 = vld [vmem:[%s21769_s2 + $0xe8] sm:$0xf]  ;;  %v10816_v36 = vor.u32 %v14769_v20, %v10815_v19  ;;  %v10692_v37 = vor.u32 %v14735_v23, %v10689_v24 }
  0x2c   :  { %555 = vmatpush.bf16.msra.mxu3 %v10868_v62  ;;  %v14766_v29 = vld [vmem:[%s21769_s2 + $0xf4] sm:$0xf0]  ;;  %v10935_v30 = vld [vmem:[%s21769_s2 + $0x1e8] sm:$0xf]  ;;  %s21787_s20 = sld [smem:[#allocation12_spill]]  ;;  %v10820_v40 = vor.u32 %v14767_v25, %v10817_v27  ;;  %vm616_vm0 = vcmask 1041408  }
  0x2d   :  { %517 = vmatpush.bf16.msra.mxu0 %v10720_v4  ;;  %v14798_v31 = vld [vmem:[%s21769_s2 + $0x1f4] sm:$0xf0]  ;;  %v14764_v34 = vld [vmem:[%s21769_s2 + $0xec] sm:$0xf]  ;;  %v10809_v35 = vld [vmem:[%s21769_s2 + $0xf8] sm:$0xf0]  ;;  %v10808_v41 = vor.u32 %v14766_v29, %v10807_v28 }
  0x2e   :  { %530 = vmatpush.bf16.msra.mxu1 %v10848_v5  ;;  %v14796_v38 = vld [vmem:[%s21769_s2 + $0x1ec] sm:$0xf]  ;;  %v10937_v39 = vld [vmem:[%s21769_s2 + $0x1f8] sm:$0xf0]  ;;  %v10936_v42 = vor.u32 %v14798_v31, %v10935_v30  ;;  %v10812_v43 = vor.u32 %v14764_v34, %v10809_v35  ;;  %v10791_v44 = vld [vmem:[%s21769_s2 + $0xc8] sm:$0xf] }
  0x2f   :  { %543 = vmatpush.bf16.msra.mxu2 %v10724_v6  ;;  %v14762_v45 = vld [vmem:[%s21769_s2 + $0xd4] sm:$0xf0]  ;;  %v10919_v46 = vld [vmem:[%s21769_s2 + $0x1c8] sm:$0xf]  ;;  %v10940_v47 = vor.u32 %v14796_v38, %v10937_v39  ;;  %v14760_v49 = vld [vmem:[%s21769_s2 + $0xcc] sm:$0xf] }
  0x30   :  { %556 = vmatpush.bf16.msra.mxu3 %v10852_v10  ;;  %v14794_v48 = vld [vmem:[%s21769_s2 + $0x1d4] sm:$0xf0]  ;;  %v10793_v50 = vld [vmem:[%s21769_s2 + $0xd8] sm:$0xf0]  ;;  %v14792_v51 = vld [vmem:[%s21769_s2 + $0x1cc] sm:$0xf]  ;;  %v10792_v53 = vor.u32 %v14762_v45, %v10791_v44 }
  0x31   :  { %518 = vmatpush.bf16.msra.mxu0 %v10704_v17  ;;  %v10921_v52 = vld [vmem:[%s21769_s2 + $0x1d8] sm:$0xf0]  ;;  %v10775_v54 = vld [vmem:[%s21769_s2 + $0xa8] sm:$0xf]  ;;  %v14758_v55 = vld [vmem:[%s21769_s2 + $0xb4] sm:$0xf0]  ;;  %v10920_v57 = vor.u32 %v14794_v48, %v10919_v46  ;;  %v10796_v58 = vor.u32 %v14760_v49, %v10793_v50 }
  0x32   :  { %v119_v32 = vld [vmem:[%s21787_s20] sm:$0xf]  ;;  %531 = vmatpush.bf16.msra.mxu1 %v10832_v21  ;;  %v10903_v56 = vld [vmem:[%s21769_s2 + $0x1a8] sm:$0xf]  ;;  %v10924_v61 = vor.u32 %v14792_v51, %v10921_v52  ;;  %v14790_v63 = vld [vmem:[%s21769_s2 + $0x1b4] sm:$0xf0]  ;;  %v10776_v5 = vor.u32 %v14758_v55, %v10775_v54 }
  0x33   :  { %121 = vst [vmem:[#allocation1] ss:$4 sm:$0xff] %v119_v32  ;;  %544 = vmatpush.bf16.msra.mxu2 %v10708_v22  ;;  %v14756_v0 = vld [vmem:[%s21769_s2 + $0xac] sm:$0xf]  ;;  %v10777_v1 = vld [vmem:[%s21769_s2 + $0xb8] sm:$0xf0]  ;;  %v10904_v6 = vor.u32 %v14790_v63, %v10903_v56 }
  0x34   :  { %557 = vmatpush.bf16.msra.mxu3 %v10836_v26  ;;  %v14788_v3 = vld [vmem:[%s21769_s2 + $0x1ac] sm:$0xf]  ;;  %v10905_v4 = vld [vmem:[%s21769_s2 + $0x1b8] sm:$0xf0]  ;;  %v10780_v7 = vor.u32 %v14756_v0, %v10777_v1  ;;  %v10759_v8 = vld [vmem:[%s21769_s2 + $0x88] sm:$0xf] }
  0x35   :  { %519 = vmatpush.bf16.msra.mxu0 %v10688_v33  ;;  %v14754_v9 = vld [vmem:[%s21769_s2 + $0x94] sm:$0xf0]  ;;  %v10887_v10 = vld [vmem:[%s21769_s2 + $0x188] sm:$0xf]  ;;  %v10908_v11 = vor.u32 %v14788_v3, %v10905_v4  ;;  %v14752_v13 = vld [vmem:[%s21769_s2 + $0x8c] sm:$0xf] }
  0x36   :  { %532 = vmatpush.bf16.msra.mxu1 %v10816_v36  ;;  %v14786_v12 = vld [vmem:[%s21769_s2 + $0x194] sm:$0xf0]  ;;  %v10761_v14 = vld [vmem:[%s21769_s2 + $0x98] sm:$0xf0]  ;;  %v14784_v15 = vld [vmem:[%s21769_s2 + $0x18c] sm:$0xf]  ;;  %v10760_v17 = vor.u32 %v14754_v9, %v10759_v8 }
  0x37   :  { %545 = vmatpush.bf16.msra.mxu2 %v10692_v37  ;;  %v10889_v16 = vld [vmem:[%s21769_s2 + $0x198] sm:$0xf0]  ;;  %v10888_v18 = vor.u32 %v14786_v12, %v10887_v10  ;;  %v10764_v19 = vor.u32 %v14752_v13, %v10761_v14  ;;  %v10743_v20 = vld [vmem:[%s21769_s2 + $0x68] sm:$0xf]  ;;  %v14750_v21 = vld [vmem:[%s21769_s2 + $0x74] sm:$0xf0] }
  0x38   :  { %558 = vmatpush.bf16.msra.mxu3 %v10820_v40  ;;  %v10871_v22 = vld [vmem:[%s21769_s2 + $0x168] sm:$0xf]  ;;  %v10892_v23 = vor.u32 %v14784_v15, %v10889_v16  ;;  %v14782_v24 = vld [vmem:[%s21769_s2 + $0x174] sm:$0xf0]  ;;  %v14748_v25 = vld [vmem:[%s21769_s2 + $0x6c] sm:$0xf]  ;;  %v10744_v29 = vor.u32 %v14750_v21, %v10743_v20 }
  0x39   :  { %564 = vmatpush.bf16.msrb.mxu0 %v10808_v41  ;;  %v10745_v26 = vld [vmem:[%s21769_s2 + $0x78] sm:$0xf0]  ;;  %v14780_v27 = vld [vmem:[%s21769_s2 + $0x16c] sm:$0xf]  ;;  %v10727_v30 = vld [vmem:[%s21769_s2 + $0x48] sm:$0xf]  ;;  %v10872_v31 = vor.u32 %v14782_v24, %v10871_v22 }
  0x3a   :  { %577 = vmatpush.bf16.msrb.mxu1 %v10936_v42  ;;  %v122_v59 = vld.sshfl [vmem:[#allocation1] sm:$0xff pattern:$0x73625140]  ;;  %v123_v60 = vld.sshfl [vmem:[#allocation1 + $0x8] sm:$0xff pattern:$0x73625140]  ;;  %v10748_v32 = vor.u32 %v14748_v25, %v10745_v26 }
  0x3b   :  { %590 = vmatpush.bf16.msrb.mxu2 %v10812_v43  ;;  %v16237_v62 = vpack.c.bf16 %v122_v59, %v122_v59  ;;  %v16248_v2 = vpack.c.bf16 %v123_v60, %v123_v60  ;;  %v10873_v28 = vld [vmem:[%s21769_s2 + $0x178] sm:$0xf0]  ;;  %v14746_v33 = vld [vmem:[%s21769_s2 + $0x54] sm:$0xf0]  ;;  %v10855_v34 = vld [vmem:[%s21769_s2 + $0x148] sm:$0xf] }
  0x3c   :  { %603 = vmatpush.bf16.msrb.mxu3 %v10940_v47  ;;  %v14778_v35 = vld [vmem:[%s21769_s2 + $0x154] sm:$0xf0]  ;;  %v10876_v36 = vor.u32 %v14780_v27, %v10873_v28  ;;  %v14744_v37 = vld [vmem:[%s21769_s2 + $0x4c] sm:$0xf]  ;;  %v10729_v38 = vld [vmem:[%s21769_s2 + $0x58] sm:$0xf0]  ;;  %v10728_v41 = vor.u32 %v14746_v33, %v10727_v30 }
  0x3d   :  { %565 = vmatpush.bf16.msrb.mxu0 %v10792_v53  ;;  %546 = vmatmul.bf16.vlgmr.msra.gmra.mxu2 %v16237_v62  ;;  %v14776_v39 = vld [vmem:[%s21769_s2 + $0x14c] sm:$0xf]  ;;  %v10857_v40 = vld [vmem:[%s21769_s2 + $0x158] sm:$0xf0]  ;;  %v10856_v42 = vor.u32 %v14778_v35, %v10855_v34  ;;  %v10732_v43 = vor.u32 %v14744_v37, %v10729_v38  ;;  %v10711_v44 = vld [vmem:[%s21769_s2 + $0x28] sm:$0xf] }
  0x3e   :  { %578 = vmatpush.bf16.msrb.mxu1 %v10920_v57  ;;  %520 = vmatmul.bf16.vlgmr.msra.gmra.mxu0 %v16237_v62  ;;  %v14742_v45 = vld [vmem:[%s21769_s2 + $0x34] sm:$0xf0]  ;;  %v10839_v46 = vld [vmem:[%s21769_s2 + $0x128] sm:$0xf]  ;;  %v10860_v47 = vor.u32 %v14776_v39, %v10857_v40  ;;  %v14740_v49 = vld [vmem:[%s21769_s2 + $0x2c] sm:$0xf] }
  0x3f   :  { %591 = vmatpush.bf16.msrb.mxu2 %v10796_v58  ;;  %559 = vmatmul.bf16.vlgmr.msra.gmra.mxu3 %v16248_v2  ;;  %v14774_v48 = vld [vmem:[%s21769_s2 + $0x134] sm:$0xf0]  ;;  %v10713_v50 = vld [vmem:[%s21769_s2 + $0x38] sm:$0xf0]  ;;  %v14772_v51 = vld [vmem:[%s21769_s2 + $0x12c] sm:$0xf]  ;;  %v10712_v53 = vor.u32 %v14742_v45, %v10711_v44 }
  0x40   :  { %604 = vmatpush.bf16.msrb.mxu3 %v10924_v61  ;;  %533 = vmatmul.bf16.vlgmr.msra.gmra.mxu1 %v16248_v2  ;;  %v10841_v52 = vld [vmem:[%s21769_s2 + $0x138] sm:$0xf0]  ;;  %v10840_v54 = vor.u32 %v14774_v48, %v10839_v46  ;;  %v10716_v55 = vor.u32 %v14740_v49, %v10713_v50  ;;  %v10695_v56 = vld [vmem:[%s21769_s2 + $0x8] sm:$0xf]  ;;  %v14738_v57 = vld [vmem:[%s21769_s2 + $0x14] sm:$0xf0] }
  0x41   :  { %566 = vmatpush.bf16.msrb.mxu0 %v10776_v5  ;;  %v10823_v58 = vld [vmem:[%s21769_s2 + $0x108] sm:$0xf]  ;;  %v10844_v59 = vor.u32 %v14772_v51, %v10841_v52  ;;  %v14770_v60 = vld [vmem:[%s21769_s2 + $0x114] sm:$0xf0]  ;;  %v14736_v61 = vld [vmem:[%s21769_s2 + $0xc] sm:$0xf]  ;;  %v10696_v3 = vor.u32 %v14738_v57, %v10695_v56 }
  0x42   :  { %579 = vmatpush.bf16.msrb.mxu1 %v10904_v6  ;;  %v10697_v63 = vld [vmem:[%s21769_s2 + $0x18] sm:$0xf0]  ;;  %v14768_v0 = vld [vmem:[%s21769_s2 + $0x10c] sm:$0xf]  ;;  %v10824_v4 = vor.u32 %v14770_v60, %v10823_v58  ;;  %v696_v9 = vld [vmem:[%s21780_s13 + $0x70] sm:$0xff]  ;;  %vm677_vm1 = vcmask 1040384  }
  0x43   :  { %592 = vmatpush.bf16.msrb.mxu2 %v10780_v7  ;;  %v10825_v1 = vld [vmem:[%s21769_s2 + $0x118] sm:$0xf0]  ;;  %v10700_v5 = vor.u32 %v14736_v61, %v10697_v63  ;;  %v712_v10 = vld [vmem:[%s21780_s13 + $0xf0] sm:$0xff]  ;;  %v711_v12 = vld [vmem:[%s21780_s13 + $0xe8] sm:$0xff]  ;;  %vm860_vm5 = vcmask 64512   ;;  %vm1602_vm13 = vcmask 130048  }
  0x44   :  { %605 = vmatpush.bf16.msrb.mxu3 %v10908_v11  ;;  %v10828_v6 = vor.u32 %v14768_v0, %v10825_v1  ;;  %v697_v7 = vld [vmem:[%s21780_s13 + $0x78] sm:$0xff]  ;;  %v695_v11 = vld [vmem:[%s21780_s13 + $0x68] sm:$0xff]  ;;  %v694_v13 = vld [vmem:[%s21780_s13 + $0x60] sm:$0xff]  ;;  %s15882_s1 = smov 120   ;;  %s21788_s2 = sld [smem:[#allocation13_spill]] }
  0x45   :  { %567 = vmatpush.bf16.msrb.mxu0 %v10760_v17  ;;  %v713_v8 = vld [vmem:[%s21780_s13 + $0xf8] sm:$0xff]  ;;  %v692_v15 = vld [vmem:[%s21780_s13 + $0x50] sm:$0xff]  ;;  %v691_v17 = vld [vmem:[%s21780_s13 + $0x48] sm:$0xff] }
  0x46   :  { %580 = vmatpush.bf16.msrb.mxu1 %v10888_v18  ;;  %v709_v14 = vld [vmem:[%s21780_s13 + $0xd8] sm:$0xff]  ;;  %v708_v16 = vld [vmem:[%s21780_s13 + $0xd0] sm:$0xff]  ;;  %v707_v18 = vld [vmem:[%s21780_s13 + $0xc8] sm:$0xff] }
  0x47   :  { %593 = vmatpush.bf16.msrb.mxu2 %v10764_v19  ;;  %v690_v19 = vld [vmem:[%s21780_s13 + $0x40] sm:$0xff]  ;;  %v689_v21 = vld [vmem:[%s21780_s13 + $0x38] sm:$0xff]  ;;  %v704_v24 = vld [vmem:[%s21780_s13 + $0xb0] sm:$0xff] }
  0x48   :  { %606 = vmatpush.bf16.msrb.mxu3 %v10892_v23  ;;  %v706_v20 = vld [vmem:[%s21780_s13 + $0xc0] sm:$0xff]  ;;  %v705_v22 = vld [vmem:[%s21780_s13 + $0xb8] sm:$0xff]  ;;  %v688_v23 = vld [vmem:[%s21780_s13 + $0x30] sm:$0xff] }
  0x49   :  { %568 = vmatpush.bf16.msrb.mxu0 %v10744_v29  ;;  %v687_v25 = vld [vmem:[%s21780_s13 + $0x28] sm:$0xff]  ;;  %v729_v27 = vld [vmem:[%s21780_s13 + $0x178] sm:$0xff]  ;;  %v686_v28 = vld [vmem:[%s21780_s13 + $0x20] sm:$0xff] }
  0x4a   :  { %581 = vmatpush.bf16.msrb.mxu1 %v10872_v31  ;;  %v703_v26 = vld [vmem:[%s21780_s13 + $0xa8] sm:$0xff]  ;;  %v702_v29 = vld [vmem:[%s21780_s13 + $0xa0] sm:$0xff]  ;;  %v728_v30 = vld [vmem:[%s21780_s13 + $0x170] sm:$0xff] }
  0x4b   :  { %594 = vmatpush.bf16.msrb.mxu2 %v10748_v32  ;;  %v685_v31 = vld [vmem:[%s21780_s13 + $0x18] sm:$0xff]  ;;  %v727_v33 = vld [vmem:[%s21780_s13 + $0x168] sm:$0xff]  ;;  %v684_v34 = vld [vmem:[%s21780_s13 + $0x10] sm:$0xff] }
  0x4c   :  { %607 = vmatpush.bf16.msrb.mxu3 %v10876_v36  ;;  %v701_v32 = vld [vmem:[%s21780_s13 + $0x98] sm:$0xff]  ;;  %v700_v35 = vld [vmem:[%s21780_s13 + $0x90] sm:$0xff]  ;;  %v726_v36 = vld [vmem:[%s21780_s13 + $0x160] sm:$0xff] }
  0x4d   :  { %569 = vmatpush.bf16.msrb.mxu0 %v10728_v41  ;;  %v745_v37 = vld [vmem:[%s21780_s13 + $0x1f8] sm:$0xff]  ;;  %v683_v38 = vld [vmem:[%s21780_s13 + $0x8] sm:$0xff]  ;;  %v744_v40 = vld [vmem:[%s21780_s13 + $0x1f0] sm:$0xff] }
  0x4e   :  { %582 = vmatpush.bf16.msrb.mxu1 %v10856_v42  ;;  %v699_v39 = vld [vmem:[%s21780_s13 + $0x88] sm:$0xff]  ;;  %v725_v41 = vld [vmem:[%s21780_s13 + $0x158] sm:$0xff]  ;;  %v698_v44 = vld [vmem:[%s21780_s13 + $0x80] sm:$0xff] }
  0x4f   :  { %595 = vmatpush.bf16.msrb.mxu2 %v10732_v43  ;;  %v743_v42 = vld [vmem:[%s21780_s13 + $0x1e8] sm:$0xff]  ;;  %v682_v43 = vld [vmem:[%s21780_s13] sm:$0xff]  ;;  %v724_v45 = vld [vmem:[%s21780_s13 + $0x150] sm:$0xff] }
  0x50   :  { %608 = vmatpush.bf16.msrb.mxu3 %v10860_v47  ;;  %v723_v46 = vld [vmem:[%s21780_s13 + $0x148] sm:$0xff]  ;;  %v742_v47 = vld [vmem:[%s21780_s13 + $0x1e0] sm:$0xff]  ;;  %v741_v49 = vld [vmem:[%s21780_s13 + $0x1d8] sm:$0xff] }
  0x51   :  { %570 = vmatpush.bf16.msrb.mxu0 %v10712_v53  ;;  %v722_v48 = vld [vmem:[%s21780_s13 + $0x140] sm:$0xff]  ;;  %v721_v50 = vld [vmem:[%s21780_s13 + $0x138] sm:$0xff]  ;;  %v740_v51 = vld [vmem:[%s21780_s13 + $0x1d0] sm:$0xff] }
  0x52   :  { %583 = vmatpush.bf16.msrb.mxu1 %v10840_v54  ;;  %v720_v53 = vld [vmem:[%s21780_s13 + $0x130] sm:$0xff]  ;;  %v739_v54 = vld [vmem:[%s21780_s13 + $0x1c8] sm:$0xff]  ;;  %v738_v58 = vld [vmem:[%s21780_s13 + $0x1c0] sm:$0xff] }
  0x53   :  { %596 = vmatpush.bf16.msrb.mxu2 %v10716_v55  ;;  %v719_v57 = vld [vmem:[%s21780_s13 + $0x128] sm:$0xff]  ;;  %v718_v63 = vld [vmem:[%s21780_s13 + $0x120] sm:$0xff]  ;;  %v737_v0 = vld [vmem:[%s21780_s13 + $0x1b8] sm:$0xff] }
  0x54   :  { %609 = vmatpush.bf16.msrb.mxu3 %v10844_v59 }
  0x55   :  { %571 = vmatpush.bf16.msrb.mxu0 %v10696_v3 }
  0x56   :  { %584 = vmatpush.bf16.msrb.mxu1 %v10824_v4  ;;  %v717_v4 = vld [vmem:[%s21780_s13 + $0x118] sm:$0xff] }
  0x57   :  { %597 = vmatpush.bf16.msrb.mxu2 %v10700_v5  ;;  %v736_v5 = vld [vmem:[%s21780_s13 + $0x1b0] sm:$0xff] }
  0x58   :  { %610 = vmatpush.bf16.msrb.mxu3 %v10828_v6  ;;  %572 = vmatmul.bf16.vlgmr.msrb.gmra.mxu0 %v16237_v62 }
  0x59   :  { %746 = vmatpush.msra.mxu0 %v697_v7  ;;  %585 = vmatmul.bf16.vlgmr.msrb.gmra.mxu1 %v16248_v2 }
  0x5a   :  { %766 = vmatpush.msra.mxu1 %v713_v8  ;;  %598 = vmatmul.bf16.vlgmr.msrb.gmra.mxu2 %v16237_v62  ;;  %v710_v62 = vld [vmem:[%s21780_s13 + $0xe0] sm:$0xff] }
  0x5b   :  { %611 = vmatmul.bf16.vlgmr.msrb.gmra.mxu3 %v16248_v2  ;;  %747 = vmatpush.msra.mxu0 %v696_v9  ;;  %v693_v2 = vld [vmem:[%s21780_s13 + $0x58] sm:$0xff] }
  0x5c   :  { %767 = vmatpush.msra.mxu1 %v712_v10  ;;  %786 = vmatpush.msra.mxu2 %v729_v27 }
  0x5d   :  { %748 = vmatpush.msra.mxu0 %v695_v11  ;;  %806 = vmatpush.msra.mxu3 %v745_v37  ;;  %v716_v11 = vld [vmem:[%s21780_s13 + $0x110] sm:$0xff] }
  0x5e   :  { %768 = vmatpush.msra.mxu1 %v711_v12  ;;  %787 = vmatpush.msra.mxu2 %v728_v30  ;;  %v735_v12 = vld [vmem:[%s21780_s13 + $0x1a8] sm:$0xff] }
  0x5f   :  { %749 = vmatpush.msra.mxu0 %v694_v13  ;;  %807 = vmatpush.msra.mxu3 %v744_v40  ;;  %v731_v30 = vld [vmem:[%s21780_s13 + $0x188] sm:$0xff] }
  0x60   :  { %769 = vmatpush.msra.mxu1 %v710_v62  ;;  %788 = vmatpush.msra.mxu2 %v727_v33 }
  0x61   :  { %750 = vmatpush.msra.mxu0 %v693_v2  ;;  %808 = vmatpush.msra.mxu3 %v743_v42 }
  0x62   :  { %770 = vmatpush.msra.mxu1 %v709_v14  ;;  %789 = vmatpush.msra.mxu2 %v726_v36  ;;  %v730_v36 = vld [vmem:[%s21780_s13 + $0x180] sm:$0xff] }
  0x63   :  { %751 = vmatpush.msra.mxu0 %v692_v15  ;;  %809 = vmatpush.msra.mxu3 %v742_v47 }
  0x64   :  { %771 = vmatpush.msra.mxu1 %v708_v16  ;;  %790 = vmatpush.msra.mxu2 %v725_v41  ;;  %v715_v16 = vld [vmem:[%s21780_s13 + $0x108] sm:$0xff] }
  0x65   :  { %752 = vmatpush.msra.mxu0 %v691_v17  ;;  %810 = vmatpush.msra.mxu3 %v741_v49  ;;  %v734_v17 = vld [vmem:[%s21780_s13 + $0x1a0] sm:$0xff] }
  0x66   :  { %772 = vmatpush.msra.mxu1 %v707_v18  ;;  %791 = vmatpush.msra.mxu2 %v724_v45 }
  0x67   :  { %753 = vmatpush.msra.mxu0 %v690_v19  ;;  %811 = vmatpush.msra.mxu3 %v740_v51 }
  0x68   :  { %773 = vmatpush.msra.mxu1 %v706_v20  ;;  %792 = vmatpush.msra.mxu2 %v723_v46 }
  0x69   :  { %754 = vmatpush.msra.mxu0 %v689_v21  ;;  %812 = vmatpush.msra.mxu3 %v739_v54  ;;  %v714_v21 = vld [vmem:[%s21780_s13 + $0x100] sm:$0xff] }
  0x6a   :  { %774 = vmatpush.msra.mxu1 %v705_v22  ;;  %793 = vmatpush.msra.mxu2 %v722_v48  ;;  %v733_v22 = vld [vmem:[%s21780_s13 + $0x198] sm:$0xff] }
  0x6b   :  { %755 = vmatpush.msra.mxu0 %v688_v23  ;;  %813 = vmatpush.msra.mxu3 %v738_v58 }
  0x6c   :  { %775 = vmatpush.msra.mxu1 %v704_v24  ;;  %794 = vmatpush.msra.mxu2 %v721_v50 }
  0x6d   :  { %756 = vmatpush.msra.mxu0 %v687_v25  ;;  %814 = vmatpush.msra.mxu3 %v737_v0 }
  0x6e   :  { %776 = vmatpush.msra.mxu1 %v703_v26  ;;  %795 = vmatpush.msra.mxu2 %v720_v53 }
  0x6f   :  { %757 = vmatpush.msra.mxu0 %v686_v28  ;;  %815 = vmatpush.msra.mxu3 %v736_v5 }
  0x70   :  { %777 = vmatpush.msra.mxu1 %v702_v29  ;;  %796 = vmatpush.msra.mxu2 %v719_v57  ;;  %v732_v29 = vld [vmem:[%s21780_s13 + $0x190] sm:$0xff] }
  0x71   :  { %758 = vmatpush.msra.mxu0 %v685_v31  ;;  %816 = vmatpush.msra.mxu3 %v735_v12 }
  0x72   :  { %778 = vmatpush.msra.mxu1 %v701_v32  ;;  %797 = vmatpush.msra.mxu2 %v718_v63 }
  0x73   :  { %759 = vmatpush.msra.mxu0 %v684_v34  ;;  %817 = vmatpush.msra.mxu3 %v734_v17 }
  0x74   :  { %779 = vmatpush.msra.mxu1 %v700_v35  ;;  %798 = vmatpush.msra.mxu2 %v717_v4 }
  0x75   :  { %760 = vmatpush.msra.mxu0 %v683_v38  ;;  %818 = vmatpush.msra.mxu3 %v733_v22 }
  0x76   :  { %780 = vmatpush.msra.mxu1 %v699_v39  ;;  %799 = vmatpush.msra.mxu2 %v716_v11 }
  0x77   :  { %761 = vmatpush.msra.mxu0 %v682_v43  ;;  %819 = vmatpush.msra.mxu3 %v732_v29 }
  0x78   :  { %781 = vmatpush.msra.mxu1 %v698_v44  ;;  %800 = vmatpush.msra.mxu2 %v715_v16 }
  0x79   :  { %820 = vmatpush.msra.mxu3 %v731_v30 }
  0x7a   :  { %801 = vmatpush.msra.mxu2 %v714_v21 }
  0x7b   :  { %821 = vmatpush.msra.mxu3 %v730_v36 }
  0xbb   :  { %v521_v52 = vpop.f32.mrf.mxu0 }
  0xbd   :  { %v534_v55 = vpop.f32.mrf.mxu1 }
  0xbe   :  { %v16531_v56 = vadd.f32 %v534_v55, %v521_v52 }
  0xc0   :  { %v617_v59 = vsel %vm616_vm0, %v16531_v56, 0.0  ;;  %v645_v60 = vmul.f32 %v16531_v56, %v16531_v56  ;;  %v547_v61 = vpop.f32.mrf.mxu2 }
  0xc1   :  { %v618_v1 = vrot.slane %v617_v59, 4 }
  0xc2   :  { %v649_v3 = vsel %vm616_vm0, %v645_v60, 0.0  ;;  %v560_v8 = vpop.f32.mrf.mxu3 }
  0xc3   :  { %v619_v6 = vadd.f32 %v618_v1, %v617_v59  ;;  %v650_v7 = vrot.slane %v649_v3, 4  ;;  %v16556_v9 = vadd.f32 %v560_v8, %v547_v61  ;;  %v523_v10 = vpop.f32.mrf.mxu0 }
  0xc5   :  { %v620_v13 = vrot.slane %v619_v6, 2  ;;  %v651_v62 = vadd.f32 %v650_v7, %v649_v3  ;;  %v536_v2 = vpop.f32.mrf.mxu1  ;;  %v624_v14 = vsel %vm616_vm0, %v16556_v9, 0.0  ;;  %v646_v15 = vmul.f32 %v16556_v9, %v16556_v9 }
  0xc6   :  { %v625_v20 = vrot.slane %v624_v14, 4 }
  0xc7   :  { %v621_v18 = vadd.f32 %v620_v13, %v619_v6  ;;  %v652_v19 = vrot.slane %v651_v62, 2  ;;  %v656_v23 = vsel %vm616_vm0, %v646_v15, 0.0 }
  0xc8   :  { %v549_v24 = vpop.f32.mrf.mxu2  ;;  %v626_v25 = vadd.f32 %v625_v20, %v624_v14  ;;  %v657_v26 = vrot.slane %v656_v23, 4 }
  0xc9   :  { %v622_v27 = vrot.slane %v621_v18, 1  ;;  %v653_v28 = vadd.f32 %v652_v19, %v651_v62 }
  0xca   :  { %v627_v31 = vrot.slane %v626_v25, 2  ;;  %v658_v32 = vadd.f32 %v657_v26, %v656_v23  ;;  %v562_v33 = vpop.f32.mrf.mxu3 }
  0xcb   :  { %v623_v34 = vadd.f32 %v622_v27, %v621_v18  ;;  %v654_v35 = vrot.slane %v653_v28, 1 }
  0xcc   :  { %v628_v37 = vadd.f32 %v627_v31, %v626_v25  ;;  %v659_v38 = vrot.slane %v658_v32, 2 }
  0xcd   :  { %v655_v39 = vadd.f32 %v654_v35, %v653_v28 }
  0xce   :  { %v629_v41 = vrot.slane %v628_v37, 1  ;;  %v660_v42 = vadd.f32 %v659_v38, %v658_v32  ;;  %v856_v38 = vld [vmem:[#allocation7] sm:$0xff] }
  0xcf   :  { %v678_v40 = vsel %vm677_vm1, %v623_v34, %v655_v39  ;;  %v857_v39 = vld [vmem:[#allocation7 + $0x8] sm:$0xff]  ;;  %879 = vmatpush.msrb.mxu0 %v856_v38  ;;  %v14822_v38 = vld [vmem:[#allocation2 + $0xb4] sm:$0xf0] }
  0xd0   :  { %762 = vmatmul.f32.vlgmr.msra.gmra.mxu0 %v678_v40  ;;  %v630_v43 = vadd.f32 %v629_v41, %v628_v37  ;;  %v661_v44 = vrot.slane %v660_v42, 1  ;;  %v858_v40 = vld [vmem:[#allocation7 + $0x10] sm:$0xff]  ;;  %899 = vmatpush.msrb.mxu1 %v857_v39  ;;  %v859_v41 = vld [vmem:[#allocation7 + $0x18] sm:$0xff] }
  0xd1   :  { %919 = vmatpush.msrb.mxu2 %v858_v40  ;;  %939 = vmatpush.msrb.mxu3 %v859_v41  ;;  %v10964_v40 = vld [vmem:[#allocation2 + $0x20] sm:$0xf] }
  0xd2   :  { %v662_v45 = vadd.f32 %v661_v44, %v660_v42  ;;  %v11004_v44 = vld [vmem:[#allocation2 + $0x70] sm:$0xf] }
  0xd4   :  { %v679_v46 = vsel %vm677_vm1, %v630_v43, %v662_v45  ;;  %v14814_v45 = vld [vmem:[#allocation2 + $0x74] sm:$0xf0] }
  0xd5   :  { %v573_v47 = vpop.f32.mrf.mxu0  ;;  %782 = vmatmul.f32.vlgmr.msra.gmra.mxu1 %v679_v46  ;;  %v11005_v46 = vor.u32 %v14814_v45, %v11004_v44  ;;  %v11100_v45 = vld [vmem:[#allocation2 + $0x130] sm:$0xf] }
  0xd6   :  { %v586_v48 = vpop.f32.mrf.mxu1 }
  0xd7   :  { %v16592_v49 = vadd.f32 %v586_v48, %v573_v47  ;;  %v11068_v47 = vld [vmem:[#allocation2 + $0xf0] sm:$0xf]  ;;  %v14830_v48 = vld [vmem:[#allocation2 + $0xf4] sm:$0xf0]  ;;  %1360 = vmatpush.bf16.msra.mxu0 %v11005_v46 }
  0xd8   :  { %v14838_v46 = vld [vmem:[#allocation2 + $0x134] sm:$0xf0] }
  0xd9   :  { %v631_v50 = vsel %vm616_vm0, %v16592_v49, 0.0  ;;  %v647_v51 = vmul.f32 %v16592_v49, %v16592_v49 }
  0xda   :  { %v632_v52 = vrot.slane %v631_v50, 4 }
  0xdb   :  { %v663_v53 = vsel %vm616_vm0, %v647_v51, 0.0  ;;  %v11069_v51 = vor.u32 %v14830_v48, %v11068_v47  ;;  %v14804_v48 = vld [vmem:[#allocation2 + $0x24] sm:$0xf0] }
  0xdc   :  { %v633_v54 = vadd.f32 %v632_v52, %v631_v50  ;;  %v664_v55 = vrot.slane %v663_v53, 4  ;;  %v10996_v50 = vld [vmem:[#allocation2 + $0x60] sm:$0xf]  ;;  %v14812_v52 = vld [vmem:[#allocation2 + $0x64] sm:$0xf0] }
  0xdd   :  { %v599_v57 = vpop.f32.mrf.mxu2  ;;  %v575_v59 = vpop.f32.mrf.mxu0  ;;  %1373 = vmatpush.bf16.msra.mxu1 %v11069_v51  ;;  %v14854_v51 = vld [vmem:[#allocation2 + $0x1b4] sm:$0xf0] }
  0xde   :  { %v612_v58 = vpop.f32.mrf.mxu3  ;;  %v634_v60 = vrot.slane %v633_v54, 2  ;;  %v665_v61 = vadd.f32 %v664_v55, %v663_v53  ;;  %v588_v0 = vpop.f32.mrf.mxu1  ;;  %v11060_v53 = vld [vmem:[#allocation2 + $0xe0] sm:$0xf]  ;;  %v10997_v55 = vor.u32 %v14812_v52, %v10996_v50  ;;  %v11196_v59 = vld [vmem:[#allocation2 + $0x1f0] sm:$0xf] }
  0xdf   :  { %v16599_v63 = vadd.f32 %v612_v58, %v599_v57  ;;  %v11132_v57 = vld [vmem:[#allocation2 + $0x170] sm:$0xf]  ;;  %v14846_v58 = vld [vmem:[#allocation2 + $0x174] sm:$0xf0] }
  0xe0   :  { %v635_v1 = vadd.f32 %v634_v60, %v633_v54  ;;  %v666_v3 = vrot.slane %v665_v61, 2  ;;  %v14828_v54 = vld [vmem:[#allocation2 + $0xe4] sm:$0xf0]  ;;  %v14862_v0 = vld [vmem:[#allocation2 + $0x1f4] sm:$0xf0]  ;;  %1361 = vmatpush.bf16.msra.mxu0 %v10997_v55 }
  0xe1   :  { %v638_v4 = vsel %vm616_vm0, %v16599_v63, 0.0  ;;  %v648_v5 = vmul.f32 %v16599_v63, %v16599_v63  ;;  %v11061_v60 = vor.u32 %v14828_v54, %v11060_v53  ;;  %v11164_v50 = vld [vmem:[#allocation2 + $0x1b0] sm:$0xf]  ;;  %v11028_v53 = vld [vmem:[#allocation2 + $0xa0] sm:$0xf] }
  0xe2   :  { %v639_v6 = vrot.slane %v638_v4, 4  ;;  %v636_v8 = vrot.slane %v635_v1, 1  ;;  %v667_v10 = vadd.f32 %v666_v3, %v665_v61  ;;  %v11133_v61 = vor.u32 %v14846_v58, %v11132_v57  ;;  %v14810_v3 = vld [vmem:[#allocation2 + $0x54] sm:$0xf0]  ;;  %v14820_v54 = vld [vmem:[#allocation2 + $0xa4] sm:$0xf0] }
  0xe3   :  { %v670_v7 = vsel %vm616_vm0, %v648_v5, 0.0  ;;  %v11052_v5 = vld [vmem:[#allocation2 + $0xd0] sm:$0xf]  ;;  %1374 = vmatpush.bf16.msra.mxu1 %v11061_v60  ;;  %v833_v55 = vld [vmem:[%s21779_s12] sm:$0x3]  ;;  %v11101_v57 = vor.u32 %v14838_v46, %v11100_v45  ;;  %v10965_v60 = vor.u32 %v14804_v48, %v10964_v40 }
  0xe4   :  { %v640_v11 = vadd.f32 %v639_v6, %v638_v4  ;;  %v671_v12 = vrot.slane %v670_v7, 4  ;;  %v668_v62 = vrot.slane %v667_v10, 1  ;;  %v637_v16 = vadd.f32 %v636_v8, %v635_v1  ;;  %v10988_v1 = vld [vmem:[#allocation2 + $0x50] sm:$0xf]  ;;  %v14826_v6 = vld [vmem:[#allocation2 + $0xd4] sm:$0xf0] }
  0xe5   :  { %v601_v13 = vpop.f32.mrf.mxu2  ;;  %v11197_v4 = vor.u32 %v14862_v0, %v11196_v59  ;;  %v14844_v8 = vld [vmem:[#allocation2 + $0x164] sm:$0xf0]  ;;  %v10956_v58 = vld [vmem:[#allocation2 + $0x10] sm:$0xf]  ;;  %v14802_v0 = vld [vmem:[#allocation2 + $0x14] sm:$0xf0] }
  0xe6   :  { %v641_v2 = vrot.slane %v640_v11, 2  ;;  %v672_v14 = vadd.f32 %v671_v12, %v670_v7  ;;  %v614_v15 = vpop.f32.mrf.mxu3  ;;  %v669_v17 = vadd.f32 %v668_v62, %v667_v10  ;;  %v11124_v7 = vld [vmem:[#allocation2 + $0x160] sm:$0xf]  ;;  %v10989_v12 = vor.u32 %v14810_v3, %v10988_v1  ;;  %v14836_v3 = vld [vmem:[#allocation2 + $0x124] sm:$0xf0] }
  0xe7   :  { %v11188_v10 = vld [vmem:[#allocation2 + $0x1e0] sm:$0xf]  ;;  %v11125_v13 = vor.u32 %v14844_v8, %v11124_v7  ;;  %v11020_v7 = vld [vmem:[#allocation2 + $0x90] sm:$0xf]  ;;  %v14818_v8 = vld [vmem:[#allocation2 + $0x94] sm:$0xf0] }
  0xe8   :  { %v642_v18 = vadd.f32 %v641_v2, %v640_v11  ;;  %v673_v19 = vrot.slane %v672_v14, 2  ;;  %v680_v20 = vsel %vm677_vm1, %v637_v16, %v669_v17  ;;  %v14860_v11 = vld [vmem:[#allocation2 + $0x1e4] sm:$0xf0]  ;;  %v10980_v2 = vld [vmem:[#allocation2 + $0x40] sm:$0xf]  ;;  %v11053_v16 = vor.u32 %v14826_v6, %v11052_v5  ;;  %1362 = vmatpush.bf16.msra.mxu0 %v10989_v12 }
  0xe9   :  { %802 = vmatmul.f32.vlgmr.msra.gmra.mxu2 %v680_v20  ;;  %v11189_v62 = vor.u32 %v14860_v11, %v11188_v10  ;;  %v11044_v17 = vld [vmem:[#allocation2 + $0xc0] sm:$0xf]  ;;  %v14852_v6 = vld [vmem:[#allocation2 + $0x1a4] sm:$0xf0]  ;;  %v10957_v12 = vor.u32 %v14802_v0, %v10956_v58  ;;  %v14825_v58 = vld [vmem:[#allocation2 + $0xd4] sm:$0xf] }
  0xea   :  { %v643_v21 = vrot.slane %v642_v18, 1  ;;  %v674_v22 = vadd.f32 %v673_v19, %v672_v14  ;;  %1386 = vmatpush.bf16.msra.mxu2 %v11133_v61  ;;  %v14808_v14 = vld [vmem:[#allocation2 + $0x44] sm:$0xf0]  ;;  %v14842_v19 = vld [vmem:[#allocation2 + $0x154] sm:$0xf0]  ;;  %1375 = vmatpush.bf16.msra.mxu1 %v11053_v16  ;;  %v11165_v61 = vor.u32 %v14854_v51, %v11164_v50 }
  0xeb   :  { %v11092_v1 = vld [vmem:[#allocation2 + $0x120] sm:$0xf]  ;;  %v14848_v46 = vld [vmem:[#allocation2 + $0x184] sm:$0xf0]  ;;  %v11134_v50 = vld [vmem:[#allocation2 + $0x178] sm:$0xf0] }
  0xec   :  { %v675_v23 = vrot.slane %v674_v22, 1  ;;  %v644_v24 = vadd.f32 %v643_v21, %v642_v18  ;;  %v11116_v18 = vld [vmem:[#allocation2 + $0x150] sm:$0xf]  ;;  %v14824_v21 = vld [vmem:[#allocation2 + $0xc4] sm:$0xf0]  ;;  %v11093_v11 = vor.u32 %v14836_v3, %v11092_v1 }
  0xed   :  { %v11156_v5 = vld [vmem:[#allocation2 + $0x1a0] sm:$0xf]  ;;  %v14861_v51 = vld [vmem:[#allocation2 + $0x1f4] sm:$0xf]  ;;  %v14843_v0 = vld [vmem:[#allocation2 + $0x164] sm:$0xf] }
  0xee   :  { %v676_v25 = vadd.f32 %v675_v23, %v674_v22  ;;  %v11180_v22 = vld [vmem:[#allocation2 + $0x1d0] sm:$0xf]  ;;  %v14858_v23 = vld [vmem:[#allocation2 + $0x1d4] sm:$0xf0]  ;;  %1387 = vmatpush.bf16.msra.mxu2 %v11125_v13  ;;  %v11157_v13 = vor.u32 %v14852_v6, %v11156_v5  ;;  %v10948_v16 = vld [vmem:[#allocation2] sm:$0xf] }
  0xef   :  { %v11076_v40 = vld [vmem:[#allocation2 + $0x100] sm:$0xf]  ;;  %v11126_v1 = vld [vmem:[#allocation2 + $0x168] sm:$0xf0]  ;;  %v14859_v3 = vld [vmem:[#allocation2 + $0x1e4] sm:$0xf] }
  0xf0   :  { %v681_v26 = vsel %vm677_vm1, %v644_v24, %v676_v25  ;;  %v11117_v24 = vor.u32 %v14842_v19, %v11116_v18  ;;  %v11012_v18 = vld [vmem:[#allocation2 + $0x80] sm:$0xf]  ;;  %v14807_v6 = vld [vmem:[#allocation2 + $0x44] sm:$0xf] }
  0xf1   :  { %822 = vmatmul.f32.vlgmr.msra.gmra.mxu3 %v681_v26  ;;  %v10981_v26 = vor.u32 %v14808_v14, %v10980_v2  ;;  %v14834_v2 = vld [vmem:[#allocation2 + $0x114] sm:$0xf0]  ;;  %v11140_v45 = vld [vmem:[#allocation2 + $0x180] sm:$0xf] }
  0xf2   :  { %1399 = vmatpush.bf16.msra.mxu3 %v11197_v4  ;;  %1388 = vmatpush.bf16.msra.mxu2 %v11117_v24  ;;  %v11029_v4 = vor.u32 %v14820_v54, %v11028_v53  ;;  %v14829_v24 = vld [vmem:[#allocation2 + $0xf4] sm:$0xf]  ;;  %v11141_v48 = vor.u32 %v14848_v46, %v11140_v45  ;;  %v11022_v46 = vld [vmem:[#allocation2 + $0x98] sm:$0xf0] }
  0xf3   :  { %1363 = vmatpush.bf16.msra.mxu0 %v10981_v26 }
  0xf6   :  { %1400 = vmatpush.bf16.msra.mxu3 %v11189_v62  ;;  %v11084_v62 = vld [vmem:[#allocation2 + $0x110] sm:$0xf] }
 0x14d   :  { %v763_v27 = vpop.f32.mrf.mxu0 }
 0x152   :  { %v783_v28 = vpop.f32.mrf.mxu1 }
 0x153   :  { %v784_v30 = vadd.f32 %v783_v28, %v763_v27  ;;  %v11181_v27 = vor.u32 %v14858_v23, %v11180_v22  ;;  %v10972_v28 = vld [vmem:[#allocation2 + $0x30] sm:$0xf]  ;;  %v11085_v22 = vor.u32 %v14834_v2, %v11084_v62  ;;  %v11006_v23 = vld [vmem:[#allocation2 + $0x78] sm:$0xf0]  ;;  %v14857_v2 = vld [vmem:[#allocation2 + $0x1d4] sm:$0xf] }
 0x154   :  { %v11118_v62 = vld [vmem:[#allocation2 + $0x158] sm:$0xf0] }
 0x155   :  { %1401 = vmatpush.bf16.msra.mxu3 %v11181_v27  ;;  %v11148_v27 = vld [vmem:[#allocation2 + $0x190] sm:$0xf] }
 0x16c   :  { %v803_v29 = vpop.f32.mrf.mxu2 }
 0x16d   :  { %v804_v31 = vadd.f32 %v803_v29, %v784_v30  ;;  %v11108_v29 = vld [vmem:[#allocation2 + $0x140] sm:$0xf]  ;;  %v14840_v30 = vld [vmem:[#allocation2 + $0x144] sm:$0xf0] }
 0x16e   :  { %v11109_v39 = vor.u32 %v14840_v30, %v11108_v29 }
 0x170   :  { %1389 = vmatpush.bf16.msra.mxu2 %v11109_v39  ;;  %v11062_v39 = vld [vmem:[#allocation2 + $0xe8] sm:$0xf0] }
 0x174   :  { %v823_v32 = vpop.f32.mrf.mxu3  ;;  %1390 = vmatpush.bf16.msra.mxu2 %v11101_v57  ;;  %v10990_v57 = vld [vmem:[#allocation2 + $0x58] sm:$0xf0] }
 0x175   :  { %v824_v33 = vadd.f32 %v823_v32, %v804_v31  ;;  %v11045_v31 = vor.u32 %v14824_v21, %v11044_v17  ;;  %v14806_v32 = vld [vmem:[#allocation2 + $0x34] sm:$0xf0]  ;;  %v14800_v17 = vld [vmem:[#allocation2 + $0x4] sm:$0xf0]  ;;  %v14813_v21 = vld [vmem:[#allocation2 + $0x74] sm:$0xf] }
 0x177   :  { %v16608_v34 = vmul.f32 0.0078125, %v824_v33  ;;  %v11172_v33 = vld [vmem:[#allocation2 + $0x1c0] sm:$0xf]  ;;  %1376 = vmatpush.bf16.msra.mxu1 %v11045_v31  ;;  %v11009_v31 = vor.u32 %v14813_v21, %v11006_v23  ;;  %v11038_v21 = vld [vmem:[#allocation2 + $0xb8] sm:$0xf0] }
 0x178   :  { %1391 = vmatpush.bf16.msra.mxu2 %v11093_v11  ;;  %v11046_v11 = vld [vmem:[#allocation2 + $0xc8] sm:$0xf0]  ;;  %v14839_v23 = vld [vmem:[#allocation2 + $0x144] sm:$0xf] }
 0x179   :  { %v827_v35 = vmul.f32 %v16608_v34, %v16608_v34 }
 0x17b   :  { %v829_v36 = vrot.slane %v827_v35, 7  ;;  %v14856_v35 = vld [vmem:[#allocation2 + $0x1c4] sm:$0xf0] }
 0x17c   :  { %v11173_v44 = vor.u32 %v14856_v35, %v11172_v33  ;;  %1392 = vmatpush.bf16.msra.mxu2 %v11085_v22  ;;  %v14811_v35 = vld [vmem:[#allocation2 + $0x64] sm:$0xf] }
 0x17d   :  { %v831_v37 = vsub.f32 %v16608_v34, %v829_v36 }
 0x17e   :  { %1402 = vmatpush.bf16.msra.mxu3 %v11173_v44 }
 0x17f   :  { %v832_v42 = vmax.f32 %v831_v37, 0.0  ;;  %v11036_v37 = vld [vmem:[#allocation2 + $0xb0] sm:$0xf] }
 0x180   :  { %v11037_v47 = vor.u32 %v14822_v38, %v11036_v37  ;;  %v14827_v37 = vld [vmem:[#allocation2 + $0xe4] sm:$0xf] }
 0x181   :  { %v16613_v43 = vadd.f32 1e-05, %v832_v42  ;;  %v10973_v42 = vor.u32 %v14806_v32, %v10972_v28  ;;  %v10949_v28 = vor.u32 %v14800_v17, %v10948_v16  ;;  %v14805_v17 = vld [vmem:[#allocation2 + $0x34] sm:$0xf] }
 0x182   :  { %1377 = vmatpush.bf16.msra.mxu1 %v11037_v47  ;;  %1403 = vmatpush.bf16.msra.mxu3 %v11165_v61  ;;  %v14845_v47 = vld [vmem:[#allocation2 + $0x174] sm:$0xf] }
 0x183   :  { %15749 = vrsqrt.f32 %v16613_v43  ;;  %vm841_vm3 = vweird.f32 %v16613_v43  ;;  %1364 = vmatpush.bf16.msra.mxu0 %v10973_v42  ;;  %v11065_v42 = vor.u32 %v14827_v37, %v11062_v39  ;;  %v11137_v53 = vor.u32 %v14845_v47, %v11134_v50  ;;  %v14853_v37 = vld [vmem:[#allocation2 + $0x1b4] sm:$0xf]  ;;  %v11166_v39 = vld [vmem:[#allocation2 + $0x1b8] sm:$0xf0]  ;;  %v14835_v47 = vld [vmem:[#allocation2 + $0x124] sm:$0xf] }
 0x186   :  { %1378 = vmatpush.bf16.msra.mxu1 %v11029_v4  ;;  %1404 = vmatpush.bf16.msra.mxu3 %v11157_v13  ;;  %v11190_v4 = vld [vmem:[#allocation2 + $0x1e8] sm:$0xf0]  ;;  %v14841_v13 = vld [vmem:[#allocation2 + $0x154] sm:$0xf] }
 0x187   :  { %1365 = vmatpush.bf16.msra.mxu0 %v10965_v60  ;;  %v11054_v60 = vld [vmem:[#allocation2 + $0xd8] sm:$0xf0]  ;;  %v11193_v5 = vor.u32 %v14859_v3, %v11190_v4  ;;  %v14849_v3 = vld [vmem:[#allocation2 + $0x194] sm:$0xf] }
 0x188   :  { %v11057_v61 = vor.u32 %v14825_v58, %v11054_v60  ;;  %v14815_v58 = vld [vmem:[#allocation2 + $0x84] sm:$0xf] }
 0x189   :  { %v15750_v15 = vpop.eup %15749 }
 0x18a   :  { %v836_v20 = vmul.f32 %v15750_v15, %v16613_v43  ;;  %vm842_vm2 = vweird.f32 %v15750_v15 }
 0x18b   :  { %vm843_vm4 = vmor %vm841_vm3, %vm842_vm2  ;;  %1366 = vmatpush.bf16.msra.mxu0 %v10957_v12 }
 0x18c   :  { %v837_v25 = vmul.f32 %v15750_v15, %v836_v20  ;;  %v14816_v20 = vld [vmem:[#allocation2 + $0x84] sm:$0xf0] }
 0x18d   :  { %v11013_v29 = vor.u32 %v14816_v20, %v11012_v18  ;;  %v10974_v18 = vld [vmem:[#allocation2 + $0x38] sm:$0xf0] }
 0x18e   :  { %v838_v36 = vmul.f32 0.5, %v837_v25  ;;  %v11070_v25 = vld [vmem:[#allocation2 + $0xf8] sm:$0xf0]  ;;  %v10977_v20 = vor.u32 %v14805_v17, %v10974_v18 }
 0x18f   :  { %v11073_v32 = vor.u32 %v14829_v24, %v11070_v25  ;;  %1367 = vmatpush.bf16.msra.mxu0 %v10949_v28  ;;  %v11110_v24 = vld [vmem:[#allocation2 + $0x148] sm:$0xf0]  ;;  %v14855_v25 = vld [vmem:[#allocation2 + $0x1c4] sm:$0xf] }
 0x190   :  { %v839_v41 = vsub.f32 1.5, %v838_v36  ;;  %v10998_v36 = vld [vmem:[#allocation2 + $0x68] sm:$0xf0] }
 0x191   :  { %v11001_v38 = vor.u32 %v14811_v35, %v10998_v36  ;;  %v10966_v28 = vld [vmem:[#allocation2 + $0x28] sm:$0xf0]  ;;  %v14837_v35 = vld [vmem:[#allocation2 + $0x134] sm:$0xf]  ;;  %v11102_v36 = vld [vmem:[#allocation2 + $0x138] sm:$0xf0] }
 0x192   :  { %v840_v52 = vmul.f32 %v15750_v15, %v839_v41  ;;  %v14832_v41 = vld [vmem:[#allocation2 + $0x104] sm:$0xf0] }
 0x193   :  { %v11077_v44 = vor.u32 %v14832_v41, %v11076_v40  ;;  %v11169_v40 = vor.u32 %v14853_v37, %v11166_v39  ;;  %v14801_v41 = vld [vmem:[#allocation2 + $0x14] sm:$0xf] }
 0x194   :  { %v844_v59 = vsel %vm843_vm4, %v15750_v15, %v840_v52  ;;  %v11021_v15 = vor.u32 %v14818_v8, %v11020_v7  ;;  %v11198_v52 = vld [vmem:[#allocation2 + $0x1f8] sm:$0xf0]  ;;  %v10982_v7 = vld [vmem:[#allocation2 + $0x48] sm:$0xf0]  ;;  %v14823_v8 = vld [vmem:[#allocation2 + $0xc4] sm:$0xf] }
 0x195   :  { %v10941_v43 = vrot.slane %v844_v59, 9  ;;  %1393 = vmatpush.bf16.msra.mxu2 %v11077_v44  ;;  %v11201_v54 = vor.u32 %v14861_v51, %v11198_v52  ;;  %v11049_v12 = vor.u32 %v14823_v8, %v11046_v11  ;;  %v14817_v44 = vld [vmem:[#allocation2 + $0x94] sm:$0xf]  ;;  %v14851_v52 = vld [vmem:[#allocation2 + $0x1a4] sm:$0xf] }
 0x196   :  { %1379 = vmatpush.bf16.msra.mxu1 %v11021_v15  ;;  %v11182_v15 = vld [vmem:[#allocation2 + $0x1d8] sm:$0xf0]  ;;  %v11025_v50 = vor.u32 %v14817_v44, %v11022_v46  ;;  %v14847_v8 = vld [vmem:[#allocation2 + $0x184] sm:$0xf]  ;;  %v11142_v11 = vld [vmem:[#allocation2 + $0x188] sm:$0xf0] }
 0x197   :  { %v849_v10 = vmul.f32 %v10941_v43, %v833_v55  ;;  %v11129_v43 = vor.u32 %v14843_v0, %v11126_v1  ;;  %v11185_v16 = vor.u32 %v14857_v2, %v11182_v15  ;;  %v14833_v0 = vld [vmem:[#allocation2 + $0x114] sm:$0xf]  ;;  %v11086_v1 = vld [vmem:[#allocation2 + $0x118] sm:$0xf0]  ;;  %v1505_v46 = vld [vmem:[%s21780_s13 + $0x248] sm:$0xff] }
 0x198   :  { %v11089_v4 = vor.u32 %v14833_v0, %v11086_v1  ;;  %v1507_v44 = vld [vmem:[%s21780_s13 + $0x258] sm:$0xff]  ;;  %v1497_v0 = vld [vmem:[%s21780_s13 + $0x208] sm:$0xff] }
 0x199   :  { %v850_v14 = vmul.f32 %v849_v10, %v16608_v34  ;;  %v14850_v34 = vld [vmem:[#allocation2 + $0x194] sm:$0xf0]  ;;  %v1521_v1 = vld [vmem:[%s21780_s13 + $0x2c8] sm:$0xff] }
 0x19a   :  { %v11149_v33 = vor.u32 %v14850_v34, %v11148_v27  ;;  %1380 = vmatpush.bf16.msra.mxu1 %v11013_v29  ;;  %v11174_v27 = vld [vmem:[#allocation2 + $0x1c8] sm:$0xf0]  ;;  %v14803_v34 = vld [vmem:[#allocation2 + $0x24] sm:$0xf] }
 0x19b   :  { %v852_v19 = vrot.slane %v850_v14, 7  ;;  %v11121_v14 = vor.u32 %v14841_v13, %v11118_v62  ;;  %v11177_v29 = vor.u32 %v14855_v25, %v11174_v27 }
 0x19c   :  { %1405 = vmatpush.bf16.msra.mxu3 %v11149_v33 }
 0x19d   :  { %v854_v26 = vsub.f32 %v833_v55, %v852_v19  ;;  %v14809_v55 = vld [vmem:[#allocation2 + $0x54] sm:$0xf] }
 0x19e   :  { %v10993_v59 = vor.u32 %v14809_v55, %v10990_v57  ;;  %v14821_v19 = vld [vmem:[#allocation2 + $0xb4] sm:$0xf]  ;;  %v10950_v57 = vld [vmem:[#allocation2 + $0x8] sm:$0xf0] }
 0x19f   :  { %v855_v30 = vsel %vm677_vm1, %v849_v10, %v854_v26  ;;  %v10985_v10 = vor.u32 %v14807_v6, %v10982_v7  ;;  %v11041_v22 = vor.u32 %v14821_v19, %v11038_v21  ;;  %v11113_v26 = vor.u32 %v14839_v23, %v11110_v24  ;;  %v14831_v6 = vld [vmem:[#allocation2 + $0x104] sm:$0xf]  ;;  %v11078_v7 = vld [vmem:[#allocation2 + $0x108] sm:$0xf0] }
 0x1a0   :  { %10942 = vmatmul.msk.f32.vlgmr.msrb.gmra.mxu0 %vm860_vm5, %v855_v30  ;;  %10943 = vmatmul.msk.f32.vlgmr.msrb.gmra.mxu1 %vm860_vm5, %v855_v30 }
 0x1a1   :  { %10944 = vmatmul.msk.f32.vlgmr.msrb.gmra.mxu2 %vm860_vm5, %v855_v30  ;;  %10945 = vmatmul.msk.f32.vlgmr.msrb.gmra.mxu3 %vm860_vm5, %v855_v30  ;;  %v10969_v30 = vor.u32 %v14803_v34, %v10966_v28 }
 0x1a2   :  { %1412 = vmatpush.bf16.msrb.mxu0 %v11009_v31  ;;  %1425 = vmatpush.bf16.msrb.mxu1 %v11073_v32  ;;  %v14819_v31 = vld [vmem:[#allocation2 + $0xa4] sm:$0xf]  ;;  %v11030_v32 = vld [vmem:[#allocation2 + $0xa8] sm:$0xf0] }
 0x1a3   :  { %1406 = vmatpush.bf16.msra.mxu3 %v11141_v48  ;;  %1438 = vmatpush.bf16.msrb.mxu2 %v11137_v53  ;;  %v11033_v33 = vor.u32 %v14819_v31, %v11030_v32  ;;  %v11094_v48 = vld [vmem:[#allocation2 + $0x128] sm:$0xf0] }
 0x1a4   :  { %v11097_v51 = vor.u32 %v14835_v47, %v11094_v48  ;;  %v11158_v53 = vld [vmem:[#allocation2 + $0x1a8] sm:$0xf0]  ;;  %v1504_v47 = vld [vmem:[%s21780_s13 + $0x240] sm:$0xff]  ;;  %v1503_v48 = vld [vmem:[%s21780_s13 + $0x238] sm:$0xff] }
 0x1a5   :  { %v11161_v55 = vor.u32 %v14851_v52, %v11158_v53  ;;  %v1526_v52 = vld [vmem:[%s21780_s13 + $0x2f0] sm:$0xff]  ;;  %v1501_v53 = vld [vmem:[%s21780_s13 + $0x228] sm:$0xff] }
 0x1a6   :  { %1413 = vmatpush.bf16.msrb.mxu0 %v11001_v38  ;;  %1426 = vmatpush.bf16.msrb.mxu1 %v11065_v42  ;;  %v11105_v38 = vor.u32 %v14837_v35, %v11102_v36  ;;  %v10958_v42 = vld [vmem:[#allocation2 + $0x18] sm:$0xf0] }
 0x1a7   :  { %1451 = vmatpush.bf16.msrb.mxu3 %v11201_v54  ;;  %1439 = vmatpush.bf16.msrb.mxu2 %v11129_v43  ;;  %v10961_v45 = vor.u32 %v14801_v41, %v10958_v42  ;;  %v14799_v54 = vld [vmem:[#allocation2 + $0x4] sm:$0xf]  ;;  %v11150_v43 = vld [vmem:[#allocation2 + $0x198] sm:$0xf0] }
 0x1a8   :  { %v10953_v60 = vor.u32 %v14799_v54, %v10950_v57  ;;  %v1509_v41 = vld [vmem:[%s21780_s13 + $0x268] sm:$0xff]  ;;  %v1508_v42 = vld [vmem:[%s21780_s13 + $0x260] sm:$0xff] }
 0x1a9   :  { %v1525_v54 = vld [vmem:[%s21780_s13 + $0x2e8] sm:$0xff]  ;;  %v1524_v57 = vld [vmem:[%s21780_s13 + $0x2e0] sm:$0xff] }
 0x1aa   :  { %1414 = vmatpush.bf16.msrb.mxu0 %v10993_v59  ;;  %1427 = vmatpush.bf16.msrb.mxu1 %v11057_v61  ;;  %v11014_v59 = vld [vmem:[#allocation2 + $0x88] sm:$0xf0] }
 0x1ab   :  { %1452 = vmatpush.bf16.msrb.mxu3 %v11193_v5  ;;  %1440 = vmatpush.bf16.msrb.mxu2 %v11121_v14  ;;  %v11017_v61 = vor.u32 %v14815_v58, %v11014_v59  ;;  %v11153_v5 = vor.u32 %v14849_v3, %v11150_v43  ;;  %v1499_v58 = vld [vmem:[%s21780_s13 + $0x218] sm:$0xff] }
 0x1ac   :  { %v1523_v59 = vld [vmem:[%s21780_s13 + $0x2d8] sm:$0xff] }
 0x1ae   :  { %1415 = vmatpush.bf16.msrb.mxu0 %v10985_v10  ;;  %1428 = vmatpush.bf16.msrb.mxu1 %v11049_v12  ;;  %v11081_v10 = vor.u32 %v14831_v6, %v11078_v7  ;;  %v11145_v12 = vor.u32 %v14847_v8, %v11142_v11  ;;  %v1519_v6 = vld [vmem:[%s21780_s13 + $0x2b8] sm:$0xff]  ;;  %v1518_v7 = vld [vmem:[%s21780_s13 + $0x2b0] sm:$0xff]  ;;  %v1517_v8 = vld [vmem:[%s21780_s13 + $0x2a8] sm:$0xff] }
 0x1af   :  { %1453 = vmatpush.bf16.msrb.mxu3 %v11185_v16  ;;  %1441 = vmatpush.bf16.msrb.mxu2 %v11113_v26 }
 0x1b2   :  { %1416 = vmatpush.bf16.msrb.mxu0 %v10977_v20  ;;  %1429 = vmatpush.bf16.msrb.mxu1 %v11041_v22 }
 0x1b3   :  { %1454 = vmatpush.bf16.msrb.mxu3 %v11177_v29  ;;  %1442 = vmatpush.bf16.msrb.mxu2 %v11105_v38 }
 0x1b6   :  { %1417 = vmatpush.bf16.msrb.mxu0 %v10969_v30  ;;  %1430 = vmatpush.bf16.msrb.mxu1 %v11033_v33 }
 0x1b7   :  { %1455 = vmatpush.bf16.msrb.mxu3 %v11169_v40  ;;  %1443 = vmatpush.bf16.msrb.mxu2 %v11097_v51  ;;  %v1502_v51 = vld [vmem:[%s21780_s13 + $0x230] sm:$0xff] }
 0x1ba   :  { %1418 = vmatpush.bf16.msrb.mxu0 %v10961_v45  ;;  %1431 = vmatpush.bf16.msrb.mxu1 %v11025_v50  ;;  %v1506_v45 = vld [vmem:[%s21780_s13 + $0x250] sm:$0xff]  ;;  %v1527_v50 = vld [vmem:[%s21780_s13 + $0x2f8] sm:$0xff] }
 0x1bb   :  { %1456 = vmatpush.bf16.msrb.mxu3 %v11161_v55  ;;  %1444 = vmatpush.bf16.msrb.mxu2 %v11089_v4  ;;  %v1500_v55 = vld [vmem:[%s21780_s13 + $0x220] sm:$0xff] }
 0x1bc   :  { %v1496_v4 = vld [vmem:[%s21780_s13 + $0x200] sm:$0xff] }
 0x1be   :  { %1419 = vmatpush.bf16.msrb.mxu0 %v10953_v60  ;;  %1432 = vmatpush.bf16.msrb.mxu1 %v11017_v61  ;;  %v1498_v60 = vld [vmem:[%s21780_s13 + $0x210] sm:$0xff] }
 0x1bf   :  { %1457 = vmatpush.bf16.msrb.mxu3 %v11153_v5  ;;  %1445 = vmatpush.bf16.msrb.mxu2 %v11081_v10  ;;  %v1522_v61 = vld [vmem:[%s21780_s13 + $0x2d0] sm:$0xff]  ;;  %v1520_v5 = vld [vmem:[%s21780_s13 + $0x2c0] sm:$0xff] }
 0x1c3   :  { %1458 = vmatpush.bf16.msrb.mxu3 %v11145_v12  ;;  %v1516_v12 = vld [vmem:[%s21780_s13 + $0x2a0] sm:$0xff] }
 0x21d   :  { %v881_v13 = vpop.f32.mrf.mxu0  ;;  %v901_v62 = vpop.f32.mrf.mxu1 }
 0x21e   :  { %v944_v2 = vperm.slane %v881_v13, 0  ;;  %v945_v14 = vperm.slane %v901_v62, 0  ;;  %v952_v16 = vperm.slane %v881_v13, 1  ;;  %v953_v18 = vperm.slane %v901_v62, 1  ;;  %v1515_v13 = vld [vmem:[%s21780_s13 + $0x298] sm:$0xff]  ;;  %v1514_v62 = vld [vmem:[%s21780_s13 + $0x290] sm:$0xff] }
 0x220   :  { %v948_v15 = vmul.f32 %v944_v2, %v16531_v56  ;;  %v949_v17 = vmul.f32 %v945_v14, %v16556_v9  ;;  %v1513_v14 = vld [vmem:[%s21780_s13 + $0x288] sm:$0xff] }
 0x222   :  { %v956_v19 = vadd.f32 %v952_v16, %v948_v15  ;;  %v957_v20 = vadd.f32 %v953_v18, %v949_v17  ;;  %v1512_v18 = vld [vmem:[%s21780_s13 + $0x280] sm:$0xff] }
 0x224   :  { %vm960_vm6 = vcmp.ge.f32.partialorder %v956_v19, 0.0  ;;  %v964_v21 = vmul.f32 0.01, %v956_v19  ;;  %vm961_vm7 = vcmp.ge.f32.partialorder %v957_v20, 0.0  ;;  %v965_v22 = vmul.f32 0.01, %v957_v20  ;;  %v921_v23 = vpop.f32.mrf.mxu2  ;;  %v941_v24 = vpop.f32.mrf.mxu3 }
 0x225   :  { %v946_v25 = vperm.slane %v921_v23, 0  ;;  %v947_v26 = vperm.slane %v941_v24, 0  ;;  %v954_v27 = vperm.slane %v921_v23, 1  ;;  %v955_v34 = vperm.slane %v941_v24, 1 }
 0x226   :  { %v968_v28 = vsel %vm960_vm6, %v956_v19, %v964_v21  ;;  %v969_v29 = vsel %vm961_vm7, %v957_v20, %v965_v22  ;;  %vm1902_vm6 = vcmask 261120  }
 0x227   :  { %v950_v56 = vmul.f32 %v946_v25, %v16592_v49  ;;  %v951_v30 = vmul.f32 %v947_v26, %v16599_v63  ;;  %v972_v9 = vpack.c.bf16 %v968_v28, %v968_v28  ;;  %v973_v31 = vpack.c.bf16 %v969_v29, %v969_v29  ;;  %v1511_v49 = vld [vmem:[%s21780_s13 + $0x278] sm:$0xff]  ;;  %v1510_v63 = vld [vmem:[%s21780_s13 + $0x270] sm:$0xff] }
 0x229   :  { %v958_v32 = vadd.f32 %v954_v27, %v950_v56  ;;  %v959_v33 = vadd.f32 %v955_v34, %v951_v30  ;;  %1368 = vmatmul.bf16.vlgmr.msra.gmra.mxu0 %v972_v9  ;;  %1381 = vmatmul.bf16.vlgmr.msra.gmra.mxu1 %v973_v31 }
 0x22a   :  { %1528 = vmatpush.msra.mxu0 %v1511_v49  ;;  %1548 = vmatpush.msra.mxu1 %v1527_v50 }
 0x22b   :  { %vm962_vm8 = vcmp.ge.f32.partialorder %v958_v32, 0.0  ;;  %v966_v35 = vmul.f32 0.01, %v958_v32  ;;  %vm963_vm9 = vcmp.ge.f32.partialorder %v959_v33, 0.0  ;;  %v967_v36 = vmul.f32 0.01, %v959_v33 }
 0x22c   :  { %1529 = vmatpush.msra.mxu0 %v1510_v63  ;;  %1549 = vmatpush.msra.mxu1 %v1526_v52 }
 0x22d   :  { %v970_v37 = vsel %vm962_vm8, %v958_v32, %v966_v35  ;;  %v971_v38 = vsel %vm963_vm9, %v959_v33, %v967_v36  ;;  %vm2011_vm8 = vcmask 254976  }
 0x22e   :  { %v974_v39 = vpack.c.bf16 %v970_v37, %v970_v37  ;;  %v975_v40 = vpack.c.bf16 %v971_v38, %v971_v38  ;;  %1530 = vmatpush.msra.mxu0 %v1509_v41  ;;  %1550 = vmatpush.msra.mxu1 %v1525_v54 }
 0x230   :  { %1394 = vmatmul.bf16.vlgmr.msra.gmra.mxu2 %v974_v39  ;;  %1407 = vmatmul.bf16.vlgmr.msra.gmra.mxu3 %v975_v40 }
 0x231   :  { %1531 = vmatpush.msra.mxu0 %v1508_v42  ;;  %1551 = vmatpush.msra.mxu1 %v1524_v57 }
 0x233   :  { %1532 = vmatpush.msra.mxu0 %v1507_v44  ;;  %1552 = vmatpush.msra.mxu1 %v1523_v59 }
 0x235   :  { %1533 = vmatpush.msra.mxu0 %v1506_v45  ;;  %1553 = vmatpush.msra.mxu1 %v1522_v61 }
 0x237   :  { %1534 = vmatpush.msra.mxu0 %v1505_v46  ;;  %1554 = vmatpush.msra.mxu1 %v1521_v1 }
 0x239   :  { %1420 = vmatmul.bf16.vlgmr.msrb.gmra.mxu0 %v972_v9  ;;  %1433 = vmatmul.bf16.vlgmr.msrb.gmra.mxu1 %v973_v31 }
 0x23a   :  { %1535 = vmatpush.msra.mxu0 %v1504_v47  ;;  %1555 = vmatpush.msra.mxu1 %v1520_v5 }
 0x23c   :  { %1536 = vmatpush.msra.mxu0 %v1503_v48  ;;  %1556 = vmatpush.msra.mxu1 %v1519_v6 }
 0x23e   :  { %1537 = vmatpush.msra.mxu0 %v1502_v51  ;;  %1557 = vmatpush.msra.mxu1 %v1518_v7 }
 0x240   :  { %1446 = vmatmul.bf16.vlgmr.msrb.gmra.mxu2 %v974_v39  ;;  %1459 = vmatmul.bf16.vlgmr.msrb.gmra.mxu3 %v975_v40 }
 0x241   :  { %1538 = vmatpush.msra.mxu0 %v1501_v53  ;;  %1558 = vmatpush.msra.mxu1 %v1517_v8  ;;  %v1600_v8 = vld [vmem:[#allocation7 + $0x100] sm:$0xff] }
 0x242   :  { %1620 = vmatpush.msra.mxu2 %v1600_v8  ;;  %v1836_v8 = vld [vmem:[%s21780_s13 + $0x320] sm:$0xff] }
 0x243   :  { %1539 = vmatpush.msra.mxu0 %v1500_v55  ;;  %1559 = vmatpush.msra.mxu1 %v1516_v12  ;;  %v1598_v12 = vld [vmem:[#allocation7 + $0x80] sm:$0xff] }
 0x244   :  { %1621 = vmatpush.msra.mxu2 %v1598_v12  ;;  %v1833_v12 = vld [vmem:[%s21780_s13 + $0x308] sm:$0xff] }
 0x245   :  { %1540 = vmatpush.msra.mxu0 %v1499_v58  ;;  %1560 = vmatpush.msra.mxu1 %v1515_v13  ;;  %v1599_v13 = vld [vmem:[#allocation7 + $0x88] sm:$0xff] }
 0x247   :  { %1541 = vmatpush.msra.mxu0 %v1498_v60  ;;  %1561 = vmatpush.msra.mxu1 %v1514_v62 }
 0x249   :  { %1542 = vmatpush.msra.mxu0 %v1497_v0  ;;  %1562 = vmatpush.msra.mxu1 %v1513_v14  ;;  %v14878_v14 = vld [vmem:[%s21771_s4 + $0x78] sm:$0xff] }
 0x24b   :  { %1543 = vmatpush.msra.mxu0 %v1496_v4  ;;  %1563 = vmatpush.msra.mxu1 %v1512_v18  ;;  %v14868_v18 = vld [vmem:[%s21771_s4 + $0x28] sm:$0xff] }
 0x2a6   :  { %v1369_v3 = vpop.f32.mrf.mxu0  ;;  %v1382_v43 = vpop.f32.mrf.mxu1 }
 0x2a7   :  { %v1383_v2 = vadd.f32 %v1382_v43, %v1369_v3 }
 0x2ae   :  { %v1371_v10 = vpop.f32.mrf.mxu0  ;;  %v1384_v11 = vpop.f32.mrf.mxu1 }
 0x2af   :  { %v1601_v10 = vld [vmem:[#allocation7 + $0x108] sm:$0xff] }
 0x2b0   :  { %1640 = vmatpush.msra.mxu3 %v1601_v10  ;;  %v1835_v10 = vld [vmem:[%s21780_s13 + $0x318] sm:$0xff] }
 0x2b2   :  { %1641 = vmatpush.msra.mxu3 %v1599_v13  ;;  %v1832_v13 = vld [vmem:[%s21780_s13 + $0x300] sm:$0xff] }
 0x2b3   :  { %v1395_v15 = vpop.f32.mrf.mxu2  ;;  %v1408_v16 = vpop.f32.mrf.mxu3 }
 0x2b4   :  { %v1396_v17 = vadd.f32 %v1395_v15, %v1383_v2  ;;  %v14870_v2 = vld [vmem:[%s21771_s4 + $0x38] sm:$0xff]  ;;  %1803 = vmatpush.bf16.msrb.mxu3 %v14878_v14 }
 0x2b5   :  { %1790 = vmatpush.bf16.msrb.mxu2 %v14870_v2 }
 0x2b6   :  { %v16728_v19 = vadd.f32 %v1408_v16, %v1396_v17  ;;  %v1421_v20 = vpop.f32.mrf.mxu0  ;;  %v1434_v21 = vpop.f32.mrf.mxu1  ;;  %v14869_v16 = vld [vmem:[%s21771_s4 + $0x30] sm:$0xff] }
 0x2b7   :  { %v1435_v36 = vadd.f32 %v1434_v21, %v1421_v20  ;;  %v14877_v17 = vld [vmem:[%s21771_s4 + $0x70] sm:$0xff]  ;;  %v14876_v20 = vld [vmem:[%s21771_s4 + $0x68] sm:$0xff] }
 0x2b8   :  { %v1464_v22 = vsel %vm616_vm0, %v16728_v19, 0.0  ;;  %v1478_v23 = vmul.f32 %v16728_v19, %v16728_v19  ;;  %1804 = vmatpush.bf16.msrb.mxu3 %v14877_v17 }
 0x2b9   :  { %v1465_v24 = vrot.slane %v1464_v22, 4  ;;  %1791 = vmatpush.bf16.msrb.mxu2 %v14869_v16 }
 0x2ba   :  { %v1480_v25 = vsel %vm616_vm0, %v1478_v23, 0.0  ;;  %v14867_v23 = vld [vmem:[%s21771_s4 + $0x20] sm:$0xff] }
 0x2bb   :  { %v1466_v26 = vadd.f32 %v1465_v24, %v1464_v22  ;;  %v1481_v27 = vrot.slane %v1480_v25, 4  ;;  %v1397_v34 = vpop.f32.mrf.mxu2  ;;  %v1410_v28 = vpop.f32.mrf.mxu3  ;;  %v14875_v24 = vld [vmem:[%s21771_s4 + $0x60] sm:$0xff] }
 0x2bc   :  { %1805 = vmatpush.bf16.msrb.mxu3 %v14876_v20  ;;  %v14874_v34 = vld [vmem:[%s21771_s4 + $0x58] sm:$0xff] }
 0x2bd   :  { %v1467_v29 = vrot.slane %v1466_v26, 2  ;;  %v1482_v56 = vadd.f32 %v1481_v27, %v1480_v25  ;;  %1792 = vmatpush.bf16.msrb.mxu2 %v14868_v18  ;;  %v14866_v27 = vld [vmem:[%s21771_s4 + $0x18] sm:$0xff] }
 0x2be   :  { %v1423_v30 = vpop.f32.mrf.mxu0  ;;  %v1436_v9 = vpop.f32.mrf.mxu1 }
 0x2bf   :  { %v1468_v31 = vadd.f32 %v1467_v29, %v1466_v26  ;;  %v1483_v32 = vrot.slane %v1482_v56, 2 }
 0x2c0   :  { %1806 = vmatpush.bf16.msrb.mxu3 %v14875_v24 }
 0x2c1   :  { %v1469_v33 = vrot.slane %v1468_v31, 1  ;;  %v1484_v35 = vadd.f32 %v1483_v32, %v1482_v56  ;;  %1793 = vmatpush.bf16.msrb.mxu2 %v14867_v23  ;;  %v1575_v56 = vld [vmem:[%s21779_s12 + $0x2] sm:$0x3] }
 0x2c3   :  { %v1447_v37 = vpop.f32.mrf.mxu2  ;;  %v1460_v38 = vpop.f32.mrf.mxu3  ;;  %v1485_v39 = vrot.slane %v1484_v35, 1  ;;  %v1470_v49 = vadd.f32 %v1469_v33, %v1468_v31 }
 0x2c4   :  { %v1448_v40 = vadd.f32 %v1447_v37, %v1435_v36  ;;  %1807 = vmatpush.bf16.msrb.mxu3 %v14874_v34  ;;  %v14865_v37 = vld [vmem:[%s21771_s4 + $0x10] sm:$0xff] }
 0x2c5   :  { %v1486_v63 = vadd.f32 %v1485_v39, %v1484_v35  ;;  %1794 = vmatpush.bf16.msrb.mxu2 %v14866_v27  ;;  %v14864_v39 = vld [vmem:[%s21771_s4 + $0x8] sm:$0xff] }
 0x2c6   :  { %v16735_v41 = vadd.f32 %v1460_v38, %v1448_v40  ;;  %v14873_v38 = vld [vmem:[%s21771_s4 + $0x50] sm:$0xff]  ;;  %v14872_v40 = vld [vmem:[%s21771_s4 + $0x48] sm:$0xff] }
 0x2c7   :  { %v1494_v42 = vsel %vm677_vm1, %v1470_v49, %v1486_v63  ;;  %v14863_v49 = vld [vmem:[%s21771_s4] sm:$0xff] }
 0x2c8   :  { %v1471_v44 = vsel %vm616_vm0, %v16735_v41, 0.0  ;;  %v1479_v45 = vmul.f32 %v16735_v41, %v16735_v41  ;;  %1544 = vmatmul.f32.vlgmr.msra.gmra.mxu0 %v1494_v42  ;;  %1808 = vmatpush.bf16.msrb.mxu3 %v14873_v38  ;;  %v14871_v63 = vld [vmem:[%s21771_s4 + $0x40] sm:$0xff]  ;;  %v1847_v42 = vld [vmem:[%s21780_s13 + $0x378] sm:$0xff]  ;;  %v1899_v38 = vld [vmem:[#allocation7 + $0x200] sm:$0xff] }
 0x2c9   :  { %v1472_v46 = vrot.slane %v1471_v44, 4  ;;  %1795 = vmatpush.bf16.msrb.mxu2 %v14865_v37  ;;  %1848 = vmatpush.msrb.mxu0 %v1847_v42 }
 0x2ca   :  { %v1487_v47 = vsel %vm616_vm0, %v1479_v45, 0.0  ;;  %v1845_v45 = vld [vmem:[%s21780_s13 + $0x368] sm:$0xff] }
 0x2cb   :  { %v1473_v48 = vadd.f32 %v1472_v46, %v1471_v44  ;;  %v1488_v50 = vrot.slane %v1487_v47, 4  ;;  %v1449_v51 = vpop.f32.mrf.mxu2  ;;  %v1462_v52 = vpop.f32.mrf.mxu3  ;;  %v1846_v44 = vld [vmem:[%s21780_s13 + $0x370] sm:$0xff]  ;;  %v1844_v46 = vld [vmem:[%s21780_s13 + $0x360] sm:$0xff] }
 0x2cc   :  { %1809 = vmatpush.bf16.msrb.mxu3 %v14872_v40  ;;  %1849 = vmatpush.msrb.mxu0 %v1846_v44  ;;  %v1898_v40 = vld [vmem:[#allocation7 + $0x180] sm:$0xff]  ;;  %v14885_v44 = vld [vmem:[%s21772_s5 + $0x30] sm:$0xff] }
 0x2cd   :  { %v1474_v53 = vrot.slane %v1473_v48, 2  ;;  %v1489_v54 = vadd.f32 %v1488_v50, %v1487_v47  ;;  %1796 = vmatpush.bf16.msrb.mxu2 %v14864_v39  ;;  %v1843_v47 = vld [vmem:[%s21780_s13 + $0x358] sm:$0xff] }
 0x2ce   :  { %1850 = vmatpush.msrb.mxu0 %v1845_v45  ;;  %v14884_v45 = vld [vmem:[%s21772_s5 + $0x28] sm:$0xff] }
 0x2cf   :  { %v1475_v55 = vadd.f32 %v1474_v53, %v1473_v48  ;;  %v1490_v57 = vrot.slane %v1489_v54, 2  ;;  %v1842_v48 = vld [vmem:[%s21780_s13 + $0x350] sm:$0xff] }
 0x2d0   :  { %1810 = vmatpush.bf16.msrb.mxu3 %v14871_v63  ;;  %1851 = vmatpush.msrb.mxu0 %v1844_v46  ;;  %v14886_v63 = vld [vmem:[%s21772_s5 + $0x38] sm:$0xff] }
 0x2d1   :  { %v1476_v58 = vrot.slane %v1475_v55, 1  ;;  %v1491_v59 = vadd.f32 %v1490_v57, %v1489_v54  ;;  %1797 = vmatpush.bf16.msrb.mxu2 %v14863_v49 }
 0x2d2   :  { %1852 = vmatpush.msrb.mxu0 %v1843_v47 }
 0x2d3   :  { %v1492_v60 = vrot.slane %v1491_v59, 1  ;;  %v1477_v61 = vadd.f32 %v1476_v58, %v1475_v55 }
 0x2d4   :  { %1853 = vmatpush.msrb.mxu0 %v1842_v48  ;;  %v14883_v48 = vld [vmem:[%s21772_s5 + $0x20] sm:$0xff] }
 0x2d5   :  { %v1493_v0 = vadd.f32 %v1492_v60, %v1491_v59 }
 0x2d7   :  { %v1495_v1 = vsel %vm677_vm1, %v1477_v61, %v1493_v0 }
 0x2d8   :  { %1564 = vmatmul.f32.vlgmr.msra.gmra.mxu1 %v1495_v1 }
 0x345   :  { %v1545_v3 = vpop.f32.mrf.mxu0 }
 0x355   :  { %v1565_v43 = vpop.f32.mrf.mxu1 }
 0x356   :  { %v1566_v4 = vadd.f32 %v1565_v43, %v1545_v3 }
 0x358   :  { %v1568_v5 = vmul.f32 0.03125, %v1566_v4 }
 0x35a   :  { %v1569_v6 = vmul.f32 %v1568_v5, %v1568_v5 }
 0x35c   :  { %v1571_v7 = vrot.slane %v1569_v6, 7  ;;  %v1838_v6 = vld [vmem:[%s21780_s13 + $0x330] sm:$0xff] }
 0x35e   :  { %v1573_v11 = vsub.f32 %v1568_v5, %v1571_v7  ;;  %v1837_v7 = vld [vmem:[%s21780_s13 + $0x328] sm:$0xff] }
 0x360   :  { %v1574_v62 = vmax.f32 %v1573_v11, 0.0  ;;  %v1834_v11 = vld [vmem:[%s21780_s13 + $0x310] sm:$0xff] }
 0x362   :  { %v1576_v15 = vadd.f32 1e-05, %v1574_v62 }
 0x364   :  { %15751 = vrsqrt.f32 %v1576_v15  ;;  %vm1583_vm11 = vweird.f32 %v1576_v15 }
 0x36a   :  { %v15752_v21 = vpop.eup %15751 }
 0x36b   :  { %v1578_v22 = vmul.f32 %v15752_v21, %v1576_v15  ;;  %vm1584_vm10 = vweird.f32 %v15752_v21 }
 0x36c   :  { %vm1585_vm12 = vmor %vm1583_vm11, %vm1584_vm10 }
 0x36d   :  { %v1579_v25 = vmul.f32 %v15752_v21, %v1578_v22 }
 0x36f   :  { %v1580_v26 = vmul.f32 0.5, %v1579_v25 }
 0x371   :  { %v1581_v28 = vsub.f32 1.5, %v1580_v26 }
 0x373   :  { %v1582_v29 = vmul.f32 %v15752_v21, %v1581_v28 }
 0x375   :  { %v1586_v30 = vsel %vm1585_vm12, %v15752_v21, %v1582_v29 }
 0x376   :  { %v11202_v9 = vrot.slane %v1586_v30, 9 }
 0x378   :  { %v1591_v31 = vmul.f32 %v11202_v9, %v1575_v56 }
 0x37a   :  { %v1592_v32 = vmul.f32 %v1591_v31, %v1568_v5  ;;  %v1839_v5 = vld [vmem:[%s21780_s13 + $0x338] sm:$0xff] }
 0x37c   :  { %v1594_v33 = vrot.slane %v1592_v32, 7 }
 0x37e   :  { %v1596_v35 = vsub.f32 %v1575_v56, %v1594_v33  ;;  %v1901_v33 = vld [vmem:[#allocation7 + $0x300] sm:$0xff] }
 0x37f   :  { %1918 = vmatpush.msrb.mxu1 %v1901_v33 }
 0x380   :  { %v1597_v36 = vsel %vm677_vm1, %v1591_v31, %v1596_v35 }
 0x381   :  { %11203 = vmatmul.msk.f32.vlgmr.msra.gmra.mxu2 %vm1602_vm13, %v1597_v36  ;;  %11204 = vmatmul.msk.f32.vlgmr.msra.gmra.mxu3 %vm1602_vm13, %v1597_v36  ;;  %v1900_v36 = vld [vmem:[#allocation7 + $0x280] sm:$0xff] }
 0x382   :  { %1919 = vmatpush.msrb.mxu1 %v1900_v36 }
 0x384   :  { %1920 = vmatpush.msrb.mxu1 %v1899_v38 }
 0x386   :  { %1921 = vmatpush.msrb.mxu1 %v1898_v40 }
 0x388   :  { %1998 = vmatpush.bf16.msra.mxu1 %v14886_v63 }
 0x38c   :  { %1999 = vmatpush.bf16.msra.mxu1 %v14885_v44 }
 0x390   :  { %2000 = vmatpush.bf16.msra.mxu1 %v14884_v45 }
 0x394   :  { %2001 = vmatpush.bf16.msra.mxu1 %v14883_v48  ;;  %v2062_v48 = vld [vmem:[%s21779_s12 + $0x6] sm:$0x3] }
 0x404   :  { %v1623_v50 = vpop.f32.mrf.mxu2  ;;  %v1643_v51 = vpop.f32.mrf.mxu3 }
 0x405   :  { %v1646_v52 = vperm.slane %v1623_v50, 0  ;;  %v1647_v53 = vperm.slane %v1643_v51, 0  ;;  %v1650_v55 = vperm.slane %v1623_v50, 1  ;;  %v1651_v58 = vperm.slane %v1643_v51, 1 }
 0x407   :  { %v1648_v54 = vmul.f32 %v1646_v52, %v16728_v19  ;;  %v1649_v57 = vmul.f32 %v1647_v53, %v16735_v41  ;;  %v1841_v19 = vld [vmem:[%s21780_s13 + $0x348] sm:$0xff]  ;;  %v1840_v41 = vld [vmem:[%s21780_s13 + $0x340] sm:$0xff]  ;;  %v14882_v52 = vld [vmem:[%s21772_s5 + $0x18] sm:$0xff] }
 0x408   :  { %1854 = vmatpush.msrb.mxu0 %v1841_v19  ;;  %2002 = vmatpush.bf16.msra.mxu1 %v14882_v52 }
 0x409   :  { %v1652_v59 = vadd.f32 %v1650_v55, %v1648_v54  ;;  %v1653_v60 = vadd.f32 %v1651_v58, %v1649_v57  ;;  %v1875_v55 = vld [vmem:[%s21779_s12 + $0x4] sm:$0x3] }
 0x40a   :  { %1855 = vmatpush.msrb.mxu0 %v1840_v41 }
 0x40b   :  { %v1656_v61 = vmul.f32 0.01, %v1652_v59  ;;  %v1657_v0 = vmul.f32 0.01, %v1653_v60  ;;  %vm1654_vm14 = vcmp.ge.f32.partialorder %v1652_v59, 0.0  ;;  %vm1655_vm15 = vcmp.ge.f32.partialorder %v1653_v60, 0.0 }
 0x40c   :  { %1856 = vmatpush.msrb.mxu0 %v1839_v5 }
 0x40d   :  { %v1658_v1 = vsel %vm1654_vm14, %v1652_v59, %v1656_v61  ;;  %v1659_v3 = vsel %vm1655_vm15, %v1653_v60, %v1657_v0  ;;  %vm2156_vm14 = vcmask 123904   ;;  %vm2177_vm15 = vcmask 1043456  }
 0x40e   :  { %v1660_v43 = vpack.c.bf16 %v1658_v1, %v1658_v1  ;;  %v1661_v4 = vpack.c.bf16 %v1659_v3, %v1659_v3  ;;  %1857 = vmatpush.msrb.mxu0 %v1838_v6  ;;  %v14881_v3 = vld [vmem:[%s21772_s5 + $0x10] sm:$0xff] }
 0x40f   :  { %2003 = vmatpush.bf16.msra.mxu1 %v14881_v3 }
 0x410   :  { %1798 = vmatmul.bf16.vlgmr.msrb.gmra.mxu2 %v1660_v43  ;;  %1811 = vmatmul.bf16.vlgmr.msrb.gmra.mxu3 %v1661_v4  ;;  %v14880_v43 = vld [vmem:[%s21772_s5 + $0x8] sm:$0xff]  ;;  %v14879_v4 = vld [vmem:[%s21772_s5] sm:$0xff] }
 0x411   :  { %1858 = vmatpush.msrb.mxu0 %v1837_v7 }
 0x413   :  { %1859 = vmatpush.msrb.mxu0 %v1836_v8  ;;  %2004 = vmatpush.bf16.msra.mxu1 %v14880_v43 }
 0x415   :  { %1860 = vmatpush.msrb.mxu0 %v1835_v10 }
 0x417   :  { %1861 = vmatpush.msrb.mxu0 %v1834_v11  ;;  %2005 = vmatpush.bf16.msra.mxu1 %v14879_v4 }
 0x419   :  { %1862 = vmatpush.msrb.mxu0 %v1833_v12  ;;  %v2031_v12 = vld [vmem:[%s21780_s13 + $0x398] sm:$0xff] }
 0x41a   :  { %2047 = vmatpush.msra.mxu2 %v2031_v12  ;;  %v2169_v12 = vld [vmem:[%s21773_s6] sm:$0xf] }
 0x41b   :  { %1863 = vmatpush.msrb.mxu0 %v1832_v13  ;;  %v2030_v13 = vld [vmem:[%s21780_s13 + $0x390] sm:$0xff] }
 0x41c   :  { %2048 = vmatpush.msra.mxu2 %v2030_v13  ;;  %v2179_v13 = vsel %vm2177_vm15, %v2169_v12, 0 }
 0x493   :  { %v1799_v62 = vpop.f32.mrf.mxu2  ;;  %v1812_v2 = vpop.f32.mrf.mxu3 }
 0x494   :  { %v16848_v14 = vadd.f32 %v1812_v2, %v1799_v62  ;;  %v2029_v62 = vld [vmem:[%s21780_s13 + $0x388] sm:$0xff]  ;;  %v2028_v2 = vld [vmem:[%s21780_s13 + $0x380] sm:$0xff] }
 0x495   :  { %2049 = vmatpush.msra.mxu2 %v2029_v62  ;;  %v2225_v62 = vld [vmem:[%s21780_s13 + $0x418] sm:$0xff] }
 0x496   :  { %v1816_v15 = vsel %vm616_vm0, %v16848_v14, 0.0  ;;  %v1823_v16 = vmul.f32 %v16848_v14, %v16848_v14 }
 0x497   :  { %v1817_v17 = vrot.slane %v1816_v15, 4  ;;  %2050 = vmatpush.msra.mxu2 %v2028_v2  ;;  %v2224_v2 = vld [vmem:[%s21780_s13 + $0x410] sm:$0xff] }
 0x498   :  { %v1824_v18 = vsel %vm616_vm0, %v1823_v16, 0.0 }
 0x499   :  { %v1818_v20 = vadd.f32 %v1817_v17, %v1816_v15  ;;  %v1825_v21 = vrot.slane %v1824_v18, 4  ;;  %2188 = vmatpush.bf16.msrb.mxu2 %v2179_v13 }
 0x49b   :  { %v1819_v22 = vrot.slane %v1818_v20, 2  ;;  %v1826_v23 = vadd.f32 %v1825_v21, %v1824_v18  ;;  %v1801_v24 = vpop.f32.mrf.mxu2  ;;  %v1814_v25 = vpop.f32.mrf.mxu3 }
 0x49d   :  { %v1820_v26 = vadd.f32 %v1819_v22, %v1818_v20  ;;  %v1827_v27 = vrot.slane %v1826_v23, 2 }
 0x49f   :  { %v1821_v34 = vrot.slane %v1820_v26, 1  ;;  %v1828_v28 = vadd.f32 %v1827_v27, %v1826_v23 }
 0x4a1   :  { %v1829_v29 = vrot.slane %v1828_v28, 1  ;;  %v1822_v56 = vadd.f32 %v1821_v34, %v1820_v26 }
 0x4a3   :  { %v1830_v30 = vadd.f32 %v1829_v29, %v1828_v28 }
 0x4a5   :  { %v1831_v9 = vsel %vm677_vm1, %v1822_v56, %v1830_v30 }
 0x4a6   :  { %1864 = vmatmul.f32.vlgmr.msrb.gmra.mxu0 %v1831_v9 }
 0x523   :  { %v1865_v31 = vpop.f32.mrf.mxu0 }
 0x524   :  { %v1868_v32 = vmul.f32 0.125, %v1865_v31 }
 0x526   :  { %v1869_v35 = vmul.f32 %v1868_v32, %v1868_v32 }
 0x528   :  { %v1871_v37 = vrot.slane %v1869_v35, 7  ;;  %v2087_v35 = vld [vmem:[#allocation7 + $0x480] sm:$0xff] }
 0x52a   :  { %v1873_v39 = vsub.f32 %v1868_v32, %v1871_v37  ;;  %v2086_v37 = vld [vmem:[#allocation7 + $0x400] sm:$0xff] }
 0x52c   :  { %v1874_v49 = vmax.f32 %v1873_v39, 0.0  ;;  %v2085_v39 = vld [vmem:[#allocation7 + $0x380] sm:$0xff] }
 0x52e   :  { %v1876_v42 = vadd.f32 1e-05, %v1874_v49 }
 0x530   :  { %15753 = vrsqrt.f32 %v1876_v42  ;;  %vm1883_vm3 = vweird.f32 %v1876_v42 }
 0x536   :  { %v15754_v46 = vpop.eup %15753 }
 0x537   :  { %v1878_v47 = vmul.f32 %v15754_v46, %v1876_v42  ;;  %vm1884_vm2 = vweird.f32 %v15754_v46 }
 0x538   :  { %vm1885_vm4 = vmor %vm1883_vm3, %vm1884_vm2 }
 0x539   :  { %v1879_v50 = vmul.f32 %v15754_v46, %v1878_v47 }
 0x53b   :  { %v1880_v51 = vmul.f32 0.5, %v1879_v50 }
 0x53d   :  { %v1881_v53 = vsub.f32 1.5, %v1880_v51 }
 0x53f   :  { %v1882_v54 = vmul.f32 %v15754_v46, %v1881_v53 }
 0x541   :  { %v1886_v57 = vsel %vm1885_vm4, %v15754_v46, %v1882_v54 }
 0x542   :  { %v11269_v58 = vrot.slane %v1886_v57, 9 }
 0x544   :  { %v1891_v59 = vmul.f32 %v11269_v58, %v1875_v55  ;;  %v14888_v58 = vld [vmem:[%s21778_s11 + $0x8] sm:$0xff] }
 0x545   :  { %2149 = vmatpush.bf16.msra.mxu0 %v14888_v58  ;;  %v2278_v58 = vld [vmem:[#allocation7 + $0x680] sm:$0xff] }
 0x546   :  { %v1892_v60 = vmul.f32 %v1891_v59, %v1868_v32  ;;  %v2088_v32 = vld [vmem:[#allocation7 + $0x500] sm:$0xff] }
 0x547   :  { %2104 = vmatpush.msra.mxu3 %v2088_v32 }
 0x548   :  { %v1894_v61 = vrot.slane %v1892_v60, 7 }
 0x549   :  { %2105 = vmatpush.msra.mxu3 %v2087_v35 }
 0x54a   :  { %v1896_v0 = vsub.f32 %v1875_v55, %v1894_v61 }
 0x54b   :  { %2106 = vmatpush.msra.mxu3 %v2086_v37 }
 0x54c   :  { %v1897_v1 = vsel %vm677_vm1, %v1891_v59, %v1896_v0  ;;  %v14887_v59 = vld [vmem:[%s21778_s11] sm:$0xff] }
 0x54d   :  { %11270 = vmatmul.msk.f32.vlgmr.msrb.gmra.mxu1 %vm1902_vm6, %v1897_v1  ;;  %2107 = vmatpush.msra.mxu3 %v2085_v39 }
 0x54e   :  { %2150 = vmatpush.bf16.msra.mxu0 %v14887_v59 }
 0x54f   :  { %2226 = vmatpush.msrb.mxu3 %v2225_v62  ;;  %v11360_v62 = vld [vmem:[%s21774_s7 + $0x50] sm:$0xf] }
 0x551   :  { %2227 = vmatpush.msrb.mxu3 %v2224_v2  ;;  %v14900_v2 = vld [vmem:[%s21774_s7 + $0x54] sm:$0xf0] }
 0x5ca   :  { %v1923_v19 = vpop.f32.mrf.mxu1 }
 0x5cb   :  { %v1926_v41 = vperm.slane %v1923_v19, 0  ;;  %v1928_v6 = vperm.slane %v1923_v19, 1 }
 0x5cd   :  { %v1927_v5 = vmul.f32 %v1926_v41, %v16848_v14  ;;  %v15747_v41 = vld [vmem:[%s21782_s15] ss:$0 sm:$0xff] }
 0x5cf   :  { %v1929_v7 = vadd.f32 %v1928_v6, %v1927_v5 }
 0x5d1   :  { %vm1930_vm7 = vcmp.ge.f32.partialorder %v1929_v7, 0.0  ;;  %v1931_v8 = vmul.f32 0.01, %v1929_v7 }
 0x5d3   :  { %v1932_v10 = vsel %vm1930_vm7, %v1929_v7, %v1931_v8 }
 0x5d4   :  { %v1933_v11 = vpack.c.bf16 %v1932_v10, %v1932_v10 }
 0x5d6   :  { %2006 = vmatmul.bf16.vlgmr.msra.gmra.mxu1 %v1933_v11 }
 0x653   :  { %v2007_v14 = vpop.f32.mrf.mxu1 }
 0x654   :  { %v2012_v15 = vsel %vm2011_vm8, %v2007_v14, 0.0  ;;  %v2019_v16 = vmul.f32 %v2007_v14, %v2007_v14 }
 0x655   :  { %v2013_v17 = vrot.slane %v2012_v15, 4 }
 0x656   :  { %v2020_v18 = vsel %vm2011_vm8, %v2019_v16, 0.0  ;;  %v2221_v16 = vld [vmem:[%s21780_s13 + $0x3f8] sm:$0xff] }
 0x657   :  { %v2014_v20 = vadd.f32 %v2013_v17, %v2012_v15  ;;  %v2021_v21 = vrot.slane %v2020_v18, 4  ;;  %v2222_v15 = vld [vmem:[%s21780_s13 + $0x400] sm:$0xff]  ;;  %v2220_v17 = vld [vmem:[%s21780_s13 + $0x3f0] sm:$0xff] }
 0x659   :  { %v2015_v22 = vrot.slane %v2014_v20, 2  ;;  %v2022_v23 = vadd.f32 %v2021_v21, %v2020_v18  ;;  %v2158_v18 = vld [vmem:[%s21788_s2] sm:$0x3] }
 0x65b   :  { %v2016_v24 = vadd.f32 %v2015_v22, %v2014_v20  ;;  %v2023_v25 = vrot.slane %v2022_v23, 2  ;;  %v2009_v26 = vpop.f32.mrf.mxu1 }
 0x65c   :  { %v2217_v26 = vld [vmem:[%s21780_s13 + $0x3d8] sm:$0xff] }
 0x65d   :  { %v2017_v27 = vrot.slane %v2016_v24, 1  ;;  %v2024_v34 = vadd.f32 %v2023_v25, %v2022_v23  ;;  %v2218_v25 = vld [vmem:[%s21780_s13 + $0x3e0] sm:$0xff] }
 0x65f   :  { %v2025_v28 = vrot.slane %v2024_v34, 1  ;;  %v2018_v29 = vadd.f32 %v2017_v27, %v2016_v24  ;;  %v2219_v24 = vld [vmem:[%s21780_s13 + $0x3e8] sm:$0xff]  ;;  %v2216_v27 = vld [vmem:[%s21780_s13 + $0x3d0] sm:$0xff] }
 0x661   :  { %v2026_v56 = vadd.f32 %v2025_v28, %v2024_v34  ;;  %v2215_v34 = vld [vmem:[%s21780_s13 + $0x3c8] sm:$0xff]  ;;  %v2214_v28 = vld [vmem:[%s21780_s13 + $0x3c0] sm:$0xff] }
 0x663   :  { %v2027_v30 = vsel %vm677_vm1, %v2018_v29, %v2026_v56  ;;  %v2213_v29 = vld [vmem:[%s21780_s13 + $0x3b8] sm:$0xff]  ;;  %v2212_v56 = vld [vmem:[%s21780_s13 + $0x3b0] sm:$0xff] }
 0x664   :  { %11303 = vmatmul.msk.f32.vlgmr.msra.gmra.mxu2 %vm1902_vm6, %v2027_v30  ;;  %v2211_v30 = vld [vmem:[%s21780_s13 + $0x3a8] sm:$0xff] }
 0x6e7   :  { %v2052_v9 = vpop.f32.mrf.mxu2 }
 0x6e8   :  { %v2055_v31 = vmul.f32 0.5, %v2052_v9  ;;  %v2210_v9 = vld [vmem:[%s21780_s13 + $0x3a0] sm:$0xff] }
 0x6ea   :  { %v2056_v33 = vmul.f32 %v2055_v31, %v2055_v31 }
 0x6ec   :  { %v2058_v36 = vrot.slane %v2056_v33, 7 }
 0x6ee   :  { %v2060_v38 = vsub.f32 %v2055_v31, %v2058_v36 }
 0x6f0   :  { %v2061_v40 = vmax.f32 %v2060_v38, 0.0 }
 0x6f2   :  { %v2063_v49 = vadd.f32 1e-05, %v2061_v40 }
 0x6f4   :  { %15755 = vrsqrt.f32 %v2063_v49  ;;  %vm2070_vm10 = vweird.f32 %v2063_v49 }
 0x6fa   :  { %v15756_v63 = vpop.eup %15755 }
 0x6fb   :  { %v2065_v42 = vmul.f32 %v15756_v63, %v2063_v49  ;;  %vm2071_vm9 = vweird.f32 %v15756_v63 }
 0x6fc   :  { %vm2072_vm11 = vmor %vm2070_vm10, %vm2071_vm9 }
 0x6fd   :  { %v2066_v44 = vmul.f32 %v15756_v63, %v2065_v42 }
 0x6ff   :  { %v2067_v45 = vmul.f32 0.5, %v2066_v44 }
 0x701   :  { %v2068_v46 = vsub.f32 1.5, %v2067_v45 }
 0x703   :  { %v2069_v47 = vmul.f32 %v15756_v63, %v2068_v46 }
 0x705   :  { %v2073_v50 = vsel %vm2072_vm11, %v15756_v63, %v2069_v47 }
 0x706   :  { %v11304_v51 = vrot.slane %v2073_v50, 9 }
 0x708   :  { %v2078_v52 = vmul.f32 %v11304_v51, %v2062_v48 }
 0x70a   :  { %v2079_v53 = vmul.f32 %v2078_v52, %v2055_v31  ;;  %v15748_v31 = vld [vmem:[%s21782_s15 + $0x1] ss:$0 sm:$0xff] }
 0x70c   :  { %v2081_v54 = vrot.slane %v2079_v53, 7 }
 0x70e   :  { %v2083_v55 = vsub.f32 %v2062_v48, %v2081_v54 }
 0x710   :  { %v2084_v57 = vsel %vm677_vm1, %v2078_v52, %v2083_v55  ;;  %v2279_v55 = vld [vmem:[#allocation7 + $0x700] sm:$0xff] }
 0x711   :  { %11305 = vmatmul.msk.f32.vlgmr.msra.gmra.mxu3 %vm1902_vm6, %v2084_v57  ;;  %2295 = vmatpush.msrb.mxu0 %v2279_v55  ;;  %v11330_v55 = vld [vmem:[%s21774_s7 + $0x18] sm:$0xf0] }
 0x713   :  { %2296 = vmatpush.msrb.mxu0 %v2278_v58  ;;  %v11320_v58 = vld [vmem:[%s21774_s7] sm:$0xf] }
 0x794   :  { %v2109_v60 = vpop.f32.mrf.mxu3 }
 0x795   :  { %v2112_v61 = vperm.slane %v2109_v60, 0  ;;  %v2114_v1 = vperm.slane %v2109_v60, 1  ;;  %v2277_v60 = vld [vmem:[#allocation7 + $0x600] sm:$0xff] }
 0x796   :  { %2297 = vmatpush.msrb.mxu0 %v2277_v60  ;;  %v14889_v60 = vld [vmem:[%s21774_s7 + $0x4] sm:$0xf] }
 0x797   :  { %v2113_v0 = vmul.f32 %v2112_v61, %v2007_v14  ;;  %v2223_v14 = vld [vmem:[%s21780_s13 + $0x408] sm:$0xff] }
 0x798   :  { %2228 = vmatpush.msrb.mxu3 %v2223_v14  ;;  %v14899_v14 = vld [vmem:[%s21774_s7 + $0x54] sm:$0xf] }
 0x799   :  { %v2115_v3 = vadd.f32 %v2114_v1, %v2113_v0  ;;  %v2276_v0 = vld [vmem:[#allocation7 + $0x580] sm:$0xff] }
 0x79a   :  { %2229 = vmatpush.msrb.mxu3 %v2222_v15  ;;  %2298 = vmatpush.msrb.mxu0 %v2276_v0  ;;  %v11362_v15 = vld [vmem:[%s21774_s7 + $0x58] sm:$0xf0]  ;;  %v11322_v0 = vld [vmem:[%s21774_s7 + $0x8] sm:$0xf0] }
 0x79b   :  { %vm2116_vm12 = vcmp.ge.f32.partialorder %v2115_v3, 0.0  ;;  %v2117_v43 = vmul.f32 0.01, %v2115_v3 }
 0x79c   :  { %2230 = vmatpush.msrb.mxu3 %v2221_v16  ;;  %v11361_v16 = vor.u32 %v14900_v2, %v11360_v62 }
 0x79d   :  { %v2118_v4 = vsel %vm2116_vm12, %v2115_v3, %v2117_v43  ;;  %v11376_v3 = vld [vmem:[%s21774_s7 + $0x70] sm:$0xf]  ;;  %v14904_v43 = vld [vmem:[%s21774_s7 + $0x74] sm:$0xf0] }
 0x79e   :  { %v2119_v19 = vpack.c.bf16 %v2118_v4, %v2118_v4  ;;  %2231 = vmatpush.msrb.mxu3 %v2220_v17  ;;  %v14903_v4 = vld [vmem:[%s21774_s7 + $0x74] sm:$0xf]  ;;  %v11365_v17 = vor.u32 %v14899_v14, %v11362_v15 }
 0x7a0   :  { %11314 = vmatmul.msk.bf16.vlgmr.msra.gmra.mxu0 %vm1902_vm6, %v2119_v19  ;;  %2232 = vmatpush.msrb.mxu3 %v2219_v24 }
 0x7a2   :  { %2233 = vmatpush.msrb.mxu3 %v2218_v25 }
 0x7a4   :  { %2234 = vmatpush.msrb.mxu3 %v2217_v26 }
 0x7a6   :  { %2235 = vmatpush.msrb.mxu3 %v2216_v27 }
 0x7a8   :  { %2236 = vmatpush.msrb.mxu3 %v2215_v34  ;;  %v11344_v34 = vld [vmem:[%s21774_s7 + $0x30] sm:$0xf] }
 0x7aa   :  { %2237 = vmatpush.msrb.mxu3 %v2214_v28  ;;  %v14896_v28 = vld [vmem:[%s21774_s7 + $0x34] sm:$0xf0] }
 0x7ac   :  { %2238 = vmatpush.msrb.mxu3 %v2213_v29  ;;  %v14895_v29 = vld [vmem:[%s21774_s7 + $0x34] sm:$0xf] }
 0x7ae   :  { %2239 = vmatpush.msrb.mxu3 %v2212_v56  ;;  %v11346_v56 = vld [vmem:[%s21774_s7 + $0x38] sm:$0xf0] }
 0x7b0   :  { %2240 = vmatpush.msrb.mxu3 %v2211_v30 }
 0x7b2   :  { %2241 = vmatpush.msrb.mxu3 %v2210_v9  ;;  %v11345_v9 = vor.u32 %v14896_v28, %v11344_v34  ;;  %v2468_v34 = vld [vmem:[%s21780_s13 + $0x438] sm:$0xff]  ;;  %v2487_v28 = vld [vmem:[%s21780_s13 + $0x4d0] sm:$0xff] }
 0x81d   :  { %v2152_v5 = vpop.f32.mrf.mxu0 }
 0x81e   :  { %v2153_v6 = vadd.f32 %v15747_v41, %v2152_v5  ;;  %v11377_v41 = vor.u32 %v14904_v43, %v11376_v3  ;;  %v11378_v5 = vld [vmem:[%s21774_s7 + $0x78] sm:$0xf0]  ;;  %v2479_v43 = vld [vmem:[%s21780_s13 + $0x490] sm:$0xff] }
 0x81f   :  { %v2480_v3 = vld [vmem:[%s21780_s13 + $0x498] sm:$0xff] }
 0x820   :  { %2157 = vst.msk [vmem:[%s21784_s17] sm:$0x3] %vm2156_vm14, %v2153_v6  ;;  %v2159_v7 = vmul.f32 0.5, %v2153_v6  ;;  %2407 = vmatpush.bf16.msrb.mxu1 %v11377_v41  ;;  %2497 = vmatpush.msra.mxu0 %v2480_v3  ;;  %v2495_v41 = vld [vmem:[%s21780_s13 + $0x510] sm:$0xff] }
 0x822   :  { %v2160_v8 = vmul.f32 1.442695, %v2159_v7  ;;  %v11381_v7 = vor.u32 %v14903_v4, %v11378_v5  ;;  %v2496_v4 = vld [vmem:[%s21780_s13 + $0x518] sm:$0xff]  ;;  %2498 = vmatpush.msra.mxu0 %v2479_v43  ;;  %v2494_v5 = vld [vmem:[%s21780_s13 + $0x508] sm:$0xff] }
 0x823   :  { %2517 = vmatpush.msra.mxu3 %v2496_v4 }
 0x824   :  { %15757 = vpow2.f32 %v2160_v8  ;;  %v14902_v8 = vld [vmem:[%s21774_s7 + $0x64] sm:$0xf0]  ;;  %2420 = vmatpush.bf16.msra.mxu2 %v11381_v7  ;;  %v2493_v7 = vld [vmem:[%s21780_s13 + $0x500] sm:$0xff] }
 0x825   :  { %v2154_v10 = vpop.f32.mrf.mxu0  ;;  %2518 = vmatpush.msra.mxu3 %v2495_v41 }
 0x826   :  { %v14901_v10 = vld [vmem:[%s21774_s7 + $0x64] sm:$0xf] }
 0x827   :  { %2519 = vmatpush.msra.mxu3 %v2494_v5 }
 0x829   :  { %2520 = vmatpush.msra.mxu3 %v2493_v7 }
 0x82a   :  { %v15758_v11 = vpop.eup %15757 }
 0x82b   :  { %2163 = vrot.lane.b32.xlu0 %v15758_v11, %s15882_s1  ;;  %v11370_v11 = vld [vmem:[%s21774_s7 + $0x68] sm:$0xf0] }
 0x82c   :  { %v11373_v13 = vor.u32 %v14901_v10, %v11370_v11  ;;  %v2475_v10 = vld [vmem:[%s21780_s13 + $0x470] sm:$0xff]  ;;  %v2474_v11 = vld [vmem:[%s21780_s13 + $0x468] sm:$0xff] }
 0x82e   :  { %2421 = vmatpush.bf16.msra.mxu2 %v11373_v13 }
 0x832   :  { %2422 = vmatpush.bf16.msra.mxu2 %v11365_v17 }
 0x89d   :  { %v2164_v20 = vpop.permute.xlu0 %2163 }
 0x89e   :  { %v2166_v21 = vmul.f32 %v2164_v20, %v2158_v18  ;;  %v11352_v18 = vld [vmem:[%s21774_s7 + $0x40] sm:$0xf]  ;;  %v14898_v20 = vld [vmem:[%s21774_s7 + $0x44] sm:$0xf0] }
 0x89f   :  { %v11353_v25 = vor.u32 %v14898_v20, %v11352_v18  ;;  %v2473_v18 = vld [vmem:[%s21780_s13 + $0x460] sm:$0xff]  ;;  %v2492_v20 = vld [vmem:[%s21780_s13 + $0x4f8] sm:$0xff] }
 0x8a0   :  { %v2167_v22 = vadd.f32 %v2166_v21, %v2153_v6  ;;  %v11368_v6 = vld [vmem:[%s21774_s7 + $0x60] sm:$0xf]  ;;  %2521 = vmatpush.msra.mxu3 %v2492_v20 }
 0x8a1   :  { %v11369_v12 = vor.u32 %v14902_v8, %v11368_v6  ;;  %v2477_v6 = vld [vmem:[%s21780_s13 + $0x480] sm:$0xff]  ;;  %v2476_v8 = vld [vmem:[%s21780_s13 + $0x478] sm:$0xff] }
 0x8a2   :  { %v2168_v23 = vpack.c.bf16 %v2167_v22, %v2167_v22  ;;  %v14897_v22 = vld [vmem:[%s21774_s7 + $0x44] sm:$0xf] }
 0x8a3   :  { %2408 = vmatpush.bf16.msrb.mxu1 %v11369_v12 }
 0x8a4   :  { %11315 = vmatmul.msk.bf16.vlgmr.msrb.gmra.mxu2 %vm860_vm5, %v2168_v23  ;;  %v11354_v23 = vld [vmem:[%s21774_s7 + $0x48] sm:$0xf0] }
 0x8a5   :  { %v11357_v27 = vor.u32 %v14897_v22, %v11354_v23  ;;  %v2471_v22 = vld [vmem:[%s21780_s13 + $0x450] sm:$0xff]  ;;  %v2490_v23 = vld [vmem:[%s21780_s13 + $0x4e8] sm:$0xff] }
 0x8a7   :  { %2409 = vmatpush.bf16.msrb.mxu1 %v11361_v16  ;;  %2423 = vmatpush.bf16.msra.mxu2 %v11357_v27  ;;  %v2488_v27 = vld [vmem:[%s21780_s13 + $0x4d8] sm:$0xff] }
 0x8ab   :  { %2410 = vmatpush.bf16.msrb.mxu1 %v11353_v25  ;;  %v2489_v25 = vld [vmem:[%s21780_s13 + $0x4e0] sm:$0xff] }
 0x8af   :  { %2411 = vmatpush.bf16.msrb.mxu1 %v11345_v9  ;;  %v2485_v9 = vld [vmem:[%s21780_s13 + $0x4c0] sm:$0xff] }
 0x927   :  { %v2190_v32 = vpop.f32.mrf.mxu2 }
 0x928   :  { %v16976_v33 = vadd.f32 %v15748_v31, %v2190_v32  ;;  %v11349_v32 = vor.u32 %v14895_v29, %v11346_v56  ;;  %v2467_v29 = vld [vmem:[%s21780_s13 + $0x430] sm:$0xff]  ;;  %v2486_v56 = vld [vmem:[%s21780_s13 + $0x4c8] sm:$0xff] }
 0x92a   :  { %v2194_v35 = vsel %vm616_vm0, %v16976_v33, 0.0  ;;  %v2201_v36 = vmul.f32 %v16976_v33, %v16976_v33  ;;  %2424 = vmatpush.bf16.msra.mxu2 %v11349_v32  ;;  %v2484_v32 = vld [vmem:[%s21780_s13 + $0x4b8] sm:$0xff] }
 0x92b   :  { %v2195_v37 = vrot.slane %v2194_v35, 4 }
 0x92c   :  { %v2202_v38 = vsel %vm616_vm0, %v2201_v36, 0.0  ;;  %v2253_v36 = vld [vmem:[%s21779_s12 + $0x8] sm:$0x3] }
 0x92d   :  { %v2196_v39 = vadd.f32 %v2195_v37, %v2194_v35  ;;  %v2203_v40 = vrot.slane %v2202_v38, 4 }
 0x92f   :  { %v2197_v49 = vrot.slane %v2196_v39, 2  ;;  %v2204_v63 = vadd.f32 %v2203_v40, %v2202_v38  ;;  %v2192_v42 = vpop.f32.mrf.mxu2 }
 0x931   :  { %v2198_v44 = vadd.f32 %v2197_v49, %v2196_v39  ;;  %v2205_v45 = vrot.slane %v2204_v63, 2 }
 0x933   :  { %v2199_v46 = vrot.slane %v2198_v44, 1  ;;  %v2206_v47 = vadd.f32 %v2205_v45, %v2204_v63  ;;  %v14894_v45 = vld [vmem:[%s21774_s7 + $0x24] sm:$0xf0] }
 0x935   :  { %v2207_v48 = vrot.slane %v2206_v47, 1  ;;  %v2200_v50 = vadd.f32 %v2199_v46, %v2198_v44  ;;  %v11336_v44 = vld [vmem:[%s21774_s7 + $0x20] sm:$0xf]  ;;  %v14893_v46 = vld [vmem:[%s21774_s7 + $0x24] sm:$0xf] }
 0x937   :  { %v2208_v51 = vadd.f32 %v2207_v48, %v2206_v47  ;;  %v11337_v47 = vor.u32 %v14894_v45, %v11336_v44  ;;  %v11338_v48 = vld [vmem:[%s21774_s7 + $0x28] sm:$0xf0] }
 0x939   :  { %v2209_v52 = vsel %vm677_vm1, %v2200_v50, %v2208_v51  ;;  %v11341_v50 = vor.u32 %v14893_v46, %v11338_v48  ;;  %2412 = vmatpush.bf16.msrb.mxu1 %v11337_v47  ;;  %v11328_v51 = vld [vmem:[%s21774_s7 + $0x10] sm:$0xf] }
 0x93a   :  { %2242 = vmatmul.f32.vlgmr.msrb.gmra.mxu3 %v2209_v52  ;;  %v14892_v52 = vld [vmem:[%s21774_s7 + $0x14] sm:$0xf0] }
 0x93b   :  { %2425 = vmatpush.bf16.msra.mxu2 %v11341_v50 }
 0x9bd   :  { %v2243_v53 = vpop.f32.mrf.mxu3 }
 0x9be   :  { %v16984_v54 = vmul.f32 0.125, %v2243_v53  ;;  %v14891_v53 = vld [vmem:[%s21774_s7 + $0x14] sm:$0xf] }
 0x9c0   :  { %v2247_v57 = vmul.f32 %v16984_v54, %v16984_v54 }
 0x9c2   :  { %v2249_v59 = vrot.slane %v2247_v57, 7  ;;  %v11333_v57 = vor.u32 %v14891_v53, %v11330_v55 }
 0x9c4   :  { %v2251_v61 = vsub.f32 %v16984_v54, %v2249_v59  ;;  %2426 = vmatpush.bf16.msra.mxu2 %v11333_v57  ;;  %v14890_v59 = vld [vmem:[%s21774_s7 + $0x4] sm:$0xf0] }
 0x9c6   :  { %v2252_v1 = vmax.f32 %v2251_v61, 0.0  ;;  %v11321_v61 = vor.u32 %v14890_v59, %v11320_v58 }
 0x9c8   :  { %v2254_v19 = vadd.f32 1e-05, %v2252_v1  ;;  %v11325_v1 = vor.u32 %v14889_v60, %v11322_v0 }
 0x9ca   :  { %15759 = vrsqrt.f32 %v2254_v19  ;;  %vm2261_vm3 = vweird.f32 %v2254_v19  ;;  %2427 = vmatpush.bf16.msra.mxu2 %v11325_v1 }
 0x9d0   :  { %v15760_v21 = vpop.eup %15759 }
 0x9d1   :  { %v2256_v24 = vmul.f32 %v15760_v21, %v2254_v19  ;;  %vm2262_vm2 = vweird.f32 %v15760_v21  ;;  %v2478_v19 = vld [vmem:[%s21780_s13 + $0x488] sm:$0xff] }
 0x9d2   :  { %vm2263_vm4 = vmor %vm2261_vm3, %vm2262_vm2  ;;  %2499 = vmatpush.msra.mxu0 %v2478_v19 }
 0x9d3   :  { %v2257_v26 = vmul.f32 %v15760_v21, %v2256_v24  ;;  %v2470_v24 = vld [vmem:[%s21780_s13 + $0x448] sm:$0xff] }
 0x9d4   :  { %2500 = vmatpush.msra.mxu0 %v2477_v6 }
 0x9d5   :  { %v2258_v30 = vmul.f32 0.5, %v2257_v26  ;;  %v2469_v26 = vld [vmem:[%s21780_s13 + $0x440] sm:$0xff] }
 0x9d6   :  { %2501 = vmatpush.msra.mxu0 %v2476_v8 }
 0x9d7   :  { %v2259_v31 = vsub.f32 1.5, %v2258_v30  ;;  %v2466_v30 = vld [vmem:[%s21780_s13 + $0x428] sm:$0xff] }
 0x9d8   :  { %2502 = vmatpush.msra.mxu0 %v2475_v10 }
 0x9d9   :  { %v2260_v35 = vmul.f32 %v15760_v21, %v2259_v31  ;;  %v2465_v31 = vld [vmem:[%s21780_s13 + $0x420] sm:$0xff] }
 0x9da   :  { %2503 = vmatpush.msra.mxu0 %v2474_v11 }
 0x9db   :  { %v2264_v37 = vsel %vm2263_vm4, %v15760_v21, %v2260_v35  ;;  %v2491_v21 = vld [vmem:[%s21780_s13 + $0x4f0] sm:$0xff] }
 0x9dc   :  { %v11316_v38 = vrot.slane %v2264_v37, 9  ;;  %2504 = vmatpush.msra.mxu0 %v2473_v18  ;;  %2522 = vmatpush.msra.mxu3 %v2491_v21  ;;  %v2483_v35 = vld [vmem:[%s21780_s13 + $0x4b0] sm:$0xff]  ;;  %v2481_v37 = vld [vmem:[%s21780_s13 + $0x4a0] sm:$0xff] }
 0x9dd   :  { %v2570_v18 = vld [vmem:[#allocation7 + $0x808] sm:$0xff] }
 0x9de   :  { %v2269_v39 = vmul.f32 %v11316_v38, %v2253_v36  ;;  %2523 = vmatpush.msra.mxu3 %v2490_v23  ;;  %2608 = vmatpush.msrb.mxu2 %v2570_v18  ;;  %v2568_v21 = vld [vmem:[#allocation7 + $0x788] sm:$0xff]  ;;  %v11499_v23 = vld [vmem:[#allocation4 + $0xe0] sm:$0xf] }
 0x9df   :  { %v11419_v18 = vld [vmem:[#allocation4 + $0x40] sm:$0xf] }
 0x9e0   :  { %v2270_v40 = vmul.f32 %v2269_v39, %v16984_v54  ;;  %v11329_v54 = vor.u32 %v14892_v52, %v11328_v51  ;;  %2524 = vmatpush.msra.mxu3 %v2489_v25  ;;  %2609 = vmatpush.msrb.mxu2 %v2568_v21  ;;  %v14933_v25 = vld [vmem:[#allocation4 + $0xe4] sm:$0xf]  ;;  %v14915_v21 = vld [vmem:[#allocation4 + $0x4c] sm:$0xf0] }
 0x9e2   :  { %v2272_v49 = vrot.slane %v2270_v40, 7  ;;  %2413 = vmatpush.bf16.msrb.mxu1 %v11329_v54  ;;  %2525 = vmatpush.msra.mxu3 %v2488_v27 }
 0x9e4   :  { %v2274_v63 = vsub.f32 %v2253_v36, %v2272_v49  ;;  %2526 = vmatpush.msra.mxu3 %v2487_v28  ;;  %v2482_v36 = vld [vmem:[%s21780_s13 + $0x4a8] sm:$0xff] }
 0x9e5   :  { %v11483_v28 = vld [vmem:[#allocation4 + $0xc0] sm:$0xf] }
 0x9e6   :  { %v2275_v42 = vsel %vm677_vm1, %v2269_v39, %v2274_v63  ;;  %2414 = vmatpush.bf16.msrb.mxu1 %v11321_v61  ;;  %2527 = vmatpush.msra.mxu3 %v2486_v56  ;;  %v14931_v56 = vld [vmem:[#allocation4 + $0xcc] sm:$0xf0] }
 0x9e7   :  { %11317 = vmatmul.msk.f32.vlgmr.msrb.gmra.mxu0 %vm1902_vm6, %v2275_v42 }
 0x9e8   :  { %2528 = vmatpush.msra.mxu3 %v2485_v9  ;;  %v11485_v9 = vld [vmem:[#allocation4 + $0xd0] sm:$0xf0] }
 0x9ea   :  { %2529 = vmatpush.msra.mxu3 %v2484_v32  ;;  %v11627_v32 = vld [vmem:[#allocation4 + $0x1e0] sm:$0xf] }
 0x9ec   :  { %2530 = vmatpush.msra.mxu3 %v2483_v35  ;;  %v14967_v35 = vld [vmem:[#allocation4 + $0x1ec] sm:$0xf0] }
 0x9ee   :  { %2531 = vmatpush.msra.mxu3 %v2482_v36  ;;  %v14965_v36 = vld [vmem:[#allocation4 + $0x1e4] sm:$0xf] }
 0x9f0   :  { %2532 = vmatpush.msra.mxu3 %v2481_v37 }
 0xa64   :  { %v2300_v12 = vpop.f32.mrf.mxu0 }
 0xa65   :  { %v2303_v13 = vperm.slane %v2300_v12, 0  ;;  %v2305_v2 = vperm.slane %v2300_v12, 1 }
 0xa67   :  { %v2304_v62 = vmul.f32 %v2303_v13, %v16976_v33  ;;  %v2472_v33 = vld [vmem:[%s21780_s13 + $0x458] sm:$0xff] }
 0xa68   :  { %2505 = vmatpush.msra.mxu0 %v2472_v33  ;;  %v2567_v33 = vld [vmem:[#allocation7 + $0x780] sm:$0xff] }
 0xa69   :  { %v2306_v14 = vadd.f32 %v2305_v2, %v2304_v62 }
 0xa6a   :  { %2506 = vmatpush.msra.mxu0 %v2471_v22 }
 0xa6b   :  { %v2308_v15 = vmul.f32 0.01, %v2306_v14  ;;  %vm2307_vm6 = vcmp.ge.f32.partialorder %v2306_v14, 0.0 }
 0xa6c   :  { %2507 = vmatpush.msra.mxu0 %v2470_v24  ;;  %v14935_v24 = vld [vmem:[#allocation4 + $0xec] sm:$0xf0] }
 0xa6d   :  { %v2309_v16 = vsel %vm2307_vm6, %v2306_v14, %v2308_v15  ;;  %v11500_v27 = vor.u32 %v14935_v24, %v11499_v23  ;;  %v14951_v23 = vld [vmem:[#allocation4 + $0x16c] sm:$0xf0] }
 0xa6e   :  { %v2310_v17 = vpack.c.bf16 %v2309_v16, %v2309_v16  ;;  %2508 = vmatpush.msra.mxu0 %v2469_v26 }
 0xa70   :  { %2415 = vmatmul.bf16.vlgmr.msrb.gmra.mxu1 %v2310_v17  ;;  %2428 = vmatmul.bf16.vlgmr.msra.gmra.mxu2 %v2310_v17  ;;  %v2569_v17 = vld [vmem:[#allocation7 + $0x800] sm:$0xff] }
 0xa71   :  { %2509 = vmatpush.msra.mxu0 %v2468_v34  ;;  %2588 = vmatpush.msra.mxu1 %v2569_v17  ;;  %v11501_v34 = vld [vmem:[#allocation4 + $0xf0] sm:$0xf0] }
 0xa73   :  { %2510 = vmatpush.msra.mxu0 %v2467_v29  ;;  %2589 = vmatpush.msra.mxu1 %v2567_v33  ;;  %v11504_v29 = vor.u32 %v14933_v25, %v11501_v34  ;;  %v11565_v34 = vld [vmem:[#allocation4 + $0x170] sm:$0xf0] }
 0xa75   :  { %2511 = vmatpush.msra.mxu0 %v2466_v30  ;;  %v14929_v30 = vld [vmem:[#allocation4 + $0xc4] sm:$0xf]  ;;  %3040 = vmatpush.bf16.msra.mxu2 %v11504_v29  ;;  %v11421_v29 = vld [vmem:[#allocation4 + $0x50] sm:$0xf0] }
 0xa76   :  { %v11488_v37 = vor.u32 %v14929_v30, %v11485_v9  ;;  %v14926_v9 = vld [vmem:[#allocation4 + $0xac] sm:$0xf] }
 0xa77   :  { %2512 = vmatpush.msra.mxu0 %v2465_v31  ;;  %v11484_v31 = vor.u32 %v14931_v56, %v11483_v28  ;;  %v14913_v28 = vld [vmem:[#allocation4 + $0x44] sm:$0xf]  ;;  %v2544_v56 = vld [vmem:[%s21779_s12 + $0xa] sm:$0x3] }
 0xa79   :  { %3014 = vmatpush.bf16.msrb.mxu0 %v11500_v27  ;;  %3041 = vmatpush.bf16.msra.mxu2 %v11488_v37  ;;  %v14949_v27 = vld [vmem:[#allocation4 + $0x164] sm:$0xf]  ;;  %v14947_v37 = vld [vmem:[#allocation4 + $0x14c] sm:$0xf0] }
 0xa7d   :  { %3015 = vmatpush.bf16.msrb.mxu0 %v11484_v31 }
 0xaed   :  { %v17188_v38 = vpop.f32.mrf.mxu1 }
 0xaee   :  { %v2433_v39 = vsel %vm616_vm0, %v17188_v38, 0.0  ;;  %v2447_v40 = vmul.f32 %v17188_v38, %v17188_v38 }
 0xaef   :  { %v2434_v49 = vrot.slane %v2433_v39, 4 }
 0xaf0   :  { %v2449_v63 = vsel %vm616_vm0, %v2447_v40, 0.0  ;;  %v11629_v40 = vld [vmem:[#allocation4 + $0x1f0] sm:$0xf0] }
 0xaf1   :  { %v2435_v42 = vadd.f32 %v2434_v49, %v2433_v39  ;;  %v2450_v44 = vrot.slane %v2449_v63, 4  ;;  %v11628_v39 = vor.u32 %v14967_v35, %v11627_v32  ;;  %v11467_v49 = vld [vmem:[#allocation4 + $0xa0] sm:$0xf]  ;;  %v11420_v32 = vor.u32 %v14915_v21, %v11419_v18  ;;  %v14939_v18 = vld [vmem:[#allocation4 + $0x10c] sm:$0xf0] }
 0xaf2   :  { %v11568_v35 = vor.u32 %v14949_v27, %v11565_v34  ;;  %v14937_v21 = vld [vmem:[#allocation4 + $0x104] sm:$0xf]  ;;  %v14966_v27 = vld [vmem:[#allocation4 + $0x1ec] sm:$0xf]  ;;  %v11637_v34 = vld [vmem:[#allocation4 + $0x1f8] sm:$0xf0] }
 0xaf3   :  { %v2436_v45 = vrot.slane %v2435_v42, 2  ;;  %v2451_v46 = vadd.f32 %v2450_v44, %v2449_v63  ;;  %v17195_v47 = vpop.f32.mrf.mxu2  ;;  %v14927_v63 = vld [vmem:[#allocation4 + $0xac] sm:$0xf0]  ;;  %v14925_v44 = vld [vmem:[#allocation4 + $0xa4] sm:$0xf]  ;;  %3027 = vmatpush.bf16.msrb.mxu1 %v11628_v39 }
 0xaf4   :  { %v2440_v48 = vsel %vm616_vm0, %v17195_v47, 0.0  ;;  %v2448_v50 = vmul.f32 %v17195_v47, %v17195_v47 }
 0xaf5   :  { %v2437_v51 = vadd.f32 %v2436_v45, %v2435_v42  ;;  %v2452_v52 = vrot.slane %v2451_v46, 2  ;;  %v2441_v53 = vrot.slane %v2440_v48, 4  ;;  %v2418_v54 = vpop.f32.mrf.mxu1  ;;  %v11632_v42 = vor.u32 %v14965_v36, %v11629_v40  ;;  %v11469_v45 = vld [vmem:[#allocation4 + $0xb0] sm:$0xf0]  ;;  %v11403_v36 = vld [vmem:[#allocation4 + $0x20] sm:$0xf] }
 0xaf6   :  { %v2456_v55 = vsel %vm616_vm0, %v2448_v50, 0.0  ;;  %v14961_v50 = vld [vmem:[#allocation4 + $0x1c4] sm:$0xf]  ;;  %v11424_v40 = vor.u32 %v14913_v28, %v11421_v29  ;;  %v11640_v29 = vor.u32 %v14966_v27, %v11637_v34  ;;  %v11557_v27 = vld [vmem:[#allocation4 + $0x158] sm:$0xf0] }
 0xaf7   :  { %v2442_v57 = vadd.f32 %v2441_v53, %v2440_v48  ;;  %v2457_v58 = vrot.slane %v2456_v55, 4  ;;  %v2438_v59 = vrot.slane %v2437_v51, 1  ;;  %v2453_v60 = vadd.f32 %v2452_v52, %v2451_v46  ;;  %v11611_v46 = vld [vmem:[#allocation4 + $0x1c0] sm:$0xf]  ;;  %v14963_v48 = vld [vmem:[#allocation4 + $0x1cc] sm:$0xf0]  ;;  %3053 = vmatpush.bf16.msrb.mxu3 %v11632_v42 }
 0xaf8   :  { %v11468_v52 = vor.u32 %v14927_v63, %v11467_v49  ;;  %v11612_v53 = vor.u32 %v14963_v48, %v11611_v46  ;;  %v14911_v49 = vld [vmem:[#allocation4 + $0x2c] sm:$0xf0]  ;;  %v14945_v63 = vld [vmem:[#allocation4 + $0x144] sm:$0xf]  ;;  %v11549_v42 = vld [vmem:[#allocation4 + $0x150] sm:$0xf0] }
 0xaf9   :  { %v2443_v61 = vrot.slane %v2442_v57, 2  ;;  %v2458_v0 = vadd.f32 %v2457_v58, %v2456_v55  ;;  %v2454_v1 = vrot.slane %v2453_v60, 1  ;;  %v2439_v19 = vadd.f32 %v2438_v59, %v2437_v51  ;;  %v11613_v51 = vld [vmem:[#allocation4 + $0x1d0] sm:$0xf0]  ;;  %v11451_v55 = vld [vmem:[#allocation4 + $0x80] sm:$0xf] }
 0xafa   :  { %v11616_v54 = vor.u32 %v14961_v50, %v11613_v51  ;;  %v11472_v58 = vor.u32 %v14925_v44, %v11469_v45  ;;  %v14921_v59 = vld [vmem:[#allocation4 + $0x84] sm:$0xf]  ;;  %3028 = vmatpush.bf16.msrb.mxu1 %v11612_v53  ;;  %3016 = vmatpush.bf16.msrb.mxu0 %v11468_v52  ;;  %v11405_v46 = vld [vmem:[#allocation4 + $0x30] sm:$0xf0]  ;;  %v11404_v51 = vor.u32 %v14911_v49, %v11403_v36  ;;  %v11387_v53 = vld [vmem:[#allocation4] sm:$0xf] }
 0xafb   :  { %v2444_v3 = vadd.f32 %v2443_v61, %v2442_v57  ;;  %v2459_v43 = vrot.slane %v2458_v0, 2  ;;  %v2431_v4 = vpop.f32.mrf.mxu2  ;;  %v2455_v41 = vadd.f32 %v2454_v1, %v2453_v60  ;;  %v14923_v57 = vld [vmem:[#allocation4 + $0x8c] sm:$0xf0]  ;;  %v11595_v60 = vld [vmem:[#allocation4 + $0x1a0] sm:$0xf]  ;;  %v11552_v52 = vor.u32 %v14945_v63, %v11549_v42 }
 0xafc   :  { %v14959_v61 = vld [vmem:[#allocation4 + $0x1ac] sm:$0xf0]  ;;  %v11453_v1 = vld [vmem:[#allocation4 + $0x90] sm:$0xf0]  ;;  %3054 = vmatpush.bf16.msrb.mxu3 %v11616_v54  ;;  %3042 = vmatpush.bf16.msra.mxu2 %v11472_v58  ;;  %v14909_v45 = vld [vmem:[#allocation4 + $0x24] sm:$0xf] }
 0xafd   :  { %v2463_v5 = vsel %vm677_vm1, %v2439_v19, %v2455_v41  ;;  %v2445_v6 = vrot.slane %v2444_v3, 1  ;;  %v2460_v7 = vadd.f32 %v2459_v43, %v2458_v0  ;;  %v11597_v43 = vld [vmem:[#allocation4 + $0x1b0] sm:$0xf0]  ;;  %v11596_v19 = vor.u32 %v14959_v61, %v11595_v60  ;;  %v11531_v54 = vld [vmem:[#allocation4 + $0x120] sm:$0xf] }
 0xafe   :  { %2513 = vmatmul.f32.vlgmr.msra.gmra.mxu0 %v2463_v5  ;;  %v11452_v41 = vor.u32 %v14923_v57, %v11451_v55  ;;  %v14943_v55 = vld [vmem:[#allocation4 + $0x12c] sm:$0xf0]  ;;  %v11408_v57 = vor.u32 %v14909_v45, %v11405_v46  ;;  %v11533_v60 = vld [vmem:[#allocation4 + $0x130] sm:$0xf0]  ;;  %v11619_v36 = vld [vmem:[#allocation4 + $0x1c8] sm:$0xf] }
 0xaff   :  { %v2461_v8 = vrot.slane %v2460_v7, 1  ;;  %v2446_v10 = vadd.f32 %v2445_v6, %v2444_v3  ;;  %v14957_v3 = vld [vmem:[#allocation4 + $0x1a4] sm:$0xf]  ;;  %v11435_v6 = vld [vmem:[#allocation4 + $0x60] sm:$0xf]  ;;  %3029 = vmatpush.bf16.msrb.mxu1 %v11596_v19 }
 0xb00   :  { %v11600_v5 = vor.u32 %v14957_v3, %v11597_v43  ;;  %3017 = vmatpush.bf16.msrb.mxu0 %v11452_v41  ;;  %v14907_v58 = vld [vmem:[#allocation4 + $0xc] sm:$0xf0]  ;;  %v11507_v3 = vld [vmem:[#allocation4 + $0xe8] sm:$0xf]  ;;  %v14936_v43 = vld [vmem:[#allocation4 + $0xf4] sm:$0xf0] }
 0xb01   :  { %v2462_v11 = vadd.f32 %v2461_v8, %v2460_v7  ;;  %v11579_v7 = vld [vmem:[#allocation4 + $0x180] sm:$0xf]  ;;  %v14955_v8 = vld [vmem:[#allocation4 + $0x18c] sm:$0xf0]  ;;  %v11388_v41 = vor.u32 %v14907_v58, %v11387_v53  ;;  %v11459_v63 = vld [vmem:[#allocation4 + $0x88] sm:$0xf] }
 0xb02   :  { %v11580_v17 = vor.u32 %v14955_v8, %v11579_v7  ;;  %3055 = vmatpush.bf16.msrb.mxu3 %v11600_v5  ;;  %v14934_v5 = vld [vmem:[#allocation4 + $0xec] sm:$0xf]  ;;  %v14924_v42 = vld [vmem:[#allocation4 + $0x94] sm:$0xf0]  ;;  %v11461_v46 = vld [vmem:[#allocation4 + $0x98] sm:$0xf0] }
 0xb03   :  { %v2464_v12 = vsel %vm677_vm1, %v2446_v10, %v2462_v11  ;;  %v11456_v11 = vor.u32 %v14921_v59, %v11453_v1  ;;  %v14941_v59 = vld [vmem:[#allocation4 + $0x124] sm:$0xf]  ;;  %v11389_v1 = vld [vmem:[#allocation4 + $0x10] sm:$0xf0]  ;;  %v11460_v45 = vor.u32 %v14924_v42, %v11459_v63  ;;  %v14920_v58 = vld [vmem:[#allocation4 + $0x74] sm:$0xf0] }
 0xb04   :  { %2533 = vmatmul.f32.vlgmr.msra.gmra.mxu3 %v2464_v12  ;;  %v14919_v12 = vld [vmem:[#allocation4 + $0x6c] sm:$0xf0]  ;;  %3030 = vmatpush.bf16.msrb.mxu1 %v11580_v17  ;;  %v11536_v7 = vor.u32 %v14941_v59, %v11533_v60  ;;  %v11515_v17 = vld [vmem:[#allocation4 + $0x100] sm:$0xf]  ;;  %v14918_v59 = vld [vmem:[#allocation4 + $0x6c] sm:$0xf] }
 0xb05   :  { %3043 = vmatpush.bf16.msra.mxu2 %v11456_v11  ;;  %v11508_v11 = vor.u32 %v14936_v43, %v11507_v3  ;;  %v14956_v3 = vld [vmem:[#allocation4 + $0x194] sm:$0xf0]  ;;  %v14954_v43 = vld [vmem:[#allocation4 + $0x18c] sm:$0xf]  ;;  %v11395_v34 = vld [vmem:[#allocation4 + $0x8] sm:$0xf] }
 0xb06   :  { %v14938_v63 = vld [vmem:[#allocation4 + $0x10c] sm:$0xf] }
 0xb7b   :  { %v2514_v13 = vpop.f32.mrf.mxu0 }
 0xb87   :  { %v2534_v62 = vpop.f32.mrf.mxu3 }
 0xb88   :  { %v2535_v2 = vadd.f32 %v2534_v62, %v2514_v13  ;;  %v14953_v13 = vld [vmem:[#allocation4 + $0x184] sm:$0xf]  ;;  %v11581_v62 = vld [vmem:[#allocation4 + $0x190] sm:$0xf0] }
 0xb89   :  { %v11584_v33 = vor.u32 %v14953_v13, %v11581_v62  ;;  %v11491_v13 = vld [vmem:[#allocation4 + $0xc8] sm:$0xf]  ;;  %v14932_v62 = vld [vmem:[#allocation4 + $0xd4] sm:$0xf0] }
 0xb8a   :  { %v17204_v14 = vmul.f32 0.03125, %v2535_v2  ;;  %v14917_v2 = vld [vmem:[#allocation4 + $0x64] sm:$0xf] }
 0xb8b   :  { %3056 = vmatpush.bf16.msrb.mxu3 %v11584_v33  ;;  %v11516_v33 = vor.u32 %v14939_v18, %v11515_v17  ;;  %v14912_v17 = vld [vmem:[#allocation4 + $0x34] sm:$0xf0]  ;;  %v14910_v18 = vld [vmem:[#allocation4 + $0x2c] sm:$0xf] }
 0xb8c   :  { %v2538_v15 = vmul.f32 %v17204_v14, %v17204_v14 }
 0xb8e   :  { %v2540_v16 = vrot.slane %v2538_v15, 7  ;;  %v11437_v15 = vld [vmem:[#allocation4 + $0x70] sm:$0xf0] }
 0xb8f   :  { %v11440_v25 = vor.u32 %v14917_v2, %v11437_v15  ;;  %3057 = vmatpush.bf16.msrb.mxu3 %v11568_v35  ;;  %v14930_v2 = vld [vmem:[#allocation4 + $0xcc] sm:$0xf]  ;;  %v11492_v15 = vor.u32 %v14932_v62, %v11491_v13 }
 0xb90   :  { %v2542_v20 = vsub.f32 %v17204_v14, %v2540_v16  ;;  %v14950_v13 = vld [vmem:[#allocation4 + $0x16c] sm:$0xf] }
 0xb91   :  { %3044 = vmatpush.bf16.msra.mxu2 %v11440_v25  ;;  %v14968_v25 = vld [vmem:[#allocation4 + $0x1f4] sm:$0xf0] }
 0xb92   :  { %v2543_v22 = vmax.f32 %v2542_v20, 0.0  ;;  %v11436_v20 = vor.u32 %v14919_v12, %v11435_v6  ;;  %v11509_v6 = vld [vmem:[#allocation4 + $0xf8] sm:$0xf0] }
 0xb93   :  { %3058 = vmatpush.bf16.msrb.mxu3 %v11552_v52  ;;  %v11512_v12 = vor.u32 %v14934_v5, %v11509_v6  ;;  %v14958_v52 = vld [vmem:[#allocation4 + $0x1ac] sm:$0xf]  ;;  %v14916_v5 = vld [vmem:[#allocation4 + $0x54] sm:$0xf0] }
 0xb94   :  { %v17209_v26 = vadd.f32 1e-05, %v2543_v22  ;;  %v11563_v22 = vld [vmem:[#allocation4 + $0x160] sm:$0xf]  ;;  %3018 = vmatpush.bf16.msrb.mxu0 %v11436_v20 }
 0xb95   :  { %v11564_v31 = vor.u32 %v14951_v23, %v11563_v22  ;;  %3045 = vmatpush.bf16.msra.mxu2 %v11424_v40  ;;  %v11517_v22 = vld [vmem:[#allocation4 + $0x110] sm:$0xf0]  ;;  %v11635_v23 = vld [vmem:[#allocation4 + $0x1e8] sm:$0xf]  ;;  %v11621_v40 = vld [vmem:[#allocation4 + $0x1d8] sm:$0xf0] }
 0xb96   :  { %15761 = vrsqrt.f32 %v17209_v26  ;;  %vm2552_vm8 = vweird.f32 %v17209_v26  ;;  %v11636_v28 = vor.u32 %v14968_v25, %v11635_v23  ;;  %v14946_v25 = vld [vmem:[#allocation4 + $0x14c] sm:$0xf] }
 0xb97   :  { %3031 = vmatpush.bf16.msrb.mxu1 %v11564_v31  ;;  %3059 = vmatpush.bf16.msrb.mxu3 %v11536_v7 }
 0xb98   :  { %3019 = vmatpush.bf16.msrb.mxu0 %v11420_v32  ;;  %v11477_v32 = vld [vmem:[#allocation4 + $0xb8] sm:$0xf0] }
 0xb99   :  { %3046 = vmatpush.bf16.msra.mxu2 %v11408_v57  ;;  %v11480_v35 = vor.u32 %v14926_v9, %v11477_v32  ;;  %v11443_v57 = vld [vmem:[#allocation4 + $0x68] sm:$0xf] }
 0xb9a   :  { %v11444_v60 = vor.u32 %v14920_v58, %v11443_v57  ;;  %v11539_v32 = vld [vmem:[#allocation4 + $0x128] sm:$0xf] }
 0xb9c   :  { %v15762_v0 = vpop.eup %15761  ;;  %3020 = vmatpush.bf16.msrb.mxu0 %v11404_v51  ;;  %v14960_v51 = vld [vmem:[#allocation4 + $0x1b4] sm:$0xf0] }
 0xb9d   :  { %v2547_v4 = vmul.f32 %v15762_v0, %v17209_v26  ;;  %vm2553_vm7 = vweird.f32 %v15762_v0  ;;  %v11547_v26 = vld [vmem:[#allocation4 + $0x140] sm:$0xf] }
 0xb9e   :  { %vm17218_vm9 = vmor %vm2552_vm8, %vm2553_vm7  ;;  %v11548_v48 = vor.u32 %v14947_v37, %v11547_v26  ;;  %v14964_v26 = vld [vmem:[#allocation4 + $0x1d4] sm:$0xf0]  ;;  %v14962_v37 = vld [vmem:[#allocation4 + $0x1cc] sm:$0xf] }
 0xb9f   :  { %v2548_v10 = vmul.f32 %v15762_v0, %v2547_v4  ;;  %v11532_v4 = vor.u32 %v14943_v55, %v11531_v54  ;;  %v11624_v49 = vor.u32 %v14962_v37, %v11621_v40  ;;  %v11605_v54 = vld [vmem:[#allocation4 + $0x1b8] sm:$0xf0]  ;;  %v11523_v40 = vld [vmem:[#allocation4 + $0x108] sm:$0xf] }
 0xba0   :  { %3032 = vmatpush.bf16.msrb.mxu1 %v11548_v48  ;;  %3021 = vmatpush.bf16.msrb.mxu0 %v11388_v41  ;;  %v11608_v55 = vor.u32 %v14958_v52, %v11605_v54  ;;  %v11427_v41 = vld [vmem:[#allocation4 + $0x48] sm:$0xf] }
 0xba1   :  { %v2549_v16 = vmul.f32 0.5, %v2548_v10  ;;  %v11428_v7 = vor.u32 %v14916_v5, %v11427_v41  ;;  %v3193_v41 = vld [vmem:[%s21780_s13 + $0x578] sm:$0xff]  ;;  %v3212_v5 = vld [vmem:[%s21780_s13 + $0x610] sm:$0xff] }
 0xba3   :  { %v2550_v24 = vsub.f32 1.5, %v2549_v16  ;;  %v11493_v16 = vld [vmem:[#allocation4 + $0xd8] sm:$0xf0] }
 0xba4   :  { %3033 = vmatpush.bf16.msrb.mxu1 %v11532_v4  ;;  %3066 = vmatpush.bf16.msra.mxu0 %v11508_v11  ;;  %v11496_v20 = vor.u32 %v14930_v2, %v11493_v16  ;;  %v11573_v2 = vld [vmem:[#allocation4 + $0x178] sm:$0xf0]  ;;  %v11411_v16 = vld [vmem:[#allocation4 + $0x28] sm:$0xf] }
 0xba5   :  { %v2551_v30 = vmul.f32 %v15762_v0, %v2550_v24  ;;  %v11520_v24 = vor.u32 %v14937_v21, %v11517_v22  ;;  %v11555_v21 = vld [vmem:[#allocation4 + $0x148] sm:$0xf]  ;;  %v14948_v22 = vld [vmem:[#allocation4 + $0x154] sm:$0xf0] }
 0xba7   :  { %v2555_v39 = vsel %vm17218_vm9, %v15762_v0, %v2551_v30  ;;  %v14905_v0 = vld [vmem:[#allocation4 + $0x4] sm:$0xf]  ;;  %v14928_v30 = vld [vmem:[#allocation4 + $0xb4] sm:$0xf0]  ;;  %3060 = vmatpush.bf16.msrb.mxu3 %v11520_v24  ;;  %v11556_v24 = vor.u32 %v14948_v22, %v11555_v21  ;;  %v3205_v21 = vld [vmem:[%s21780_s13 + $0x5d8] sm:$0xff] }
 0xba8   :  { %v11382_v44 = vrot.slane %v2555_v39, 9  ;;  %v11392_v10 = vor.u32 %v14905_v0, %v11389_v1  ;;  %3067 = vmatpush.bf16.msra.mxu0 %v11492_v15  ;;  %3034 = vmatpush.bf16.msrb.mxu1 %v11516_v33  ;;  %v11620_v39 = vor.u32 %v14964_v26, %v11619_v36  ;;  %v11587_v1 = vld [vmem:[#allocation4 + $0x188] sm:$0xf]  ;;  %v11576_v15 = vor.u32 %v14950_v13, %v11573_v2  ;;  %v11413_v33 = vld [vmem:[#allocation4 + $0x38] sm:$0xf0] }
 0xba9   :  { %v11588_v4 = vor.u32 %v14956_v3, %v11587_v1  ;;  %v11416_v23 = vor.u32 %v14910_v18, %v11413_v33  ;;  %v14942_v36 = vld [vmem:[#allocation4 + $0x12c] sm:$0xf]  ;;  %v11541_v26 = vld [vmem:[#allocation4 + $0x138] sm:$0xf0] }
 0xbaa   :  { %v2560_v50 = vmul.f32 %v11382_v44, %v2544_v56  ;;  %3047 = vmatpush.bf16.msra.mxu2 %v11392_v10  ;;  %v14922_v44 = vld [vmem:[#allocation4 + $0x8c] sm:$0xf]  ;;  %v11429_v10 = vld [vmem:[#allocation4 + $0x58] sm:$0xf0] }
 0xbab   :  { %3105 = vmatpush.bf16.msra.mxu3 %v11640_v29  ;;  %v11464_v48 = vor.u32 %v14922_v44, %v11461_v46  ;;  %v14908_v29 = vld [vmem:[#allocation4 + $0x14] sm:$0xf0]  ;;  %v11525_v44 = vld [vmem:[#allocation4 + $0x118] sm:$0xf0]  ;;  %v3208_v13 = vld [vmem:[%s21780_s13 + $0x5f0] sm:$0xff] }
 0xbac   :  { %v2561_v61 = vmul.f32 %v2560_v50, %v17204_v14  ;;  %v11396_v9 = vor.u32 %v14908_v29, %v11395_v34  ;;  %v3188_v2 = vld [vmem:[%s21780_s13 + $0x550] sm:$0xff]  ;;  %v3206_v18 = vld [vmem:[%s21780_s13 + $0x5e0] sm:$0xff]  ;;  %v3203_v29 = vld [vmem:[%s21780_s13 + $0x5c8] sm:$0xff] }
 0xbad   :  { %v3186_v33 = vld [vmem:[%s21780_s13 + $0x540] sm:$0xff]  ;;  %v3244_v34 = vld [vmem:[%s21780_s13 + $0x710] sm:$0xff] }
 0xbae   :  { %v2563_v19 = vrot.slane %v2561_v61, 7  ;;  %v11445_v61 = vld [vmem:[#allocation4 + $0x78] sm:$0xf0] }
 0xbaf   :  { %3106 = vmatpush.bf16.msra.mxu3 %v11624_v49  ;;  %v11448_v0 = vor.u32 %v14918_v59, %v11445_v61  ;;  %v14940_v49 = vld [vmem:[#allocation4 + $0x114] sm:$0xf0]  ;;  %v3197_v61 = vld [vmem:[%s21780_s13 + $0x598] sm:$0xff] }
 0xbb0   :  { %v2565_v8 = vsub.f32 %v2544_v56, %v2563_v19  ;;  %v11475_v56 = vld [vmem:[#allocation4 + $0xa8] sm:$0xf]  ;;  %v11589_v19 = vld [vmem:[#allocation4 + $0x198] sm:$0xf0]  ;;  %v11524_v42 = vor.u32 %v14940_v49, %v11523_v40  ;;  %v3221_v49 = vld [vmem:[%s21780_s13 + $0x658] sm:$0xff] }
 0xbb1   :  { %v11476_v31 = vor.u32 %v14928_v30, %v11475_v56  ;;  %v11592_v6 = vor.u32 %v14954_v43, %v11589_v19  ;;  %v14906_v56 = vld [vmem:[#allocation4 + $0xc] sm:$0xf]  ;;  %v11397_v30 = vld [vmem:[#allocation4 + $0x18] sm:$0xf0]  ;;  %v3213_v19 = vld [vmem:[%s21780_s13 + $0x618] sm:$0xff] }
 0xbb2   :  { %v2566_v14 = vsel %vm677_vm1, %v2560_v50, %v2565_v8  ;;  %v11603_v50 = vld [vmem:[#allocation4 + $0x1a8] sm:$0xf]  ;;  %v14914_v8 = vld [vmem:[#allocation4 + $0x4c] sm:$0xf]  ;;  %v3226_v22 = vld [vmem:[%s21780_s13 + $0x680] sm:$0xff] }
 0xbb3   :  { %11383 = vmatmul.msk.f32.vlgmr.msra.gmra.mxu1 %vm1602_vm13, %v2566_v14  ;;  %11384 = vmatmul.msk.f32.vlgmr.msrb.gmra.mxu2 %vm1602_vm13, %v2566_v14  ;;  %v11604_v53 = vor.u32 %v14960_v51, %v11603_v50  ;;  %v11432_v11 = vor.u32 %v14914_v8, %v11429_v10  ;;  %v14952_v14 = vld [vmem:[#allocation4 + $0x174] sm:$0xf0]  ;;  %v3191_v8 = vld [vmem:[%s21780_s13 + $0x568] sm:$0xff]  ;;  %v3200_v40 = vld [vmem:[%s21780_s13 + $0x5b0] sm:$0xff] }
 0xbb4   :  { %3092 = vmatpush.bf16.msrb.mxu2 %v11512_v12  ;;  %3079 = vmatpush.bf16.msra.mxu1 %v11636_v28  ;;  %v11571_v12 = vld [vmem:[#allocation4 + $0x168] sm:$0xf]  ;;  %v11560_v28 = vor.u32 %v14946_v25, %v11557_v27  ;;  %v3210_v10 = vld [vmem:[%s21780_s13 + $0x600] sm:$0xff]  ;;  %v3225_v27 = vld [vmem:[%s21780_s13 + $0x678] sm:$0xff] }
 0xbb5   :  { %3068 = vmatpush.bf16.msra.mxu0 %v11476_v31  ;;  %3107 = vmatpush.bf16.msra.mxu3 %v11608_v55  ;;  %v11572_v62 = vor.u32 %v14952_v14, %v11571_v12  ;;  %v11400_v31 = vor.u32 %v14906_v56, %v11397_v30  ;;  %v3209_v12 = vld [vmem:[%s21780_s13 + $0x5f8] sm:$0xff]  ;;  %v3204_v25 = vld [vmem:[%s21780_s13 + $0x5d0] sm:$0xff]  ;;  %v3243_v30 = vld [vmem:[%s21780_s13 + $0x708] sm:$0xff] }
 0xbb6   :  { %v3189_v14 = vld [vmem:[%s21780_s13 + $0x558] sm:$0xff]  ;;  %v3224_v56 = vld [vmem:[%s21780_s13 + $0x670] sm:$0xff] }
 0xbb8   :  { %3093 = vmatpush.bf16.msrb.mxu2 %v11496_v20  ;;  %3080 = vmatpush.bf16.msra.mxu1 %v11620_v39  ;;  %v11412_v20 = vor.u32 %v14912_v17, %v11411_v16  ;;  %v11544_v39 = vor.u32 %v14942_v36, %v11541_v26  ;;  %v3228_v16 = vld [vmem:[%s21780_s13 + $0x690] sm:$0xff]  ;;  %v3187_v17 = vld [vmem:[%s21780_s13 + $0x548] sm:$0xff]  ;;  %v3182_v36 = vld [vmem:[%s21780_s13 + $0x520] sm:$0xff] }
 0xbb9   :  { %3069 = vmatpush.bf16.msra.mxu0 %v11460_v45  ;;  %3108 = vmatpush.bf16.msra.mxu3 %v11592_v6  ;;  %v11528_v45 = vor.u32 %v14938_v63, %v11525_v44  ;;  %v3192_v6 = vld [vmem:[%s21780_s13 + $0x570] sm:$0xff]  ;;  %v3201_v26 = vld [vmem:[%s21780_s13 + $0x5b8] sm:$0xff] }
 0xbba   :  { %v3240_v63 = vld [vmem:[%s21780_s13 + $0x6f0] sm:$0xff] }
 0xbbb   :  { %v3220_v44 = vld [vmem:[%s21780_s13 + $0x650] sm:$0xff] }
 0xbbc   :  { %3094 = vmatpush.bf16.msrb.mxu2 %v11480_v35  ;;  %3081 = vmatpush.bf16.msra.mxu1 %v11604_v53  ;;  %v14944_v35 = vld [vmem:[#allocation4 + $0x134] sm:$0xf0] }
 0xbbd   :  { %3070 = vmatpush.bf16.msra.mxu0 %v11444_v60  ;;  %3109 = vmatpush.bf16.msra.mxu3 %v11576_v15  ;;  %v11540_v37 = vor.u32 %v14944_v35, %v11539_v32  ;;  %v3207_v15 = vld [vmem:[%s21780_s13 + $0x5e8] sm:$0xff]  ;;  %v3242_v35 = vld [vmem:[%s21780_s13 + $0x700] sm:$0xff] }
 0xbbe   :  { %v3223_v32 = vld [vmem:[%s21780_s13 + $0x668] sm:$0xff] }
 0xbc0   :  { %3095 = vmatpush.bf16.msrb.mxu2 %v11464_v48  ;;  %3082 = vmatpush.bf16.msra.mxu1 %v11588_v4  ;;  %v3194_v4 = vld [vmem:[%s21780_s13 + $0x580] sm:$0xff] }
 0xbc1   :  { %3071 = vmatpush.bf16.msra.mxu0 %v11428_v7  ;;  %3110 = vmatpush.bf16.msra.mxu3 %v11560_v28  ;;  %v3211_v7 = vld [vmem:[%s21780_s13 + $0x608] sm:$0xff]  ;;  %v3184_v28 = vld [vmem:[%s21780_s13 + $0x530] sm:$0xff] }
 0xbc4   :  { %3096 = vmatpush.bf16.msrb.mxu2 %v11448_v0  ;;  %3083 = vmatpush.bf16.msra.mxu1 %v11572_v62  ;;  %v3229_v62 = vld [vmem:[%s21780_s13 + $0x698] sm:$0xff] }
 0xbc5   :  { %3072 = vmatpush.bf16.msra.mxu0 %v11412_v20  ;;  %3111 = vmatpush.bf16.msra.mxu3 %v11544_v39  ;;  %v3227_v20 = vld [vmem:[%s21780_s13 + $0x688] sm:$0xff]  ;;  %v3241_v39 = vld [vmem:[%s21780_s13 + $0x6f8] sm:$0xff] }
 0xbc8   :  { %3097 = vmatpush.bf16.msrb.mxu2 %v11432_v11  ;;  %3084 = vmatpush.bf16.msra.mxu1 %v11556_v24  ;;  %v3190_v11 = vld [vmem:[%s21780_s13 + $0x560] sm:$0xff]  ;;  %v3185_v24 = vld [vmem:[%s21780_s13 + $0x538] sm:$0xff] }
 0xbc9   :  { %3073 = vmatpush.bf16.msra.mxu0 %v11396_v9  ;;  %3112 = vmatpush.bf16.msra.mxu3 %v11528_v45  ;;  %v3183_v9 = vld [vmem:[%s21780_s13 + $0x528] sm:$0xff] }
 0xbca   :  { %v3239_v45 = vld [vmem:[%s21780_s13 + $0x6e8] sm:$0xff] }
 0xbcc   :  { %3098 = vmatpush.bf16.msrb.mxu2 %v11416_v23  ;;  %3085 = vmatpush.bf16.msra.mxu1 %v11540_v37  ;;  %v3245_v23 = vld [vmem:[%s21780_s13 + $0x718] sm:$0xff]  ;;  %v3222_v37 = vld [vmem:[%s21780_s13 + $0x660] sm:$0xff] }
 0xbd0   :  { %3099 = vmatpush.bf16.msrb.mxu2 %v11400_v31  ;;  %3086 = vmatpush.bf16.msra.mxu1 %v11524_v42  ;;  %v3202_v31 = vld [vmem:[%s21780_s13 + $0x5c0] sm:$0xff]  ;;  %v3199_v42 = vld [vmem:[%s21780_s13 + $0x5a8] sm:$0xff] }
 0xc30   :  { %v2591_v46 = vpop.f32.mrf.mxu1 }
 0xc31   :  { %v2614_v48 = vperm.slane %v2591_v46, 0  ;;  %v2618_v51 = vperm.slane %v2591_v46, 1  ;;  %v3198_v46 = vld [vmem:[%s21780_s13 + $0x5a0] sm:$0xff] }
 0xc33   :  { %v2616_v50 = vmul.f32 %v2614_v48, %v17188_v38  ;;  %v3196_v38 = vld [vmem:[%s21780_s13 + $0x590] sm:$0xff]  ;;  %v3219_v48 = vld [vmem:[%s21780_s13 + $0x648] sm:$0xff] }
 0xc35   :  { %v2620_v52 = vadd.f32 %v2618_v51, %v2616_v50  ;;  %v3238_v50 = vld [vmem:[%s21780_s13 + $0x6e0] sm:$0xff] }
 0xc36   :  { %v2611_v53 = vpop.f32.mrf.mxu2  ;;  %v3218_v51 = vld [vmem:[%s21780_s13 + $0x640] sm:$0xff] }
 0xc37   :  { %v2624_v54 = vmul.f32 0.01, %v2620_v52  ;;  %v2615_v55 = vperm.slane %v2611_v53, 0  ;;  %vm2622_vm13 = vcmp.ge.f32.partialorder %v2620_v52, 0.0  ;;  %v2619_v58 = vperm.slane %v2611_v53, 1 }
 0xc39   :  { %v2617_v57 = vmul.f32 %v2615_v55, %v17195_v47  ;;  %v2626_v59 = vsel %vm2622_vm13, %v2620_v52, %v2624_v54  ;;  %v3195_v47 = vld [vmem:[%s21780_s13 + $0x588] sm:$0xff]  ;;  %v3237_v52 = vld [vmem:[%s21780_s13 + $0x6d8] sm:$0xff]  ;;  %v3236_v55 = vld [vmem:[%s21780_s13 + $0x6d0] sm:$0xff] }
 0xc3a   :  { %v2628_v60 = vpack.c.bf16 %v2626_v59, %v2626_v59  ;;  %v3217_v54 = vld [vmem:[%s21780_s13 + $0x638] sm:$0xff]  ;;  %v3215_v59 = vld [vmem:[%s21780_s13 + $0x628] sm:$0xff] }
 0xc3b   :  { %v2621_v0 = vadd.f32 %v2619_v58, %v2617_v57  ;;  %v3216_v57 = vld [vmem:[%s21780_s13 + $0x630] sm:$0xff]  ;;  %v3235_v58 = vld [vmem:[%s21780_s13 + $0x6c8] sm:$0xff] }
 0xc3c   :  { %3022 = vmatmul.bf16.vlgmr.msrb.gmra.mxu0 %v2628_v60  ;;  %3048 = vmatmul.bf16.vlgmr.msra.gmra.mxu2 %v2628_v60 }
 0xc3d   :  { %v2625_v1 = vmul.f32 0.01, %v2621_v0  ;;  %vm2623_vm10 = vcmp.ge.f32.partialorder %v2621_v0, 0.0  ;;  %3246 = vmatpush.msrb.mxu0 %v3197_v61  ;;  %3286 = vmatpush.msra.mxu2 %v3229_v62 }
 0xc3f   :  { %v2627_v3 = vsel %vm2623_vm10, %v2621_v0, %v2625_v1  ;;  %3247 = vmatpush.msrb.mxu0 %v3196_v38  ;;  %3287 = vmatpush.msra.mxu2 %v3228_v16  ;;  %v3214_v38 = vld [vmem:[%s21780_s13 + $0x620] sm:$0xff]  ;;  %v3233_v1 = vld [vmem:[%s21780_s13 + $0x6b8] sm:$0xff] }
 0xc40   :  { %v2629_v43 = vpack.c.bf16 %v2627_v3, %v2627_v3 }
 0xc41   :  { %3248 = vmatpush.msrb.mxu0 %v3195_v47  ;;  %3288 = vmatpush.msra.mxu2 %v3227_v20 }
 0xc42   :  { %3035 = vmatmul.bf16.vlgmr.msrb.gmra.mxu1 %v2629_v43  ;;  %3061 = vmatmul.bf16.vlgmr.msrb.gmra.mxu3 %v2629_v43 }
 0xc43   :  { %3249 = vmatpush.msrb.mxu0 %v3194_v4  ;;  %3266 = vmatpush.msrb.mxu1 %v3213_v19  ;;  %v3232_v19 = vld [vmem:[%s21780_s13 + $0x6b0] sm:$0xff] }
 0xc44   :  { %3289 = vmatpush.msra.mxu2 %v3226_v22  ;;  %3306 = vmatpush.msrb.mxu3 %v3245_v23 }
 0xc45   :  { %3250 = vmatpush.msrb.mxu0 %v3193_v41  ;;  %3267 = vmatpush.msrb.mxu1 %v3212_v5  ;;  %v3231_v5 = vld [vmem:[%s21780_s13 + $0x6a8] sm:$0xff] }
 0xc46   :  { %3290 = vmatpush.msra.mxu2 %v3225_v27  ;;  %3307 = vmatpush.msrb.mxu3 %v3244_v34 }
 0xc47   :  { %3251 = vmatpush.msrb.mxu0 %v3192_v6  ;;  %3268 = vmatpush.msrb.mxu1 %v3211_v7 }
 0xc48   :  { %3291 = vmatpush.msra.mxu2 %v3224_v56  ;;  %3308 = vmatpush.msrb.mxu3 %v3243_v30 }
 0xc49   :  { %3252 = vmatpush.msrb.mxu0 %v3191_v8  ;;  %3269 = vmatpush.msrb.mxu1 %v3210_v10 }
 0xc4a   :  { %3292 = vmatpush.msra.mxu2 %v3223_v32  ;;  %3309 = vmatpush.msrb.mxu3 %v3242_v35 }
 0xc4b   :  { %3253 = vmatpush.msrb.mxu0 %v3190_v11  ;;  %3270 = vmatpush.msrb.mxu1 %v3209_v12  ;;  %v3230_v11 = vld [vmem:[%s21780_s13 + $0x6a0] sm:$0xff] }
 0xc4c   :  { %3074 = vmatmul.bf16.vlgmr.msra.gmra.mxu0 %v2628_v60  ;;  %3100 = vmatmul.bf16.vlgmr.msrb.gmra.mxu2 %v2628_v60  ;;  %v3234_v60 = vld [vmem:[%s21780_s13 + $0x6c0] sm:$0xff] }
 0xc4d   :  { %3254 = vmatpush.msrb.mxu0 %v3189_v14  ;;  %3271 = vmatpush.msrb.mxu1 %v3208_v13 }
 0xc4e   :  { %3293 = vmatpush.msra.mxu2 %v3222_v37  ;;  %3310 = vmatpush.msrb.mxu3 %v3241_v39 }
 0xc4f   :  { %3255 = vmatpush.msrb.mxu0 %v3188_v2  ;;  %3272 = vmatpush.msrb.mxu1 %v3207_v15 }
 0xc50   :  { %3294 = vmatpush.msra.mxu2 %v3221_v49  ;;  %3311 = vmatpush.msrb.mxu3 %v3240_v63 }
 0xc51   :  { %3256 = vmatpush.msrb.mxu0 %v3187_v17  ;;  %3273 = vmatpush.msrb.mxu1 %v3206_v18 }
 0xc52   :  { %3087 = vmatmul.bf16.vlgmr.msra.gmra.mxu1 %v2629_v43  ;;  %3113 = vmatmul.bf16.vlgmr.msra.gmra.mxu3 %v2629_v43 }
 0xc53   :  { %3257 = vmatpush.msrb.mxu0 %v3186_v33  ;;  %3274 = vmatpush.msrb.mxu1 %v3205_v21 }
 0xc54   :  { %3295 = vmatpush.msra.mxu2 %v3220_v44  ;;  %3312 = vmatpush.msrb.mxu3 %v3239_v45 }
 0xc55   :  { %3258 = vmatpush.msrb.mxu0 %v3185_v24  ;;  %3275 = vmatpush.msrb.mxu1 %v3204_v25 }
 0xc56   :  { %3296 = vmatpush.msra.mxu2 %v3219_v48  ;;  %3313 = vmatpush.msrb.mxu3 %v3238_v50 }
 0xc57   :  { %3259 = vmatpush.msrb.mxu0 %v3184_v28  ;;  %3276 = vmatpush.msrb.mxu1 %v3203_v29 }
 0xc58   :  { %3297 = vmatpush.msra.mxu2 %v3218_v51  ;;  %3314 = vmatpush.msrb.mxu3 %v3237_v52 }
 0xc59   :  { %3260 = vmatpush.msrb.mxu0 %v3183_v9  ;;  %3277 = vmatpush.msrb.mxu1 %v3202_v31 }
 0xc5a   :  { %3298 = vmatpush.msra.mxu2 %v3217_v54  ;;  %3315 = vmatpush.msrb.mxu3 %v3236_v55 }
 0xc5b   :  { %3261 = vmatpush.msrb.mxu0 %v3182_v36  ;;  %3278 = vmatpush.msrb.mxu1 %v3201_v26 }
 0xc5c   :  { %3299 = vmatpush.msra.mxu2 %v3216_v57  ;;  %3316 = vmatpush.msrb.mxu3 %v3235_v58 }
 0xc5d   :  { %3279 = vmatpush.msrb.mxu1 %v3200_v40 }
 0xc5e   :  { %3300 = vmatpush.msra.mxu2 %v3215_v59  ;;  %3317 = vmatpush.msrb.mxu3 %v3234_v60 }
 0xc5f   :  { %3280 = vmatpush.msrb.mxu1 %v3199_v42 }
 0xc60   :  { %3301 = vmatpush.msra.mxu2 %v3214_v38  ;;  %3318 = vmatpush.msrb.mxu3 %v3233_v1 }
 0xc61   :  { %3281 = vmatpush.msrb.mxu1 %v3198_v46 }
 0xc62   :  { %3319 = vmatpush.msrb.mxu3 %v3232_v19 }
 0xc64   :  { %3320 = vmatpush.msrb.mxu3 %v3231_v5 }
 0xc66   :  { %3321 = vmatpush.msrb.mxu3 %v3230_v11 }
 0xcb9   :  { %v3023_v53 = vpop.f32.mrf.mxu0 }
 0xcbf   :  { %v3036_v61 = vpop.f32.mrf.mxu1  ;;  %v3049_v0 = vpop.f32.mrf.mxu2 }
 0xcc0   :  { %v17413_v47 = vadd.f32 %v3036_v61, %v3023_v53 }
 0xcc1   :  { %v3025_v3 = vpop.f32.mrf.mxu0 }
 0xcc2   :  { %v3118_v43 = vsel %vm616_vm0, %v17413_v47, 0.0  ;;  %v3146_v4 = vmul.f32 %v17413_v47, %v17413_v47 }
 0xcc3   :  { %v3119_v41 = vrot.slane %v3118_v43, 4 }
 0xcc4   :  { %v3150_v6 = vsel %vm616_vm0, %v3146_v4, 0.0 }
 0xcc5   :  { %v3120_v7 = vadd.f32 %v3119_v41, %v3118_v43  ;;  %v3151_v8 = vrot.slane %v3150_v6, 4  ;;  %v3062_v10 = vpop.f32.mrf.mxu3 }
 0xcc6   :  { %v17429_v12 = vadd.f32 %v3062_v10, %v3049_v0 }
 0xcc7   :  { %v3121_v14 = vrot.slane %v3120_v7, 2  ;;  %v3152_v13 = vadd.f32 %v3151_v8, %v3150_v6  ;;  %v3038_v62 = vpop.f32.mrf.mxu1  ;;  %v3051_v2 = vpop.f32.mrf.mxu2 }
 0xcc8   :  { %v3125_v15 = vsel %vm616_vm0, %v17429_v12, 0.0  ;;  %v3147_v16 = vmul.f32 %v17429_v12, %v17429_v12 }
 0xcc9   :  { %v3122_v17 = vadd.f32 %v3121_v14, %v3120_v7  ;;  %v3153_v18 = vrot.slane %v3152_v13, 2  ;;  %v3126_v20 = vrot.slane %v3125_v15, 4  ;;  %v3075_v33 = vpop.f32.mrf.mxu0 }
 0xcca   :  { %v3157_v21 = vsel %vm616_vm0, %v3147_v16, 0.0 }
 0xccb   :  { %v3127_v22 = vadd.f32 %v3126_v20, %v3125_v15  ;;  %v3158_v23 = vrot.slane %v3157_v21, 4  ;;  %v3123_v24 = vrot.slane %v3122_v17, 1  ;;  %v3154_v25 = vadd.f32 %v3153_v18, %v3152_v13 }
 0xccd   :  { %v3128_v27 = vrot.slane %v3127_v22, 2  ;;  %v3159_v34 = vadd.f32 %v3158_v23, %v3157_v21  ;;  %v3064_v28 = vpop.f32.mrf.mxu3  ;;  %v3155_v29 = vrot.slane %v3154_v25, 1  ;;  %v3124_v32 = vadd.f32 %v3123_v24, %v3122_v17 }
 0xccf   :  { %v3129_v56 = vadd.f32 %v3128_v27, %v3127_v22  ;;  %v3160_v30 = vrot.slane %v3159_v34, 2  ;;  %v3088_v9 = vpop.f32.mrf.mxu1  ;;  %v3101_v31 = vpop.f32.mrf.mxu2  ;;  %v3156_v35 = vadd.f32 %v3155_v29, %v3154_v25 }
 0xcd0   :  { %v17436_v36 = vadd.f32 %v3088_v9, %v3075_v33  ;;  %v3357_v9 = vld [vmem:[#allocation7 + $0x888] sm:$0xff] }
 0xcd1   :  { %v3077_v26 = vpop.f32.mrf.mxu0  ;;  %v3178_v37 = vsel %vm677_vm1, %v3124_v32, %v3156_v35  ;;  %v3130_v39 = vrot.slane %v3129_v56, 1  ;;  %v3161_v40 = vadd.f32 %v3160_v30, %v3159_v34  ;;  %v3356_v30 = vld [vmem:[#allocation7 + $0x880] sm:$0xff]  ;;  %3398 = vmatpush.msra.mxu1 %v3357_v9  ;;  %v11776_v9 = vld [vmem:[%s21776_s9 + $0x100] sm:$0xf] }
 0xcd2   :  { %v3132_v49 = vsel %vm616_vm0, %v17436_v36, 0.0  ;;  %v3148_v63 = vmul.f32 %v17436_v36, %v17436_v36  ;;  %3262 = vmatmul.f32.vlgmr.msrb.gmra.mxu0 %v3178_v37  ;;  %v3359_v26 = vld [vmem:[#allocation7 + $0x898] sm:$0xff] }
 0xcd3   :  { %v3133_v42 = vrot.slane %v3132_v49, 4  ;;  %v3162_v44 = vrot.slane %v3161_v40, 1  ;;  %v3131_v51 = vadd.f32 %v3130_v39, %v3129_v56  ;;  %3378 = vmatpush.msra.mxu0 %v3356_v30  ;;  %v12096_v37 = vld [vmem:[%s21776_s9 + $0x380] sm:$0xf] }
 0xcd4   :  { %v3164_v45 = vsel %vm616_vm0, %v3148_v63, 0.0  ;;  %v15089_v39 = vld [vmem:[%s21776_s9 + $0x3bc] sm:$0xf0] }
 0xcd5   :  { %v3134_v46 = vadd.f32 %v3133_v42, %v3132_v49  ;;  %v3165_v48 = vrot.slane %v3164_v45, 4  ;;  %v3114_v50 = vpop.f32.mrf.mxu3  ;;  %v3163_v52 = vadd.f32 %v3162_v44, %v3161_v40  ;;  %3438 = vmatpush.msrb.mxu0 %v3359_v26  ;;  %v12608_v40 = vld [vmem:[%s21776_s9 + $0x780] sm:$0xf]  ;;  %v12097_v63 = vor.u32 %v15089_v39, %v12096_v37 }
 0xcd6   :  { %v17444_v53 = vadd.f32 %v3114_v50, %v3101_v31  ;;  %v3358_v31 = vld [vmem:[#allocation7 + $0x890] sm:$0xff]  ;;  %v15217_v42 = vld [vmem:[%s21776_s9 + $0x7bc] sm:$0xf0] }
 0xcd7   :  { %v3135_v54 = vrot.slane %v3134_v46, 2  ;;  %v3166_v55 = vadd.f32 %v3165_v48, %v3164_v45  ;;  %v3090_v57 = vpop.f32.mrf.mxu1  ;;  %v3103_v58 = vpop.f32.mrf.mxu2  ;;  %v3179_v59 = vsel %vm677_vm1, %v3131_v51, %v3163_v52  ;;  %3418 = vmatpush.msrb.mxu2 %v3358_v31  ;;  %v12032_v44 = vld [vmem:[%s21776_s9 + $0x300] sm:$0xf]  ;;  %v12609_v48 = vor.u32 %v15217_v42, %v12608_v40 }
 0xcd8   :  { %v3139_v60 = vsel %vm616_vm0, %v17444_v53, 0.0  ;;  %v3149_v61 = vmul.f32 %v17444_v53, %v17444_v53  ;;  %3282 = vmatmul.f32.vlgmr.msrb.gmra.mxu1 %v3179_v59  ;;  %v15073_v45 = vld [vmem:[%s21776_s9 + $0x33c] sm:$0xf0] }
 0xcd9   :  { %v3136_v0 = vadd.f32 %v3135_v54, %v3134_v46  ;;  %v3167_v38 = vrot.slane %v3166_v55, 2  ;;  %v3140_v1 = vrot.slane %v3139_v60, 4  ;;  %v12544_v50 = vld [vmem:[%s21776_s9 + $0x700] sm:$0xf]  ;;  %6547 = vmatpush.bf16.msrb.mxu1 %v12097_v63  ;;  %v12033_v54 = vor.u32 %v15073_v45, %v12032_v44 }
 0xcda   :  { %v3171_v3 = vsel %vm616_vm0, %v3149_v61, 0.0  ;;  %v15201_v51 = vld [vmem:[%s21776_s9 + $0x73c] sm:$0xf0] }
 0xcdb   :  { %v3141_v43 = vadd.f32 %v3140_v1, %v3139_v60  ;;  %v3172_v4 = vrot.slane %v3171_v3, 4  ;;  %v3137_v19 = vrot.slane %v3136_v0, 1  ;;  %v3168_v41 = vadd.f32 %v3167_v38, %v3166_v55  ;;  %v13120_v52 = vld [vmem:[%s21776_s9 + $0xb80] sm:$0xf] }
 0xcdc   :  { %v15345_v55 = vld [vmem:[%s21776_s9 + $0xbbc] sm:$0xf0]  ;;  %v12545_v58 = vor.u32 %v15201_v51, %v12544_v50 }
 0xcdd   :  { %v3142_v5 = vrot.slane %v3141_v43, 2  ;;  %v3173_v6 = vadd.f32 %v3172_v4, %v3171_v3  ;;  %v3116_v7 = vpop.f32.mrf.mxu3  ;;  %v3169_v8 = vrot.slane %v3168_v41, 1  ;;  %v3138_v14 = vadd.f32 %v3137_v19, %v3136_v0  ;;  %v11968_v60 = vld [vmem:[%s21776_s9 + $0x280] sm:$0xf]  ;;  %6548 = vmatpush.bf16.msrb.mxu1 %v12033_v54 }
 0xcde   :  { %v13121_v59 = vor.u32 %v15345_v55, %v13120_v52  ;;  %v15057_v61 = vld [vmem:[%s21776_s9 + $0x2bc] sm:$0xf0] }
 0xcdf   :  { %v3143_v10 = vadd.f32 %v3142_v5, %v3141_v43  ;;  %v3174_v11 = vrot.slane %v3173_v6, 2  ;;  %v3170_v13 = vadd.f32 %v3169_v8, %v3168_v41  ;;  %v12480_v0 = vld [vmem:[%s21776_s9 + $0x680] sm:$0xf]  ;;  %v11969_v4 = vor.u32 %v15057_v61, %v11968_v60 }
 0xce0   :  { %v15185_v38 = vld [vmem:[%s21776_s9 + $0x6bc] sm:$0xf0]  ;;  %6573 = vmatpush.bf16.msra.mxu3 %v13121_v59 }
 0xce1   :  { %v3180_v62 = vsel %vm677_vm1, %v3138_v14, %v3170_v13  ;;  %v3144_v2 = vrot.slane %v3143_v10, 1  ;;  %v3175_v15 = vadd.f32 %v3174_v11, %v3173_v6  ;;  %v13056_v1 = vld [vmem:[%s21776_s9 + $0xb00] sm:$0xf]  ;;  %v12481_v6 = vor.u32 %v15185_v38, %v12480_v0  ;;  %6549 = vmatpush.bf16.msrb.mxu1 %v11969_v4  ;;  %v12098_v4 = vld [vmem:[%s21776_s9 + $0x3c0] sm:$0xf0] }
 0xce2   :  { %3302 = vmatmul.f32.vlgmr.msra.gmra.mxu2 %v3180_v62  ;;  %v15329_v43 = vld [vmem:[%s21776_s9 + $0xb3c] sm:$0xf0] }
 0xce3   :  { %v3176_v16 = vrot.slane %v3175_v15, 1  ;;  %v3145_v17 = vadd.f32 %v3144_v2, %v3143_v10  ;;  %6560 = vmatpush.bf16.msra.mxu2 %v12609_v48  ;;  %v13057_v19 = vor.u32 %v15329_v43, %v13056_v1  ;;  %v11904_v41 = vld [vmem:[%s21776_s9 + $0x200] sm:$0xf]  ;;  %v3333_v2 = vld [vmem:[%s21779_s12 + $0xc] sm:$0x3] }
 0xce4   :  { %v15041_v7 = vld [vmem:[%s21776_s9 + $0x23c] sm:$0xf0]  ;;  %v15081_v43 = vld [vmem:[%s21776_s9 + $0x384] sm:$0xf] }
 0xce5   :  { %v3177_v18 = vadd.f32 %v3176_v16, %v3175_v15  ;;  %v12416_v8 = vld [vmem:[%s21776_s9 + $0x600] sm:$0xf]  ;;  %6574 = vmatpush.bf16.msra.mxu3 %v13057_v19  ;;  %v11905_v15 = vor.u32 %v15041_v7, %v11904_v41 }
 0xce6   :  { %v15169_v10 = vld [vmem:[%s21776_s9 + $0x63c] sm:$0xf0] }
 0xce7   :  { %v3181_v20 = vsel %vm677_vm1, %v3145_v17, %v3177_v18  ;;  %6561 = vmatpush.bf16.msra.mxu2 %v12545_v58  ;;  %v12992_v11 = vld [vmem:[%s21776_s9 + $0xa80] sm:$0xf]  ;;  %v12417_v18 = vor.u32 %v15169_v10, %v12416_v8  ;;  %6550 = vmatpush.bf16.msrb.mxu1 %v11905_v15  ;;  %v15209_v10 = vld [vmem:[%s21776_s9 + $0x784] sm:$0xf] }
 0xce8   :  { %3322 = vmatmul.f32.vlgmr.msrb.gmra.mxu3 %v3181_v20  ;;  %v15313_v14 = vld [vmem:[%s21776_s9 + $0xabc] sm:$0xf0]  ;;  %v13122_v15 = vld [vmem:[%s21776_s9 + $0xbc0] sm:$0xf0] }
 0xce9   :  { %v12993_v62 = vor.u32 %v15313_v14, %v12992_v11  ;;  %v12928_v16 = vld [vmem:[%s21776_s9 + $0xa00] sm:$0xf] }
 0xcea   :  { %v11840_v20 = vld [vmem:[%s21776_s9 + $0x180] sm:$0xf] }
 0xceb   :  { %6562 = vmatpush.bf16.msra.mxu2 %v12481_v6  ;;  %6575 = vmatpush.bf16.msra.mxu3 %v12993_v62  ;;  %v15009_v31 = vld [vmem:[%s21776_s9 + $0x13c] sm:$0xf0]  ;;  %v12610_v62 = vld [vmem:[%s21776_s9 + $0x7c0] sm:$0xf0] }
 0xcec   :  { %v15473_v26 = vld [vmem:[%s21776_s9 + $0xfbc] sm:$0xf0] }
 0xced   :  { %v12288_v37 = vld [vmem:[%s21776_s9 + $0x500] sm:$0xf] }
 0xcee   :  { %v15137_v39 = vld [vmem:[%s21776_s9 + $0x53c] sm:$0xf0] }
 0xcef   :  { %6563 = vmatpush.bf16.msra.mxu2 %v12417_v18  ;;  %v12800_v63 = vld [vmem:[%s21776_s9 + $0x900] sm:$0xf]  ;;  %v12289_v52 = vor.u32 %v15137_v39, %v12288_v37  ;;  %v12034_v18 = vld [vmem:[%s21776_s9 + $0x340] sm:$0xf0] }
 0xcf0   :  { %v15265_v42 = vld [vmem:[%s21776_s9 + $0x93c] sm:$0xf0]  ;;  %v15177_v37 = vld [vmem:[%s21776_s9 + $0x684] sm:$0xf] }
 0xcf1   :  { %v11712_v44 = vld [vmem:[%s21776_s9 + $0x80] sm:$0xf]  ;;  %v12801_v55 = vor.u32 %v15265_v42, %v12800_v63  ;;  %v12994_v63 = vld [vmem:[%s21776_s9 + $0xac0] sm:$0xf0] }
 0xcf2   :  { %v14993_v45 = vld [vmem:[%s21776_s9 + $0xbc] sm:$0xf0] }
 0xcf3   :  { %v13568_v50 = vld [vmem:[%s21776_s9 + $0xf00] sm:$0xf]  ;;  %v11713_v58 = vor.u32 %v14993_v45, %v11712_v44  ;;  %v15033_v44 = vld [vmem:[%s21776_s9 + $0x204] sm:$0xf] }
 0xcf4   :  { %v15457_v51 = vld [vmem:[%s21776_s9 + $0xf3c] sm:$0xf0]  ;;  %v11906_v45 = vld [vmem:[%s21776_s9 + $0x240] sm:$0xf0] }
 0xcf5   :  { %v12224_v54 = vld [vmem:[%s21776_s9 + $0x480] sm:$0xf]  ;;  %v13569_v1 = vor.u32 %v15457_v51, %v13568_v50 }
 0xcf6   :  { %v15121_v59 = vld [vmem:[%s21776_s9 + $0x4bc] sm:$0xf0] }
 0xcf7   :  { %v12736_v60 = vld [vmem:[%s21776_s9 + $0x880] sm:$0xf]  ;;  %v12225_v41 = vor.u32 %v15121_v59, %v12224_v54  ;;  %v15161_v54 = vld [vmem:[%s21776_s9 + $0x604] sm:$0xf] }
 0xcf8   :  { %v15249_v61 = vld [vmem:[%s21776_s9 + $0x8bc] sm:$0xf0]  ;;  %v11842_v59 = vld [vmem:[%s21776_s9 + $0x1c0] sm:$0xf0] }
 0xcf9   :  { %v11648_v0 = vld [vmem:[%s21776_s9] sm:$0xf]  ;;  %v12737_v7 = vor.u32 %v15249_v61, %v12736_v60 }
 0xcfa   :  { %v14977_v38 = vld [vmem:[%s21776_s9 + $0x3c] sm:$0xf0] }
 0xcfb   :  { %v15441_v19 = vld [vmem:[%s21776_s9 + $0xebc] sm:$0xf0]  ;;  %v11649_v8 = vor.u32 %v14977_v38, %v11648_v0 }
 0xcfc   :  { %v15105_v6 = vld [vmem:[%s21776_s9 + $0x43c] sm:$0xf0] }
 0xcfd   :  { %v12672_v11 = vld [vmem:[%s21776_s9 + $0x800] sm:$0xf] }
 0xcfe   :  { %v15233_v14 = vld [vmem:[%s21776_s9 + $0x83c] sm:$0xf0] }
 0xcff   :  { %v13248_v60 = vld [vmem:[%s21776_s9 + $0xc80] sm:$0xf] }
 0xd00   :  { %v15377_v61 = vld [vmem:[%s21776_s9 + $0xcbc] sm:$0xf0] }
 0xd4f   :  { %v3263_v21 = vpop.f32.mrf.mxu0 }
 0xd55   :  { %v3283_v33 = vpop.f32.mrf.mxu1 }
 0xd56   :  { %v3284_v23 = vadd.f32 %v3283_v33, %v3263_v21  ;;  %v15025_v33 = vld [vmem:[%s21776_s9 + $0x1bc] sm:$0xf0] }
 0xd57   :  { %v15297_v21 = vld [vmem:[%s21776_s9 + $0xa3c] sm:$0xf0] }
 0xd65   :  { %v3303_v22 = vpop.f32.mrf.mxu2 }
 0xd66   :  { %v3304_v24 = vadd.f32 %v3303_v22, %v3284_v23  ;;  %v12352_v23 = vld [vmem:[%s21776_s9 + $0x580] sm:$0xf] }
 0xd6b   :  { %v3323_v25 = vpop.f32.mrf.mxu3 }
 0xd6c   :  { %v3324_v27 = vadd.f32 %v3323_v25, %v3304_v24  ;;  %v15153_v24 = vld [vmem:[%s21776_s9 + $0x5bc] sm:$0xf0]  ;;  %v12929_v25 = vor.u32 %v15297_v21, %v12928_v16 }
 0xd6d   :  { %v12353_v30 = vor.u32 %v15153_v24, %v12352_v23  ;;  %v12613_v23 = vor.u32 %v15209_v10, %v12610_v62  ;;  %v15193_v24 = vld [vmem:[%s21776_s9 + $0x704] sm:$0xf] }
 0xd6e   :  { %v17454_v34 = vmul.f32 0.0078125, %v3324_v27  ;;  %6576 = vmatpush.bf16.msra.mxu3 %v12929_v25  ;;  %v15449_v10 = vld [vmem:[%s21776_s9 + $0xf04] sm:$0xf] }
 0xd6f   :  { %6564 = vmatpush.bf16.msra.mxu2 %v12353_v30  ;;  %v13506_v62 = vld [vmem:[%s21776_s9 + $0xec0] sm:$0xf0] }
 0xd70   :  { %v3327_v28 = vmul.f32 %v17454_v34, %v17454_v34 }
 0xd72   :  { %v3329_v29 = vrot.slane %v3327_v28, 7  ;;  %v11841_v28 = vor.u32 %v15025_v33, %v11840_v20  ;;  %v13440_v20 = vld [vmem:[%s21776_s9 + $0xe00] sm:$0xf] }
 0xd73   :  { %6565 = vmatpush.bf16.msra.mxu2 %v12289_v52  ;;  %v15425_v33 = vld [vmem:[%s21776_s9 + $0xe3c] sm:$0xf0]  ;;  %v11909_v52 = vor.u32 %v15033_v44, %v11906_v45  ;;  %v11650_v44 = vld [vmem:[%s21776_s9 + $0x40] sm:$0xf0] }
 0xd74   :  { %v3331_v56 = vsub.f32 %v17454_v34, %v3329_v29  ;;  %v12864_v29 = vld [vmem:[%s21776_s9 + $0x980] sm:$0xf]  ;;  %6551 = vmatpush.bf16.msrb.mxu1 %v11841_v28  ;;  %v12546_v28 = vld [vmem:[%s21776_s9 + $0x740] sm:$0xf0]  ;;  %v13441_v30 = vor.u32 %v15425_v33, %v13440_v20 }
 0xd75   :  { %v11778_v20 = vld [vmem:[%s21776_s9 + $0x140] sm:$0xf0] }
 0xd76   :  { %v3332_v32 = vmax.f32 %v3331_v56, 0.0  ;;  %v15281_v56 = vld [vmem:[%s21776_s9 + $0x9bc] sm:$0xf0]  ;;  %v15129_v33 = vld [vmem:[%s21776_s9 + $0x504] sm:$0xf] }
 0xd77   :  { %v12865_v40 = vor.u32 %v15281_v56, %v12864_v29  ;;  %6566 = vmatpush.bf16.msra.mxu2 %v12225_v41  ;;  %v15321_v29 = vld [vmem:[%s21776_s9 + $0xb04] sm:$0xf] }
 0xd78   :  { %v3334_v35 = vadd.f32 1e-05, %v3332_v32  ;;  %v13058_v56 = vld [vmem:[%s21776_s9 + $0xb40] sm:$0xf0] }
 0xd79   :  { %6577 = vmatpush.bf16.msra.mxu3 %v12865_v40  ;;  %v13061_v39 = vor.u32 %v15321_v29, %v13058_v56  ;;  %v15465_v41 = vld [vmem:[%s21776_s9 + $0xf84] sm:$0xf] }
 0xd7a   :  { %15763 = vrsqrt.f32 %v3334_v35  ;;  %vm3341_vm12 = vweird.f32 %v3334_v35  ;;  %v12866_v29 = vld [vmem:[%s21776_s9 + $0x9c0] sm:$0xf0] }
 0xd7b   :  { %v15097_v45 = vld [vmem:[%s21776_s9 + $0x404] sm:$0xf] }
 0xd7d   :  { %6578 = vmatpush.bf16.msra.mxu3 %v12801_v55  ;;  %v12418_v55 = vld [vmem:[%s21776_s9 + $0x640] sm:$0xf0] }
 0xd7e   :  { %v12421_v0 = vor.u32 %v15161_v54, %v12418_v55  ;;  %v15241_v55 = vld [vmem:[%s21776_s9 + $0x884] sm:$0xf] }
 0xd80   :  { %v15764_v49 = vpop.eup %15763 }
 0xd81   :  { %v3336_v46 = vmul.f32 %v15764_v49, %v3334_v35  ;;  %vm3342_vm11 = vweird.f32 %v15764_v49  ;;  %v13632_v35 = vld [vmem:[%s21776_s9 + $0xf80] sm:$0xf]  ;;  %6579 = vmatpush.bf16.msra.mxu3 %v12737_v7 }
 0xd82   :  { %vm3343_vm14 = vmor %vm3341_vm12, %vm3342_vm11  ;;  %v13633_v48 = vor.u32 %v15473_v26, %v13632_v35  ;;  %v15409_v35 = vld [vmem:[%s21776_s9 + $0xdbc] sm:$0xf0]  ;;  %v12549_v26 = vor.u32 %v15193_v24, %v12546_v28  ;;  %v13442_v24 = vld [vmem:[%s21776_s9 + $0xe40] sm:$0xf0] }
 0xd83   :  { %v3337_v57 = vmul.f32 %v15764_v49, %v3336_v46  ;;  %v15273_v28 = vld [vmem:[%s21776_s9 + $0x984] sm:$0xf] }
 0xd84   :  { %v12869_v56 = vor.u32 %v15273_v28, %v12866_v29 }
 0xd85   :  { %v3338_v3 = vmul.f32 0.5, %v3337_v57 }
 0xd87   :  { %v3339_v5 = vsub.f32 1.5, %v3338_v3  ;;  %v13504_v3 = vld [vmem:[%s21776_s9 + $0xe80] sm:$0xf] }
 0xd88   :  { %v13505_v16 = vor.u32 %v15441_v19, %v13504_v3  ;;  %v12354_v3 = vld [vmem:[%s21776_s9 + $0x5c0] sm:$0xf0]  ;;  %v15361_v19 = vld [vmem:[%s21776_s9 + $0xc3c] sm:$0xf0] }
 0xd89   :  { %v3340_v13 = vmul.f32 %v15764_v49, %v3339_v5  ;;  %v12160_v5 = vld [vmem:[%s21776_s9 + $0x400] sm:$0xf] }
 0xd8a   :  { %v12161_v21 = vor.u32 %v15105_v6, %v12160_v5  ;;  %v13634_v5 = vld [vmem:[%s21776_s9 + $0xfc0] sm:$0xf0] }
 0xd8b   :  { %v3344_v17 = vsel %vm3343_vm14, %v15764_v49, %v3340_v13  ;;  %v12101_v13 = vor.u32 %v15081_v43, %v12098_v4  ;;  %v13249_v43 = vor.u32 %v15377_v61, %v13248_v60  ;;  %v13184_v4 = vld [vmem:[%s21776_s9 + $0xc00] sm:$0xf]  ;;  %v13250_v60 = vld [vmem:[%s21776_s9 + $0xcc0] sm:$0xf0] }
 0xd8c   :  { %v11641_v22 = vrot.slane %v3344_v17, 9  ;;  %v15065_v17 = vld [vmem:[%s21776_s9 + $0x304] sm:$0xf]  ;;  %6567 = vmatpush.bf16.msra.mxu2 %v12161_v21  ;;  %v13185_v7 = vor.u32 %v15361_v19, %v13184_v4 }
 0xd8e   :  { %v3349_v27 = vmul.f32 %v11641_v22, %v3333_v2  ;;  %v12673_v22 = vor.u32 %v15233_v14, %v12672_v11  ;;  %v13570_v11 = vld [vmem:[%s21776_s9 + $0xf40] sm:$0xf0] }
 0xd8f   :  { %v13573_v14 = vor.u32 %v15449_v10, %v13570_v11 }
 0xd90   :  { %v3350_v32 = vmul.f32 %v3349_v27, %v17454_v34  ;;  %v11777_v34 = vor.u32 %v15009_v31, %v11776_v9  ;;  %v15049_v9 = vld [vmem:[%s21776_s9 + $0x284] sm:$0xf]  ;;  %6580 = vmatpush.bf16.msra.mxu3 %v12673_v22 }
 0xd91   :  { %v11970_v31 = vld [vmem:[%s21776_s9 + $0x2c0] sm:$0xf0] }
 0xd92   :  { %v3352_v49 = vrot.slane %v3350_v32, 7  ;;  %6552 = vmatpush.bf16.msrb.mxu1 %v11777_v34  ;;  %v13376_v32 = vld [vmem:[%s21776_s9 + $0xd80] sm:$0xf]  ;;  %v11973_v40 = vor.u32 %v15049_v9, %v11970_v31  ;;  %v15305_v34 = vld [vmem:[%s21776_s9 + $0xa84] sm:$0xf] }
 0xd93   :  { %v13377_v42 = vor.u32 %v15409_v35, %v13376_v32  ;;  %v12997_v51 = vor.u32 %v15305_v34, %v12994_v63  ;;  %v12290_v22 = vld [vmem:[%s21776_s9 + $0x540] sm:$0xf0] }
 0xd94   :  { %v3354_v46 = vsub.f32 %v3333_v2, %v3352_v49  ;;  %v15337_v2 = vld [vmem:[%s21776_s9 + $0xb84] sm:$0xf] }
 0xd95   :  { %v13125_v25 = vor.u32 %v15337_v2, %v13122_v15  ;;  %v12482_v49 = vld [vmem:[%s21776_s9 + $0x6c0] sm:$0xf0] }
 0xd96   :  { %v3355_v57 = vsel %vm677_vm1, %v3349_v27, %v3354_v46  ;;  %6553 = vmatpush.bf16.msrb.mxu1 %v11713_v58  ;;  %v12037_v27 = vor.u32 %v15065_v17, %v12034_v18  ;;  %v13312_v46 = vld [vmem:[%s21776_s9 + $0xd00] sm:$0xf]  ;;  %v12485_v50 = vor.u32 %v15177_v37, %v12482_v49  ;;  %v15017_v58 = vld [vmem:[%s21776_s9 + $0x184] sm:$0xf] }
 0xd97   :  { %11642 = vmatmul.msk.f32.vlgmr.msra.gmra.mxu0 %vm860_vm5, %v3355_v57  ;;  %11643 = vmatmul.msk.f32.vlgmr.msra.gmra.mxu1 %vm860_vm5, %v3355_v57  ;;  %v11845_v38 = vor.u32 %v15017_v58, %v11842_v59  ;;  %v15289_v15 = vld [vmem:[%s21776_s9 + $0xa04] sm:$0xf] }
 0xd98   :  { %11644 = vmatmul.msk.f32.vlgmr.msrb.gmra.mxu2 %vm860_vm5, %v3355_v57  ;;  %6586 = vmatpush.bf16.msra.mxu0 %v13633_v48  ;;  %v15393_v48 = vld [vmem:[%s21776_s9 + $0xd3c] sm:$0xf0]  ;;  %v15001_v18 = vld [vmem:[%s21776_s9 + $0x104] sm:$0xf] }
 0xd99   :  { %6612 = vmatpush.bf16.msrb.mxu2 %v12613_v23  ;;  %6625 = vmatpush.bf16.msrb.mxu3 %v13125_v25  ;;  %v11781_v21 = vor.u32 %v15001_v18, %v11778_v20  ;;  %v15417_v23 = vld [vmem:[%s21776_s9 + $0xe04] sm:$0xf]  ;;  %v12293_v25 = vor.u32 %v15129_v33, %v12290_v22 }
 0xd9a   :  { %6554 = vmatpush.bf16.msrb.mxu1 %v11649_v8  ;;  %v13637_v8 = vor.u32 %v15465_v41, %v13634_v5  ;;  %v11714_v9 = vld [vmem:[%s21776_s9 + $0xc0] sm:$0xf0] }
 0xd9b   :  { %v15113_v31 = vld [vmem:[%s21776_s9 + $0x484] sm:$0xf] }
 0xd9c   :  { %6587 = vmatpush.bf16.msra.mxu0 %v13569_v1  ;;  %v15145_v1 = vld [vmem:[%s21776_s9 + $0x584] sm:$0xf] }
 0xd9d   :  { %6613 = vmatpush.bf16.msrb.mxu2 %v12549_v26  ;;  %6626 = vmatpush.bf16.msrb.mxu3 %v13061_v39  ;;  %v12357_v6 = vor.u32 %v15145_v1, %v12354_v3  ;;  %v12226_v35 = vld [vmem:[%s21776_s9 + $0x4c0] sm:$0xf0] }
 0xd9e   :  { %6599 = vmatpush.bf16.msra.mxu1 %v12101_v13  ;;  %v15433_v13 = vld [vmem:[%s21776_s9 + $0xe84] sm:$0xf]  ;;  %v12229_v39 = vor.u32 %v15113_v31, %v12226_v35  ;;  %v15202_v31 = vld [vmem:[%s21776_s9 + $0x744] sm:$0xf0] }
 0xd9f   :  { %11645 = vmatmul.msk.f32.vlgmr.msrb.gmra.mxu0 %vm860_vm5, %v3355_v57  ;;  %v13313_v57 = vor.u32 %v15393_v48, %v13312_v46  ;;  %v13509_v2 = vor.u32 %v15433_v13, %v13506_v62  ;;  %v15401_v26 = vld [vmem:[%s21776_s9 + $0xd84] sm:$0xf]  ;;  %v12104_v62 = vld [vmem:[%s21776_s9 + $0x388] sm:$0xf] }
 0xda0   :  { %6588 = vmatpush.bf16.msra.mxu0 %v13505_v16  ;;  %v12930_v16 = vld [vmem:[%s21776_s9 + $0xa40] sm:$0xf0] }
 0xda1   :  { %6614 = vmatpush.bf16.msrb.mxu2 %v12485_v50  ;;  %6627 = vmatpush.bf16.msrb.mxu3 %v12997_v51  ;;  %v12933_v17 = vor.u32 %v15289_v15, %v12930_v16  ;;  %v13378_v37 = vld [vmem:[%s21776_s9 + $0xdc0] sm:$0xf0]  ;;  %v12616_v15 = vld [vmem:[%s21776_s9 + $0x788] sm:$0xf] }
 0xda2   :  { %6600 = vmatpush.bf16.msra.mxu1 %v12037_v27  ;;  %v13445_v27 = vor.u32 %v15417_v23, %v13442_v24  ;;  %v15257_v49 = vld [vmem:[%s21776_s9 + $0x904] sm:$0xf] }
 0xda3   :  { %v12802_v34 = vld [vmem:[%s21776_s9 + $0x940] sm:$0xf0] }
 0xda4   :  { %6589 = vmatpush.bf16.msra.mxu0 %v13441_v30  ;;  %v14985_v30 = vld [vmem:[%s21776_s9 + $0x84] sm:$0xf]  ;;  %v12805_v63 = vor.u32 %v15257_v49, %v12802_v34  ;;  %v15058_v34 = vld [vmem:[%s21776_s9 + $0x2c4] sm:$0xf0] }
 0xda5   :  { %6615 = vmatpush.bf16.msrb.mxu2 %v12421_v0  ;;  %6628 = vmatpush.bf16.msrb.mxu3 %v12933_v17  ;;  %v11717_v32 = vor.u32 %v14985_v30, %v11714_v9  ;;  %v12162_v48 = vld [vmem:[%s21776_s9 + $0x440] sm:$0xf0]  ;;  %v12552_v9 = vld [vmem:[%s21776_s9 + $0x708] sm:$0xf] }
 0xda6   :  { %6601 = vmatpush.bf16.msra.mxu1 %v11973_v40  ;;  %v13381_v40 = vor.u32 %v15401_v26, %v13378_v37  ;;  %v15385_v50 = vld [vmem:[%s21776_s9 + $0xd04] sm:$0xf]  ;;  %v15346_v37 = vld [vmem:[%s21776_s9 + $0xbc4] sm:$0xf0]  ;;  %v12553_v49 = vor.u32 %v15202_v31, %v12552_v9 }
 0xda7   :  { %v13314_v51 = vld [vmem:[%s21776_s9 + $0xd40] sm:$0xf0] }
 0xda8   :  { %6590 = vmatpush.bf16.msra.mxu0 %v13377_v42  ;;  %v14969_v42 = vld [vmem:[%s21776_s9 + $0x4] sm:$0xf]  ;;  %v13317_v54 = vor.u32 %v15385_v50, %v13314_v51 }
 0xda9   :  { %6616 = vmatpush.bf16.msrb.mxu2 %v12357_v6  ;;  %6629 = vmatpush.bf16.msrb.mxu3 %v12869_v56  ;;  %v11653_v46 = vor.u32 %v14969_v42, %v11650_v44  ;;  %v15369_v59 = vld [vmem:[%s21776_s9 + $0xc84] sm:$0xf]  ;;  %v15186_v42 = vld [vmem:[%s21776_s9 + $0x6c4] sm:$0xf0] }
 0xdaa   :  { %6602 = vmatpush.bf16.msra.mxu1 %v11909_v52  ;;  %v12165_v52 = vor.u32 %v15097_v45, %v12162_v48  ;;  %v13253_v61 = vor.u32 %v15369_v59, %v13250_v60  ;;  %v15225_v0 = vld [vmem:[%s21776_s9 + $0x804] sm:$0xf]  ;;  %v13640_v45 = vld [vmem:[%s21776_s9 + $0xf88] sm:$0xf] }
 0xdab   :  { %v15353_v3 = vld [vmem:[%s21776_s9 + $0xc04] sm:$0xf]  ;;  %v15474_v48 = vld [vmem:[%s21776_s9 + $0xfc4] sm:$0xf0] }
 0xdac   :  { %6591 = vmatpush.bf16.msra.mxu0 %v13313_v57  ;;  %v12738_v57 = vld [vmem:[%s21776_s9 + $0x8c0] sm:$0xf0]  ;;  %v15330_v59 = vld [vmem:[%s21776_s9 + $0xb44] sm:$0xf0] }
 0xdad   :  { %6617 = vmatpush.bf16.msrb.mxu2 %v12293_v25  ;;  %6630 = vmatpush.bf16.msrb.mxu3 %v12805_v63  ;;  %v12741_v58 = vor.u32 %v15241_v55, %v12738_v57  ;;  %v12040_v25 = vld [vmem:[%s21776_s9 + $0x308] sm:$0xf] }
 0xdae   :  { %6603 = vmatpush.bf16.msra.mxu1 %v11845_v38  ;;  %v12674_v38 = vld [vmem:[%s21776_s9 + $0x840] sm:$0xf0]  ;;  %v12488_v63 = vld [vmem:[%s21776_s9 + $0x688] sm:$0xf] }
 0xdaf   :  { %v12677_v1 = vor.u32 %v15225_v0, %v12674_v38  ;;  %v12489_v57 = vor.u32 %v15186_v42, %v12488_v63  ;;  %v11912_v60 = vld [vmem:[%s21776_s9 + $0x208] sm:$0xf]  ;;  %v13641_v0 = vor.u32 %v15474_v48, %v13640_v45 }
 0xdb0   :  { %6592 = vmatpush.bf16.msra.mxu0 %v13249_v43  ;;  %v13186_v43 = vld [vmem:[%s21776_s9 + $0xc40] sm:$0xf0]  ;;  %v15042_v38 = vld [vmem:[%s21776_s9 + $0x244] sm:$0xf0] }
 0xdb1   :  { %6618 = vmatpush.bf16.msrb.mxu2 %v12229_v39  ;;  %6631 = vmatpush.bf16.msrb.mxu3 %v12741_v58  ;;  %v13189_v4 = vor.u32 %v15353_v3, %v13186_v43  ;;  %v11976_v39 = vld [vmem:[%s21776_s9 + $0x288] sm:$0xf] }
 0xdb2   :  { %6604 = vmatpush.bf16.msra.mxu1 %v11781_v21  ;;  %v13064_v58 = vld [vmem:[%s21776_s9 + $0xb08] sm:$0xf] }
 0xdb3   :  { %v15170_v3 = vld [vmem:[%s21776_s9 + $0x644] sm:$0xf0] }
 0xdb4   :  { %6593 = vmatpush.bf16.msra.mxu0 %v13185_v7  ;;  %v13576_v43 = vld [vmem:[%s21776_s9 + $0xf08] sm:$0xf] }
 0xdb5   :  { %6619 = vmatpush.bf16.msrb.mxu2 %v12165_v52  ;;  %6632 = vmatpush.bf16.msrb.mxu3 %v12677_v1  ;;  %v11977_v52 = vor.u32 %v15058_v34, %v11976_v39  ;;  %v12424_v1 = vld [vmem:[%s21776_s9 + $0x608] sm:$0xf] }
 0xdb6   :  { %6605 = vmatpush.bf16.msra.mxu1 %v11717_v32  ;;  %v15410_v39 = vld [vmem:[%s21776_s9 + $0xdc4] sm:$0xf0] }
 0xdb7   :  { %v15266_v34 = vld [vmem:[%s21776_s9 + $0x944] sm:$0xf0] }
 0xdb8   :  { %6638 = vmatpush.bf16.msrb.mxu0 %v13637_v8  ;;  %v11656_v63 = vld [vmem:[%s21776_s9 + $0x8] sm:$0xf] }
 0xdb9   :  { %v14978_v45 = vld [vmem:[%s21776_s9 + $0x44] sm:$0xf0] }
 0xdba   :  { %6606 = vmatpush.bf16.msra.mxu1 %v11653_v46  ;;  %v15106_v48 = vld [vmem:[%s21776_s9 + $0x444] sm:$0xf0] }
 0xdbc   :  { %6639 = vmatpush.bf16.msrb.mxu0 %v13573_v14 }
 0xdc0   :  { %6640 = vmatpush.bf16.msrb.mxu0 %v13509_v2  ;;  %v15090_v2 = vld [vmem:[%s21776_s9 + $0x3c4] sm:$0xf0] }
 0xdc1   :  { %v12105_v33 = vor.u32 %v15090_v2, %v12104_v62  ;;  %v13512_v62 = vld [vmem:[%s21776_s9 + $0xe88] sm:$0xf] }
 0xdc2   :  { %v15442_v2 = vld [vmem:[%s21776_s9 + $0xec4] sm:$0xf0] }
 0xdc4   :  { %6641 = vmatpush.bf16.msrb.mxu0 %v13445_v27  ;;  %v15074_v27 = vld [vmem:[%s21776_s9 + $0x344] sm:$0xf0] }
 0xdc8   :  { %6642 = vmatpush.bf16.msrb.mxu0 %v13381_v40 }
 0xdcc   :  { %6643 = vmatpush.bf16.msrb.mxu0 %v13317_v54 }
 0xdd0   :  { %6644 = vmatpush.bf16.msrb.mxu0 %v13253_v61 }
 0xdd4   :  { %6645 = vmatpush.bf16.msrb.mxu0 %v13189_v4  ;;  %v15458_v4 = vld [vmem:[%s21776_s9 + $0xf44] sm:$0xf0] }
 0xe14   :  { %v3380_v19 = vpop.f32.mrf.mxu0  ;;  %v3400_v41 = vpop.f32.mrf.mxu1 }
 0xe15   :  { %v3443_v5 = vperm.slane %v3380_v19, 0  ;;  %v3444_v6 = vperm.slane %v3400_v41, 0  ;;  %v3451_v8 = vperm.slane %v3380_v19, 1  ;;  %v3452_v11 = vperm.slane %v3400_v41, 1 }
 0xe16   :  { %v13065_v19 = vor.u32 %v15330_v59, %v13064_v58  ;;  %v11913_v41 = vor.u32 %v15042_v38, %v11912_v60  ;;  %v15210_v58 = vld [vmem:[%s21776_s9 + $0x78c] sm:$0xf]  ;;  %v11657_v60 = vor.u32 %v14978_v45, %v11656_v63  ;;  %v15250_v38 = vld [vmem:[%s21776_s9 + $0x8c4] sm:$0xf0] }
 0xe17   :  { %v3447_v7 = vmul.f32 %v3443_v5, %v17413_v47  ;;  %v3448_v10 = vmul.f32 %v3444_v6, %v17429_v12  ;;  %v15218_v47 = vld [vmem:[%s21776_s9 + $0x7c4] sm:$0xf0]  ;;  %v12425_v5 = vor.u32 %v15170_v3, %v12424_v1  ;;  %v12618_v59 = vld [vmem:[%s21776_s9 + $0x7c8] sm:$0xf0] }
 0xe18   :  { %v12617_v24 = vor.u32 %v15218_v47, %v12616_v15  ;;  %v13000_v6 = vld [vmem:[%s21776_s9 + $0xa88] sm:$0xf]  ;;  %v11850_v45 = vld [vmem:[%s21776_s9 + $0x1c8] sm:$0xf0] }
 0xe19   :  { %v3455_v14 = vadd.f32 %v3451_v8, %v3447_v7  ;;  %v3456_v13 = vadd.f32 %v3452_v11, %v3448_v10  ;;  %v15314_v7 = vld [vmem:[%s21776_s9 + $0xac4] sm:$0xf0]  ;;  %v13577_v8 = vor.u32 %v15458_v4, %v13576_v43  ;;  %v12621_v4 = vor.u32 %v15210_v58, %v12618_v59 }
 0xe1a   :  { %v11848_v10 = vld [vmem:[%s21776_s9 + $0x188] sm:$0xf]  ;;  %v13001_v15 = vor.u32 %v15314_v7, %v13000_v6  ;;  %v12042_v7 = vld [vmem:[%s21776_s9 + $0x348] sm:$0xf0] }
 0xe1b   :  { %vm3459_vm15 = vcmp.ge.f32.partialorder %v3455_v14, 0.0  ;;  %v3463_v12 = vmul.f32 0.01, %v3455_v14  ;;  %vm3460_vm2 = vcmp.ge.f32.partialorder %v3456_v13, 0.0  ;;  %v3464_v16 = vmul.f32 0.01, %v3456_v13  ;;  %v3420_v17 = vpop.f32.mrf.mxu2 }
 0xe1c   :  { %v3445_v18 = vperm.slane %v3420_v17, 0  ;;  %v3440_v20 = vpop.f32.mrf.mxu0  ;;  %v3453_v30 = vperm.slane %v3420_v17, 1  ;;  %v15026_v11 = vld [vmem:[%s21776_s9 + $0x1c4] sm:$0xf0] }
 0xe1d   :  { %v3467_v21 = vsel %vm3459_vm15, %v3455_v14, %v3463_v12  ;;  %v3468_v22 = vsel %vm3460_vm2, %v3456_v13, %v3464_v16  ;;  %v3446_v23 = vperm.slane %v3440_v20, 0  ;;  %v3454_v35 = vperm.slane %v3440_v20, 1  ;;  %v12360_v14 = vld [vmem:[%s21776_s9 + $0x588] sm:$0xf] }
 0xe1e   :  { %v17872_v28 = vpack.c.bf16 %v3467_v21, %v3467_v21  ;;  %v17874_v29 = vpack.c.bf16 %v3468_v22, %v3468_v22  ;;  %v3449_v56 = vmul.f32 %v3445_v18, %v17436_v36  ;;  %v13128_v36 = vld [vmem:[%s21776_s9 + $0xb88] sm:$0xf]  ;;  %v11849_v47 = vor.u32 %v15026_v11, %v11848_v10  ;;  %v12554_v10 = vld [vmem:[%s21776_s9 + $0x748] sm:$0xf0] }
 0xe1f   :  { %v3450_v32 = vmul.f32 %v3446_v23, %v17444_v53  ;;  %v12041_v53 = vor.u32 %v15074_v27, %v12040_v25  ;;  %v13129_v51 = vor.u32 %v15346_v37, %v13128_v36  ;;  %v15154_v13 = vld [vmem:[%s21776_s9 + $0x5c4] sm:$0xf0]  ;;  %v13513_v18 = vor.u32 %v15442_v2, %v13512_v62  ;;  %v15338_v62 = vld [vmem:[%s21776_s9 + $0xb8c] sm:$0xf] }
 0xe20   :  { %v3457_v26 = vadd.f32 %v3453_v30, %v3449_v56  ;;  %6555 = vmatmul.bf16.vlgmr.msrb.gmra.mxu1 %v17872_v28  ;;  %6568 = vmatmul.bf16.vlgmr.msra.gmra.mxu2 %v17874_v29  ;;  %v12936_v12 = vld [vmem:[%s21776_s9 + $0xa08] sm:$0xf]  ;;  %v12361_v17 = vor.u32 %v15154_v13, %v12360_v14  ;;  %v13130_v2 = vld [vmem:[%s21776_s9 + $0xbc8] sm:$0xf0] }
 0xe21   :  { %v3458_v40 = vadd.f32 %v3454_v35, %v3450_v32  ;;  %6651 = vmatpush.bf16.msrb.mxu1 %v12105_v33  ;;  %6664 = vmatpush.bf16.msra.mxu2 %v12617_v24  ;;  %v15298_v16 = vld [vmem:[%s21776_s9 + $0xa44] sm:$0xf0] }
 0xe22   :  { %vm3461_vm3 = vcmp.ge.f32.partialorder %v3457_v26, 0.0  ;;  %v3465_v44 = vmul.f32 0.01, %v3457_v26  ;;  %v11784_v20 = vld [vmem:[%s21776_s9 + $0x108] sm:$0xf]  ;;  %v12937_v25 = vor.u32 %v15298_v16, %v12936_v12 }
 0xe23   :  { %vm3462_vm4 = vcmp.ge.f32.partialorder %v3458_v40, 0.0  ;;  %v3466_v46 = vmul.f32 0.01, %v3458_v40  ;;  %v15010_v33 = vld [vmem:[%s21776_s9 + $0x144] sm:$0xf0] }
 0xe24   :  { %v3469_v50 = vsel %vm3461_vm3, %v3457_v26, %v3465_v44  ;;  %v12296_v21 = vld [vmem:[%s21776_s9 + $0x508] sm:$0xf]  ;;  %v11785_v27 = vor.u32 %v15010_v33, %v11784_v20  ;;  %v11978_v20 = vld [vmem:[%s21776_s9 + $0x2c8] sm:$0xf0] }
 0xe25   :  { %v17910_v54 = vpack.c.bf16 %v3469_v50, %v3469_v50  ;;  %v3470_v55 = vsel %vm3462_vm4, %v3458_v40, %v3466_v46  ;;  %6652 = vmatpush.bf16.msrb.mxu1 %v12041_v53  ;;  %6665 = vmatpush.bf16.msra.mxu2 %v12553_v49  ;;  %v15138_v22 = vld [vmem:[%s21776_s9 + $0x544] sm:$0xf0]  ;;  %v15178_v33 = vld [vmem:[%s21776_s9 + $0x68c] sm:$0xf] }
 0xe26   :  { %v17921_v61 = vpack.c.bf16 %v3470_v55, %v3470_v55  ;;  %v13448_v23 = vld [vmem:[%s21776_s9 + $0xe08] sm:$0xf]  ;;  %v12297_v9 = vor.u32 %v15138_v22, %v12296_v21  ;;  %v12490_v21 = vld [vmem:[%s21776_s9 + $0x6c8] sm:$0xf0]  ;;  %v13133_v22 = vor.u32 %v15338_v62, %v13130_v2 }
 0xe27   :  { %6581 = vmatmul.bf16.vlgmr.msra.gmra.mxu3 %v17910_v54  ;;  %v15426_v24 = vld [vmem:[%s21776_s9 + $0xe44] sm:$0xf0]  ;;  %v15402_v2 = vld [vmem:[%s21776_s9 + $0xd8c] sm:$0xf] }
 0xe28   :  { %6677 = vmatpush.bf16.msra.mxu3 %v13129_v51  ;;  %6594 = vmatmul.bf16.vlgmr.msra.gmra.mxu0 %v17921_v61  ;;  %v12872_v56 = vld [vmem:[%s21776_s9 + $0x988] sm:$0xf]  ;;  %v13449_v31 = vor.u32 %v15426_v24, %v13448_v23  ;;  %v15466_v23 = vld [vmem:[%s21776_s9 + $0xf8c] sm:$0xf] }
 0xe29   :  { %6653 = vmatpush.bf16.msrb.mxu1 %v11977_v52  ;;  %6666 = vmatpush.bf16.msra.mxu2 %v12489_v57  ;;  %v15282_v30 = vld [vmem:[%s21776_s9 + $0x9c4] sm:$0xf0]  ;;  %v15082_v52 = vld [vmem:[%s21776_s9 + $0x38c] sm:$0xf] }
 0xe2a   :  { %6690 = vmatpush.bf16.msra.mxu0 %v13641_v0  ;;  %v11720_v32 = vld [vmem:[%s21776_s9 + $0x88] sm:$0xf]  ;;  %v12873_v40 = vor.u32 %v15282_v30, %v12872_v56  ;;  %v12106_v57 = vld [vmem:[%s21776_s9 + $0x3c8] sm:$0xf0] }
 0xe2b   :  { %v14994_v35 = vld [vmem:[%s21776_s9 + $0xc4] sm:$0xf0]  ;;  %v12109_v43 = vor.u32 %v15082_v52, %v12106_v57  ;;  %v13642_v24 = vld [vmem:[%s21776_s9 + $0xfc8] sm:$0xf0] }
 0xe2c   :  { %6678 = vmatpush.bf16.msra.mxu3 %v13065_v19  ;;  %v12232_v26 = vld [vmem:[%s21776_s9 + $0x488] sm:$0xf]  ;;  %v11721_v53 = vor.u32 %v14994_v35, %v11720_v32  ;;  %v13066_v56 = vld [vmem:[%s21776_s9 + $0xb48] sm:$0xf0]  ;;  %v13645_v32 = vor.u32 %v15466_v23, %v13642_v24 }
 0xe2d   :  { %6654 = vmatpush.bf16.msrb.mxu1 %v11913_v41  ;;  %6667 = vmatpush.bf16.msra.mxu2 %v12425_v5  ;;  %v15122_v36 = vld [vmem:[%s21776_s9 + $0x4c4] sm:$0xf0]  ;;  %v15066_v5 = vld [vmem:[%s21776_s9 + $0x30c] sm:$0xf] }
 0xe2e   :  { %6691 = vmatpush.bf16.msra.mxu0 %v13577_v8  ;;  %v13384_v37 = vld [vmem:[%s21776_s9 + $0xd88] sm:$0xf]  ;;  %v12233_v42 = vor.u32 %v15122_v36, %v12232_v26  ;;  %v15194_v8 = vld [vmem:[%s21776_s9 + $0x70c] sm:$0xf] }
 0xe2f   :  { %v12808_v49 = vld [vmem:[%s21776_s9 + $0x908] sm:$0xf]  ;;  %v13385_v44 = vor.u32 %v15410_v39, %v13384_v37  ;;  %v11914_v35 = vld [vmem:[%s21776_s9 + $0x248] sm:$0xf0] }
 0xe30   :  { %6679 = vmatpush.bf16.msra.mxu3 %v13001_v15  ;;  %6607 = vmatmul.bf16.vlgmr.msra.gmra.mxu1 %v17872_v28  ;;  %v12168_v46 = vld [vmem:[%s21776_s9 + $0x408] sm:$0xf]  ;;  %v12809_v55 = vor.u32 %v15266_v34, %v12808_v49  ;;  %v12045_v15 = vor.u32 %v15066_v5, %v12042_v7  ;;  %v15162_v26 = vld [vmem:[%s21776_s9 + $0x60c] sm:$0xf] }
 0xe31   :  { %6620 = vmatmul.bf16.vlgmr.msrb.gmra.mxu2 %v17874_v29  ;;  %6655 = vmatpush.bf16.msrb.mxu1 %v11849_v47  ;;  %v13320_v50 = vld [vmem:[%s21776_s9 + $0xd08] sm:$0xf]  ;;  %v12169_v1 = vor.u32 %v15106_v48, %v12168_v46  ;;  %v12557_v47 = vor.u32 %v15194_v8, %v12554_v10  ;;  %v12426_v36 = vld [vmem:[%s21776_s9 + $0x648] sm:$0xf0] }
 0xe32   :  { %6668 = vmatpush.bf16.msra.mxu2 %v12361_v17  ;;  %6692 = vmatpush.bf16.msra.mxu0 %v13513_v18  ;;  %v15394_v51 = vld [vmem:[%s21776_s9 + $0xd44] sm:$0xf0]  ;;  %v15050_v17 = vld [vmem:[%s21776_s9 + $0x28c] sm:$0xf]  ;;  %v12429_v63 = vor.u32 %v15162_v26, %v12426_v36 }
 0xe33   :  { %v12744_v0 = vld [vmem:[%s21776_s9 + $0x888] sm:$0xf]  ;;  %v13321_v3 = vor.u32 %v15394_v51, %v13320_v50  ;;  %v11981_v30 = vor.u32 %v15050_v17, %v11978_v20  ;;  %v15450_v39 = vld [vmem:[%s21776_s9 + $0xf0c] sm:$0xf] }
 0xe34   :  { %6680 = vmatpush.bf16.msra.mxu3 %v12937_v25  ;;  %v13256_v19 = vld [vmem:[%s21776_s9 + $0xc88] sm:$0xf]  ;;  %v12745_v6 = vor.u32 %v15250_v38, %v12744_v0  ;;  %v13002_v49 = vld [vmem:[%s21776_s9 + $0xac8] sm:$0xf0] }
 0xe35   :  { %6656 = vmatpush.bf16.msrb.mxu1 %v11785_v27  ;;  %v15378_v41 = vld [vmem:[%s21776_s9 + $0xcc4] sm:$0xf0]  ;;  %v15322_v27 = vld [vmem:[%s21776_s9 + $0xb0c] sm:$0xf] }
 0xe36   :  { %6669 = vmatpush.bf16.msra.mxu2 %v12297_v9  ;;  %6693 = vmatpush.bf16.msra.mxu0 %v13449_v31  ;;  %v12680_v11 = vld [vmem:[%s21776_s9 + $0x808] sm:$0xf]  ;;  %v13257_v13 = vor.u32 %v15378_v41, %v13256_v19  ;;  %v12493_v9 = vor.u32 %v15178_v33, %v12490_v21  ;;  %v15034_v31 = vld [vmem:[%s21776_s9 + $0x20c] sm:$0xf]  ;;  %v13069_v37 = vor.u32 %v15322_v27, %v13066_v56  ;;  %v12112_v27 = vld [vmem:[%s21776_s9 + $0x390] sm:$0xf] }
 0xe37   :  { %6633 = vmatmul.bf16.vlgmr.msrb.gmra.mxu3 %v17910_v54  ;;  %v15234_v14 = vld [vmem:[%s21776_s9 + $0x844] sm:$0xf0]  ;;  %v11917_v34 = vor.u32 %v15034_v31, %v11914_v35  ;;  %v15146_v46 = vld [vmem:[%s21776_s9 + $0x58c] sm:$0xf]  ;;  %v15091_v56 = vld [vmem:[%s21776_s9 + $0x3cc] sm:$0xf0] }
 0xe38   :  { %6681 = vmatpush.bf16.msra.mxu3 %v12873_v40  ;;  %6646 = vmatmul.bf16.vlgmr.msrb.gmra.mxu0 %v17921_v61  ;;  %v13192_v12 = vld [vmem:[%s21776_s9 + $0xc08] sm:$0xf]  ;;  %v12681_v18 = vor.u32 %v15234_v14, %v12680_v11  ;;  %v13578_v40 = vld [vmem:[%s21776_s9 + $0xf48] sm:$0xf0] }
 0xe39   :  { %6657 = vmatpush.bf16.msrb.mxu1 %v11721_v53  ;;  %v15362_v16 = vld [vmem:[%s21776_s9 + $0xc44] sm:$0xf0]  ;;  %v15306_v53 = vld [vmem:[%s21776_s9 + $0xa8c] sm:$0xf] }
 0xe3a   :  { %6670 = vmatpush.bf16.msra.mxu2 %v12233_v42  ;;  %6694 = vmatpush.bf16.msra.mxu0 %v13385_v44  ;;  %v13193_v25 = vor.u32 %v15362_v16, %v13192_v12  ;;  %v15018_v42 = vld [vmem:[%s21776_s9 + $0x18c] sm:$0xf]  ;;  %v13581_v44 = vor.u32 %v15450_v39, %v13578_v40  ;;  %v13005_v50 = vor.u32 %v15306_v53, %v13002_v49 }
 0xe3b   :  { %v12362_v48 = vld [vmem:[%s21776_s9 + $0x5c8] sm:$0xf0]  ;;  %v11853_v58 = vor.u32 %v15018_v42, %v11850_v45  ;;  %v12560_v42 = vld [vmem:[%s21776_s9 + $0x710] sm:$0xf] }
 0xe3c   :  { %6682 = vmatpush.bf16.msra.mxu3 %v12809_v55  ;;  %v15434_v51 = vld [vmem:[%s21776_s9 + $0xe8c] sm:$0xf]  ;;  %v12365_v59 = vor.u32 %v15146_v46, %v12362_v48  ;;  %v13136_v48 = vld [vmem:[%s21776_s9 + $0xb90] sm:$0xf] }
 0xe3d   :  { %6658 = vmatpush.bf16.msrb.mxu1 %v11657_v60  ;;  %v13514_v52 = vld [vmem:[%s21776_s9 + $0xec8] sm:$0xf0] }
 0xe3e   :  { %6671 = vmatpush.bf16.msra.mxu2 %v12169_v1  ;;  %6695 = vmatpush.bf16.msra.mxu0 %v13321_v3  ;;  %v15290_v55 = vld [vmem:[%s21776_s9 + $0xa0c] sm:$0xf]  ;;  %v13517_v0 = vor.u32 %v15434_v51, %v13514_v52 }
 0xe3f   :  { %v12938_v57 = vld [vmem:[%s21776_s9 + $0xa48] sm:$0xf0] }
 0xe40   :  { %6683 = vmatpush.bf16.msra.mxu3 %v12745_v6  ;;  %6659 = vmatmul.bf16.vlgmr.msrb.gmra.mxu1 %v17872_v28  ;;  %v15002_v60 = vld [vmem:[%s21776_s9 + $0x10c] sm:$0xf] }
 0xe41   :  { %6703 = vmatpush.bf16.msra.mxu1 %v12109_v43  ;;  %6672 = vmatmul.bf16.vlgmr.msra.gmra.mxu2 %v17874_v29  ;;  %v11786_v38 = vld [vmem:[%s21776_s9 + $0x148] sm:$0xf0]  ;;  %v12941_v43 = vor.u32 %v15290_v55, %v12938_v57 }
 0xe42   :  { %6716 = vmatpush.bf16.msrb.mxu2 %v12621_v4  ;;  %6696 = vmatpush.bf16.msra.mxu0 %v13257_v13  ;;  %v15130_v1 = vld [vmem:[%s21776_s9 + $0x50c] sm:$0xf]  ;;  %v11789_v6 = vor.u32 %v15002_v60, %v11786_v38  ;;  %v11984_v60 = vld [vmem:[%s21776_s9 + $0x290] sm:$0xf] }
 0xe43   :  { %v12298_v3 = vld [vmem:[%s21776_s9 + $0x548] sm:$0xf0] }
 0xe44   :  { %6684 = vmatpush.bf16.msra.mxu3 %v12681_v18  ;;  %v15418_v4 = vld [vmem:[%s21776_s9 + $0xe0c] sm:$0xf]  ;;  %v12301_v7 = vor.u32 %v15130_v1, %v12298_v3  ;;  %v12496_v1 = vld [vmem:[%s21776_s9 + $0x690] sm:$0xf] }
 0xe45   :  { %6704 = vmatpush.bf16.msra.mxu1 %v12045_v15  ;;  %v13450_v19 = vld [vmem:[%s21776_s9 + $0xe48] sm:$0xf0]  ;;  %v15187_v3 = vld [vmem:[%s21776_s9 + $0x6cc] sm:$0xf0] }
 0xe46   :  { %6717 = vmatpush.bf16.msrb.mxu2 %v12557_v47  ;;  %6697 = vmatpush.bf16.msra.mxu0 %v13193_v25  ;;  %v15274_v41 = vld [vmem:[%s21776_s9 + $0x98c] sm:$0xf]  ;;  %v13453_v10 = vor.u32 %v15418_v4, %v13450_v19  ;;  %v15475_v4 = vld [vmem:[%s21776_s9 + $0xfcc] sm:$0xf0] }
 0xe47   :  { %6685 = vmatmul.bf16.vlgmr.msra.gmra.mxu3 %v17910_v54  ;;  %v12874_v5 = vld [vmem:[%s21776_s9 + $0x9c8] sm:$0xf0]  ;;  %v13072_v19 = vld [vmem:[%s21776_s9 + $0xb10] sm:$0xf] }
 0xe48   :  { %6729 = vmatpush.bf16.msrb.mxu3 %v13133_v22  ;;  %v14986_v8 = vld [vmem:[%s21776_s9 + $0x8c] sm:$0xf]  ;;  %v12877_v62 = vor.u32 %v15274_v41, %v12874_v5  ;;  %v15331_v41 = vld [vmem:[%s21776_s9 + $0xb4c] sm:$0xf0] }
 0xe49   :  { %6705 = vmatpush.bf16.msra.mxu1 %v11981_v30  ;;  %6698 = vmatmul.bf16.vlgmr.msra.gmra.mxu0 %v17921_v61  ;;  %v11722_v11 = vld [vmem:[%s21776_s9 + $0xc8] sm:$0xf0]  ;;  %v12624_v30 = vld [vmem:[%s21776_s9 + $0x790] sm:$0xf] }
 0xe4a   :  { %6718 = vmatpush.bf16.msrb.mxu2 %v12493_v9  ;;  %6742 = vmatpush.bf16.msrb.mxu0 %v13645_v32  ;;  %v15114_v14 = vld [vmem:[%s21776_s9 + $0x48c] sm:$0xf]  ;;  %v11725_v16 = vor.u32 %v14986_v8, %v11722_v11  ;;  %v15219_v9 = vld [vmem:[%s21776_s9 + $0x7cc] sm:$0xf0] }
 0xe4b   :  { %v12234_v13 = vld [vmem:[%s21776_s9 + $0x4c8] sm:$0xf0]  ;;  %v12625_v53 = vor.u32 %v15219_v9, %v12624_v30  ;;  %v11920_v8 = vld [vmem:[%s21776_s9 + $0x210] sm:$0xf] }
 0xe4c   :  { %6730 = vmatpush.bf16.msrb.mxu3 %v13069_v37  ;;  %v13386_v15 = vld [vmem:[%s21776_s9 + $0xdc8] sm:$0xf0]  ;;  %v12237_v17 = vor.u32 %v15114_v14, %v12234_v13  ;;  %v12113_v37 = vor.u32 %v15091_v56, %v12112_v27  ;;  %v13073_v14 = vor.u32 %v15331_v41, %v13072_v19  ;;  %v12432_v13 = vld [vmem:[%s21776_s9 + $0x610] sm:$0xf]  ;;  %v15083_v41 = vld [vmem:[%s21776_s9 + $0x394] sm:$0xf] }
 0xe4d   :  { %6706 = vmatpush.bf16.msra.mxu1 %v11917_v34  ;;  %v15258_v47 = vld [vmem:[%s21776_s9 + $0x90c] sm:$0xf]  ;;  %v13389_v21 = vor.u32 %v15402_v2, %v13386_v15  ;;  %v12048_v34 = vld [vmem:[%s21776_s9 + $0x310] sm:$0xf] }
 0xe4e   :  { %6719 = vmatpush.bf16.msrb.mxu2 %v12429_v63  ;;  %6743 = vmatpush.bf16.msrb.mxu0 %v13581_v44  ;;  %v12810_v12 = vld [vmem:[%s21776_s9 + $0x948] sm:$0xf0]  ;;  %v15075_v63 = vld [vmem:[%s21776_s9 + $0x34c] sm:$0xf0] }
 0xe4f   :  { %v14970_v18 = vld [vmem:[%s21776_s9 + $0xc] sm:$0xf]  ;;  %v12813_v25 = vor.u32 %v15258_v47, %v12810_v12  ;;  %v15203_v44 = vld [vmem:[%s21776_s9 + $0x74c] sm:$0xf0]  ;;  %v12049_v52 = vor.u32 %v15075_v63, %v12048_v34 }
 0xe50   :  { %6731 = vmatpush.bf16.msrb.mxu3 %v13005_v50  ;;  %v11658_v20 = vld [vmem:[%s21776_s9 + $0x48] sm:$0xf0]  ;;  %v15347_v50 = vld [vmem:[%s21776_s9 + $0xbcc] sm:$0xf0]  ;;  %v12561_v57 = vor.u32 %v15203_v44, %v12560_v42 }
 0xe51   :  { %6707 = vmatpush.bf16.msra.mxu1 %v11853_v58  ;;  %v15098_v33 = vld [vmem:[%s21776_s9 + $0x40c] sm:$0xf]  ;;  %v11661_v35 = vor.u32 %v14970_v18, %v11658_v20  ;;  %v13137_v38 = vor.u32 %v15347_v50, %v13136_v48  ;;  %v13584_v2 = vld [vmem:[%s21776_s9 + $0xf10] sm:$0xf] }
 0xe52   :  { %6720 = vmatpush.bf16.msrb.mxu2 %v12365_v59  ;;  %6744 = vmatpush.bf16.msrb.mxu0 %v13517_v0  ;;  %v12170_v22 = vld [vmem:[%s21776_s9 + $0x448] sm:$0xf0]  ;;  %v15059_v0 = vld [vmem:[%s21776_s9 + $0x2cc] sm:$0xf0] }
 0xe53   :  { %v15386_v23 = vld [vmem:[%s21776_s9 + $0xd0c] sm:$0xf]  ;;  %v12173_v26 = vor.u32 %v15098_v33, %v12170_v22  ;;  %v15459_v15 = vld [vmem:[%s21776_s9 + $0xf4c] sm:$0xf0] }
 0xe54   :  { %6732 = vmatpush.bf16.msrb.mxu3 %v12941_v43  ;;  %v13322_v24 = vld [vmem:[%s21776_s9 + $0xd48] sm:$0xf0]  ;;  %v13648_v43 = vld [vmem:[%s21776_s9 + $0xf90] sm:$0xf]  ;;  %v13585_v33 = vor.u32 %v15459_v15, %v13584_v2 }
 0xe55   :  { %6708 = vmatpush.bf16.msra.mxu1 %v11789_v6  ;;  %v15242_v31 = vld [vmem:[%s21776_s9 + $0x88c] sm:$0xf]  ;;  %v13325_v36 = vor.u32 %v15386_v23, %v13322_v24  ;;  %v11985_v6 = vor.u32 %v15059_v0, %v11984_v60  ;;  %v13649_v11 = vor.u32 %v15475_v4, %v13648_v43  ;;  %v13008_v47 = vld [vmem:[%s21776_s9 + $0xa90] sm:$0xf] }
 0xe56   :  { %6721 = vmatpush.bf16.msrb.mxu2 %v12301_v7  ;;  %6745 = vmatpush.bf16.msrb.mxu0 %v13453_v10  ;;  %v12746_v32 = vld [vmem:[%s21776_s9 + $0x8c8] sm:$0xf0]  ;;  %v12497_v7 = vor.u32 %v15187_v3, %v12496_v1  ;;  %v15043_v10 = vld [vmem:[%s21776_s9 + $0x24c] sm:$0xf0] }
 0xe57   :  { %v15370_v39 = vld [vmem:[%s21776_s9 + $0xc8c] sm:$0xf]  ;;  %v12749_v49 = vor.u32 %v15242_v31, %v12746_v32  ;;  %v15315_v12 = vld [vmem:[%s21776_s9 + $0xacc] sm:$0xf0] }
 0xe58   :  { %6733 = vmatpush.bf16.msrb.mxu3 %v12877_v62  ;;  %v13258_v40 = vld [vmem:[%s21776_s9 + $0xcc8] sm:$0xf0]  ;;  %v15171_v62 = vld [vmem:[%s21776_s9 + $0x64c] sm:$0xf0] }
 0xe59   :  { %6709 = vmatpush.bf16.msra.mxu1 %v11725_v16  ;;  %v15226_v45 = vld [vmem:[%s21776_s9 + $0x80c] sm:$0xf]  ;;  %v13261_v51 = vor.u32 %v15370_v39, %v13258_v40  ;;  %v11921_v16 = vor.u32 %v15043_v10, %v11920_v8  ;;  %v11856_v18 = vld [vmem:[%s21776_s9 + $0x190] sm:$0xf] }
 0xe5a   :  { %6722 = vmatpush.bf16.msrb.mxu2 %v12237_v17  ;;  %6746 = vmatpush.bf16.msrb.mxu0 %v13389_v21  ;;  %v12682_v46 = vld [vmem:[%s21776_s9 + $0x848] sm:$0xf0]  ;;  %v12433_v17 = vor.u32 %v15171_v62, %v12432_v13  ;;  %v15027_v20 = vld [vmem:[%s21776_s9 + $0x1cc] sm:$0xf0]  ;;  %v13009_v21 = vor.u32 %v15315_v12, %v13008_v47 }
 0xe5b   :  { %v15354_v55 = vld [vmem:[%s21776_s9 + $0xc0c] sm:$0xf]  ;;  %v12685_v58 = vor.u32 %v15226_v45, %v12682_v46  ;;  %v12368_v22 = vld [vmem:[%s21776_s9 + $0x590] sm:$0xf]  ;;  %v11857_v30 = vor.u32 %v15027_v20, %v11856_v18  ;;  %v15195_v18 = vld [vmem:[%s21776_s9 + $0x714] sm:$0xf] }
 0xe5c   :  { %6734 = vmatpush.bf16.msrb.mxu3 %v12813_v25  ;;  %v13194_v59 = vld [vmem:[%s21776_s9 + $0xc48] sm:$0xf0]  ;;  %v15155_v23 = vld [vmem:[%s21776_s9 + $0x5cc] sm:$0xf0]  ;;  %v12562_v20 = vld [vmem:[%s21776_s9 + $0x750] sm:$0xf0] }
 0xe5d   :  { %6710 = vmatpush.bf16.msra.mxu1 %v11661_v35  ;;  %v13197_v5 = vor.u32 %v15354_v55, %v13194_v59  ;;  %v13520_v24 = vld [vmem:[%s21776_s9 + $0xe90] sm:$0xf]  ;;  %v12369_v9 = vor.u32 %v15155_v23, %v12368_v22  ;;  %v15339_v22 = vld [vmem:[%s21776_s9 + $0xb94] sm:$0xf] }
 0xe5e   :  { %6723 = vmatpush.bf16.msrb.mxu2 %v12173_v26  ;;  %6747 = vmatpush.bf16.msrb.mxu0 %v13325_v36  ;;  %v15443_v25 = vld [vmem:[%s21776_s9 + $0xecc] sm:$0xf0]  ;;  %v13138_v23 = vld [vmem:[%s21776_s9 + $0xbd0] sm:$0xf0] }
 0xe5f   :  { %v12944_v27 = vld [vmem:[%s21776_s9 + $0xa10] sm:$0xf]  ;;  %v13521_v35 = vor.u32 %v15443_v25, %v13520_v24 }
 0xe60   :  { %6735 = vmatpush.bf16.msrb.mxu3 %v12749_v49  ;;  %6711 = vmatmul.bf16.vlgmr.msra.gmra.mxu1 %v17872_v28  ;;  %v15299_v56 = vld [vmem:[%s21776_s9 + $0xa4c] sm:$0xf0] }
 0xe61   :  { %6755 = vmatpush.bf16.msrb.mxu1 %v12113_v37  ;;  %6724 = vmatmul.bf16.vlgmr.msrb.gmra.mxu2 %v17874_v29  ;;  %v11792_v31 = vld [vmem:[%s21776_s9 + $0x110] sm:$0xf]  ;;  %v12945_v26 = vor.u32 %v15299_v56, %v12944_v27  ;;  %v12565_v56 = vor.u32 %v15195_v18, %v12562_v20  ;;  %v14987_v18 = vld [vmem:[%s21776_s9 + $0x94] sm:$0xf] }
 0xe62   :  { %6768 = vmatpush.bf16.msra.mxu2 %v12625_v53  ;;  %6748 = vmatpush.bf16.msrb.mxu0 %v13261_v51  ;;  %v15011_v32 = vld [vmem:[%s21776_s9 + $0x14c] sm:$0xf0]  ;;  %v11730_v20 = vld [vmem:[%s21776_s9 + $0xd0] sm:$0xf0] }
 0xe63   :  { %v12304_v36 = vld [vmem:[%s21776_s9 + $0x510] sm:$0xf]  ;;  %v11793_v34 = vor.u32 %v15011_v32, %v11792_v31  ;;  %v15051_v31 = vld [vmem:[%s21776_s9 + $0x294] sm:$0xf] }
 0xe64   :  { %6736 = vmatpush.bf16.msrb.mxu3 %v12685_v58  ;;  %v15139_v37 = vld [vmem:[%s21776_s9 + $0x54c] sm:$0xf0]  ;;  %v11986_v32 = vld [vmem:[%s21776_s9 + $0x2d0] sm:$0xf0] }
 0xe65   :  { %6756 = vmatpush.bf16.msrb.mxu1 %v12049_v52  ;;  %v13456_v39 = vld [vmem:[%s21776_s9 + $0xe10] sm:$0xf]  ;;  %v12305_v63 = vor.u32 %v15139_v37, %v12304_v36  ;;  %v12498_v36 = vld [vmem:[%s21776_s9 + $0x6d0] sm:$0xf0] }
 0xe66   :  { %6769 = vmatpush.bf16.msra.mxu2 %v12561_v57  ;;  %6749 = vmatpush.bf16.msrb.mxu0 %v13197_v5  ;;  %v15427_v40 = vld [vmem:[%s21776_s9 + $0xe4c] sm:$0xf0]  ;;  %v12114_v5 = vld [vmem:[%s21776_s9 + $0x3d0] sm:$0xf0] }
 0xe67   :  { %6737 = vmatmul.bf16.vlgmr.msrb.gmra.mxu3 %v17910_v54  ;;  %v12880_v53 = vld [vmem:[%s21776_s9 + $0x990] sm:$0xf]  ;;  %v13457_v45 = vor.u32 %v15427_v40, %v13456_v39  ;;  %v12117_v62 = vor.u32 %v15083_v41, %v12114_v5  ;;  %v15467_v37 = vld [vmem:[%s21776_s9 + $0xf94] sm:$0xf] }
 0xe68   :  { %6781 = vmatpush.bf16.msra.mxu3 %v13137_v38  ;;  %v15283_v49 = vld [vmem:[%s21776_s9 + $0x9cc] sm:$0xf0]  ;;  %v13650_v39 = vld [vmem:[%s21776_s9 + $0xfd0] sm:$0xf0] }
 0xe69   :  { %6757 = vmatpush.bf16.msrb.mxu1 %v11985_v6  ;;  %6750 = vmatmul.bf16.vlgmr.msrb.gmra.mxu0 %v17921_v61  ;;  %v11728_v42 = vld [vmem:[%s21776_s9 + $0x90] sm:$0xf]  ;;  %v12881_v46 = vor.u32 %v15283_v49, %v12880_v53  ;;  %v15211_v6 = vld [vmem:[%s21776_s9 + $0x794] sm:$0xf] }
 0xe6a   :  { %6770 = vmatpush.bf16.msra.mxu2 %v12497_v7  ;;  %6794 = vmatpush.bf16.msra.mxu0 %v13649_v11  ;;  %v14995_v44 = vld [vmem:[%s21776_s9 + $0xcc] sm:$0xf0]  ;;  %v12626_v7 = vld [vmem:[%s21776_s9 + $0x7d0] sm:$0xf0] }
 0xe6b   :  { %v12240_v48 = vld [vmem:[%s21776_s9 + $0x490] sm:$0xf]  ;;  %v11729_v58 = vor.u32 %v14995_v44, %v11728_v42  ;;  %v12629_v47 = vor.u32 %v15211_v6, %v12626_v7  ;;  %v15323_v40 = vld [vmem:[%s21776_s9 + $0xb14] sm:$0xf] }
 0xe6c   :  { %6782 = vmatpush.bf16.msra.mxu3 %v13073_v14  ;;  %v15123_v50 = vld [vmem:[%s21776_s9 + $0x4cc] sm:$0xf0]  ;;  %v13074_v53 = vld [vmem:[%s21776_s9 + $0xb50] sm:$0xf0] }
 0xe6d   :  { %6758 = vmatpush.bf16.msrb.mxu1 %v11921_v16  ;;  %v13392_v51 = vld [vmem:[%s21776_s9 + $0xd90] sm:$0xf]  ;;  %v12241_v59 = vor.u32 %v15123_v50, %v12240_v48  ;;  %v15067_v16 = vld [vmem:[%s21776_s9 + $0x314] sm:$0xf] }
 0xe6e   :  { %6771 = vmatpush.bf16.msra.mxu2 %v12433_v17  ;;  %6795 = vmatpush.bf16.msra.mxu0 %v13585_v33  ;;  %v15411_v52 = vld [vmem:[%s21776_s9 + $0xdcc] sm:$0xf0]  ;;  %v12050_v17 = vld [vmem:[%s21776_s9 + $0x350] sm:$0xf0] }
 0xe6f   :  { %v12816_v55 = vld [vmem:[%s21776_s9 + $0x910] sm:$0xf]  ;;  %v13393_v1 = vor.u32 %v15411_v52, %v13392_v51  ;;  %v12053_v25 = vor.u32 %v15067_v16, %v12050_v17  ;;  %v15035_v42 = vld [vmem:[%s21776_s9 + $0x214] sm:$0xf] }
 0xe70   :  { %6783 = vmatpush.bf16.msra.mxu3 %v13009_v21  ;;  %v15267_v57 = vld [vmem:[%s21776_s9 + $0x94c] sm:$0xf0]  ;;  %v11922_v44 = vld [vmem:[%s21776_s9 + $0x250] sm:$0xf0] }
 0xe71   :  { %6759 = vmatpush.bf16.msrb.mxu1 %v11857_v30  ;;  %v11664_v60 = vld [vmem:[%s21776_s9 + $0x10] sm:$0xf]  ;;  %v12817_v3 = vor.u32 %v15267_v57, %v12816_v55  ;;  %v15163_v48 = vld [vmem:[%s21776_s9 + $0x614] sm:$0xf] }
 0xe72   :  { %6772 = vmatpush.bf16.msra.mxu2 %v12369_v9  ;;  %6796 = vmatpush.bf16.msra.mxu0 %v13521_v35  ;;  %v14979_v0 = vld [vmem:[%s21776_s9 + $0x4c] sm:$0xf0]  ;;  %v13141_v35 = vor.u32 %v15339_v22, %v13138_v23  ;;  %v12434_v50 = vld [vmem:[%s21776_s9 + $0x650] sm:$0xf0] }
 0xe73   :  { %v12176_v38 = vld [vmem:[%s21776_s9 + $0x410] sm:$0xf]  ;;  %v11665_v11 = vor.u32 %v14979_v0, %v11664_v60  ;;  %v15451_v51 = vld [vmem:[%s21776_s9 + $0xf14] sm:$0xf] }
 0xe74   :  { %6784 = vmatpush.bf16.msra.mxu3 %v12945_v26  ;;  %v15107_v43 = vld [vmem:[%s21776_s9 + $0x44c] sm:$0xf0]  ;;  %v15179_v26 = vld [vmem:[%s21776_s9 + $0x694] sm:$0xf] }
 0xe75   :  { %6760 = vmatpush.bf16.msrb.mxu1 %v11793_v34  ;;  %v13328_v4 = vld [vmem:[%s21776_s9 + $0xd10] sm:$0xf]  ;;  %v12177_v14 = vor.u32 %v15107_v43, %v12176_v38  ;;  %v11989_v34 = vor.u32 %v15051_v31, %v11986_v32  ;;  %v13586_v52 = vld [vmem:[%s21776_s9 + $0xf50] sm:$0xf0] }
 0xe76   :  { %6773 = vmatpush.bf16.msra.mxu2 %v12305_v63  ;;  %6797 = vmatpush.bf16.msra.mxu0 %v13457_v45  ;;  %v15395_v19 = vld [vmem:[%s21776_s9 + $0xd4c] sm:$0xf0]  ;;  %v12501_v63 = vor.u32 %v15179_v26, %v12498_v36  ;;  %v13653_v45 = vor.u32 %v15467_v37, %v13650_v39  ;;  %v15307_v55 = vld [vmem:[%s21776_s9 + $0xa94] sm:$0xf]  ;;  %v13589_v38 = vor.u32 %v15451_v51, %v13586_v52 }
 0xe77   :  { %v12752_v8 = vld [vmem:[%s21776_s9 + $0x890] sm:$0xf]  ;;  %v13329_v13 = vor.u32 %v15395_v19, %v13328_v4  ;;  %v13010_v57 = vld [vmem:[%s21776_s9 + $0xad0] sm:$0xf0] }
 0xe78   :  { %6785 = vmatpush.bf16.msra.mxu3 %v12881_v46  ;;  %v15251_v10 = vld [vmem:[%s21776_s9 + $0x8cc] sm:$0xf0]  ;;  %v13077_v46 = vor.u32 %v15323_v40, %v13074_v53  ;;  %v15019_v60 = vld [vmem:[%s21776_s9 + $0x194] sm:$0xf]  ;;  %v12120_v53 = vld [vmem:[%s21776_s9 + $0x398] sm:$0xf] }
 0xe79   :  { %6761 = vmatpush.bf16.msrb.mxu1 %v11729_v58  ;;  %v13264_v2 = vld [vmem:[%s21776_s9 + $0xc90] sm:$0xf]  ;;  %v12753_v12 = vor.u32 %v15251_v10, %v12752_v8  ;;  %v11925_v58 = vor.u32 %v15035_v42, %v11922_v44  ;;  %v11858_v0 = vld [vmem:[%s21776_s9 + $0x1d0] sm:$0xf0] }
 0xe7a   :  { %6774 = vmatpush.bf16.msra.mxu2 %v12241_v59  ;;  %6798 = vmatpush.bf16.msra.mxu0 %v13393_v1  ;;  %v15379_v15 = vld [vmem:[%s21776_s9 + $0xccc] sm:$0xf0]  ;;  %v12437_v59 = vor.u32 %v15163_v48, %v12434_v50  ;;  %v13013_v1 = vor.u32 %v15307_v55, %v13010_v57  ;;  %v12370_v43 = vld [vmem:[%s21776_s9 + $0x5d0] sm:$0xf0]  ;;  %v11861_v6 = vor.u32 %v15019_v60, %v11858_v0  ;;  %v12568_v60 = vld [vmem:[%s21776_s9 + $0x718] sm:$0xf] }
 0xe7b   :  { %v12688_v33 = vld [vmem:[%s21776_s9 + $0x810] sm:$0xf]  ;;  %v13265_v24 = vor.u32 %v15379_v15, %v13264_v2  ;;  %v15435_v4 = vld [vmem:[%s21776_s9 + $0xe94] sm:$0xf]  ;;  %v15204_v0 = vld [vmem:[%s21776_s9 + $0x754] sm:$0xf0] }
 0xe7c   :  { %6786 = vmatpush.bf16.msra.mxu3 %v12817_v3  ;;  %v15235_v21 = vld [vmem:[%s21776_s9 + $0x84c] sm:$0xf0]  ;;  %v15147_v3 = vld [vmem:[%s21776_s9 + $0x594] sm:$0xf] }
 0xe7d   :  { %6762 = vmatpush.bf16.msrb.mxu1 %v11665_v11  ;;  %v13200_v27 = vld [vmem:[%s21776_s9 + $0xc10] sm:$0xf]  ;;  %v12689_v30 = vor.u32 %v15235_v21, %v12688_v33  ;;  %v13522_v19 = vld [vmem:[%s21776_s9 + $0xed0] sm:$0xf0]  ;;  %v12373_v7 = vor.u32 %v15147_v3, %v12370_v43  ;;  %v13144_v3 = vld [vmem:[%s21776_s9 + $0xb98] sm:$0xf] }
 0xe7e   :  { %6775 = vmatpush.bf16.msra.mxu2 %v12177_v14  ;;  %6799 = vmatpush.bf16.msra.mxu0 %v13329_v13  ;;  %v15363_v9 = vld [vmem:[%s21776_s9 + $0xc4c] sm:$0xf0]  ;;  %v15291_v41 = vld [vmem:[%s21776_s9 + $0xa14] sm:$0xf]  ;;  %v13525_v11 = vor.u32 %v15435_v4, %v13522_v19  ;;  %v15348_v43 = vld [vmem:[%s21776_s9 + $0xbd4] sm:$0xf0] }
 0xe7f   :  { %v13201_v49 = vor.u32 %v15363_v9, %v13200_v27  ;;  %v12946_v5 = vld [vmem:[%s21776_s9 + $0xa50] sm:$0xf0] }
 0xe80   :  { %6787 = vmatpush.bf16.msra.mxu3 %v12753_v12  ;;  %6763 = vmatmul.bf16.vlgmr.msrb.gmra.mxu1 %v17872_v28  ;;  %v15003_v8 = vld [vmem:[%s21776_s9 + $0x114] sm:$0xf]  ;;  %v12949_v14 = vor.u32 %v15291_v41, %v12946_v5  ;;  %v12569_v5 = vor.u32 %v15204_v0, %v12568_v60  ;;  %v15428_v60 = vld [vmem:[%s21776_s9 + $0xe54] sm:$0xf0] }
 0xe81   :  { %6807 = vmatpush.bf16.msra.mxu1 %v12117_v62  ;;  %6776 = vmatmul.bf16.vlgmr.msra.gmra.mxu2 %v17874_v29  ;;  %v11794_v10 = vld [vmem:[%s21776_s9 + $0x150] sm:$0xf0]  ;;  %v12888_v0 = vld [vmem:[%s21776_s9 + $0x998] sm:$0xf] }
 0xe82   :  { %6820 = vmatpush.bf16.msrb.mxu2 %v12629_v47  ;;  %6800 = vmatpush.bf16.msra.mxu0 %v13265_v24  ;;  %v15131_v13 = vld [vmem:[%s21776_s9 + $0x514] sm:$0xf]  ;;  %v11797_v16 = vor.u32 %v15003_v8, %v11794_v10  ;;  %v11992_v8 = vld [vmem:[%s21776_s9 + $0x298] sm:$0xf] }
 0xe83   :  { %v12306_v62 = vld [vmem:[%s21776_s9 + $0x550] sm:$0xf0]  ;;  %v15060_v10 = vld [vmem:[%s21776_s9 + $0x2d4] sm:$0xf0] }
 0xe84   :  { %6788 = vmatpush.bf16.msra.mxu3 %v12689_v30  ;;  %v15419_v2 = vld [vmem:[%s21776_s9 + $0xe14] sm:$0xf]  ;;  %v12309_v17 = vor.u32 %v15131_v13, %v12306_v62  ;;  %v11733_v30 = vor.u32 %v14987_v18, %v11730_v20  ;;  %v15188_v13 = vld [vmem:[%s21776_s9 + $0x6d4] sm:$0xf0] }
 0xe85   :  { %6808 = vmatpush.bf16.msra.mxu1 %v12053_v25  ;;  %v13458_v15 = vld [vmem:[%s21776_s9 + $0xe50] sm:$0xf0]  ;;  %v13656_v62 = vld [vmem:[%s21776_s9 + $0xf98] sm:$0xf] }
 0xe86   :  { %6821 = vmatpush.bf16.msrb.mxu2 %v12565_v56  ;;  %6801 = vmatpush.bf16.msra.mxu0 %v13201_v49  ;;  %v15275_v47 = vld [vmem:[%s21776_s9 + $0x994] sm:$0xf]  ;;  %v13461_v33 = vor.u32 %v15419_v2, %v13458_v15  ;;  %v15092_v49 = vld [vmem:[%s21776_s9 + $0x3d4] sm:$0xf0] }
 0xe87   :  { %6789 = vmatmul.bf16.vlgmr.msra.gmra.mxu3 %v17910_v54  ;;  %v12882_v12 = vld [vmem:[%s21776_s9 + $0x9d0] sm:$0xf0]  ;;  %v12121_v50 = vor.u32 %v15092_v49, %v12120_v53  ;;  %v15476_v2 = vld [vmem:[%s21776_s9 + $0xfd4] sm:$0xf0] }
 0xe88   :  { %6833 = vmatpush.bf16.msrb.mxu3 %v13141_v35  ;;  %v12885_v21 = vor.u32 %v15275_v47, %v12882_v12  ;;  %v15115_v22 = vld [vmem:[%s21776_s9 + $0x494] sm:$0xf]  ;;  %v13080_v15 = vld [vmem:[%s21776_s9 + $0xb18] sm:$0xf] }
 0xe89   :  { %6809 = vmatpush.bf16.msra.mxu1 %v11989_v34  ;;  %6802 = vmatmul.bf16.vlgmr.msra.gmra.mxu0 %v17921_v61  ;;  %v12242_v23 = vld [vmem:[%s21776_s9 + $0x4d0] sm:$0xf0]  ;;  %v12632_v34 = vld [vmem:[%s21776_s9 + $0x798] sm:$0xf] }
 0xe8a   :  { %6822 = vmatpush.bf16.msrb.mxu2 %v12501_v63  ;;  %6846 = vmatpush.bf16.msrb.mxu0 %v13653_v45  ;;  %v15403_v24 = vld [vmem:[%s21776_s9 + $0xd94] sm:$0xf]  ;;  %v12245_v9 = vor.u32 %v15115_v22, %v12242_v23  ;;  %v15220_v63 = vld [vmem:[%s21776_s9 + $0x7d4] sm:$0xf0] }
 0xe8b   :  { %v13394_v25 = vld [vmem:[%s21776_s9 + $0xdd0] sm:$0xf0]  ;;  %v12633_v55 = vor.u32 %v15220_v63, %v12632_v34  ;;  %v15332_v47 = vld [vmem:[%s21776_s9 + $0xb54] sm:$0xf0] }
 0xe8c   :  { %6834 = vmatpush.bf16.msrb.mxu3 %v13077_v46  ;;  %v15259_v27 = vld [vmem:[%s21776_s9 + $0x914] sm:$0xf]  ;;  %v13397_v26 = vor.u32 %v15403_v24, %v13394_v25  ;;  %v11928_v20 = vld [vmem:[%s21776_s9 + $0x218] sm:$0xf]  ;;  %v13081_v22 = vor.u32 %v15332_v47, %v13080_v15 }
 0xe8d   :  { %6810 = vmatpush.bf16.msra.mxu1 %v11925_v58  ;;  %v12818_v56 = vld [vmem:[%s21776_s9 + $0x950] sm:$0xf0]  ;;  %v12056_v58 = vld [vmem:[%s21776_s9 + $0x318] sm:$0xf] }
 0xe8e   :  { %6823 = vmatpush.bf16.msrb.mxu2 %v12437_v59  ;;  %6847 = vmatpush.bf16.msrb.mxu0 %v13589_v38  ;;  %v14971_v31 = vld [vmem:[%s21776_s9 + $0x14] sm:$0xf]  ;;  %v12821_v36 = vor.u32 %v15259_v27, %v12818_v56  ;;  %v15076_v59 = vld [vmem:[%s21776_s9 + $0x354] sm:$0xf0] }
 0xe8f   :  { %v11666_v32 = vld [vmem:[%s21776_s9 + $0x50] sm:$0xf0]  ;;  %v12057_v19 = vor.u32 %v15076_v59, %v12056_v58  ;;  %v12440_v23 = vld [vmem:[%s21776_s9 + $0x618] sm:$0xf] }
 0xe90   :  { %6835 = vmatpush.bf16.msrb.mxu3 %v13013_v1  ;;  %v15099_v35 = vld [vmem:[%s21776_s9 + $0x414] sm:$0xf]  ;;  %v11669_v45 = vor.u32 %v14971_v31, %v11666_v32  ;;  %v15172_v24 = vld [vmem:[%s21776_s9 + $0x654] sm:$0xf0] }
 0xe91   :  { %6811 = vmatpush.bf16.msra.mxu1 %v11861_v6  ;;  %v12178_v37 = vld [vmem:[%s21776_s9 + $0x450] sm:$0xf0]  ;;  %v13592_v25 = vld [vmem:[%s21776_s9 + $0xf18] sm:$0xf]  ;;  %v12441_v31 = vor.u32 %v15172_v24, %v12440_v23 }
 0xe92   :  { %6824 = vmatpush.bf16.msrb.mxu2 %v12373_v7  ;;  %6848 = vmatpush.bf16.msrb.mxu0 %v13525_v11  ;;  %v15387_v39 = vld [vmem:[%s21776_s9 + $0xd14] sm:$0xf]  ;;  %v12181_v46 = vor.u32 %v15099_v35, %v12178_v37  ;;  %v13145_v11 = vor.u32 %v15348_v43, %v13144_v3  ;;  %v15460_v27 = vld [vmem:[%s21776_s9 + $0xf54] sm:$0xf0] }
 0xe93   :  { %v13330_v40 = vld [vmem:[%s21776_s9 + $0xd50] sm:$0xf0]  ;;  %v13016_v56 = vld [vmem:[%s21776_s9 + $0xa98] sm:$0xf] }
 0xe94   :  { %6836 = vmatpush.bf16.msrb.mxu3 %v12949_v14  ;;  %v15243_v42 = vld [vmem:[%s21776_s9 + $0x894] sm:$0xf]  ;;  %v13333_v48 = vor.u32 %v15387_v39, %v13330_v40  ;;  %v12504_v14 = vld [vmem:[%s21776_s9 + $0x698] sm:$0xf] }
 0xe95   :  { %6812 = vmatpush.bf16.msra.mxu1 %v11797_v16  ;;  %v12754_v44 = vld [vmem:[%s21776_s9 + $0x8d0] sm:$0xf0]  ;;  %v11993_v16 = vor.u32 %v15060_v10, %v11992_v8  ;;  %v11864_v32 = vld [vmem:[%s21776_s9 + $0x198] sm:$0xf] }
 0xe96   :  { %6825 = vmatpush.bf16.msrb.mxu2 %v12309_v17  ;;  %6849 = vmatpush.bf16.msrb.mxu0 %v13461_v33  ;;  %v15371_v51 = vld [vmem:[%s21776_s9 + $0xc94] sm:$0xf]  ;;  %v12757_v57 = vor.u32 %v15243_v42, %v12754_v44  ;;  %v12505_v17 = vor.u32 %v15188_v13, %v12504_v14  ;;  %v15044_v33 = vld [vmem:[%s21776_s9 + $0x254] sm:$0xf0] }
 0xe97   :  { %v13266_v52 = vld [vmem:[%s21776_s9 + $0xcd0] sm:$0xf0]  ;;  %v15028_v35 = vld [vmem:[%s21776_s9 + $0x1d4] sm:$0xf0] }
 0xe98   :  { %6837 = vmatpush.bf16.msrb.mxu3 %v12885_v21  ;;  %v15227_v38 = vld [vmem:[%s21776_s9 + $0x814] sm:$0xf]  ;;  %v13269_v4 = vor.u32 %v15371_v51, %v13266_v52  ;;  %v13657_v21 = vor.u32 %v15476_v2, %v13656_v62  ;;  %v12376_v37 = vld [vmem:[%s21776_s9 + $0x598] sm:$0xf]  ;;  %v11865_v44 = vor.u32 %v15028_v35, %v11864_v32 }
 0xe99   :  { %6813 = vmatpush.bf16.msra.mxu1 %v11733_v30  ;;  %v12690_v1 = vld [vmem:[%s21776_s9 + $0x850] sm:$0xf0]  ;;  %v15316_v30 = vld [vmem:[%s21776_s9 + $0xad4] sm:$0xf0] }
 0xe9a   :  { %6826 = vmatpush.bf16.msrb.mxu2 %v12245_v9  ;;  %6850 = vmatpush.bf16.msrb.mxu0 %v13397_v26  ;;  %v15355_v41 = vld [vmem:[%s21776_s9 + $0xc14] sm:$0xf]  ;;  %v12693_v6 = vor.u32 %v15227_v38, %v12690_v1  ;;  %v11929_v9 = vor.u32 %v15044_v33, %v11928_v20  ;;  %v13593_v26 = vor.u32 %v15460_v27, %v13592_v25  ;;  %v15156_v39 = vld [vmem:[%s21776_s9 + $0x5d4] sm:$0xf0]  ;;  %v15084_v25 = vld [vmem:[%s21776_s9 + $0x39c] sm:$0xf] }
 0xe9b   :  { %v13202_v7 = vld [vmem:[%s21776_s9 + $0xc50] sm:$0xf0]  ;;  %v13528_v40 = vld [vmem:[%s21776_s9 + $0xe98] sm:$0xf]  ;;  %v12122_v27 = vld [vmem:[%s21776_s9 + $0x3d8] sm:$0xf0] }
 0xe9c   :  { %6838 = vmatpush.bf16.msrb.mxu3 %v12821_v36  ;;  %v13205_v12 = vor.u32 %v15355_v41, %v13202_v7  ;;  %v13017_v36 = vor.u32 %v15316_v30, %v13016_v56  ;;  %v15444_v49 = vld [vmem:[%s21776_s9 + $0xed4] sm:$0xf0]  ;;  %v15212_v56 = vld [vmem:[%s21776_s9 + $0x79c] sm:$0xf] }
 0xe9d   :  { %6814 = vmatpush.bf16.msra.mxu1 %v11669_v45  ;;  %v6556_v18 = vpop.f32.mrf.mxu1  ;;  %v12952_v34 = vld [vmem:[%s21776_s9 + $0xa18] sm:$0xf]  ;;  %v12377_v45 = vor.u32 %v15156_v39, %v12376_v37  ;;  %v13529_v52 = vor.u32 %v15444_v49, %v13528_v40  ;;  %v12634_v30 = vld [vmem:[%s21776_s9 + $0x7d8] sm:$0xf0]  ;;  %v12125_v37 = vor.u32 %v15084_v25, %v12122_v27 }
 0xe9e   :  { %6827 = vmatpush.bf16.msrb.mxu2 %v12181_v46  ;;  %6851 = vmatpush.bf16.msrb.mxu0 %v13333_v48  ;;  %v15300_v63 = vld [vmem:[%s21776_s9 + $0xa54] sm:$0xf0]  ;;  %v15308_v25 = vld [vmem:[%s21776_s9 + $0xa9c] sm:$0xf] }
 0xe9f   :  { %v15012_v51 = vld [vmem:[%s21776_s9 + $0x154] sm:$0xf0]  ;;  %v13018_v27 = vld [vmem:[%s21776_s9 + $0xad8] sm:$0xf0] }
 0xea0   :  { %6839 = vmatpush.bf16.msrb.mxu3 %v12757_v57  ;;  %6815 = vmatmul.bf16.vlgmr.msra.gmra.mxu1 %v17872_v28  ;;  %v12312_v57 = vld [vmem:[%s21776_s9 + $0x518] sm:$0xf] }
 0xea1   :  { %6859 = vmatpush.bf16.msrb.mxu1 %v12121_v50  ;;  %6828 = vmatmul.bf16.vlgmr.msrb.gmra.mxu2 %v17874_v29  ;;  %v11800_v50 = vld [vmem:[%s21776_s9 + $0x118] sm:$0xf] }
 0xea2   :  { %6872 = vmatpush.bf16.msra.mxu2 %v12633_v55  ;;  %6852 = vmatpush.bf16.msrb.mxu0 %v13269_v4  ;;  %v12953_v55 = vor.u32 %v15300_v63, %v12952_v34  ;;  %v15140_v58 = vld [vmem:[%s21776_s9 + $0x554] sm:$0xf0]  ;;  %v11801_v1 = vor.u32 %v15012_v51, %v11800_v50  ;;  %v15068_v34 = vld [vmem:[%s21776_s9 + $0x31c] sm:$0xf] }
 0xea3   :  { %v6569_v53 = vpop.f32.mrf.mxu2  ;;  %v13464_v59 = vld [vmem:[%s21776_s9 + $0xe18] sm:$0xf]  ;;  %v12313_v3 = vor.u32 %v15140_v58, %v12312_v57  ;;  %v12058_v63 = vld [vmem:[%s21776_s9 + $0x358] sm:$0xf0] }
 0xea4   :  { %6840 = vmatpush.bf16.msrb.mxu3 %v12693_v6  ;;  %v6570_v42 = vadd.f32 %v6569_v53, %v6556_v18  ;;  %v15284_v38 = vld [vmem:[%s21776_s9 + $0x9d4] sm:$0xf0]  ;;  %v12637_v53 = vor.u32 %v15212_v56, %v12634_v30  ;;  %v13146_v57 = vld [vmem:[%s21776_s9 + $0xbd8] sm:$0xf0] }
 0xea5   :  { %6860 = vmatpush.bf16.msrb.mxu1 %v12057_v19  ;;  %v6558_v46 = vpop.f32.mrf.mxu1  ;;  %v6595_v48 = vpop.f32.mrf.mxu0  ;;  %v11736_v43 = vld [vmem:[%s21776_s9 + $0x98] sm:$0xf]  ;;  %v13465_v19 = vor.u32 %v15428_v60, %v13464_v59  ;;  %v12061_v59 = vor.u32 %v15068_v34, %v12058_v63 }
 0xea6   :  { %6873 = vmatpush.bf16.msra.mxu2 %v12569_v5  ;;  %6853 = vmatpush.bf16.msrb.mxu0 %v13205_v12  ;;  %v14996_v4 = vld [vmem:[%s21776_s9 + $0xd4] sm:$0xf0]  ;;  %v12889_v5 = vor.u32 %v15284_v38, %v12888_v0 }
 0xea7   :  { %6841 = vmatmul.bf16.vlgmr.msrb.gmra.mxu3 %v17910_v54  ;;  %v12248_v6 = vld [vmem:[%s21776_s9 + $0x498] sm:$0xf]  ;;  %v11737_v15 = vor.u32 %v14996_v4, %v11736_v43  ;;  %v11994_v43 = vld [vmem:[%s21776_s9 + $0x2d8] sm:$0xf0] }
 0xea8   :  { %6885 = vmatpush.bf16.msra.mxu3 %v13145_v11  ;;  %v15124_v7 = vld [vmem:[%s21776_s9 + $0x4d4] sm:$0xf0] }
 0xea9   :  { %6861 = vmatpush.bf16.msrb.mxu1 %v11993_v16  ;;  %6854 = vmatmul.bf16.vlgmr.msrb.gmra.mxu0 %v17921_v61  ;;  %v13400_v8 = vld [vmem:[%s21776_s9 + $0xd98] sm:$0xf]  ;;  %v12249_v47 = vor.u32 %v15124_v7, %v12248_v6  ;;  %v13658_v6 = vld [vmem:[%s21776_s9 + $0xfd8] sm:$0xf0] }
 0xeaa   :  { %6874 = vmatpush.bf16.msra.mxu2 %v12505_v17  ;;  %6898 = vmatpush.bf16.msra.mxu0 %v13657_v21  ;;  %v6582_v41 = vpop.f32.mrf.mxu3  ;;  %v15412_v14 = vld [vmem:[%s21776_s9 + $0xdd4] sm:$0xf0]  ;;  %v15324_v7 = vld [vmem:[%s21776_s9 + $0xb1c] sm:$0xf] }
 0xeab   :  { %v6583_v10 = vadd.f32 %v6582_v41, %v6570_v42  ;;  %v6571_v11 = vpop.f32.mrf.mxu2  ;;  %v12824_v13 = vld [vmem:[%s21776_s9 + $0x918] sm:$0xf]  ;;  %v13401_v33 = vor.u32 %v15412_v14, %v13400_v8  ;;  %v15196_v42 = vld [vmem:[%s21776_s9 + $0x71c] sm:$0xf] }
 0xeac   :  { %6886 = vmatpush.bf16.msra.mxu3 %v13081_v22  ;;  %v15268_v62 = vld [vmem:[%s21776_s9 + $0x954] sm:$0xf0]  ;;  %v12506_v41 = vld [vmem:[%s21776_s9 + $0x6d8] sm:$0xf0] }
 0xead   :  { %6862 = vmatpush.bf16.msrb.mxu1 %v11929_v9  ;;  %v18806_v2 = vadd.f32 %v6595_v48, %v6583_v10  ;;  %v6597_v12 = vpop.f32.mrf.mxu0  ;;  %v6608_v16 = vpop.f32.mrf.mxu1  ;;  %v11672_v17 = vld [vmem:[%s21776_s9 + $0x18] sm:$0xf]  ;;  %v12825_v21 = vor.u32 %v15268_v62, %v12824_v13  ;;  %v13082_v8 = vld [vmem:[%s21776_s9 + $0xb58] sm:$0xf0] }
 0xeae   :  { %6875 = vmatpush.bf16.msra.mxu2 %v12441_v31  ;;  %6899 = vmatpush.bf16.msra.mxu0 %v13593_v26  ;;  %v14980_v18 = vld [vmem:[%s21776_s9 + $0x54] sm:$0xf0] }
 0xeaf   :  { %v12184_v20 = vld [vmem:[%s21776_s9 + $0x418] sm:$0xf]  ;;  %v11673_v32 = vor.u32 %v14980_v18, %v11672_v17  ;;  %v13085_v17 = vor.u32 %v15324_v7, %v13082_v8  ;;  %v15164_v18 = vld [vmem:[%s21776_s9 + $0x61c] sm:$0xf] }
 0xeb0   :  { %6887 = vmatpush.bf16.msra.mxu3 %v13017_v36  ;;  %v15108_v22 = vld [vmem:[%s21776_s9 + $0x454] sm:$0xf0]  ;;  %v13402_v7 = vld [vmem:[%s21776_s9 + $0xdd8] sm:$0xf0] }
 0xeb1   :  { %6863 = vmatpush.bf16.msrb.mxu1 %v11865_v44  ;;  %v13336_v23 = vld [vmem:[%s21776_s9 + $0xd18] sm:$0xf]  ;;  %v12185_v35 = vor.u32 %v15108_v22, %v12184_v20  ;;  %v12442_v20 = vld [vmem:[%s21776_s9 + $0x658] sm:$0xf0] }
 0xeb2   :  { %6876 = vmatpush.bf16.msra.mxu2 %v12377_v45  ;;  %6900 = vmatpush.bf16.msra.mxu0 %v13529_v52  ;;  %v15396_v24 = vld [vmem:[%s21776_s9 + $0xd54] sm:$0xf0]  ;;  %v6584_v36 = vpop.f32.mrf.mxu3  ;;  %v12570_v45 = vld [vmem:[%s21776_s9 + $0x758] sm:$0xf0]  ;;  %v12445_v30 = vor.u32 %v15164_v18, %v12442_v20 }
 0xeb3   :  { %v12760_v9 = vld [vmem:[%s21776_s9 + $0x898] sm:$0xf]  ;;  %v13337_v26 = vor.u32 %v15396_v24, %v13336_v23  ;;  %v12573_v0 = vor.u32 %v15196_v42, %v12570_v45  ;;  %v13594_v24 = vld [vmem:[%s21776_s9 + $0xf58] sm:$0xf0] }
 0xeb4   :  { %6888 = vmatpush.bf16.msra.mxu3 %v12953_v55  ;;  %v15252_v31 = vld [vmem:[%s21776_s9 + $0x8d4] sm:$0xf0]  ;;  %v6621_v44 = vpop.f32.mrf.mxu2  ;;  %v15340_v55 = vld [vmem:[%s21776_s9 + $0xb9c] sm:$0xf] }
 0xeb5   :  { %6864 = vmatpush.bf16.msrb.mxu1 %v11801_v1  ;;  %v13272_v39 = vld [vmem:[%s21776_s9 + $0xc98] sm:$0xf]  ;;  %v12761_v49 = vor.u32 %v15252_v31, %v12760_v9  ;;  %v6622_v50 = vadd.f32 %v6621_v44, %v6608_v16  ;;  %v6610_v51 = vpop.f32.mrf.mxu1  ;;  %v6647_v52 = vpop.f32.mrf.mxu0  ;;  %v13149_v4 = vor.u32 %v15340_v55, %v13146_v57  ;;  %v15020_v9 = vld [vmem:[%s21776_s9 + $0x19c] sm:$0xf] }
 0xeb6   :  { %6877 = vmatpush.bf16.msra.mxu2 %v12313_v3  ;;  %6901 = vmatpush.bf16.msra.mxu0 %v13465_v19  ;;  %v15380_v40 = vld [vmem:[%s21776_s9 + $0xcd4] sm:$0xf0]  ;;  %v15052_v3 = vld [vmem:[%s21776_s9 + $0x29c] sm:$0xf] }
 0xeb7   :  { %v12696_v46 = vld [vmem:[%s21776_s9 + $0x818] sm:$0xf]  ;;  %v13273_v58 = vor.u32 %v15380_v40, %v13272_v39  ;;  %v15180_v19 = vld [vmem:[%s21776_s9 + $0x69c] sm:$0xf]  ;;  %v11997_v13 = vor.u32 %v15052_v3, %v11994_v43 }
 0xeb8   :  { %6889 = vmatpush.bf16.msra.mxu3 %v12889_v5  ;;  %v15236_v48 = vld [vmem:[%s21776_s9 + $0x854] sm:$0xf0]  ;;  %v15468_v5 = vld [vmem:[%s21776_s9 + $0xf9c] sm:$0xf]  ;;  %v12509_v62 = vor.u32 %v15180_v19, %v12506_v41 }
 0xeb9   :  { %6865 = vmatpush.bf16.msrb.mxu1 %v11737_v15  ;;  %v13208_v60 = vld [vmem:[%s21776_s9 + $0xc18] sm:$0xf]  ;;  %v12697_v38 = vor.u32 %v15236_v48, %v12696_v46  ;;  %v15036_v15 = vld [vmem:[%s21776_s9 + $0x21c] sm:$0xf]  ;;  %v13661_v12 = vor.u32 %v15468_v5, %v13658_v6 }
 0xeba   :  { %6878 = vmatpush.bf16.msra.mxu2 %v12249_v47  ;;  %6902 = vmatpush.bf16.msra.mxu0 %v13401_v33  ;;  %v15364_v1 = vld [vmem:[%s21776_s9 + $0xc54] sm:$0xf0]  ;;  %v6634_v11 = vpop.f32.mrf.mxu3  ;;  %v11930_v47 = vld [vmem:[%s21776_s9 + $0x258] sm:$0xf0] }
 0xebb   :  { %v13209_v10 = vor.u32 %v15364_v1, %v13208_v60  ;;  %v6635_v14 = vadd.f32 %v6634_v11, %v6622_v50  ;;  %v15452_v33 = vld [vmem:[%s21776_s9 + $0xf1c] sm:$0xf]  ;;  %v11933_v56 = vor.u32 %v15036_v15, %v11930_v47 }
 0xebc   :  { %6890 = vmatpush.bf16.msra.mxu3 %v12825_v21  ;;  %v6623_v16 = vpop.f32.mrf.mxu2  ;;  %v11866_v31 = vld [vmem:[%s21776_s9 + $0x1d8] sm:$0xf0] }
 0xebd   :  { %6866 = vmatpush.bf16.msrb.mxu1 %v11673_v32  ;;  %v18921_v21 = vadd.f32 %v6647_v52, %v6635_v14  ;;  %v6649_v22 = vpop.f32.mrf.mxu0  ;;  %v6660_v23 = vpop.f32.mrf.mxu1  ;;  %v13597_v32 = vor.u32 %v15452_v33, %v13594_v24  ;;  %v12378_v36 = vld [vmem:[%s21776_s9 + $0x5d8] sm:$0xf0]  ;;  %v11869_v34 = vor.u32 %v15020_v9, %v11866_v31  ;;  %v15093_v24 = vld [vmem:[%s21776_s9 + $0x3dc] sm:$0xf0] }
 0xebe   :  { %6879 = vmatpush.bf16.msra.mxu2 %v12185_v35  ;;  %6903 = vmatpush.bf16.msra.mxu0 %v13337_v26  ;;  %v13021_v35 = vor.u32 %v15308_v25, %v13018_v27  ;;  %v15148_v26 = vld [vmem:[%s21776_s9 + $0x59c] sm:$0xf]  ;;  %v12640_v25 = vld [vmem:[%s21776_s9 + $0x7a0] sm:$0xf] }
 0xebf   :  { %v13530_v39 = vld [vmem:[%s21776_s9 + $0xed8] sm:$0xf0]  ;;  %v12381_v63 = vor.u32 %v15148_v26, %v12378_v36 }
 0xec0   :  { %6891 = vmatpush.bf16.msra.mxu3 %v12761_v49  ;;  %6867 = vmatmul.bf16.vlgmr.msrb.gmra.mxu1 %v17872_v28  ;;  %v15292_v40 = vld [vmem:[%s21776_s9 + $0xa1c] sm:$0xf] }
 0xec1   :  { %6911 = vmatpush.bf16.msra.mxu1 %v12125_v37  ;;  %6880 = vmatmul.bf16.vlgmr.msra.gmra.mxu2 %v17874_v29  ;;  %v15436_v37 = vld [vmem:[%s21776_s9 + $0xe9c] sm:$0xf] }
 0xec2   :  { %6924 = vmatpush.bf16.msrb.mxu2 %v12637_v53  ;;  %6904 = vmatpush.bf16.msra.mxu0 %v13273_v58  ;;  %v12954_v53 = vld [vmem:[%s21776_s9 + $0xa58] sm:$0xf0]  ;;  %v6636_v49 = vpop.f32.mrf.mxu3  ;;  %v13533_v45 = vor.u32 %v15436_v37, %v13530_v39 }
 0xec3   :  { %v15004_v42 = vld [vmem:[%s21776_s9 + $0x11c] sm:$0xf]  ;;  %v12957_v48 = vor.u32 %v15292_v40, %v12954_v53  ;;  %v12064_v49 = vld [vmem:[%s21776_s9 + $0x320] sm:$0xf] }
 0xec4   :  { %6892 = vmatpush.bf16.msra.mxu3 %v12697_v38  ;;  %v11802_v44 = vld [vmem:[%s21776_s9 + $0x158] sm:$0xf0]  ;;  %v6673_v46 = vpop.f32.mrf.mxu2 }
 0xec5   :  { %6912 = vmatpush.bf16.msra.mxu1 %v12061_v59  ;;  %v15132_v50 = vld [vmem:[%s21776_s9 + $0x51c] sm:$0xf]  ;;  %v6674_v55 = vadd.f32 %v6673_v46, %v6660_v23  ;;  %v6662_v57 = vpop.f32.mrf.mxu1  ;;  %v11805_v38 = vor.u32 %v15004_v42, %v11802_v44  ;;  %v12128_v23 = vld [vmem:[%s21776_s9 + $0x3a0] sm:$0xf] }
 0xec6   :  { %6925 = vmatpush.bf16.msrb.mxu2 %v12573_v0  ;;  %6905 = vmatpush.bf16.msra.mxu0 %v13209_v10  ;;  %v12314_v51 = vld [vmem:[%s21776_s9 + $0x558] sm:$0xf0]  ;;  %v6699_v0 = vpop.f32.mrf.mxu0  ;;  %v12129_v36 = vor.u32 %v15093_v24, %v12128_v23  ;;  %v15205_v42 = vld [vmem:[%s21776_s9 + $0x75c] sm:$0xf0] }
 0xec7   :  { %6893 = vmatmul.bf16.vlgmr.msra.gmra.mxu3 %v17910_v54  ;;  %v15420_v52 = vld [vmem:[%s21776_s9 + $0xe1c] sm:$0xf]  ;;  %v12317_v1 = vor.u32 %v15132_v50, %v12314_v51  ;;  %v15349_v50 = vld [vmem:[%s21776_s9 + $0xbdc] sm:$0xf0] }
 0xec8   :  { %6937 = vmatpush.bf16.msrb.mxu3 %v13149_v4  ;;  %v13466_v58 = vld [vmem:[%s21776_s9 + $0xe58] sm:$0xf0] }
 0xec9   :  { %6913 = vmatpush.bf16.msra.mxu1 %v11997_v13  ;;  %6906 = vmatmul.bf16.vlgmr.msra.gmra.mxu0 %v17921_v61  ;;  %v15276_v59 = vld [vmem:[%s21776_s9 + $0x99c] sm:$0xf]  ;;  %v13469_v4 = vor.u32 %v15420_v52, %v13466_v58 }
 0xeca   :  { %6926 = vmatpush.bf16.msrb.mxu2 %v12509_v62  ;;  %6950 = vmatpush.bf16.msrb.mxu0 %v13661_v12  ;;  %v12890_v60 = vld [vmem:[%s21776_s9 + $0x9d8] sm:$0xf0]  ;;  %v6686_v11 = vpop.f32.mrf.mxu3 }
 0xecb   :  { %v14988_v3 = vld [vmem:[%s21776_s9 + $0x9c] sm:$0xf]  ;;  %v12893_v19 = vor.u32 %v15276_v59, %v12890_v60  ;;  %v6687_v12 = vadd.f32 %v6686_v11, %v6674_v55  ;;  %v12000_v60 = vld [vmem:[%s21776_s9 + $0x2a0] sm:$0xf] }
 0xecc   :  { %6938 = vmatpush.bf16.msrb.mxu3 %v13085_v17  ;;  %v11738_v43 = vld [vmem:[%s21776_s9 + $0xd8] sm:$0xf0]  ;;  %v6675_v17 = vpop.f32.mrf.mxu2 }
 0xecd   :  { %6914 = vmatpush.bf16.msra.mxu1 %v11933_v56  ;;  %v15116_v41 = vld [vmem:[%s21776_s9 + $0x49c] sm:$0xf]  ;;  %v11741_v14 = vor.u32 %v14988_v3, %v11738_v43  ;;  %v19033_v27 = vadd.f32 %v6699_v0, %v6687_v12  ;;  %v15061_v0 = vld [vmem:[%s21776_s9 + $0x2dc] sm:$0xf0] }
 0xece   :  { %6927 = vmatpush.bf16.msrb.mxu2 %v12445_v30  ;;  %6951 = vmatpush.bf16.msrb.mxu0 %v13597_v32  ;;  %v12250_v5 = vld [vmem:[%s21776_s9 + $0x4d8] sm:$0xf0]  ;;  %v6701_v56 = vpop.f32.mrf.mxu0  ;;  %v15221_v30 = vld [vmem:[%s21776_s9 + $0x7dc] sm:$0xf0] }
 0xecf   :  { %v15404_v6 = vld [vmem:[%s21776_s9 + $0xd9c] sm:$0xf]  ;;  %v12253_v13 = vor.u32 %v15116_v41, %v12250_v5  ;;  %v12641_v40 = vor.u32 %v15221_v30, %v12640_v25  ;;  %v15189_v3 = vld [vmem:[%s21776_s9 + $0x6dc] sm:$0xf0] }
 0xed0   :  { %6939 = vmatpush.bf16.msrb.mxu3 %v13021_v35  ;;  %v15260_v8 = vld [vmem:[%s21776_s9 + $0x91c] sm:$0xf]  ;;  %v13405_v16 = vor.u32 %v15404_v6, %v13402_v7  ;;  %v13664_v43 = vld [vmem:[%s21776_s9 + $0xfa0] sm:$0xf]  ;;  %v12001_v6 = vor.u32 %v15061_v0, %v12000_v60 }
 0xed1   :  { %6915 = vmatpush.bf16.msra.mxu1 %v11869_v34  ;;  %v12826_v10 = vld [vmem:[%s21776_s9 + $0x958] sm:$0xf0]  ;;  %v15077_v34 = vld [vmem:[%s21776_s9 + $0x35c] sm:$0xf0] }
 0xed2   :  { %6928 = vmatpush.bf16.msrb.mxu2 %v12381_v63  ;;  %6952 = vmatpush.bf16.msrb.mxu0 %v13533_v45  ;;  %v14972_v62 = vld [vmem:[%s21776_s9 + $0x1c] sm:$0xf]  ;;  %v12829_v18 = vor.u32 %v15260_v8, %v12826_v10  ;;  %v12576_v63 = vld [vmem:[%s21776_s9 + $0x720] sm:$0xf]  ;;  %v6688_v46 = vpop.f32.mrf.mxu3  ;;  %v12065_v52 = vor.u32 %v15077_v34, %v12064_v49 }
 0xed3   :  { %v11674_v15 = vld [vmem:[%s21776_s9 + $0x58] sm:$0xf0]  ;;  %v12577_v57 = vor.u32 %v15205_v42, %v12576_v63  ;;  %v15333_v41 = vld [vmem:[%s21776_s9 + $0xb5c] sm:$0xf0] }
 0xed4   :  { %6940 = vmatpush.bf16.msrb.mxu3 %v12957_v48  ;;  %v15100_v47 = vld [vmem:[%s21776_s9 + $0x41c] sm:$0xf]  ;;  %v11677_v32 = vor.u32 %v14972_v62, %v11674_v15  ;;  %v13152_v48 = vld [vmem:[%s21776_s9 + $0xba0] sm:$0xf] }
 0xed5   :  { %6916 = vmatpush.bf16.msra.mxu1 %v11805_v38  ;;  %v12186_v20 = vld [vmem:[%s21776_s9 + $0x458] sm:$0xf0]  ;;  %v13153_v38 = vor.u32 %v15349_v50, %v13152_v48  ;;  %v11936_v8 = vld [vmem:[%s21776_s9 + $0x220] sm:$0xf] }
 0xed6   :  { %6929 = vmatpush.bf16.msrb.mxu2 %v12317_v1  ;;  %6953 = vmatpush.bf16.msrb.mxu0 %v13469_v4  ;;  %v15388_v33 = vld [vmem:[%s21776_s9 + $0xd1c] sm:$0xf]  ;;  %v12189_v35 = vor.u32 %v15100_v47, %v12186_v20  ;;  %v12512_v1 = vld [vmem:[%s21776_s9 + $0x6a0] sm:$0xf] }
 0xed7   :  { %v13338_v22 = vld [vmem:[%s21776_s9 + $0xd58] sm:$0xf0]  ;;  %v15477_v4 = vld [vmem:[%s21776_s9 + $0xfdc] sm:$0xf0]  ;;  %v12513_v7 = vor.u32 %v15189_v3, %v12512_v1 }
 0xed8   :  { %6941 = vmatpush.bf16.msrb.mxu3 %v12893_v19  ;;  %v15244_v9 = vld [vmem:[%s21776_s9 + $0x89c] sm:$0xf]  ;;  %v13341_v26 = vor.u32 %v15388_v33, %v13338_v22  ;;  %v13088_v19 = vld [vmem:[%s21776_s9 + $0xb20] sm:$0xf]  ;;  %v13665_v11 = vor.u32 %v15477_v4, %v13664_v43 }
 0xed9   :  { %v12762_v31 = vld [vmem:[%s21776_s9 + $0x8d8] sm:$0xf0]  ;;  %6917 = vmatpush.bf16.msra.mxu1 %v11741_v14  ;;  %v15045_v10 = vld [vmem:[%s21776_s9 + $0x25c] sm:$0xf0]  ;;  %v13089_v14 = vor.u32 %v15333_v41, %v13088_v19 }
 0xeda   :  { %6930 = vmatpush.bf16.msrb.mxu2 %v12253_v13  ;;  %6954 = vmatpush.bf16.msrb.mxu0 %v13405_v16  ;;  %v15372_v37 = vld [vmem:[%s21776_s9 + $0xc9c] sm:$0xf]  ;;  %v12765_v53 = vor.u32 %v15244_v9, %v12762_v31  ;;  %v12448_v13 = vld [vmem:[%s21776_s9 + $0x620] sm:$0xf] }
 0xedb   :  { %v13274_v39 = vld [vmem:[%s21776_s9 + $0xcd8] sm:$0xf0]  ;;  %v15173_v62 = vld [vmem:[%s21776_s9 + $0x65c] sm:$0xf0] }
 0xedc   :  { %6942 = vmatpush.bf16.msrb.mxu3 %v12829_v18  ;;  %v15228_v44 = vld [vmem:[%s21776_s9 + $0x81c] sm:$0xf]  ;;  %v13277_v51 = vor.u32 %v15372_v37, %v13274_v39  ;;  %v13600_v15 = vld [vmem:[%s21776_s9 + $0xf20] sm:$0xf]  ;;  %v11937_v18 = vor.u32 %v15045_v10, %v11936_v8  ;;  %v12449_v20 = vor.u32 %v15173_v62, %v12448_v13 }
 0xedd   :  { %v12698_v45 = vld [vmem:[%s21776_s9 + $0x858] sm:$0xf0]  ;;  %6918 = vmatpush.bf16.msra.mxu1 %v11677_v32  ;;  %v6712_v47 = vpop.f32.mrf.mxu1  ;;  %v15461_v12 = vld [vmem:[%s21776_s9 + $0xf5c] sm:$0xf0] }
 0xede   :  { %6931 = vmatpush.bf16.msrb.mxu2 %v12189_v35  ;;  %6955 = vmatpush.bf16.msrb.mxu0 %v13341_v26  ;;  %v15356_v55 = vld [vmem:[%s21776_s9 + $0xc1c] sm:$0xf]  ;;  %v12701_v58 = vor.u32 %v15228_v44, %v12698_v45  ;;  %v13024_v16 = vld [vmem:[%s21776_s9 + $0xaa0] sm:$0xf]  ;;  %v13601_v23 = vor.u32 %v15461_v12, %v13600_v15  ;;  %v15085_v12 = vld [vmem:[%s21776_s9 + $0x3a4] sm:$0xf] }
 0xedf   :  { %v13210_v59 = vld [vmem:[%s21776_s9 + $0xc58] sm:$0xf0]  ;;  %v15317_v17 = vld [vmem:[%s21776_s9 + $0xadc] sm:$0xf0] }
 0xee0   :  { %6943 = vmatpush.bf16.msrb.mxu3 %v12765_v53  ;;  %6919 = vmatmul.bf16.vlgmr.msra.gmra.mxu1 %v17872_v28  ;;  %v13213_v5 = vor.u32 %v15356_v55, %v13210_v59  ;;  %v11872_v33 = vld [vmem:[%s21776_s9 + $0x1a0] sm:$0xf]  ;;  %v13025_v24 = vor.u32 %v15317_v17, %v13024_v16  ;;  %v12130_v16 = vld [vmem:[%s21776_s9 + $0x3e0] sm:$0xf0] }
 0xee1   :  { %6963 = vmatpush.bf16.msrb.mxu1 %v12129_v36  ;;  %6932 = vmatmul.bf16.vlgmr.msrb.gmra.mxu2 %v17874_v29  ;;  %v15029_v22 = vld [vmem:[%s21776_s9 + $0x1dc] sm:$0xf0]  ;;  %v15213_v17 = vld [vmem:[%s21776_s9 + $0x7a4] sm:$0xf] }
 0xee2   :  { %6976 = vmatpush.bf16.msra.mxu2 %v12641_v40  ;;  %6956 = vmatpush.bf16.msrb.mxu0 %v13277_v51  ;;  %v12384_v25 = vld [vmem:[%s21776_s9 + $0x5a0] sm:$0xf]  ;;  %v11873_v35 = vor.u32 %v15029_v22, %v11872_v33 }
 0xee3   :  { %v15157_v56 = vld [vmem:[%s21776_s9 + $0x5dc] sm:$0xf0] }
 0xee4   :  { %6944 = vmatpush.bf16.msrb.mxu3 %v12701_v58  ;;  %v13536_v30 = vld [vmem:[%s21776_s9 + $0xea0] sm:$0xf]  ;;  %v12385_v26 = vor.u32 %v15157_v56, %v12384_v25  ;;  %v6725_v36 = vpop.f32.mrf.mxu2  ;;  %v12133_v56 = vor.u32 %v15085_v12, %v12130_v16  ;;  %v11874_v12 = vld [vmem:[%s21776_s9 + $0x1e0] sm:$0xf0] }
 0xee5   :  { %6964 = vmatpush.bf16.msrb.mxu1 %v12065_v52  ;;  %v15445_v9 = vld [vmem:[%s21776_s9 + $0xedc] sm:$0xf0]  ;;  %v6726_v53 = vadd.f32 %v6725_v36, %v6712_v47  ;;  %v6714_v44 = vpop.f32.mrf.mxu1  ;;  %v12066_v36 = vld [vmem:[%s21776_s9 + $0x360] sm:$0xf0] }
 0xee6   :  { %6977 = vmatpush.bf16.msra.mxu2 %v12577_v57  ;;  %6957 = vmatpush.bf16.msrb.mxu0 %v13213_v5  ;;  %v12960_v31 = vld [vmem:[%s21776_s9 + $0xa20] sm:$0xf]  ;;  %v13537_v40 = vor.u32 %v15445_v9, %v13536_v30  ;;  %v6751_v50 = vpop.f32.mrf.mxu0 }
 0xee7   :  { %6945 = vmatmul.bf16.vlgmr.msrb.gmra.mxu3 %v17910_v54  ;;  %v15301_v32 = vld [vmem:[%s21776_s9 + $0xa5c] sm:$0xf0] }
 0xee8   :  { %6989 = vmatpush.bf16.msra.mxu3 %v13153_v38  ;;  %v11808_v37 = vld [vmem:[%s21776_s9 + $0x120] sm:$0xf]  ;;  %v12961_v49 = vor.u32 %v15301_v32, %v12960_v31 }
 0xee9   :  { %6965 = vmatpush.bf16.msrb.mxu1 %v12001_v6  ;;  %6958 = vmatmul.bf16.vlgmr.msrb.gmra.mxu0 %v17921_v61  ;;  %v15013_v39 = vld [vmem:[%s21776_s9 + $0x15c] sm:$0xf0] }
 0xeea   :  { %6978 = vmatpush.bf16.msra.mxu2 %v12513_v7  ;;  %7002 = vmatpush.bf16.msra.mxu0 %v13665_v11  ;;  %v12320_v34 = vld [vmem:[%s21776_s9 + $0x520] sm:$0xf]  ;;  %v11809_v51 = vor.u32 %v15013_v39, %v11808_v37  ;;  %v6738_v1 = vpop.f32.mrf.mxu3  ;;  %v15197_v37 = vld [vmem:[%s21776_s9 + $0x724] sm:$0xf] }
 0xeeb   :  { %v15141_v63 = vld [vmem:[%s21776_s9 + $0x55c] sm:$0xf0]  ;;  %v6739_v19 = vadd.f32 %v6738_v1, %v6726_v53  ;;  %v12578_v39 = vld [vmem:[%s21776_s9 + $0x760] sm:$0xf0] }
 0xeec   :  { %6990 = vmatpush.bf16.msra.mxu3 %v13089_v14  ;;  %v13472_v42 = vld [vmem:[%s21776_s9 + $0xe20] sm:$0xf]  ;;  %v12321_v52 = vor.u32 %v15141_v63, %v12320_v34  ;;  %v6727_v6 = vpop.f32.mrf.mxu2  ;;  %v13154_v34 = vld [vmem:[%s21776_s9 + $0xbe0] sm:$0xf0] }
 0xeed   :  { %6966 = vmatpush.bf16.msrb.mxu1 %v11937_v18  ;;  %v15429_v45 = vld [vmem:[%s21776_s9 + $0xe5c] sm:$0xf0]  ;;  %v19213_v11 = vadd.f32 %v6751_v50, %v6739_v19  ;;  %v15053_v50 = vld [vmem:[%s21776_s9 + $0x2a4] sm:$0xf] }
 0xeee   :  { %6979 = vmatpush.bf16.msra.mxu2 %v12449_v20  ;;  %7003 = vmatpush.bf16.msra.mxu0 %v13601_v23  ;;  %v12896_v46 = vld [vmem:[%s21776_s9 + $0x9a0] sm:$0xf]  ;;  %v13473_v58 = vor.u32 %v15429_v45, %v13472_v42  ;;  %v6753_v18 = vpop.f32.mrf.mxu0  ;;  %v12642_v20 = vld [vmem:[%s21776_s9 + $0x7e0] sm:$0xf0]  ;;  %v12581_v45 = vor.u32 %v15197_v37, %v12578_v39 }
 0xeef   :  { %v15285_v48 = vld [vmem:[%s21776_s9 + $0x9dc] sm:$0xf0]  ;;  %v12645_v31 = vor.u32 %v15213_v17, %v12642_v20  ;;  %v12450_v6 = vld [vmem:[%s21776_s9 + $0x660] sm:$0xf0] }
 0xef0   :  { %6991 = vmatpush.bf16.msra.mxu3 %v13025_v24  ;;  %v11744_v55 = vld [vmem:[%s21776_s9 + $0xa0] sm:$0xf]  ;;  %v12897_v59 = vor.u32 %v15285_v48, %v12896_v46  ;;  %v15149_v18 = vld [vmem:[%s21776_s9 + $0x5a4] sm:$0xf] }
 0xef1   :  { %6967 = vmatpush.bf16.msrb.mxu1 %v11873_v35  ;;  %v14997_v57 = vld [vmem:[%s21776_s9 + $0xdc] sm:$0xf0]  ;;  %v12386_v20 = vld [vmem:[%s21776_s9 + $0x5e0] sm:$0xf0] }
 0xef2   :  { %6980 = vmatpush.bf16.msra.mxu2 %v12385_v26  ;;  %7004 = vmatpush.bf16.msra.mxu0 %v13537_v40  ;;  %v12256_v60 = vld [vmem:[%s21776_s9 + $0x4a0] sm:$0xf]  ;;  %v11745_v41 = vor.u32 %v14997_v57, %v11744_v55  ;;  %v6740_v35 = vpop.f32.mrf.mxu3  ;;  %v15069_v26 = vld [vmem:[%s21776_s9 + $0x324] sm:$0xf] }
 0xef3   :  { %v15125_v0 = vld [vmem:[%s21776_s9 + $0x4dc] sm:$0xf0]  ;;  %v12069_v42 = vor.u32 %v15069_v26, %v12066_v36  ;;  %v15181_v55 = vld [vmem:[%s21776_s9 + $0x6a4] sm:$0xf] }
 0xef4   :  { %6992 = vmatpush.bf16.msra.mxu3 %v12961_v49  ;;  %v13408_v38 = vld [vmem:[%s21776_s9 + $0xda0] sm:$0xf]  ;;  %v12257_v5 = vor.u32 %v15125_v0, %v12256_v60  ;;  %v15341_v49 = vld [vmem:[%s21776_s9 + $0xba4] sm:$0xf] }
 0xef5   :  { %v15413_v3 = vld [vmem:[%s21776_s9 + $0xddc] sm:$0xf0]  ;;  %6968 = vmatpush.bf16.msrb.mxu1 %v11809_v51  ;;  %v12002_v51 = vld [vmem:[%s21776_s9 + $0x2e0] sm:$0xf0] }
 0xef6   :  { %v12832_v43 = vld [vmem:[%s21776_s9 + $0x920] sm:$0xf]  ;;  %6981 = vmatpush.bf16.msra.mxu2 %v12321_v52  ;;  %7005 = vmatpush.bf16.msra.mxu0 %v13473_v58  ;;  %v13409_v14 = vor.u32 %v15413_v3, %v13408_v38  ;;  %v13157_v52 = vor.u32 %v15341_v49, %v13154_v34  ;;  %v12514_v57 = vld [vmem:[%s21776_s9 + $0x6e0] sm:$0xf0]  ;;  %v12005_v1 = vor.u32 %v15053_v50, %v12002_v51 }
 0xef7   :  { %v15269_v4 = vld [vmem:[%s21776_s9 + $0x95c] sm:$0xf0]  ;;  %v15469_v58 = vld [vmem:[%s21776_s9 + $0xfa4] sm:$0xf]  ;;  %v12517_v3 = vor.u32 %v15181_v55, %v12514_v57 }
 0xef8   :  { %v11680_v7 = vld [vmem:[%s21776_s9 + $0x20] sm:$0xf]  ;;  %6993 = vmatpush.bf16.msra.mxu3 %v12897_v59  ;;  %v12833_v13 = vor.u32 %v15269_v4, %v12832_v43  ;;  %v13666_v59 = vld [vmem:[%s21776_s9 + $0xfe0] sm:$0xf0] }
 0xef9   :  { %v14981_v8 = vld [vmem:[%s21776_s9 + $0x5c] sm:$0xf0]  ;;  %6969 = vmatpush.bf16.msrb.mxu1 %v11745_v41  ;;  %v15325_v60 = vld [vmem:[%s21776_s9 + $0xb24] sm:$0xf]  ;;  %v13669_v19 = vor.u32 %v15469_v58, %v13666_v59 }
 0xefa   :  { %v12192_v10 = vld [vmem:[%s21776_s9 + $0x420] sm:$0xf]  ;;  %6982 = vmatpush.bf16.msra.mxu2 %v12257_v5  ;;  %v11681_v23 = vor.u32 %v14981_v8, %v11680_v7  ;;  %7006 = vmatpush.bf16.msra.mxu0 %v13409_v14  ;;  %v13090_v0 = vld [vmem:[%s21776_s9 + $0xb60] sm:$0xf0] }
 0xefb   :  { %v15109_v62 = vld [vmem:[%s21776_s9 + $0x45c] sm:$0xf0]  ;;  %v15037_v43 = vld [vmem:[%s21776_s9 + $0x224] sm:$0xf]  ;;  %v13093_v41 = vor.u32 %v15325_v60, %v13090_v0 }
 0xefc   :  { %v13344_v15 = vld [vmem:[%s21776_s9 + $0xd20] sm:$0xf]  ;;  %v12193_v24 = vor.u32 %v15109_v62, %v12192_v10  ;;  %6994 = vmatpush.bf16.msra.mxu3 %v12833_v13  ;;  %v11938_v4 = vld [vmem:[%s21776_s9 + $0x260] sm:$0xf0] }
 0xefd   :  { %v15397_v47 = vld [vmem:[%s21776_s9 + $0xd5c] sm:$0xf0]  ;;  %6970 = vmatpush.bf16.msrb.mxu1 %v11681_v23  ;;  %v15165_v5 = vld [vmem:[%s21776_s9 + $0x624] sm:$0xf]  ;;  %v19319_v8 = vpop.f32.mrf.mxu1  ;;  %v11941_v62 = vor.u32 %v15037_v43, %v11938_v4 }
 0xefe   :  { %v12768_v33 = vld [vmem:[%s21776_s9 + $0x8a0] sm:$0xf]  ;;  %v13345_v25 = vor.u32 %v15397_v47, %v13344_v15  ;;  %6983 = vmatpush.bf16.msra.mxu2 %v12193_v24  ;;  %v15453_v7 = vld [vmem:[%s21776_s9 + $0xf24] sm:$0xf]  ;;  %v12453_v15 = vor.u32 %v15165_v5, %v12450_v6 }
 0xeff   :  { %v15253_v22 = vld [vmem:[%s21776_s9 + $0x8dc] sm:$0xf0]  ;;  %v13602_v10 = vld [vmem:[%s21776_s9 + $0xf60] sm:$0xf0] }
 0xf00   :  { %v13280_v30 = vld [vmem:[%s21776_s9 + $0xca0] sm:$0xf]  ;;  %v12769_v32 = vor.u32 %v15253_v22, %v12768_v33  ;;  %7007 = vmatpush.bf16.msra.mxu0 %v13345_v25  ;;  %6971 = vmatmul.bf16.vlgmr.msrb.gmra.mxu1 %v17872_v28  ;;  %v15309_v14 = vld [vmem:[%s21776_s9 + $0xaa4] sm:$0xf]  ;;  %v13605_v16 = vor.u32 %v15453_v7, %v13602_v10  ;;  %v12136_v7 = vld [vmem:[%s21776_s9 + $0x3a8] sm:$0xf] }
 0xf01   :  { %v15381_v9 = vld [vmem:[%s21776_s9 + $0xcdc] sm:$0xf0]  ;;  %7015 = vmatpush.bf16.msra.mxu1 %v12133_v56  ;;  %6984 = vmatmul.bf16.vlgmr.msra.gmra.mxu2 %v17874_v29  ;;  %v13026_v13 = vld [vmem:[%s21776_s9 + $0xae0] sm:$0xf0]  ;;  %v12389_v56 = vor.u32 %v15149_v18, %v12386_v20  ;;  %v15094_v10 = vld [vmem:[%s21776_s9 + $0x3e4] sm:$0xf0] }
 0xf02   :  { %v12704_v40 = vld [vmem:[%s21776_s9 + $0x820] sm:$0xf]  ;;  %v13281_v63 = vor.u32 %v15381_v9, %v13280_v30  ;;  %7028 = vmatpush.bf16.msrb.mxu2 %v12645_v31  ;;  %6995 = vmatpush.bf16.msra.mxu3 %v12769_v32  ;;  %v15021_v47 = vld [vmem:[%s21776_s9 + $0x1a4] sm:$0xf]  ;;  %v13029_v17 = vor.u32 %v15309_v14, %v13026_v13  ;;  %v12648_v14 = vld [vmem:[%s21776_s9 + $0x7a8] sm:$0xf]  ;;  %v12137_v18 = vor.u32 %v15094_v10, %v12136_v7 }
 0xf03   :  { %v15237_v53 = vld [vmem:[%s21776_s9 + $0x85c] sm:$0xf0]  ;;  %v15437_v33 = vld [vmem:[%s21776_s9 + $0xea4] sm:$0xf]  ;;  %v11877_v25 = vor.u32 %v15021_v47, %v11874_v12  ;;  %v15318_v7 = vld [vmem:[%s21776_s9 + $0xae4] sm:$0xf0] }
 0xf04   :  { %v13216_v44 = vld [vmem:[%s21776_s9 + $0xc20] sm:$0xf]  ;;  %v12705_v46 = vor.u32 %v15237_v53, %v12704_v40  ;;  %7008 = vmatpush.bf16.msra.mxu0 %v13281_v63  ;;  %v13538_v22 = vld [vmem:[%s21776_s9 + $0xee0] sm:$0xf0]  ;;  %v19356_v30 = vpop.f32.mrf.mxu2 }
 0xf05   :  { %v15365_v48 = vld [vmem:[%s21776_s9 + $0xc5c] sm:$0xf0]  ;;  %7016 = vmatpush.bf16.msra.mxu1 %v12069_v42  ;;  %v15293_v23 = vld [vmem:[%s21776_s9 + $0xa24] sm:$0xf]  ;;  %v13541_v32 = vor.u32 %v15437_v33, %v13538_v22  ;;  %v6766_v39 = vpop.f32.mrf.mxu1 }
 0xf06   :  { %v13217_v38 = vor.u32 %v15365_v48, %v13216_v44  ;;  %7029 = vmatpush.bf16.msrb.mxu2 %v12581_v45  ;;  %6996 = vmatpush.bf16.msra.mxu3 %v12705_v46  ;;  %v12962_v24 = vld [vmem:[%s21776_s9 + $0xa60] sm:$0xf0]  ;;  %v19382_v34 = vpop.f32.mrf.mxu0 }
 0xf07   :  { %v15005_v9 = vld [vmem:[%s21776_s9 + $0x124] sm:$0xf]  ;;  %v12965_v35 = vor.u32 %v15293_v23, %v12962_v24 }
 0xf08   :  { %7009 = vmatpush.bf16.msra.mxu0 %v13217_v38  ;;  %v11810_v31 = vld [vmem:[%s21776_s9 + $0x160] sm:$0xf0] }
 0xf09   :  { %6997 = vmatmul.bf16.vlgmr.msra.gmra.mxu3 %v17910_v54  ;;  %7017 = vmatpush.bf16.msra.mxu1 %v12005_v1  ;;  %v15133_v26 = vld [vmem:[%s21776_s9 + $0x524] sm:$0xf]  ;;  %v11813_v63 = vor.u32 %v15005_v9, %v11810_v31  ;;  %v12584_v9 = vld [vmem:[%s21776_s9 + $0x728] sm:$0xf] }
 0xf0a   :  { %7041 = vmatpush.bf16.msrb.mxu3 %v13157_v52  ;;  %7030 = vmatpush.bf16.msrb.mxu2 %v12517_v3  ;;  %v12322_v36 = vld [vmem:[%s21776_s9 + $0x560] sm:$0xf0]  ;;  %v19399_v55 = vpop.f32.mrf.mxu3  ;;  %v15206_v31 = vld [vmem:[%s21776_s9 + $0x764] sm:$0xf0] }
 0xf0b   :  { %7010 = vmatmul.bf16.vlgmr.msra.gmra.mxu0 %v17921_v61  ;;  %v15421_v37 = vld [vmem:[%s21776_s9 + $0xe24] sm:$0xf]  ;;  %v12325_v42 = vor.u32 %v15133_v26, %v12322_v36  ;;  %v13160_v26 = vld [vmem:[%s21776_s9 + $0xba8] sm:$0xf] }
 0xf0c   :  { %7054 = vmatpush.bf16.msrb.mxu0 %v13669_v19  ;;  %v13474_v40 = vld [vmem:[%s21776_s9 + $0xe60] sm:$0xf0]  ;;  %v6779_v38 = vpop.f32.mrf.mxu2  ;;  %v15350_v36 = vld [vmem:[%s21776_s9 + $0xbe4] sm:$0xf0] }
 0xf0d   :  { %7018 = vmatpush.bf16.msra.mxu1 %v11941_v62  ;;  %v15277_v53 = vld [vmem:[%s21776_s9 + $0x9a4] sm:$0xf]  ;;  %v13477_v46 = vor.u32 %v15421_v37, %v13474_v40  ;;  %v15222_v62 = vld [vmem:[%s21776_s9 + $0x7e4] sm:$0xf0] }
 0xf0e   :  { %7042 = vmatpush.bf16.msrb.mxu3 %v13093_v41  ;;  %7031 = vmatpush.bf16.msrb.mxu2 %v12453_v15  ;;  %v12898_v49 = vld [vmem:[%s21776_s9 + $0x9e0] sm:$0xf0]  ;;  %v6805_v13 = vpop.f32.mrf.mxu0  ;;  %v12649_v22 = vor.u32 %v15222_v62, %v12648_v14  ;;  %v15046_v38 = vld [vmem:[%s21776_s9 + $0x264] sm:$0xf0] }
 0xf0f   :  { %v14989_v44 = vld [vmem:[%s21776_s9 + $0xa4] sm:$0xf]  ;;  %v12901_v48 = vor.u32 %v15277_v53, %v12898_v49  ;;  %v12585_v53 = vor.u32 %v15206_v31, %v12584_v9  ;;  %v11880_v13 = vld [vmem:[%s21776_s9 + $0x1a8] sm:$0xf] }
 0xf10   :  { %7055 = vmatpush.bf16.msrb.mxu0 %v13605_v16  ;;  %v11746_v45 = vld [vmem:[%s21776_s9 + $0xe0] sm:$0xf0]  ;;  %v15030_v62 = vld [vmem:[%s21776_s9 + $0x1e4] sm:$0xf0] }
 0xf11   :  { %7019 = vmatpush.bf16.msra.mxu1 %v11877_v25  ;;  %v15117_v50 = vld [vmem:[%s21776_s9 + $0x4a4] sm:$0xf]  ;;  %v11749_v60 = vor.u32 %v14989_v44, %v11746_v45  ;;  %v12072_v25 = vld [vmem:[%s21776_s9 + $0x328] sm:$0xf]  ;;  %v13161_v45 = vor.u32 %v15350_v36, %v13160_v26 }
 0xf12   :  { %7043 = vmatpush.bf16.msrb.mxu3 %v13029_v17  ;;  %7032 = vmatpush.bf16.msrb.mxu2 %v12389_v56  ;;  %v12258_v51 = vld [vmem:[%s21776_s9 + $0x4e0] sm:$0xf0]  ;;  %v6792_v24 = vpop.f32.mrf.mxu3  ;;  %v15078_v56 = vld [vmem:[%s21776_s9 + $0x364] sm:$0xf0] }
 0xf13   :  { %v15405_v52 = vld [vmem:[%s21776_s9 + $0xda4] sm:$0xf]  ;;  %v12261_v0 = vor.u32 %v15117_v50, %v12258_v51  ;;  %v12073_v39 = vor.u32 %v15078_v56, %v12072_v25  ;;  %v15062_v44 = vld [vmem:[%s21776_s9 + $0x2e4] sm:$0xf0] }
 0xf14   :  { %7056 = vmatpush.bf16.msrb.mxu0 %v13541_v32  ;;  %v13410_v57 = vld [vmem:[%s21776_s9 + $0xde0] sm:$0xf0]  ;;  %v13672_v50 = vld [vmem:[%s21776_s9 + $0xfa8] sm:$0xf] }
 0xf15   :  { %v15261_v58 = vld [vmem:[%s21776_s9 + $0x924] sm:$0xf]  ;;  %7020 = vmatpush.bf16.msra.mxu1 %v11813_v63  ;;  %v13413_v4 = vor.u32 %v15405_v52, %v13410_v57  ;;  %v15478_v51 = vld [vmem:[%s21776_s9 + $0xfe4] sm:$0xf0] }
 0xf16   :  { %7044 = vmatpush.bf16.msrb.mxu3 %v12965_v35  ;;  %v12834_v59 = vld [vmem:[%s21776_s9 + $0x960] sm:$0xf0]  ;;  %7033 = vmatpush.bf16.msrb.mxu2 %v12325_v42  ;;  %v12008_v42 = vld [vmem:[%s21776_s9 + $0x2a8] sm:$0xf] }
 0xf17   :  { %v14973_v1 = vld [vmem:[%s21776_s9 + $0x24] sm:$0xf]  ;;  %v12837_v19 = vor.u32 %v15261_v58, %v12834_v59  ;;  %v13096_v52 = vld [vmem:[%s21776_s9 + $0xb28] sm:$0xf]  ;;  %v12009_v59 = vor.u32 %v15062_v44, %v12008_v42 }
 0xf18   :  { %v11682_v3 = vld [vmem:[%s21776_s9 + $0x60] sm:$0xf0]  ;;  %7057 = vmatpush.bf16.msrb.mxu0 %v13477_v46  ;;  %v12520_v46 = vld [vmem:[%s21776_s9 + $0x6a8] sm:$0xf] }
 0xf19   :  { %v15101_v43 = vld [vmem:[%s21776_s9 + $0x424] sm:$0xf]  ;;  %7021 = vmatpush.bf16.msra.mxu1 %v11749_v60  ;;  %v11685_v12 = vor.u32 %v14973_v1, %v11682_v3  ;;  %v15334_v57 = vld [vmem:[%s21776_s9 + $0xb64] sm:$0xf0]  ;;  %v13673_v1 = vor.u32 %v15478_v51, %v13672_v50 }
 0xf1a   :  { %7045 = vmatpush.bf16.msrb.mxu3 %v12901_v48  ;;  %v12194_v41 = vld [vmem:[%s21776_s9 + $0x460] sm:$0xf0]  ;;  %7034 = vmatpush.bf16.msrb.mxu2 %v12261_v0  ;;  %v15190_v48 = vld [vmem:[%s21776_s9 + $0x6e4] sm:$0xf0]  ;;  %v13097_v3 = vor.u32 %v15334_v57, %v13096_v52 }
 0xf1b   :  { %v15389_v5 = vld [vmem:[%s21776_s9 + $0xd24] sm:$0xf]  ;;  %v12197_v16 = vor.u32 %v15101_v43, %v12194_v41  ;;  %v12521_v60 = vor.u32 %v15190_v48, %v12520_v46  ;;  %v11944_v0 = vld [vmem:[%s21776_s9 + $0x228] sm:$0xf] }
 0xf1c   :  { %v13346_v6 = vld [vmem:[%s21776_s9 + $0xd60] sm:$0xf0]  ;;  %7058 = vmatpush.bf16.msrb.mxu0 %v13413_v4  ;;  %v12456_v43 = vld [vmem:[%s21776_s9 + $0x628] sm:$0xf]  ;;  %v11945_v10 = vor.u32 %v15046_v38, %v11944_v0 }
 0xf1d   :  { %v15245_v15 = vld [vmem:[%s21776_s9 + $0x8a4] sm:$0xf]  ;;  %v13349_v17 = vor.u32 %v15389_v5, %v13346_v6  ;;  %7022 = vmatpush.bf16.msra.mxu1 %v11685_v12  ;;  %v15174_v4 = vld [vmem:[%s21776_s9 + $0x664] sm:$0xf0]  ;;  %v19523_v41 = vpop.f32.mrf.mxu1 }
 0xf1e   :  { %v12770_v47 = vld [vmem:[%s21776_s9 + $0x8e0] sm:$0xf0]  ;;  %7046 = vmatpush.bf16.msrb.mxu3 %v12837_v19  ;;  %7035 = vmatpush.bf16.msrb.mxu2 %v12197_v16  ;;  %v13608_v19 = vld [vmem:[%s21776_s9 + $0xf28] sm:$0xf]  ;;  %v12457_v14 = vor.u32 %v15174_v4, %v12456_v43 }
 0xf1f   :  { %v15373_v20 = vld [vmem:[%s21776_s9 + $0xca4] sm:$0xf]  ;;  %v12773_v23 = vor.u32 %v15245_v15, %v12770_v47  ;;  %v15462_v5 = vld [vmem:[%s21776_s9 + $0xf64] sm:$0xf0] }
 0xf20   :  { %v13282_v33 = vld [vmem:[%s21776_s9 + $0xce0] sm:$0xf0]  ;;  %7059 = vmatpush.bf16.msrb.mxu0 %v13349_v17  ;;  %7023 = vmatmul.bf16.vlgmr.msra.gmra.mxu1 %v17872_v28  ;;  %v13032_v6 = vld [vmem:[%s21776_s9 + $0xaa8] sm:$0xf]  ;;  %v13609_v15 = vor.u32 %v15462_v5, %v13608_v19 }
 0xf21   :  { %v15229_v32 = vld [vmem:[%s21776_s9 + $0x824] sm:$0xf]  ;;  %7067 = vmatpush.bf16.msrb.mxu1 %v12137_v18  ;;  %v13285_v37 = vor.u32 %v15373_v20, %v13282_v33  ;;  %7036 = vmatmul.bf16.vlgmr.msrb.gmra.mxu2 %v17874_v29  ;;  %v13033_v47 = vor.u32 %v15318_v7, %v13032_v6  ;;  %v12392_v12 = vld [vmem:[%s21776_s9 + $0x5a8] sm:$0xf] }
 0xf22   :  { %v12706_v35 = vld [vmem:[%s21776_s9 + $0x860] sm:$0xf0]  ;;  %7080 = vmatpush.bf16.msra.mxu2 %v12649_v22  ;;  %7047 = vmatpush.bf16.msrb.mxu3 %v12773_v23  ;;  %v15158_v16 = vld [vmem:[%s21776_s9 + $0x5e4] sm:$0xf0]  ;;  %v11881_v22 = vor.u32 %v15030_v62, %v11880_v13  ;;  %v15214_v13 = vld [vmem:[%s21776_s9 + $0x7ac] sm:$0xf] }
 0xf23   :  { %v15357_v40 = vld [vmem:[%s21776_s9 + $0xc24] sm:$0xf]  ;;  %v12709_v49 = vor.u32 %v15229_v32, %v12706_v35  ;;  %v13544_v17 = vld [vmem:[%s21776_s9 + $0xea8] sm:$0xf]  ;;  %v12393_v23 = vor.u32 %v15158_v16, %v12392_v12 }
 0xf24   :  { %v13218_v63 = vld [vmem:[%s21776_s9 + $0xc60] sm:$0xf0]  ;;  %7060 = vmatpush.bf16.msrb.mxu0 %v13285_v37  ;;  %v15446_v18 = vld [vmem:[%s21776_s9 + $0xee4] sm:$0xf0]  ;;  %v19560_v24 = vpop.f32.mrf.mxu2 }
 0xf25   :  { %7068 = vmatpush.bf16.msrb.mxu1 %v12073_v39  ;;  %v13221_v58 = vor.u32 %v15357_v40, %v13218_v63  ;;  %v12968_v20 = vld [vmem:[%s21776_s9 + $0xa28] sm:$0xf]  ;;  %v13545_v9 = vor.u32 %v15446_v18, %v13544_v17  ;;  %v6818_v36 = vpop.f32.mrf.mxu1 }
 0xf26   :  { %7081 = vmatpush.bf16.msra.mxu2 %v12585_v53  ;;  %7048 = vmatpush.bf16.msrb.mxu3 %v12709_v49  ;;  %v15302_v33 = vld [vmem:[%s21776_s9 + $0xa64] sm:$0xf0]  ;;  %v19586_v53 = vpop.f32.mrf.mxu0 }
 0xf27   :  { %v11816_v25 = vld [vmem:[%s21776_s9 + $0x128] sm:$0xf]  ;;  %v12969_v31 = vor.u32 %v15302_v33, %v12968_v20 }
 0xf28   :  { %7061 = vmatpush.bf16.msrb.mxu0 %v13221_v58  ;;  %v15014_v56 = vld [vmem:[%s21776_s9 + $0x164] sm:$0xf0] }
 0xf29   :  { %7049 = vmatmul.bf16.vlgmr.msrb.gmra.mxu3 %v17910_v54  ;;  %7069 = vmatpush.bf16.msrb.mxu1 %v12009_v59  ;;  %v12328_v32 = vld [vmem:[%s21776_s9 + $0x528] sm:$0xf]  ;;  %v11817_v49 = vor.u32 %v15014_v56, %v11816_v25 }
 0xf2a   :  { %7093 = vmatpush.bf16.msra.mxu3 %v13161_v45  ;;  %7082 = vmatpush.bf16.msra.mxu2 %v12521_v60  ;;  %v15142_v35 = vld [vmem:[%s21776_s9 + $0x564] sm:$0xf0]  ;;  %v19603_v52 = vpop.f32.mrf.mxu3 }
 0xf2b   :  { %7062 = vmatmul.bf16.vlgmr.msrb.gmra.mxu0 %v17921_v61  ;;  %v13480_v26 = vld [vmem:[%s21776_s9 + $0xe28] sm:$0xf]  ;;  %v12329_v63 = vor.u32 %v15142_v35, %v12328_v32  ;;  %v15198_v32 = vld [vmem:[%s21776_s9 + $0x72c] sm:$0xf] }
 0xf2c   :  { %7106 = vmatpush.bf16.msra.mxu0 %v13673_v1  ;;  %v15430_v37 = vld [vmem:[%s21776_s9 + $0xe64] sm:$0xf0]  ;;  %v6831_v38 = vpop.f32.mrf.mxu2  ;;  %v12586_v35 = vld [vmem:[%s21776_s9 + $0x768] sm:$0xf0] }
 0xf2d   :  { %7070 = vmatpush.bf16.msrb.mxu1 %v11945_v10  ;;  %v12904_v39 = vld [vmem:[%s21776_s9 + $0x9a8] sm:$0xf]  ;;  %v13481_v45 = vor.u32 %v15430_v37, %v13480_v26  ;;  %v15086_v10 = vld [vmem:[%s21776_s9 + $0x3ac] sm:$0xf] }
 0xf2e   :  { %7094 = vmatpush.bf16.msra.mxu3 %v13097_v3  ;;  %7083 = vmatpush.bf16.msra.mxu2 %v12457_v14  ;;  %v15286_v40 = vld [vmem:[%s21776_s9 + $0x9e4] sm:$0xf0]  ;;  %v12138_v14 = vld [vmem:[%s21776_s9 + $0x3e8] sm:$0xf0]  ;;  %v6857_v62 = vpop.f32.mrf.mxu0 }
 0xf2f   :  { %v11752_v42 = vld [vmem:[%s21776_s9 + $0xa8] sm:$0xf]  ;;  %v12905_v46 = vor.u32 %v15286_v40, %v12904_v39  ;;  %v12141_v20 = vor.u32 %v15086_v10, %v12138_v14  ;;  %v15342_v37 = vld [vmem:[%s21776_s9 + $0xbac] sm:$0xf] }
 0xf30   :  { %7107 = vmatpush.bf16.msra.mxu0 %v13609_v15  ;;  %v14998_v44 = vld [vmem:[%s21776_s9 + $0xe4] sm:$0xf0]  ;;  %v12650_v15 = vld [vmem:[%s21776_s9 + $0x7e8] sm:$0xf0] }
 0xf31   :  { %7071 = vmatpush.bf16.msrb.mxu1 %v11881_v22  ;;  %v12264_v48 = vld [vmem:[%s21776_s9 + $0x4a8] sm:$0xf]  ;;  %v11753_v60 = vor.u32 %v14998_v44, %v11752_v42  ;;  %v13162_v39 = vld [vmem:[%s21776_s9 + $0xbe8] sm:$0xf0]  ;;  %v12589_v42 = vor.u32 %v15198_v32, %v12586_v35 }
 0xf32   :  { %7095 = vmatpush.bf16.msra.mxu3 %v13033_v47  ;;  %7084 = vmatpush.bf16.msra.mxu2 %v12393_v23  ;;  %v15126_v50 = vld [vmem:[%s21776_s9 + $0x4e4] sm:$0xf0]  ;;  %v12653_v23 = vor.u32 %v15214_v13, %v12650_v15  ;;  %v6844_v56 = vpop.f32.mrf.mxu3  ;;  %v15454_v10 = vld [vmem:[%s21776_s9 + $0xf2c] sm:$0xf] }
 0xf33   :  { %v13416_v51 = vld [vmem:[%s21776_s9 + $0xda8] sm:$0xf]  ;;  %v12265_v0 = vor.u32 %v15126_v50, %v12264_v48  ;;  %v12010_v48 = vld [vmem:[%s21776_s9 + $0x2e8] sm:$0xf0]  ;;  %v13165_v50 = vor.u32 %v15342_v37, %v13162_v39 }
 0xf34   :  { %7108 = vmatpush.bf16.msra.mxu0 %v13545_v9  ;;  %v15414_v57 = vld [vmem:[%s21776_s9 + $0xde4] sm:$0xf0]  ;;  %v15070_v9 = vld [vmem:[%s21776_s9 + $0x32c] sm:$0xf] }
 0xf35   :  { %v12840_v58 = vld [vmem:[%s21776_s9 + $0x928] sm:$0xf]  ;;  %7072 = vmatpush.bf16.msrb.mxu1 %v11817_v49  ;;  %v13417_v4 = vor.u32 %v15414_v57, %v13416_v51  ;;  %v15182_v51 = vld [vmem:[%s21776_s9 + $0x6ac] sm:$0xf] }
 0xf36   :  { %7096 = vmatpush.bf16.msra.mxu3 %v12969_v31  ;;  %v15270_v59 = vld [vmem:[%s21776_s9 + $0x964] sm:$0xf0]  ;;  %7085 = vmatpush.bf16.msra.mxu2 %v12329_v63  ;;  %v12074_v31 = vld [vmem:[%s21776_s9 + $0x368] sm:$0xf0] }
 0xf37   :  { %v11688_v1 = vld [vmem:[%s21776_s9 + $0x28] sm:$0xf]  ;;  %v12841_v19 = vor.u32 %v15270_v59, %v12840_v58  ;;  %v12077_v49 = vor.u32 %v15070_v9, %v12074_v31  ;;  %v12522_v57 = vld [vmem:[%s21776_s9 + $0x6e8] sm:$0xf0] }
 0xf38   :  { %v14982_v3 = vld [vmem:[%s21776_s9 + $0x64] sm:$0xf0]  ;;  %7109 = vmatpush.bf16.msra.mxu0 %v13481_v45  ;;  %v15470_v58 = vld [vmem:[%s21776_s9 + $0xfac] sm:$0xf] }
 0xf39   :  { %v12200_v43 = vld [vmem:[%s21776_s9 + $0x428] sm:$0xf]  ;;  %7073 = vmatpush.bf16.msrb.mxu1 %v11753_v60  ;;  %v11689_v16 = vor.u32 %v14982_v3, %v11688_v1  ;;  %v13674_v59 = vld [vmem:[%s21776_s9 + $0xfe8] sm:$0xf0]  ;;  %v12525_v3 = vor.u32 %v15182_v51, %v12522_v57 }
 0xf3a   :  { %7097 = vmatpush.bf16.msra.mxu3 %v12905_v46  ;;  %v15110_v5 = vld [vmem:[%s21776_s9 + $0x464] sm:$0xf0]  ;;  %7086 = vmatpush.bf16.msra.mxu2 %v12265_v0  ;;  %v15054_v46 = vld [vmem:[%s21776_s9 + $0x2ac] sm:$0xf] }
 0xf3b   :  { %v13352_v6 = vld [vmem:[%s21776_s9 + $0xd28] sm:$0xf]  ;;  %v12201_v17 = vor.u32 %v15110_v5, %v12200_v43  ;;  %v15326_v60 = vld [vmem:[%s21776_s9 + $0xb2c] sm:$0xf]  ;;  %v12013_v1 = vor.u32 %v15054_v46, %v12010_v48 }
 0xf3c   :  { %v15398_v7 = vld [vmem:[%s21776_s9 + $0xd64] sm:$0xf0]  ;;  %7110 = vmatpush.bf16.msra.mxu0 %v13417_v4  ;;  %v13098_v0 = vld [vmem:[%s21776_s9 + $0xb68] sm:$0xf0] }
 0xf3d   :  { %v12776_v47 = vld [vmem:[%s21776_s9 + $0x8a8] sm:$0xf]  ;;  %v13353_v18 = vor.u32 %v15398_v7, %v13352_v6  ;;  %7074 = vmatpush.bf16.msrb.mxu1 %v11689_v16  ;;  %v15038_v43 = vld [vmem:[%s21776_s9 + $0x22c] sm:$0xf]  ;;  %v13101_v5 = vor.u32 %v15326_v60, %v13098_v0  ;;  %v19727_v14 = vpop.f32.mrf.mxu1 }
 0xf3e   :  { %v15254_v12 = vld [vmem:[%s21776_s9 + $0x8e4] sm:$0xf0]  ;;  %7098 = vmatpush.bf16.msra.mxu3 %v12841_v19  ;;  %7087 = vmatpush.bf16.msra.mxu2 %v12201_v17  ;;  %v11946_v4 = vld [vmem:[%s21776_s9 + $0x268] sm:$0xf0]  ;;  %v13677_v19 = vor.u32 %v15470_v58, %v13674_v59 }
 0xf3f   :  { %v13288_v33 = vld [vmem:[%s21776_s9 + $0xca8] sm:$0xf]  ;;  %v12777_v25 = vor.u32 %v15254_v12, %v12776_v47  ;;  %v15166_v6 = vld [vmem:[%s21776_s9 + $0x62c] sm:$0xf]  ;;  %v11949_v47 = vor.u32 %v15038_v43, %v11946_v4 }
 0xf40   :  { %v15382_v22 = vld [vmem:[%s21776_s9 + $0xce4] sm:$0xf0]  ;;  %7111 = vmatpush.bf16.msra.mxu0 %v13353_v18  ;;  %7075 = vmatmul.bf16.vlgmr.msrb.gmra.mxu1 %v17872_v28  ;;  %v12458_v7 = vld [vmem:[%s21776_s9 + $0x668] sm:$0xf0] }
 0xf41   :  { %v12712_v26 = vld [vmem:[%s21776_s9 + $0x828] sm:$0xf]  ;;  %7119 = vmatpush.bf16.msra.mxu1 %v12141_v20  ;;  %v13289_v40 = vor.u32 %v15382_v22, %v13288_v33  ;;  %7088 = vmatmul.bf16.vlgmr.msra.gmra.mxu2 %v17874_v29  ;;  %v13610_v13 = vld [vmem:[%s21776_s9 + $0xf68] sm:$0xf0]  ;;  %v12461_v12 = vor.u32 %v15166_v6, %v12458_v7 }
 0xf42   :  { %v15238_v36 = vld [vmem:[%s21776_s9 + $0x864] sm:$0xf0]  ;;  %7132 = vmatpush.bf16.msrb.mxu2 %v12653_v23  ;;  %7099 = vmatpush.bf16.msra.mxu3 %v12777_v25  ;;  %v15310_v62 = vld [vmem:[%s21776_s9 + $0xaac] sm:$0xf]  ;;  %v13613_v18 = vor.u32 %v15454_v10, %v13610_v13 }
 0xf43   :  { %v13224_v63 = vld [vmem:[%s21776_s9 + $0xc28] sm:$0xf]  ;;  %v12713_v44 = vor.u32 %v15238_v36, %v12712_v26  ;;  %v13034_v15 = vld [vmem:[%s21776_s9 + $0xae8] sm:$0xf0] }
 0xf44   :  { %v15366_v45 = vld [vmem:[%s21776_s9 + $0xc64] sm:$0xf0]  ;;  %7112 = vmatpush.bf16.msra.mxu0 %v13289_v40  ;;  %v15022_v16 = vld [vmem:[%s21776_s9 + $0x1ac] sm:$0xf]  ;;  %v13037_v20 = vor.u32 %v15310_v62, %v13034_v15  ;;  %v19764_v35 = vpop.f32.mrf.mxu2 }
 0xf45   :  { %7120 = vmatpush.bf16.msra.mxu1 %v12077_v49  ;;  %v13225_v38 = vor.u32 %v15366_v45, %v13224_v63  ;;  %v11882_v17 = vld [vmem:[%s21776_s9 + $0x1e8] sm:$0xf0] }
 0xf46   :  { %7133 = vmatpush.bf16.msrb.mxu2 %v12589_v42  ;;  %7100 = vmatpush.bf16.msra.mxu3 %v12713_v44  ;;  %v15150_v33 = vld [vmem:[%s21776_s9 + $0x5ac] sm:$0xf]  ;;  %v11885_v31 = vor.u32 %v15022_v16, %v11882_v17  ;;  %v6870_v42 = vpop.f32.mrf.mxu1  ;;  %v19790_v48 = vpop.f32.mrf.mxu0 }
 0xf47   :  { %v12394_v22 = vld [vmem:[%s21776_s9 + $0x5e8] sm:$0xf0]  ;;  %v15079_v42 = vld [vmem:[%s21776_s9 + $0x36c] sm:$0xf0] }
 0xf48   :  { %7113 = vmatpush.bf16.msra.mxu0 %v13225_v38  ;;  %v15438_v23 = vld [vmem:[%s21776_s9 + $0xeac] sm:$0xf]  ;;  %v12397_v32 = vor.u32 %v15150_v33, %v12394_v22  ;;  %v12656_v33 = vld [vmem:[%s21776_s9 + $0x7b0] sm:$0xf] }
 0xf49   :  { %7101 = vmatmul.bf16.vlgmr.msra.gmra.mxu3 %v17910_v54  ;;  %7121 = vmatpush.bf16.msra.mxu1 %v12013_v1  ;;  %v13546_v25 = vld [vmem:[%s21776_s9 + $0xee8] sm:$0xf0] }
 0xf4a   :  { %7145 = vmatpush.bf16.msrb.mxu3 %v13165_v50  ;;  %7134 = vmatpush.bf16.msrb.mxu2 %v12525_v3  ;;  %v15294_v56 = vld [vmem:[%s21776_s9 + $0xa2c] sm:$0xf]  ;;  %v13549_v37 = vor.u32 %v15438_v23, %v13546_v25  ;;  %v19807_v3 = vpop.f32.mrf.mxu3  ;;  %v15223_v23 = vld [vmem:[%s21776_s9 + $0x7ec] sm:$0xf0] }
 0xf4b   :  { %7114 = vmatmul.bf16.vlgmr.msra.gmra.mxu0 %v17921_v61  ;;  %v12970_v9 = vld [vmem:[%s21776_s9 + $0xa68] sm:$0xf0] }
 0xf4c   :  { %7158 = vmatpush.bf16.msrb.mxu0 %v13677_v19  ;;  %v15006_v26 = vld [vmem:[%s21776_s9 + $0x12c] sm:$0xf]  ;;  %v12973_v39 = vor.u32 %v15294_v56, %v12970_v9  ;;  %v6883_v7 = vpop.f32.mrf.mxu2 }
 0xf4d   :  { %7122 = vmatpush.bf16.msra.mxu1 %v11949_v47  ;;  %v11818_v36 = vld [vmem:[%s21776_s9 + $0x168] sm:$0xf0]  ;;  %v13680_v7 = vld [vmem:[%s21776_s9 + $0xfb0] sm:$0xf] }
 0xf4e   :  { %7146 = vmatpush.bf16.msrb.mxu3 %v13101_v5  ;;  %7135 = vmatpush.bf16.msrb.mxu2 %v12461_v12  ;;  %v15134_v40 = vld [vmem:[%s21776_s9 + $0x52c] sm:$0xf]  ;;  %v11821_v50 = vor.u32 %v15006_v26, %v11818_v36  ;;  %v6909_v22 = vpop.f32.mrf.mxu0 }
 0xf4f   :  { %v12330_v49 = vld [vmem:[%s21776_s9 + $0x568] sm:$0xf0]  ;;  %v15175_v22 = vld [vmem:[%s21776_s9 + $0x66c] sm:$0xf0] }
 0xf50   :  { %7159 = vmatpush.bf16.msrb.mxu0 %v13613_v18  ;;  %v15422_v63 = vld [vmem:[%s21776_s9 + $0xe2c] sm:$0xf]  ;;  %v12333_v51 = vor.u32 %v15134_v40, %v12330_v49  ;;  %v12144_v18 = vld [vmem:[%s21776_s9 + $0x3b0] sm:$0xf] }
 0xf51   :  { %v13482_v44 = vld [vmem:[%s21776_s9 + $0xe68] sm:$0xf0]  ;;  %7123 = vmatpush.bf16.msra.mxu1 %v11885_v31 }
 0xf52   :  { %7147 = vmatpush.bf16.msrb.mxu3 %v13037_v20  ;;  %v15278_v45 = vld [vmem:[%s21776_s9 + $0x9ac] sm:$0xf]  ;;  %7136 = vmatpush.bf16.msrb.mxu2 %v12397_v32  ;;  %v13485_v59 = vor.u32 %v15422_v63, %v13482_v44  ;;  %v15095_v20 = vld [vmem:[%s21776_s9 + $0x3ec] sm:$0xf0]  ;;  %v6896_v49 = vpop.f32.mrf.mxu3 }
 0xf53   :  { %v12906_v46 = vld [vmem:[%s21776_s9 + $0x9e8] sm:$0xf0]  ;;  %v12145_v26 = vor.u32 %v15095_v20, %v12144_v18  ;;  %v12080_v63 = vld [vmem:[%s21776_s9 + $0x330] sm:$0xf] }
 0xf54   :  { %v14990_v57 = vld [vmem:[%s21776_s9 + $0xac] sm:$0xf]  ;;  %7160 = vmatpush.bf16.msrb.mxu0 %v13549_v37  ;;  %v12909_v60 = vor.u32 %v15278_v45, %v12906_v46  ;;  %v12592_v44 = vld [vmem:[%s21776_s9 + $0x730] sm:$0xf] }
 0xf55   :  { %v11754_v58 = vld [vmem:[%s21776_s9 + $0xe8] sm:$0xf0]  ;;  %7124 = vmatpush.bf16.msra.mxu1 %v11821_v50  ;;  %v15207_v45 = vld [vmem:[%s21776_s9 + $0x76c] sm:$0xf0] }
 0xf56   :  { %7148 = vmatpush.bf16.msrb.mxu3 %v12973_v39  ;;  %v15118_v0 = vld [vmem:[%s21776_s9 + $0x4ac] sm:$0xf]  ;;  %7137 = vmatpush.bf16.msrb.mxu2 %v12333_v51  ;;  %v11757_v5 = vor.u32 %v14990_v57, %v11754_v58  ;;  %v12657_v39 = vor.u32 %v15223_v23, %v12656_v33  ;;  %v13168_v51 = vld [vmem:[%s21776_s9 + $0xbb0] sm:$0xf] }
 0xf57   :  { %v12266_v38 = vld [vmem:[%s21776_s9 + $0x4e8] sm:$0xf0]  ;;  %v15351_v57 = vld [vmem:[%s21776_s9 + $0xbec] sm:$0xf0] }
 0xf58   :  { %v15406_v1 = vld [vmem:[%s21776_s9 + $0xdac] sm:$0xf]  ;;  %v12269_v6 = vor.u32 %v15118_v0, %v12266_v38  ;;  %7161 = vmatpush.bf16.msrb.mxu0 %v13485_v59  ;;  %v12081_v59 = vor.u32 %v15079_v42, %v12080_v63  ;;  %v12593_v0 = vor.u32 %v15207_v45, %v12592_v44  ;;  %v12464_v33 = vld [vmem:[%s21776_s9 + $0x630] sm:$0xf] }
 0xf59   :  { %v13418_v43 = vld [vmem:[%s21776_s9 + $0xde8] sm:$0xf0]  ;;  %7125 = vmatpush.bf16.msra.mxu1 %v11757_v5  ;;  %v12528_v5 = vld [vmem:[%s21776_s9 + $0x6b0] sm:$0xf] }
 0xf5a   :  { %v15262_v4 = vld [vmem:[%s21776_s9 + $0x92c] sm:$0xf]  ;;  %7149 = vmatpush.bf16.msrb.mxu3 %v12909_v60  ;;  %v13421_v15 = vor.u32 %v15406_v1, %v13418_v43  ;;  %7138 = vmatpush.bf16.msrb.mxu2 %v12269_v6  ;;  %v12016_v43 = vld [vmem:[%s21776_s9 + $0x2b0] sm:$0xf] }
 0xf5b   :  { %v12842_v19 = vld [vmem:[%s21776_s9 + $0x968] sm:$0xf0]  ;;  %v15191_v6 = vld [vmem:[%s21776_s9 + $0x6ec] sm:$0xf0] }
 0xf5c   :  { %v14974_v10 = vld [vmem:[%s21776_s9 + $0x2c] sm:$0xf]  ;;  %v12845_v47 = vor.u32 %v15262_v4, %v12842_v19  ;;  %7162 = vmatpush.bf16.msrb.mxu0 %v13421_v15  ;;  %v15063_v4 = vld [vmem:[%s21776_s9 + $0x2ec] sm:$0xf0]  ;;  %v13169_v19 = vor.u32 %v15351_v57, %v13168_v51 }
 0xf5d   :  { %v11690_v13 = vld [vmem:[%s21776_s9 + $0x68] sm:$0xf0]  ;;  %v13616_v23 = vld [vmem:[%s21776_s9 + $0xf30] sm:$0xf] }
 0xf5e   :  { %v15102_v62 = vld [vmem:[%s21776_s9 + $0x42c] sm:$0xf]  ;;  %v11693_v9 = vor.u32 %v14974_v10, %v11690_v13  ;;  %7150 = vmatpush.bf16.msrb.mxu3 %v12845_v47  ;;  %v15479_v10 = vld [vmem:[%s21776_s9 + $0xfec] sm:$0xf0]  ;;  %v12017_v47 = vor.u32 %v15063_v4, %v12016_v43 }
 0xf5f   :  { %v12202_v12 = vld [vmem:[%s21776_s9 + $0x468] sm:$0xf0]  ;;  %v13104_v13 = vld [vmem:[%s21776_s9 + $0xb30] sm:$0xf]  ;;  %v13681_v18 = vor.u32 %v15479_v10, %v13680_v7 }
 0xf60   :  { %v15390_v16 = vld [vmem:[%s21776_s9 + $0xd2c] sm:$0xf]  ;;  %v12205_v31 = vor.u32 %v15102_v62, %v12202_v12  ;;  %7126 = vmatpush.bf16.msra.mxu1 %v11693_v9  ;;  %v15335_v62 = vld [vmem:[%s21776_s9 + $0xb6c] sm:$0xf0]  ;;  %v12529_v12 = vor.u32 %v15191_v6, %v12528_v5 }
 0xf61   :  { %v13354_v17 = vld [vmem:[%s21776_s9 + $0xd68] sm:$0xf0]  ;;  %v13105_v20 = vor.u32 %v15335_v62, %v13104_v13  ;;  %v13040_v9 = vld [vmem:[%s21776_s9 + $0xab0] sm:$0xf] }
 0xf62   :  { %v15246_v25 = vld [vmem:[%s21776_s9 + $0x8ac] sm:$0xf]  ;;  %v13357_v32 = vor.u32 %v15390_v16, %v13354_v17  ;;  %7139 = vmatpush.bf16.msrb.mxu2 %v12205_v31  ;;  %v11952_v16 = vld [vmem:[%s21776_s9 + $0x230] sm:$0xf] }
 0xf63   :  { %v12778_v56 = vld [vmem:[%s21776_s9 + $0x8e8] sm:$0xf0]  ;;  %7127 = vmatmul.bf16.vlgmr.msra.gmra.mxu1 %v17872_v28  ;;  %v15047_v17 = vld [vmem:[%s21776_s9 + $0x26c] sm:$0xf0] }
 0xf64   :  { %v15374_v36 = vld [vmem:[%s21776_s9 + $0xcac] sm:$0xf]  ;;  %v12781_v40 = vor.u32 %v15246_v25, %v12778_v56  ;;  %7163 = vmatpush.bf16.msrb.mxu0 %v13357_v32  ;;  %7171 = vmatpush.bf16.msrb.mxu1 %v12145_v26  ;;  %v19931_v25 = vpop.f32.mrf.mxu1  ;;  %v15463_v56 = vld [vmem:[%s21776_s9 + $0xf6c] sm:$0xf0]  ;;  %v11953_v32 = vor.u32 %v15047_v17, %v11952_v16  ;;  %v12465_v26 = vor.u32 %v15175_v22, %v12464_v33  ;;  %v19968_v57 = vpop.f32.mrf.mxu2 }
 0xf65   :  { %v13290_v37 = vld [vmem:[%s21776_s9 + $0xce8] sm:$0xf0]  ;;  %7140 = vmatmul.bf16.vlgmr.msrb.gmra.mxu2 %v17874_v29  ;;  %v15319_v31 = vld [vmem:[%s21776_s9 + $0xaec] sm:$0xf0] }
 0xf66   :  { %v15230_v46 = vld [vmem:[%s21776_s9 + $0x82c] sm:$0xf]  ;;  %v13293_v58 = vor.u32 %v15374_v36, %v13290_v37  ;;  %7184 = vmatpush.bf16.msra.mxu2 %v12657_v39  ;;  %7151 = vmatpush.bf16.msrb.mxu3 %v12781_v40  ;;  %v11888_v36 = vld [vmem:[%s21776_s9 + $0x1b0] sm:$0xf]  ;;  %v13617_v39 = vor.u32 %v15463_v56, %v13616_v23  ;;  %v13041_v40 = vor.u32 %v15319_v31, %v13040_v9  ;;  %v19994_v7 = vpop.f32.mrf.mxu0 }
 0xf67   :  { %v12714_v50 = vld [vmem:[%s21776_s9 + $0x868] sm:$0xf0]  ;;  %v15031_v37 = vld [vmem:[%s21776_s9 + $0x1ec] sm:$0xf0] }
 0xf68   :  { %v15358_v60 = vld [vmem:[%s21776_s9 + $0xc2c] sm:$0xf]  ;;  %v12717_v38 = vor.u32 %v15230_v46, %v12714_v50  ;;  %7164 = vmatpush.bf16.msrb.mxu0 %v13293_v58  ;;  %7172 = vmatpush.bf16.msrb.mxu1 %v12081_v59  ;;  %v12400_v49 = vld [vmem:[%s21776_s9 + $0x5b0] sm:$0xf]  ;;  %v11889_v50 = vor.u32 %v15031_v37, %v11888_v36 }
 0xf69   :  { %v13226_v1 = vld [vmem:[%s21776_s9 + $0xc68] sm:$0xf0]  ;;  %v15159_v63 = vld [vmem:[%s21776_s9 + $0x5ec] sm:$0xf0] }
 0xf6a   :  { %v13229_v15 = vor.u32 %v15358_v60, %v13226_v1  ;;  %7185 = vmatpush.bf16.msra.mxu2 %v12593_v0  ;;  %7152 = vmatpush.bf16.msrb.mxu3 %v12717_v38  ;;  %v13552_v42 = vld [vmem:[%s21776_s9 + $0xeb0] sm:$0xf]  ;;  %v12401_v51 = vor.u32 %v15159_v63, %v12400_v49 }
 0xf6b   :  { %v15447_v44 = vld [vmem:[%s21776_s9 + $0xeec] sm:$0xf0] }
 0xf6c   :  { %7165 = vmatpush.bf16.msrb.mxu0 %v13229_v15  ;;  %7173 = vmatpush.bf16.msrb.mxu1 %v12017_v47  ;;  %v12976_v45 = vld [vmem:[%s21776_s9 + $0xa30] sm:$0xf]  ;;  %v13553_v60 = vor.u32 %v15447_v44, %v13552_v42  ;;  %v6922_v4 = vpop.f32.mrf.mxu1  ;;  %v6935_v31 = vpop.f32.mrf.mxu2  ;;  %v15087_v42 = vld [vmem:[%s21776_s9 + $0x3b4] sm:$0xf] }
 0xf6d   :  { %7153 = vmatmul.bf16.vlgmr.msrb.gmra.mxu3 %v17910_v54  ;;  %v15303_v46 = vld [vmem:[%s21776_s9 + $0xa6c] sm:$0xf0]  ;;  %v12146_v44 = vld [vmem:[%s21776_s9 + $0x3f0] sm:$0xf0] }
 0xf6e   :  { %7197 = vmatpush.bf16.msra.mxu3 %v13169_v19  ;;  %7186 = vmatpush.bf16.msra.mxu2 %v12529_v12  ;;  %v11824_v58 = vld [vmem:[%s21776_s9 + $0x130] sm:$0xf]  ;;  %v12977_v0 = vor.u32 %v15303_v46, %v12976_v45  ;;  %v15215_v45 = vld [vmem:[%s21776_s9 + $0x7b4] sm:$0xf]  ;;  %v6961_v46 = vpop.f32.mrf.mxu0 }
 0xf6f   :  { %7166 = vmatmul.bf16.vlgmr.msrb.gmra.mxu0 %v17921_v61  ;;  %v15015_v59 = vld [vmem:[%s21776_s9 + $0x16c] sm:$0xf0]  ;;  %v12018_v31 = vld [vmem:[%s21776_s9 + $0x2f0] sm:$0xf0] }
 0xf70   :  { %7210 = vmatpush.bf16.msra.mxu0 %v13681_v18  ;;  %7174 = vmatpush.bf16.msrb.mxu1 %v11953_v32  ;;  %v12336_v38 = vld [vmem:[%s21776_s9 + $0x530] sm:$0xf]  ;;  %v11825_v10 = vor.u32 %v15015_v59, %v11824_v58  ;;  %v11954_v46 = vld [vmem:[%s21776_s9 + $0x270] sm:$0xf0] }
 0xf71   :  { %v15143_v1 = vld [vmem:[%s21776_s9 + $0x56c] sm:$0xf0] }
 0xf72   :  { %7198 = vmatpush.bf16.msra.mxu3 %v13105_v20  ;;  %7187 = vmatpush.bf16.msra.mxu2 %v12465_v26  ;;  %v13488_v43 = vld [vmem:[%s21776_s9 + $0xe30] sm:$0xf]  ;;  %v12337_v13 = vor.u32 %v15143_v1, %v12336_v38  ;;  %v20011_v20 = vpop.f32.mrf.mxu3  ;;  %v12149_v38 = vor.u32 %v15087_v42, %v12146_v44 }
 0xf73   :  { %v15431_v19 = vld [vmem:[%s21776_s9 + $0xe6c] sm:$0xf0] }
 0xf74   :  { %7211 = vmatpush.bf16.msra.mxu0 %v13617_v39  ;;  %v12912_v5 = vld [vmem:[%s21776_s9 + $0x9b0] sm:$0xf]  ;;  %7175 = vmatpush.bf16.msrb.mxu1 %v11889_v50  ;;  %v13489_v47 = vor.u32 %v15431_v19, %v13488_v43  ;;  %v12658_v50 = vld [vmem:[%s21776_s9 + $0x7f0] sm:$0xf0] }
 0xf75   :  { %v15287_v6 = vld [vmem:[%s21776_s9 + $0x9ec] sm:$0xf0]  ;;  %v12661_v4 = vor.u32 %v15215_v45, %v12658_v50  ;;  %v15039_v45 = vld [vmem:[%s21776_s9 + $0x234] sm:$0xf] }
 0xf76   :  { %7199 = vmatpush.bf16.msra.mxu3 %v13041_v40  ;;  %7188 = vmatpush.bf16.msra.mxu2 %v12401_v51  ;;  %v11760_v62 = vld [vmem:[%s21776_s9 + $0xb0] sm:$0xf]  ;;  %v12913_v12 = vor.u32 %v15287_v6, %v12912_v5  ;;  %v15071_v6 = vld [vmem:[%s21776_s9 + $0x334] sm:$0xf] }
 0xf77   :  { %v14999_v15 = vld [vmem:[%s21776_s9 + $0xec] sm:$0xf0] }
 0xf78   :  { %7212 = vmatpush.bf16.msra.mxu0 %v13553_v60  ;;  %v12272_v16 = vld [vmem:[%s21776_s9 + $0x4b0] sm:$0xf]  ;;  %7176 = vmatpush.bf16.msrb.mxu1 %v11825_v10  ;;  %v11761_v56 = vor.u32 %v14999_v15, %v11760_v62  ;;  %v12082_v10 = vld [vmem:[%s21776_s9 + $0x370] sm:$0xf0] }
 0xf79   :  { %v15127_v17 = vld [vmem:[%s21776_s9 + $0x4ec] sm:$0xf0]  ;;  %v12594_v62 = vld [vmem:[%s21776_s9 + $0x770] sm:$0xf0] }
 0xf7a   :  { %7200 = vmatpush.bf16.msra.mxu3 %v12977_v0  ;;  %v13424_v18 = vld [vmem:[%s21776_s9 + $0xdb0] sm:$0xf]  ;;  %7189 = vmatpush.bf16.msra.mxu2 %v12337_v13  ;;  %v12273_v9 = vor.u32 %v15127_v17, %v12272_v16  ;;  %v6948_v5 = vpop.f32.mrf.mxu3  ;;  %v15199_v13 = vld [vmem:[%s21776_s9 + $0x734] sm:$0xf] }
 0xf7b   :  { %v15415_v33 = vld [vmem:[%s21776_s9 + $0xdec] sm:$0xf0]  ;;  %v13170_v16 = vld [vmem:[%s21776_s9 + $0xbf0] sm:$0xf0] }
 0xf7c   :  { %v12848_v22 = vld [vmem:[%s21776_s9 + $0x930] sm:$0xf]  ;;  %7213 = vmatpush.bf16.msra.mxu0 %v13489_v47  ;;  %v13425_v37 = vor.u32 %v15415_v33, %v13424_v18  ;;  %7177 = vmatpush.bf16.msrb.mxu1 %v11761_v56  ;;  %v12085_v18 = vor.u32 %v15071_v6, %v12082_v10  ;;  %v15023_v5 = vld [vmem:[%s21776_s9 + $0x1b4] sm:$0xf] }
 0xf7d   :  { %v15271_v23 = vld [vmem:[%s21776_s9 + $0x96c] sm:$0xf0]  ;;  %v11890_v6 = vld [vmem:[%s21776_s9 + $0x1f0] sm:$0xf0] }
 0xf7e   :  { %v11696_v32 = vld [vmem:[%s21776_s9 + $0x30] sm:$0xf]  ;;  %7201 = vmatpush.bf16.msra.mxu3 %v12913_v12  ;;  %v12849_v39 = vor.u32 %v15271_v23, %v12848_v22  ;;  %7190 = vmatpush.bf16.msra.mxu2 %v12273_v9  ;;  %v15343_v12 = vld [vmem:[%s21776_s9 + $0xbb4] sm:$0xf]  ;;  %v12597_v22 = vor.u32 %v15199_v13, %v12594_v62 }
 0xf7f   :  { %v14983_v26 = vld [vmem:[%s21776_s9 + $0x6c] sm:$0xf0]  ;;  %v15055_v9 = vld [vmem:[%s21776_s9 + $0x2b4] sm:$0xf] }
 0xf80   :  { %v12208_v36 = vld [vmem:[%s21776_s9 + $0x430] sm:$0xf]  ;;  %v11697_v59 = vor.u32 %v14983_v26, %v11696_v32  ;;  %7214 = vmatpush.bf16.msra.mxu0 %v13425_v37  ;;  %v13173_v32 = vor.u32 %v15343_v12, %v13170_v16  ;;  %v15183_v26 = vld [vmem:[%s21776_s9 + $0x6b4] sm:$0xf]  ;;  %v12021_v42 = vor.u32 %v15055_v9, %v12018_v31 }
 0xf81   :  { %v15111_v40 = vld [vmem:[%s21776_s9 + $0x46c] sm:$0xf0]  ;;  %v15471_v37 = vld [vmem:[%s21776_s9 + $0xfb4] sm:$0xf] }
 0xf82   :  { %v13360_v49 = vld [vmem:[%s21776_s9 + $0xd30] sm:$0xf]  ;;  %v12209_v60 = vor.u32 %v15111_v40, %v12208_v36  ;;  %7202 = vmatpush.bf16.msra.mxu3 %v12849_v39  ;;  %7178 = vmatpush.bf16.msrb.mxu1 %v11697_v59  ;;  %v12530_v36 = vld [vmem:[%s21776_s9 + $0x6f0] sm:$0xf0] }
 0xf83   :  { %v15399_v63 = vld [vmem:[%s21776_s9 + $0xd6c] sm:$0xf0]  ;;  %v13682_v39 = vld [vmem:[%s21776_s9 + $0xff0] sm:$0xf0]  ;;  %v12533_v44 = vor.u32 %v15183_v26, %v12530_v36 }
 0xf84   :  { %v12784_v51 = vld [vmem:[%s21776_s9 + $0x8b0] sm:$0xf]  ;;  %v13361_v0 = vor.u32 %v15399_v63, %v13360_v49  ;;  %7191 = vmatpush.bf16.msra.mxu2 %v12209_v60  ;;  %v15327_v40 = vld [vmem:[%s21776_s9 + $0xb34] sm:$0xf]  ;;  %v13685_v50 = vor.u32 %v15471_v37, %v13682_v39 }
 0xf85   :  { %v15255_v58 = vld [vmem:[%s21776_s9 + $0x8ec] sm:$0xf0]  ;;  %7179 = vmatmul.bf16.vlgmr.msrb.gmra.mxu1 %v17872_v28  ;;  %v13106_v49 = vld [vmem:[%s21776_s9 + $0xb70] sm:$0xf0] }
 0xf86   :  { %v13296_v1 = vld [vmem:[%s21776_s9 + $0xcb0] sm:$0xf]  ;;  %v12785_v19 = vor.u32 %v15255_v58, %v12784_v51  ;;  %7215 = vmatpush.bf16.msra.mxu0 %v13361_v0  ;;  %7223 = vmatpush.bf16.msra.mxu1 %v12149_v38  ;;  %v13109_v51 = vor.u32 %v15327_v40, %v13106_v49  ;;  %v15167_v58 = vld [vmem:[%s21776_s9 + $0x634] sm:$0xf]  ;;  %v6972_v0 = vpop.f32.mrf.mxu1 }
 0xf87   :  { %v15383_v43 = vld [vmem:[%s21776_s9 + $0xcec] sm:$0xf0]  ;;  %7192 = vmatmul.bf16.vlgmr.msra.gmra.mxu2 %v17874_v29  ;;  %v12466_v59 = vld [vmem:[%s21776_s9 + $0x670] sm:$0xf0] }
 0xf88   :  { %v12720_v15 = vld [vmem:[%s21776_s9 + $0x830] sm:$0xf]  ;;  %v13297_v17 = vor.u32 %v15383_v43, %v13296_v1  ;;  %7236 = vmatpush.bf16.msrb.mxu2 %v12661_v4  ;;  %7203 = vmatpush.bf16.msra.mxu3 %v12785_v19  ;;  %v15455_v60 = vld [vmem:[%s21776_s9 + $0xf34] sm:$0xf]  ;;  %v11957_v4 = vor.u32 %v15039_v45, %v11954_v46  ;;  %v12469_v19 = vor.u32 %v15167_v58, %v12466_v59 }
 0xf89   :  { %v15239_v47 = vld [vmem:[%s21776_s9 + $0x86c] sm:$0xf0]  ;;  %v13618_v38 = vld [vmem:[%s21776_s9 + $0xf70] sm:$0xf0] }
 0xf8a   :  { %v13232_v33 = vld [vmem:[%s21776_s9 + $0xc30] sm:$0xf]  ;;  %v12721_v23 = vor.u32 %v15239_v47, %v12720_v15  ;;  %7216 = vmatpush.bf16.msra.mxu0 %v13297_v17  ;;  %7224 = vmatpush.bf16.msra.mxu1 %v12085_v18  ;;  %v15311_v1 = vld [vmem:[%s21776_s9 + $0xab4] sm:$0xf]  ;;  %v13621_v10 = vor.u32 %v15455_v60, %v13618_v38  ;;  %v11893_v18 = vor.u32 %v15023_v5, %v11890_v6 }
 0xf8b   :  { %v15367_v56 = vld [vmem:[%s21776_s9 + $0xc6c] sm:$0xf0]  ;;  %v13042_v43 = vld [vmem:[%s21776_s9 + $0xaf0] sm:$0xf0] }
 0xf8c   :  { %v13233_v63 = vor.u32 %v15367_v56, %v13232_v33  ;;  %7237 = vmatpush.bf16.msrb.mxu2 %v12597_v22  ;;  %7204 = vmatpush.bf16.msra.mxu3 %v12721_v23  ;;  %v13045_v13 = vor.u32 %v15311_v1, %v13042_v43  ;;  %v15151_v62 = vld [vmem:[%s21776_s9 + $0x5b4] sm:$0xf]  ;;  %v6985_v22 = vpop.f32.mrf.mxu2  ;;  %v6998_v38 = vpop.f32.mrf.mxu3 }
 0xf8d   :  { %v12402_v15 = vld [vmem:[%s21776_s9 + $0x5f0] sm:$0xf0]  ;;  %v6986_v31 = vadd.f32 %v6985_v22, %v6972_v0  ;;  %v12152_v22 = vld [vmem:[%s21776_s9 + $0x3b8] sm:$0xf] }
 0xf8e   :  { %7217 = vmatpush.bf16.msra.mxu0 %v13233_v63  ;;  %7225 = vmatpush.bf16.msra.mxu1 %v12021_v42  ;;  %v15439_v47 = vld [vmem:[%s21776_s9 + $0xeb4] sm:$0xf]  ;;  %v12405_v33 = vor.u32 %v15151_v62, %v12402_v15  ;;  %v6974_v39 = vpop.f32.mrf.mxu1  ;;  %v7011_v42 = vpop.f32.mrf.mxu0 }
 0xf8f   :  { %7205 = vmatmul.bf16.vlgmr.msra.gmra.mxu3 %v17910_v54  ;;  %v13554_v12 = vld [vmem:[%s21776_s9 + $0xef0] sm:$0xf0] }
 0xf90   :  { %7249 = vmatpush.bf16.msrb.mxu3 %v13173_v32  ;;  %7238 = vmatpush.bf16.msrb.mxu2 %v12533_v44  ;;  %v15295_v16 = vld [vmem:[%s21776_s9 + $0xa34] sm:$0xf]  ;;  %v13557_v9 = vor.u32 %v15439_v47, %v13554_v12 }
 0xf91   :  { %7218 = vmatmul.bf16.vlgmr.msra.gmra.mxu0 %v17921_v61  ;;  %v12978_v17 = vld [vmem:[%s21776_s9 + $0xa70] sm:$0xf0] }
 0xf92   :  { %7262 = vmatpush.bf16.msrb.mxu0 %v13685_v50  ;;  %7226 = vmatpush.bf16.msra.mxu1 %v11957_v4  ;;  %v15007_v23 = vld [vmem:[%s21776_s9 + $0x134] sm:$0xf]  ;;  %v12981_v32 = vor.u32 %v15295_v16, %v12978_v17 }
 0xf93   :  { %v11826_v56 = vld [vmem:[%s21776_s9 + $0x170] sm:$0xf0] }
 0xf94   :  { %7250 = vmatpush.bf16.msrb.mxu3 %v13109_v51  ;;  %7239 = vmatpush.bf16.msrb.mxu2 %v12469_v19  ;;  %v15135_v26 = vld [vmem:[%s21776_s9 + $0x534] sm:$0xf]  ;;  %v11829_v44 = vor.u32 %v15007_v23, %v11826_v56  ;;  %v6999_v19 = vadd.f32 %v6998_v38, %v6986_v31  ;;  %v15096_v23 = vld [vmem:[%s21776_s9 + $0x3f4] sm:$0xf0] }
 0xf95   :  { %v12338_v36 = vld [vmem:[%s21776_s9 + $0x570] sm:$0xf0]  ;;  %v12664_v56 = vld [vmem:[%s21776_s9 + $0x7b8] sm:$0xf] }
 0xf96   :  { %7263 = vmatpush.bf16.msrb.mxu0 %v13621_v10  ;;  %v15423_v37 = vld [vmem:[%s21776_s9 + $0xe34] sm:$0xf]  ;;  %7227 = vmatpush.bf16.msra.mxu1 %v11893_v18  ;;  %v12341_v45 = vor.u32 %v15135_v26, %v12338_v36  ;;  %v6987_v10 = vpop.f32.mrf.mxu2  ;;  %v20227_v47 = vadd.f32 %v7011_v42, %v6999_v19  ;;  %v15224_v31 = vld [vmem:[%s21776_s9 + $0x7f4] sm:$0xf0] }
 0xf97   :  { %v13490_v40 = vld [vmem:[%s21776_s9 + $0xe70] sm:$0xf0]  ;;  %v12665_v42 = vor.u32 %v15224_v31, %v12664_v56  ;;  %v15352_v38 = vld [vmem:[%s21776_s9 + $0xbf4] sm:$0xf0] }
 0xf98   :  { %7251 = vmatpush.bf16.msrb.mxu3 %v13045_v13  ;;  %v15279_v49 = vld [vmem:[%s21776_s9 + $0x9b4] sm:$0xf]  ;;  %7240 = vmatpush.bf16.msrb.mxu2 %v12405_v33  ;;  %v13493_v51 = vor.u32 %v15423_v37, %v13490_v40  ;;  %v12153_v40 = vor.u32 %v15096_v23, %v12152_v22  ;;  %v12024_v10 = vld [vmem:[%s21776_s9 + $0x2b8] sm:$0xf] }
 0xf99   :  { %v12914_v63 = vld [vmem:[%s21776_s9 + $0x9f0] sm:$0xf0]  ;;  %v15048_v31 = vld [vmem:[%s21776_s9 + $0x274] sm:$0xf0] }
 0xf9a   :  { %v14991_v46 = vld [vmem:[%s21776_s9 + $0xb4] sm:$0xf]  ;;  %7264 = vmatpush.bf16.msrb.mxu0 %v13557_v9  ;;  %v12917_v58 = vor.u32 %v15279_v49, %v12914_v63  ;;  %7228 = vmatpush.bf16.msra.mxu1 %v11829_v44  ;;  %v7013_v9 = vpop.f32.mrf.mxu0 }
 0xf9b   :  { %v11762_v50 = vld [vmem:[%s21776_s9 + $0xf0] sm:$0xf0]  ;;  %v11960_v9 = vld [vmem:[%s21776_s9 + $0x238] sm:$0xf] }
 0xf9c   :  { %7252 = vmatpush.bf16.msrb.mxu3 %v12981_v32  ;;  %v15119_v59 = vld [vmem:[%s21776_s9 + $0x4b4] sm:$0xf]  ;;  %7241 = vmatpush.bf16.msrb.mxu2 %v12341_v45  ;;  %v11765_v5 = vor.u32 %v14991_v46, %v11762_v50  ;;  %v7000_v45 = vpop.f32.mrf.mxu3  ;;  %v12088_v46 = vld [vmem:[%s21776_s9 + $0x338] sm:$0xf] }
 0xf9d   :  { %v12274_v60 = vld [vmem:[%s21776_s9 + $0x4f0] sm:$0xf0]  ;;  %v15080_v50 = vld [vmem:[%s21776_s9 + $0x374] sm:$0xf0] }
 0xf9e   :  { %v15407_v0 = vld [vmem:[%s21776_s9 + $0xdb4] sm:$0xf]  ;;  %v12277_v6 = vor.u32 %v15119_v59, %v12274_v60  ;;  %7265 = vmatpush.bf16.msrb.mxu0 %v13493_v51  ;;  %7229 = vmatpush.bf16.msra.mxu1 %v11765_v5  ;;  %v12600_v51 = vld [vmem:[%s21776_s9 + $0x738] sm:$0xf] }
 0xf9f   :  { %v13426_v1 = vld [vmem:[%s21776_s9 + $0xdf0] sm:$0xf0] }
 0xfa0   :  { %v15263_v43 = vld [vmem:[%s21776_s9 + $0x934] sm:$0xf]  ;;  %7253 = vmatpush.bf16.msrb.mxu3 %v12917_v58  ;;  %v13429_v12 = vor.u32 %v15407_v0, %v13426_v1  ;;  %7242 = vmatpush.bf16.msrb.mxu2 %v12277_v6  ;;  %v15208_v58 = vld [vmem:[%s21776_s9 + $0x774] sm:$0xf0] }
 0xfa1   :  { %v12850_v4 = vld [vmem:[%s21776_s9 + $0x970] sm:$0xf0]  ;;  %v13176_v0 = vld [vmem:[%s21776_s9 + $0xbb8] sm:$0xf]  ;;  %v12601_v19 = vor.u32 %v15208_v58, %v12600_v51 }
 0xfa2   :  { %v14975_v13 = vld [vmem:[%s21776_s9 + $0x34] sm:$0xf]  ;;  %v12853_v16 = vor.u32 %v15263_v43, %v12850_v4  ;;  %7266 = vmatpush.bf16.msrb.mxu0 %v13429_v12  ;;  %v12089_v43 = vor.u32 %v15080_v50, %v12088_v46  ;;  %v15192_v12 = vld [vmem:[%s21776_s9 + $0x6f4] sm:$0xf0] }
 0xfa3   :  { %v11698_v62 = vld [vmem:[%s21776_s9 + $0x70] sm:$0xf0]  ;;  %v11896_v46 = vld [vmem:[%s21776_s9 + $0x1b8] sm:$0xf] }
 0xfa4   :  { %v15103_v15 = vld [vmem:[%s21776_s9 + $0x434] sm:$0xf]  ;;  %v11701_v36 = vor.u32 %v14975_v13, %v11698_v62  ;;  %7254 = vmatpush.bf16.msrb.mxu3 %v12853_v16  ;;  %v15064_v13 = vld [vmem:[%s21776_s9 + $0x2f4] sm:$0xf0]  ;;  %v13177_v62 = vor.u32 %v15352_v38, %v13176_v0 }
 0xfa5   :  { %v12210_v17 = vld [vmem:[%s21776_s9 + $0x470] sm:$0xf0]  ;;  %v13688_v16 = vld [vmem:[%s21776_s9 + $0xfb8] sm:$0xf]  ;;  %v12025_v23 = vor.u32 %v15064_v13, %v12024_v10 }
 0xfa6   :  { %v15391_v18 = vld [vmem:[%s21776_s9 + $0xd34] sm:$0xf]  ;;  %v12213_v37 = vor.u32 %v15103_v15, %v12210_v17  ;;  %7230 = vmatpush.bf16.msra.mxu1 %v11701_v36  ;;  %v12536_v15 = vld [vmem:[%s21776_s9 + $0x6b8] sm:$0xf] }
 0xfa7   :  { %v13362_v33 = vld [vmem:[%s21776_s9 + $0xd70] sm:$0xf0]  ;;  %v15480_v17 = vld [vmem:[%s21776_s9 + $0xff4] sm:$0xf0]  ;;  %v12537_v56 = vor.u32 %v15192_v12, %v12536_v15 }
 0xfa8   :  { %v15247_v32 = vld [vmem:[%s21776_s9 + $0x8b4] sm:$0xf]  ;;  %v13365_v39 = vor.u32 %v15391_v18, %v13362_v33  ;;  %7243 = vmatpush.bf16.msrb.mxu2 %v12213_v37  ;;  %v13112_v18 = vld [vmem:[%s21776_s9 + $0xb38] sm:$0xf] }
 0xfa9   :  { %v12786_v26 = vld [vmem:[%s21776_s9 + $0x8f0] sm:$0xf0]  ;;  %7231 = vmatmul.bf16.vlgmr.msra.gmra.mxu1 %v17872_v28  ;;  %v15336_v33 = vld [vmem:[%s21776_s9 + $0xb74] sm:$0xf0] }
 0xfaa   :  { %v15375_v49 = vld [vmem:[%s21776_s9 + $0xcb4] sm:$0xf]  ;;  %v12789_v44 = vor.u32 %v15247_v32, %v12786_v26  ;;  %7267 = vmatpush.bf16.msrb.mxu0 %v13365_v39  ;;  %7275 = vmatpush.bf16.msrb.mxu1 %v12153_v40  ;;  %v13689_v32 = vor.u32 %v15480_v17, %v13688_v16  ;;  %v13113_v26 = vor.u32 %v15336_v33, %v13112_v18  ;;  %v12472_v36 = vld [vmem:[%s21776_s9 + $0x638] sm:$0xf]  ;;  %v7024_v40 = vpop.f32.mrf.mxu1 }
 0xfab   :  { %v13298_v63 = vld [vmem:[%s21776_s9 + $0xcf0] sm:$0xf0]  ;;  %7244 = vmatmul.bf16.vlgmr.msrb.gmra.mxu2 %v17874_v29  ;;  %v15176_v37 = vld [vmem:[%s21776_s9 + $0x674] sm:$0xf0] }
 0xfac   :  { %v15231_v59 = vld [vmem:[%s21776_s9 + $0x834] sm:$0xf]  ;;  %v13301_v1 = vor.u32 %v15375_v49, %v13298_v63  ;;  %7288 = vmatpush.bf16.msra.mxu2 %v12665_v42  ;;  %7255 = vmatpush.bf16.msrb.mxu3 %v12789_v44  ;;  %v13624_v39 = vld [vmem:[%s21776_s9 + $0xf38] sm:$0xf]  ;;  %v11961_v44 = vor.u32 %v15048_v31, %v11960_v9  ;;  %v12473_v45 = vor.u32 %v15176_v37, %v12472_v36 }
 0xfad   :  { %v12722_v60 = vld [vmem:[%s21776_s9 + $0x870] sm:$0xf0]  ;;  %v15464_v49 = vld [vmem:[%s21776_s9 + $0xf74] sm:$0xf0] }
 0xfae   :  { %v15359_v4 = vld [vmem:[%s21776_s9 + $0xc34] sm:$0xf]  ;;  %v12725_v5 = vor.u32 %v15231_v59, %v12722_v60  ;;  %7268 = vmatpush.bf16.msrb.mxu0 %v13301_v1  ;;  %7276 = vmatpush.bf16.msrb.mxu1 %v12089_v43  ;;  %v13048_v63 = vld [vmem:[%s21776_s9 + $0xab8] sm:$0xf]  ;;  %v13625_v51 = vor.u32 %v15464_v49, %v13624_v39 }
 0xfaf   :  { %v13234_v6 = vld [vmem:[%s21776_s9 + $0xc70] sm:$0xf0]  ;;  %v15320_v42 = vld [vmem:[%s21776_s9 + $0xaf4] sm:$0xf0] }
 0xfb0   :  { %v13237_v22 = vor.u32 %v15359_v4, %v13234_v6  ;;  %7289 = vmatpush.bf16.msra.mxu2 %v12601_v19  ;;  %7256 = vmatpush.bf16.msrb.mxu3 %v12725_v5  ;;  %v15032_v50 = vld [vmem:[%s21776_s9 + $0x1f4] sm:$0xf0]  ;;  %v13049_v58 = vor.u32 %v15320_v42, %v13048_v63  ;;  %v7037_v5 = vpop.f32.mrf.mxu2  ;;  %v7050_v63 = vpop.f32.mrf.mxu3 }
 0xfb1   :  { %v12408_v59 = vld [vmem:[%s21776_s9 + $0x5b8] sm:$0xf]  ;;  %v11897_v4 = vor.u32 %v15032_v50, %v11896_v46 }
 0xfb2   :  { %7269 = vmatpush.bf16.msrb.mxu0 %v13237_v22  ;;  %7277 = vmatpush.bf16.msrb.mxu1 %v12025_v23  ;;  %v15160_v60 = vld [vmem:[%s21776_s9 + $0x5f4] sm:$0xf0]  ;;  %v7026_v18 = vpop.f32.mrf.mxu1 }
 0xfb3   :  { %7257 = vmatmul.bf16.vlgmr.msrb.gmra.mxu3 %v17910_v54  ;;  %v13560_v0 = vld [vmem:[%s21776_s9 + $0xeb8] sm:$0xf]  ;;  %v12409_v19 = vor.u32 %v15160_v60, %v12408_v59 }
 0xfb4   :  { %7301 = vmatpush.bf16.msra.mxu3 %v13177_v62  ;;  %7290 = vmatpush.bf16.msra.mxu2 %v12537_v56  ;;  %v15448_v38 = vld [vmem:[%s21776_s9 + $0xef4] sm:$0xf0]  ;;  %v7038_v62 = vadd.f32 %v7037_v5, %v7024_v40  ;;  %v7063_v56 = vpop.f32.mrf.mxu0 }
 0xfb5   :  { %7270 = vmatmul.bf16.vlgmr.msrb.gmra.mxu0 %v17921_v61  ;;  %v12984_v1 = vld [vmem:[%s21776_s9 + $0xa38] sm:$0xf]  ;;  %v13561_v13 = vor.u32 %v15448_v38, %v13560_v0 }
 0xfb6   :  { %7314 = vmatpush.bf16.msra.mxu0 %v13689_v32  ;;  %v15304_v43 = vld [vmem:[%s21776_s9 + $0xa74] sm:$0xf0]  ;;  %7278 = vmatpush.bf16.msrb.mxu1 %v11961_v44  ;;  %v7051_v46 = vadd.f32 %v7050_v63, %v7038_v62  ;;  %v15344_v63 = vld [vmem:[%s21776_s9 + $0xbbc] sm:$0xf] }
 0xfb7   :  { %v11832_v6 = vld [vmem:[%s21776_s9 + $0x138] sm:$0xf]  ;;  %v12985_v15 = vor.u32 %v15304_v43, %v12984_v1 }
 0xfb8   :  { %7302 = vmatpush.bf16.msra.mxu3 %v13113_v26  ;;  %7291 = vmatpush.bf16.msra.mxu2 %v12473_v45  ;;  %v15016_v10 = vld [vmem:[%s21776_s9 + $0x174] sm:$0xf0]  ;;  %v20425_v38 = vadd.f32 %v7063_v56, %v7051_v46 }
 0xfb9   :  { %v12344_v12 = vld [vmem:[%s21776_s9 + $0x538] sm:$0xf]  ;;  %v11833_v9 = vor.u32 %v15016_v10, %v11832_v6  ;;  %v15088_v6 = vld [vmem:[%s21776_s9 + $0x3bc] sm:$0xf] }
 0xfba   :  { %7315 = vmatpush.bf16.msra.mxu0 %v13625_v51  ;;  %v15144_v16 = vld [vmem:[%s21776_s9 + $0x574] sm:$0xf0]  ;;  %7279 = vmatpush.bf16.msrb.mxu1 %v11897_v4  ;;  %v12154_v10 = vld [vmem:[%s21776_s9 + $0x3f8] sm:$0xf0] }
 0xfbb   :  { %v13496_v17 = vld [vmem:[%s21776_s9 + $0xe38] sm:$0xf]  ;;  %v12345_v31 = vor.u32 %v15144_v16, %v12344_v12 }
 0xfbc   :  { %7303 = vmatpush.bf16.msra.mxu3 %v13049_v58  ;;  %v15432_v33 = vld [vmem:[%s21776_s9 + $0xe74] sm:$0xf0]  ;;  %7292 = vmatpush.bf16.msra.mxu2 %v12409_v19  ;;  %v7039_v58 = vpop.f32.mrf.mxu2  ;;  %v7065_v62 = vpop.f32.mrf.mxu0 }
 0xfbd   :  { %v12920_v22 = vld [vmem:[%s21776_s9 + $0x9b8] sm:$0xf]  ;;  %v13497_v36 = vor.u32 %v15432_v33, %v13496_v17 }
 0xfbe   :  { %v15288_v23 = vld [vmem:[%s21776_s9 + $0x9f4] sm:$0xf0]  ;;  %7316 = vmatpush.bf16.msra.mxu0 %v13561_v13  ;;  %7280 = vmatpush.bf16.msrb.mxu1 %v11833_v9  ;;  %v15216_v13 = vld [vmem:[%s21776_s9 + $0x7bc] sm:$0xf] }
 0xfbf   :  { %v11768_v32 = vld [vmem:[%s21776_s9 + $0xb8] sm:$0xf]  ;;  %v12921_v37 = vor.u32 %v15288_v23, %v12920_v22  ;;  %v12157_v22 = vor.u32 %v15088_v6, %v12154_v10  ;;  %v13114_v6 = vld [vmem:[%s21776_s9 + $0xb78] sm:$0xf0] }
 0xfc0   :  { %v15000_v26 = vld [vmem:[%s21776_s9 + $0xf4] sm:$0xf0]  ;;  %7304 = vmatpush.bf16.msra.mxu3 %v12985_v15  ;;  %7293 = vmatpush.bf16.msra.mxu2 %v12345_v31  ;;  %v12666_v15 = vld [vmem:[%s21776_s9 + $0x7f8] sm:$0xf0] }
 0xfc1   :  { %v12280_v39 = vld [vmem:[%s21776_s9 + $0x4b8] sm:$0xf]  ;;  %v11769_v50 = vor.u32 %v15000_v26, %v11768_v32  ;;  %v12669_v9 = vor.u32 %v15216_v13, %v12666_v15  ;;  %v7052_v32 = vpop.f32.mrf.mxu3  ;;  %v15072_v26 = vld [vmem:[%s21776_s9 + $0x33c] sm:$0xf] }
 0xfc2   :  { %v15128_v40 = vld [vmem:[%s21776_s9 + $0x4f4] sm:$0xf0]  ;;  %7317 = vmatpush.bf16.msra.mxu0 %v13497_v36  ;;  %v12090_v36 = vld [vmem:[%s21776_s9 + $0x378] sm:$0xf0] }
 0xfc3   :  { %v13432_v49 = vld [vmem:[%s21776_s9 + $0xdb8] sm:$0xf]  ;;  %v12281_v51 = vor.u32 %v15128_v40, %v12280_v39  ;;  %7281 = vmatpush.bf16.msrb.mxu1 %v11769_v50  ;;  %v12602_v39 = vld [vmem:[%s21776_s9 + $0x778] sm:$0xf0] }
 0xfc4   :  { %v15416_v42 = vld [vmem:[%s21776_s9 + $0xdf4] sm:$0xf0]  ;;  %7305 = vmatpush.bf16.msra.mxu3 %v12921_v37  ;;  %v15200_v37 = vld [vmem:[%s21776_s9 + $0x73c] sm:$0xf] }
 0xfc5   :  { %v12856_v44 = vld [vmem:[%s21776_s9 + $0x938] sm:$0xf]  ;;  %v13433_v1 = vor.u32 %v15416_v42, %v13432_v49  ;;  %7294 = vmatpush.bf16.msra.mxu2 %v12281_v51  ;;  %v13178_v42 = vld [vmem:[%s21776_s9 + $0xbf8] sm:$0xf0]  ;;  %v12605_v50 = vor.u32 %v15200_v37, %v12602_v39 }
 0xfc6   :  { %v15272_v45 = vld [vmem:[%s21776_s9 + $0x974] sm:$0xf0]  ;;  %v15040_v15 = vld [vmem:[%s21776_s9 + $0x23c] sm:$0xf] }
 0xfc7   :  { %v11704_v59 = vld [vmem:[%s21776_s9 + $0x38] sm:$0xf]  ;;  %v12857_v43 = vor.u32 %v15272_v45, %v12856_v44  ;;  %7318 = vmatpush.bf16.msra.mxu0 %v13433_v1  ;;  %v12093_v45 = vor.u32 %v15072_v26, %v12090_v36  ;;  %v15184_v1 = vld [vmem:[%s21776_s9 + $0x6bc] sm:$0xf] }
 0xfc8   :  { %v14984_v60 = vld [vmem:[%s21776_s9 + $0x74] sm:$0xf0]  ;;  %v15024_v36 = vld [vmem:[%s21776_s9 + $0x1bc] sm:$0xf] }
 0xfc9   :  { %v12216_v0 = vld [vmem:[%s21776_s9 + $0x438] sm:$0xf]  ;;  %v11705_v17 = vor.u32 %v14984_v60, %v11704_v59  ;;  %7306 = vmatpush.bf16.msra.mxu3 %v12857_v43  ;;  %v15056_v59 = vld [vmem:[%s21776_s9 + $0x2bc] sm:$0xf] }
 0xfca   :  { %v15112_v4 = vld [vmem:[%s21776_s9 + $0x474] sm:$0xf0]  ;;  %v12026_v60 = vld [vmem:[%s21776_s9 + $0x2f8] sm:$0xf0] }
 0xfcb   :  { %v13368_v19 = vld [vmem:[%s21776_s9 + $0xd38] sm:$0xf]  ;;  %v12217_v18 = vor.u32 %v15112_v4, %v12216_v0  ;;  %7282 = vmatpush.bf16.msrb.mxu1 %v11705_v17  ;;  %v13181_v0 = vor.u32 %v15344_v63, %v13178_v42  ;;  %v12538_v43 = vld [vmem:[%s21776_s9 + $0x6f8] sm:$0xf0]  ;;  %v12029_v13 = vor.u32 %v15056_v59, %v12026_v60 }
 0xfcc   :  { %v15400_v5 = vld [vmem:[%s21776_s9 + $0xd74] sm:$0xf0]  ;;  %v15472_v4 = vld [vmem:[%s21776_s9 + $0xfbc] sm:$0xf]  ;;  %v12541_v62 = vor.u32 %v15184_v1, %v12538_v43 }
 0xfcd   :  { %v12792_v12 = vld [vmem:[%s21776_s9 + $0x8b8] sm:$0xf]  ;;  %v13369_v33 = vor.u32 %v15400_v5, %v13368_v19  ;;  %7295 = vmatpush.bf16.msra.mxu2 %v12217_v18  ;;  %v13690_v19 = vld [vmem:[%s21776_s9 + $0xff8] sm:$0xf0] }
 0xfce   :  { %v15256_v16 = vld [vmem:[%s21776_s9 + $0x8f4] sm:$0xf0]  ;;  %7283 = vmatmul.bf16.vlgmr.msrb.gmra.mxu1 %v17872_v28  ;;  %v15328_v5 = vld [vmem:[%s21776_s9 + $0xb3c] sm:$0xf] }
 0xfcf   :  { %v13304_v23 = vld [vmem:[%s21776_s9 + $0xcb8] sm:$0xf]  ;;  %v12793_v31 = vor.u32 %v15256_v16, %v12792_v12  ;;  %7319 = vmatpush.bf16.msra.mxu0 %v13369_v33  ;;  %7327 = vmatpush.bf16.msra.mxu1 %v12157_v22  ;;  %v11962_v12 = vld [vmem:[%s21776_s9 + $0x278] sm:$0xf0]  ;;  %v13693_v16 = vor.u32 %v15472_v4, %v13690_v19  ;;  %v13117_v17 = vor.u32 %v15328_v5, %v13114_v6 }
 0xfd0   :  { %v15384_v56 = vld [vmem:[%s21776_s9 + $0xcf4] sm:$0xf0]  ;;  %7296 = vmatmul.bf16.vlgmr.msra.gmra.mxu2 %v17874_v29  ;;  %v15168_v18 = vld [vmem:[%s21776_s9 + $0x63c] sm:$0xf]  ;;  %v11965_v32 = vor.u32 %v15040_v15, %v11962_v12  ;;  %v7115_v15 = vpop.f32.mrf.mxu0 }
 0xfd1   :  { %v12728_v40 = vld [vmem:[%s21776_s9 + $0x838] sm:$0xf]  ;;  %v13305_v44 = vor.u32 %v15384_v56, %v13304_v23  ;;  %7340 = vmatpush.bf16.msrb.mxu2 %v12669_v9  ;;  %7307 = vmatpush.bf16.msra.mxu3 %v12793_v31  ;;  %v12474_v33 = vld [vmem:[%s21776_s9 + $0x678] sm:$0xf0]  ;;  %v7076_v23 = vpop.f32.mrf.mxu1 }
 0xfd2   :  { %v15240_v49 = vld [vmem:[%s21776_s9 + $0x874] sm:$0xf0]  ;;  %v15456_v22 = vld [vmem:[%s21776_s9 + $0xf3c] sm:$0xf]  ;;  %v12477_v26 = vor.u32 %v15168_v18, %v12474_v33 }
 0xfd3   :  { %v13240_v46 = vld [vmem:[%s21776_s9 + $0xc38] sm:$0xf]  ;;  %v12729_v51 = vor.u32 %v15240_v49, %v12728_v40  ;;  %7320 = vmatpush.bf16.msra.mxu0 %v13305_v44  ;;  %7328 = vmatpush.bf16.msra.mxu1 %v12093_v45  ;;  %v13626_v56 = vld [vmem:[%s21776_s9 + $0xf78] sm:$0xf0] }
 0xfd4   :  { %v15368_v58 = vld [vmem:[%s21776_s9 + $0xc74] sm:$0xf0]  ;;  %v15312_v9 = vld [vmem:[%s21776_s9 + $0xabc] sm:$0xf]  ;;  %v13629_v39 = vor.u32 %v15456_v22, %v13626_v56 }
 0xfd5   :  { %v13241_v10 = vor.u32 %v15368_v58, %v13240_v46  ;;  %7341 = vmatpush.bf16.msrb.mxu2 %v12605_v50  ;;  %7308 = vmatpush.bf16.msra.mxu3 %v12729_v51  ;;  %v13050_v31 = vld [vmem:[%s21776_s9 + $0xaf8] sm:$0xf0]  ;;  %v7089_v58 = vpop.f32.mrf.mxu2 }
 0xfd6   :  { %v11898_v37 = vld [vmem:[%s21776_s9 + $0x1f8] sm:$0xf0]  ;;  %v13053_v40 = vor.u32 %v15312_v9, %v13050_v31  ;;  %v7090_v1 = vadd.f32 %v7089_v58, %v7076_v23  ;;  %v7102_v31 = vpop.f32.mrf.mxu3 }
 0xfd7   :  { %7321 = vmatpush.bf16.msra.mxu0 %v13241_v10  ;;  %7329 = vmatpush.bf16.msra.mxu1 %v12029_v13  ;;  %v15152_v49 = vld [vmem:[%s21776_s9 + $0x5bc] sm:$0xf]  ;;  %v11901_v50 = vor.u32 %v15024_v36, %v11898_v37 }
 0xfd8   :  { %7309 = vmatmul.bf16.vlgmr.msra.gmra.mxu3 %v17910_v54  ;;  %v12410_v63 = vld [vmem:[%s21776_s9 + $0x5f8] sm:$0xf0]  ;;  %v7103_v37 = vadd.f32 %v7102_v31, %v7090_v1  ;;  %v7648_v31 = vld [vmem:[%s21780_s13 + $0x788] sm:$0xff] }
 0xfd9   :  { %7353 = vmatpush.bf16.msrb.mxu3 %v13181_v0  ;;  %7342 = vmatpush.bf16.msrb.mxu2 %v12541_v62  ;;  %v15440_v42 = vld [vmem:[%s21776_s9 + $0xebc] sm:$0xf]  ;;  %v12413_v51 = vor.u32 %v15152_v49, %v12410_v63  ;;  %v7078_v6 = vpop.f32.mrf.mxu1 }
 0xfda   :  { %7322 = vmatmul.bf16.vlgmr.msra.gmra.mxu0 %v17921_v61  ;;  %v13562_v44 = vld [vmem:[%s21776_s9 + $0xef8] sm:$0xf0] }
 0xfdb   :  { %7366 = vmatpush.bf16.msrb.mxu0 %v13693_v16  ;;  %v15296_v45 = vld [vmem:[%s21776_s9 + $0xa3c] sm:$0xf]  ;;  %7330 = vmatpush.bf16.msra.mxu1 %v11965_v32  ;;  %v13565_v0 = vor.u32 %v15440_v42, %v13562_v44  ;;  %v20617_v42 = vadd.f32 %v7115_v15, %v7103_v37 }
 0xfdc   :  { %v12986_v46 = vld [vmem:[%s21776_s9 + $0xa78] sm:$0xf0] }
 0xfdd   :  { %7354 = vmatpush.bf16.msrb.mxu3 %v13117_v17  ;;  %7343 = vmatpush.bf16.msrb.mxu2 %v12477_v26  ;;  %v15008_v59 = vld [vmem:[%s21776_s9 + $0x13c] sm:$0xf]  ;;  %v12989_v43 = vor.u32 %v15296_v45, %v12986_v46  ;;  %v7091_v49 = vpop.f32.mrf.mxu2 }
 0xfde   :  { %v11834_v60 = vld [vmem:[%s21776_s9 + $0x178] sm:$0xf0] }
 0xfdf   :  { %7367 = vmatpush.bf16.msrb.mxu0 %v13629_v39  ;;  %v15136_v4 = vld [vmem:[%s21776_s9 + $0x53c] sm:$0xf]  ;;  %7331 = vmatpush.bf16.msra.mxu1 %v11901_v50  ;;  %v11837_v12 = vor.u32 %v15008_v59, %v11834_v60  ;;  %v7117_v60 = vpop.f32.mrf.mxu0 }
 0xfe0   :  { %v12346_v19 = vld [vmem:[%s21776_s9 + $0x578] sm:$0xf0]  ;;  %v7645_v60 = vld [vmem:[%s21780_s13 + $0x770] sm:$0xff] }
 0xfe1   :  { %7355 = vmatpush.bf16.msrb.mxu3 %v13053_v40  ;;  %v15424_v5 = vld [vmem:[%s21776_s9 + $0xe3c] sm:$0xf]  ;;  %7344 = vmatpush.bf16.msrb.mxu2 %v12413_v51  ;;  %v12349_v16 = vor.u32 %v15136_v4, %v12346_v19 }
 0xfe2   :  { %v13498_v10 = vld [vmem:[%s21776_s9 + $0xe78] sm:$0xf0] }
 0xfe3   :  { %v15280_v13 = vld [vmem:[%s21776_s9 + $0x9bc] sm:$0xf]  ;;  %7368 = vmatpush.bf16.msrb.mxu0 %v13565_v0  ;;  %v13501_v33 = vor.u32 %v15424_v5, %v13498_v10  ;;  %7332 = vmatpush.bf16.msra.mxu1 %v11837_v12  ;;  %v7104_v10 = vpop.f32.mrf.mxu3 }
 0xfe4   :  { %v12922_v62 = vld [vmem:[%s21776_s9 + $0x9f8] sm:$0xf0] }
 0xfe5   :  { %v14992_v17 = vld [vmem:[%s21776_s9 + $0xbc] sm:$0xf]  ;;  %7356 = vmatpush.bf16.msrb.mxu3 %v12989_v43  ;;  %v12925_v22 = vor.u32 %v15280_v13, %v12922_v62  ;;  %7345 = vmatpush.bf16.msrb.mxu2 %v12349_v16 }
 0xfe6   :  { %v11770_v18 = vld [vmem:[%s21776_s9 + $0xf8] sm:$0xf0] }
 0xfe7   :  { %v15120_v23 = vld [vmem:[%s21776_s9 + $0x4bc] sm:$0xf]  ;;  %v11773_v39 = vor.u32 %v14992_v17, %v11770_v18  ;;  %7369 = vmatpush.bf16.msrb.mxu0 %v13501_v33  ;;  %v7649_v17 = vld [vmem:[%s21780_s13 + $0x790] sm:$0xff] }
 0xfe8   :  { %v12282_v56 = vld [vmem:[%s21776_s9 + $0x4f8] sm:$0xf0]  ;;  %v7665_v18 = vld [vmem:[%s21780_s13 + $0x810] sm:$0xff] }
 0xfe9   :  { %v15408_v9 = vld [vmem:[%s21776_s9 + $0xdbc] sm:$0xf]  ;;  %v12285_v40 = vor.u32 %v15120_v23, %v12282_v56  ;;  %7357 = vmatpush.bf16.msrb.mxu3 %v12925_v22  ;;  %7333 = vmatpush.bf16.msra.mxu1 %v11773_v39  ;;  %v7491_v22 = vmul.f32 %v18806_v2, %v18806_v2 }
 0xfea   :  { %v13434_v32 = vld [vmem:[%s21776_s9 + $0xdf8] sm:$0xf0] }
 0xfeb   :  { %v15264_v26 = vld [vmem:[%s21776_s9 + $0x93c] sm:$0xf]  ;;  %v13437_v44 = vor.u32 %v15408_v9, %v13434_v32  ;;  %7346 = vmatpush.bf16.msrb.mxu2 %v12285_v40  ;;  %v7492_v9 = vmul.f32 %v18921_v21, %v18921_v21  ;;  %v7664_v32 = vld [vmem:[%s21780_s13 + $0x808] sm:$0xff]  ;;  %v7507_v37 = vsel %vm616_vm0, %v7491_v22, 0.0 }
 0xfec   :  { %v12858_v36 = vld [vmem:[%s21776_s9 + $0x978] sm:$0xf0] }
 0xfed   :  { %v14976_v63 = vld [vmem:[%s21776_s9 + $0x3c] sm:$0xf]  ;;  %v12861_v45 = vor.u32 %v15264_v26, %v12858_v36  ;;  %7370 = vmatpush.bf16.msrb.mxu0 %v13437_v44  ;;  %v7647_v36 = vld [vmem:[%s21780_s13 + $0x780] sm:$0xff]  ;;  %v7514_v40 = vsel %vm616_vm0, %v7492_v9, 0.0 }
 0xfee   :  { %v11706_v46 = vld [vmem:[%s21776_s9 + $0x78] sm:$0xf0] }
 0xfef   :  { %v15104_v50 = vld [vmem:[%s21776_s9 + $0x43c] sm:$0xf]  ;;  %v11709_v43 = vor.u32 %v14976_v63, %v11706_v46  ;;  %7358 = vmatpush.bf16.msrb.mxu3 %v12861_v45  ;;  %v7379_v63 = vsel %vm616_vm0, %v18806_v2, 0.0  ;;  %v7681_v45 = vld [vmem:[%s21780_s13 + $0x890] sm:$0xff]  ;;  %v7128_v46 = vpop.f32.mrf.mxu1 }
 0xff0   :  { %v12218_v51 = vld [vmem:[%s21776_s9 + $0x478] sm:$0xf0] }
 0xff1   :  { %v15392_v58 = vld [vmem:[%s21776_s9 + $0xd3c] sm:$0xf]  ;;  %v12221_v4 = vor.u32 %v15104_v50, %v12218_v51  ;;  %7334 = vmatpush.bf16.msra.mxu1 %v11709_v43  ;;  %v7508_v50 = vrot.slane %v7507_v37, 4  ;;  %v7386_v51 = vsel %vm616_vm0, %v18921_v21, 0.0  ;;  %v7380_v43 = vrot.slane %v7379_v63, 4 }
 0xff2   :  { %v13370_v59 = vld [vmem:[%s21776_s9 + $0xd78] sm:$0xf0] }
 0xff3   :  { %v15248_v0 = vld [vmem:[%s21776_s9 + $0x8bc] sm:$0xf]  ;;  %v13373_v19 = vor.u32 %v15392_v58, %v13370_v59  ;;  %7347 = vmatpush.bf16.msrb.mxu2 %v12221_v4  ;;  %v7493_v58 = vmul.f32 %v19033_v27, %v19033_v27  ;;  %v7680_v4 = vld [vmem:[%s21780_s13 + $0x888] sm:$0xff]  ;;  %v7509_v10 = vadd.f32 %v7508_v50, %v7507_v37 }
 0xff4   :  { %v12794_v1 = vld [vmem:[%s21776_s9 + $0x8f8] sm:$0xf0]  ;;  %7335 = vmatmul.bf16.vlgmr.msra.gmra.mxu1 %v17872_v28  ;;  %v7663_v28 = vld [vmem:[%s21780_s13 + $0x800] sm:$0xff] }
 0xff5   :  { %v7650_v5 = vld [vmem:[%s21780_s13 + $0x798] sm:$0xff]  ;;  %v12797_v6 = vor.u32 %v15248_v0, %v12794_v1  ;;  %7371 = vmatpush.bf16.msrb.mxu0 %v13373_v19  ;;  %v7515_v0 = vrot.slane %v7514_v40, 4  ;;  %v7661_v1 = vld [vmem:[%s21780_s13 + $0x7f0] sm:$0xff] }
 0xff6   :  { %v15376_v13 = vld [vmem:[%s21776_s9 + $0xcbc] sm:$0xf]  ;;  %7891 = vmatpush.msrb.mxu1 %v7650_v5  ;;  %7348 = vmatmul.bf16.vlgmr.msrb.gmra.mxu2 %v17874_v29  ;;  %v7697_v19 = vld [vmem:[%s21780_s13 + $0x910] sm:$0xff]  ;;  %v7387_v5 = vrot.slane %v7386_v51, 4 }
 0xff7   :  { %v13306_v62 = vld [vmem:[%s21776_s9 + $0xcf8] sm:$0xf0]  ;;  %7359 = vmatpush.bf16.msrb.mxu3 %v12797_v6  ;;  %v7660_v6 = vld [vmem:[%s21780_s13 + $0x7e8] sm:$0xff] }
 0xff8   :  { %v7666_v15 = vld [vmem:[%s21780_s13 + $0x818] sm:$0xff]  ;;  %v13309_v33 = vor.u32 %v15376_v13, %v13306_v62  ;;  %7892 = vmatpush.msrb.mxu1 %v7649_v17  ;;  %v7521_v13 = vsel %vm616_vm0, %v7493_v58, 0.0  ;;  %v7494_v62 = vmul.f32 %v19213_v11, %v19213_v11  ;;  %v7643_v17 = vld [vmem:[%s21780_s13 + $0x760] sm:$0xff]  ;;  %v7388_v9 = vadd.f32 %v7387_v5, %v7386_v51  ;;  %v7676_v58 = vld [vmem:[%s21780_s13 + $0x868] sm:$0xff] }
 0xff9   :  { %v15232_v12 = vld [vmem:[%s21776_s9 + $0x83c] sm:$0xf]  ;;  %7911 = vmatpush.msra.mxu2 %v7666_v15  ;;  %v7679_v15 = vld [vmem:[%s21780_s13 + $0x880] sm:$0xff]  ;;  %v7400_v51 = vsel %vm616_vm0, %v19213_v11, 0.0 }
 0xffa   :  { %v12730_v16 = vld [vmem:[%s21776_s9 + $0x878] sm:$0xf0]  ;;  %7372 = vmatpush.bf16.msrb.mxu0 %v13309_v33  ;;  %7893 = vmatpush.msrb.mxu1 %v7648_v31  ;;  %v7381_v33 = vadd.f32 %v7380_v43, %v7379_v63  ;;  %v7393_v31 = vsel %vm616_vm0, %v19033_v27, 0.0  ;;  %v7528_v37 = vsel %vm616_vm0, %v7494_v62, 0.0  ;;  %v7640_v43 = vld [vmem:[%s21780_s13 + $0x748] sm:$0xff] }
 0xffb   :  { %v15360_v23 = vld [vmem:[%s21776_s9 + $0xc3c] sm:$0xf]  ;;  %v12733_v26 = vor.u32 %v15232_v12, %v12730_v16  ;;  %7912 = vmatpush.msra.mxu2 %v7665_v18  ;;  %v7696_v12 = vld [vmem:[%s21780_s13 + $0x908] sm:$0xff]  ;;  %v7516_v16 = vadd.f32 %v7515_v0, %v7514_v40  ;;  %v7141_v18 = vpop.f32.mrf.mxu2  ;;  %v7394_v50 = vrot.slane %v7393_v31, 4 }
 0xffc   :  { %v13242_v56 = vld [vmem:[%s21776_s9 + $0xc78] sm:$0xf0]  ;;  %7894 = vmatpush.msrb.mxu1 %v7647_v36 }
 0xffd   :  { %v13245_v29 = vor.u32 %v15360_v23, %v13242_v56  ;;  %7913 = vmatpush.msra.mxu2 %v7664_v32  ;;  %v7682_v39 = vld [vmem:[%s21780_s13 + $0x898] sm:$0xff]  ;;  %7360 = vmatpush.bf16.msrb.mxu3 %v12733_v26  ;;  %v7695_v23 = vld [vmem:[%s21780_s13 + $0x900] sm:$0xff]  ;;  %v7142_v56 = vadd.f32 %v7141_v18, %v7128_v46  ;;  %v7522_v32 = vrot.slane %v7521_v13, 4  ;;  %v7517_v63 = vrot.slane %v7516_v16, 2 }
 0xffe   :  { %v7646_v49 = vld [vmem:[%s21780_s13 + $0x778] sm:$0xff]  ;;  %v7382_v46 = vrot.slane %v7381_v33, 2  ;;  %v7395_v18 = vadd.f32 %v7394_v50, %v7393_v31  ;;  %v7672_v50 = vld [vmem:[%s21780_s13 + $0x848] sm:$0xff] }
 0xfff   :  { %7914 = vmatpush.msra.mxu2 %v7663_v28  ;;  %v7662_v44 = vld [vmem:[%s21780_s13 + $0x7f8] sm:$0xff]  ;;  %7373 = vmatpush.bf16.msrb.mxu0 %v13245_v29  ;;  %v7130_v28 = vpop.f32.mrf.mxu1  ;;  %v7510_v29 = vrot.slane %v7509_v10, 2  ;;  %v7523_v0 = vadd.f32 %v7522_v32, %v7521_v13  ;;  %v7518_v62 = vadd.f32 %v7517_v63, %v7516_v16 }
0x1000   :  { %v7698_v59 = vld [vmem:[%s21780_s13 + $0x918] sm:$0xff]  ;;  %7361 = vmatmul.bf16.vlgmr.msrb.gmra.mxu3 %v17910_v54  ;;  %7895 = vmatpush.msrb.mxu1 %v7646_v49  ;;  %v7644_v54 = vld [vmem:[%s21780_s13 + $0x768] sm:$0xff]  ;;  %v7167_v49 = vpop.f32.mrf.mxu0 }
0x1001   :  { %7931 = vmatpush.msra.mxu3 %v7682_v39  ;;  %7915 = vmatpush.msra.mxu2 %v7662_v44  ;;  %v7678_v22 = vld [vmem:[%s21780_s13 + $0x878] sm:$0xff]  ;;  %v7677_v39 = vld [vmem:[%s21780_s13 + $0x870] sm:$0xff]  ;;  %v7511_v5 = vadd.f32 %v7510_v29, %v7509_v10  ;;  %v7655_v10 = vld [vmem:[%s21780_s13 + $0x7c0] sm:$0xff]  ;;  %v7524_v32 = vrot.slane %v7523_v0, 2 }
0x1002   :  { %7896 = vmatpush.msrb.mxu1 %v7645_v60  ;;  %7374 = vmatmul.bf16.vlgmr.msrb.gmra.mxu0 %v17921_v61  ;;  %v7659_v61 = vld [vmem:[%s21780_s13 + $0x7e0] sm:$0xff]  ;;  %v7642_v26 = vld [vmem:[%s21780_s13 + $0x758] sm:$0xff]  ;;  %v7641_v44 = vld [vmem:[%s21780_s13 + $0x750] sm:$0xff]  ;;  %v7389_v60 = vrot.slane %v7388_v9, 2 }
0x1003   :  { %7932 = vmatpush.msra.mxu3 %v7681_v45  ;;  %7951 = vmatpush.msra.mxu0 %v7698_v59  ;;  %v7658_v36 = vld [vmem:[%s21780_s13 + $0x7d8] sm:$0xff]  ;;  %v7657_v45 = vld [vmem:[%s21780_s13 + $0x7d0] sm:$0xff]  ;;  %v7512_v29 = vrot.slane %v7511_v5, 1 }
0x1004   :  { %7916 = vmatpush.msra.mxu2 %v7661_v1  ;;  %7897 = vmatpush.msrb.mxu1 %v7644_v54  ;;  %v7694_v40 = vld [vmem:[%s21780_s13 + $0x8f8] sm:$0xff]  ;;  %v7693_v59 = vld [vmem:[%s21780_s13 + $0x8f0] sm:$0xff]  ;;  %v7529_v1 = vrot.slane %v7528_v37, 4  ;;  %v7675_v54 = vld [vmem:[%s21780_s13 + $0x860] sm:$0xff] }
0x1005   :  { %7933 = vmatpush.msra.mxu3 %v7680_v4  ;;  %7952 = vmatpush.msra.mxu0 %v7697_v19  ;;  %v7656_v4 = vld [vmem:[%s21780_s13 + $0x7c8] sm:$0xff]  ;;  %v7154_v19 = vpop.f32.mrf.mxu3  ;;  %v7674_v16 = vld [vmem:[%s21780_s13 + $0x858] sm:$0xff] }
0x1006   :  { %7917 = vmatpush.msra.mxu2 %v7660_v6  ;;  %7898 = vmatpush.msrb.mxu1 %v7643_v17  ;;  %v7692_v6 = vld [vmem:[%s21780_s13 + $0x8e8] sm:$0xff]  ;;  %v7155_v13 = vadd.f32 %v7154_v19, %v7142_v56  ;;  %v7143_v17 = vpop.f32.mrf.mxu2  ;;  %v7390_v56 = vadd.f32 %v7389_v60, %v7388_v9  ;;  %v7654_v31 = vld [vmem:[%s21780_s13 + $0x7b8] sm:$0xff] }
0x1007   :  { %7934 = vmatpush.msra.mxu3 %v7679_v15  ;;  %7953 = vmatpush.msra.mxu0 %v7696_v12  ;;  %v7401_v15 = vrot.slane %v7400_v51, 4  ;;  %v7639_v12 = vld [vmem:[%s21780_s13 + $0x740] sm:$0xff]  ;;  %v7690_v9 = vld [vmem:[%s21780_s13 + $0x8d8] sm:$0xff] }
0x1008   :  { %7918 = vmatpush.msra.mxu2 %v7659_v61  ;;  %7899 = vmatpush.msrb.mxu1 %v7642_v26  ;;  %v7383_v61 = vadd.f32 %v7382_v46, %v7381_v33  ;;  %v7530_v26 = vadd.f32 %v7529_v1, %v7528_v37  ;;  %v7638_v33 = vld [vmem:[%s21780_s13 + $0x738] sm:$0xff]  ;;  %v7169_v28 = vpop.f32.mrf.mxu0  ;;  %v6830_v46 = vadd.f32 %v19560_v24, %v19523_v41 }
0x1009   :  { %7935 = vmatpush.msra.mxu3 %v7678_v22  ;;  %7954 = vmatpush.msra.mxu0 %v7695_v23  ;;  %v7691_v22 = vld [vmem:[%s21780_s13 + $0x8e0] sm:$0xff]  ;;  %v20805_v23 = vadd.f32 %v7167_v49, %v7155_v13  ;;  %v7402_v37 = vadd.f32 %v7401_v15, %v7400_v51  ;;  %v7519_v49 = vrot.slane %v7518_v62, 1  ;;  %v7689_v51 = vld [vmem:[%s21780_s13 + $0x8d0] sm:$0xff]  ;;  %v7670_v13 = vld [vmem:[%s21780_s13 + $0x838] sm:$0xff] }
0x100a   :  { %7919 = vmatpush.msra.mxu2 %v7658_v36  ;;  %7900 = vmatpush.msrb.mxu1 %v7641_v44  ;;  %v7673_v36 = vld [vmem:[%s21780_s13 + $0x850] sm:$0xff]  ;;  %v7384_v63 = vrot.slane %v7383_v61, 1  ;;  %v7396_v44 = vrot.slane %v7395_v18, 2  ;;  %v7531_v60 = vrot.slane %v7530_v26, 2  ;;  %v6843_v1 = vadd.f32 %v19603_v52, %v6830_v46  ;;  %v7651_v52 = vld [vmem:[%s21780_s13 + $0x7a0] sm:$0xff] }
0x100b   :  { %7936 = vmatpush.msra.mxu3 %v7677_v39  ;;  %7955 = vmatpush.msra.mxu0 %v7694_v40  ;;  %v7637_v39 = vld [vmem:[%s21780_s13 + $0x730] sm:$0xff]  ;;  %v7403_v19 = vrot.slane %v7402_v37, 2 }
0x100c   :  { %7920 = vmatpush.msra.mxu2 %v7657_v45  ;;  %7901 = vmatpush.msrb.mxu1 %v7640_v43  ;;  %v7653_v40 = vld [vmem:[%s21780_s13 + $0x7b0] sm:$0xff]  ;;  %v6778_v45 = vadd.f32 %v19356_v30, %v19319_v8  ;;  %v7636_v8 = vld [vmem:[%s21780_s13 + $0x728] sm:$0xff]  ;;  %v7385_v15 = vadd.f32 %v7384_v63, %v7383_v61  ;;  %v7730_v61 = vld [vmem:[%s21780_s13 + $0xa18] sm:$0xff] }
0x100d   :  { %7937 = vmatpush.msra.mxu3 %v7676_v58  ;;  %7956 = vmatpush.msra.mxu0 %v7693_v59  ;;  %v7391_v58 = vrot.slane %v7390_v56, 1  ;;  %v7525_v59 = vadd.f32 %v7524_v32, %v7523_v0  ;;  %v7652_v30 = vld [vmem:[%s21780_s13 + $0x7a8] sm:$0xff]  ;;  %v7156_v41 = vpop.f32.mrf.mxu3  ;;  %v7671_v0 = vld [vmem:[%s21780_s13 + $0x840] sm:$0xff]  ;;  %v7669_v32 = vld [vmem:[%s21780_s13 + $0x830] sm:$0xff] }
0x100e   :  { %7921 = vmatpush.msra.mxu2 %v7656_v4  ;;  %7902 = vmatpush.msrb.mxu1 %v7639_v12  ;;  %v6791_v24 = vadd.f32 %v19399_v55, %v6778_v45  ;;  %v7688_v43 = vld [vmem:[%s21780_s13 + $0x8c8] sm:$0xff]  ;;  %v7513_v4 = vadd.f32 %v7512_v29, %v7511_v5  ;;  %v7635_v55 = vld [vmem:[%s21780_s13 + $0x720] sm:$0xff]  ;;  %v7532_v12 = vadd.f32 %v7531_v60, %v7530_v26  ;;  %v7686_v26 = vld [vmem:[%s21780_s13 + $0x8b8] sm:$0xff] }
0x100f   :  { %7938 = vmatpush.msra.mxu3 %v7675_v54  ;;  %7957 = vmatpush.msra.mxu0 %v7692_v6  ;;  %v7520_v54 = vadd.f32 %v7519_v49, %v7518_v62  ;;  %v7397_v6 = vadd.f32 %v7396_v44, %v7395_v18  ;;  %v7687_v5 = vld [vmem:[%s21780_s13 + $0x8c0] sm:$0xff]  ;;  %v7526_v17 = vrot.slane %v7525_v59, 1  ;;  %v20865_v62 = vadd.f32 %v19586_v53, %v6843_v1  ;;  %v7728_v49 = vld [vmem:[%s21780_s13 + $0xa08] sm:$0xff]  ;;  %v7710_v41 = vld [vmem:[%s21780_s13 + $0x978] sm:$0xff] }
0x1010   :  { %7922 = vmatpush.msra.mxu2 %v7655_v10  ;;  %7903 = vmatpush.msrb.mxu1 %v7638_v33  ;;  %v7392_v10 = vadd.f32 %v7391_v58, %v7390_v56  ;;  %v7619_v18 = vsel %vm677_vm1, %v7385_v15, %v7513_v4  ;;  %v7404_v56 = vadd.f32 %v7403_v19, %v7402_v37  ;;  %v7533_v29 = vrot.slane %v7532_v12, 1  ;;  %v7667_v44 = vld [vmem:[%s21780_s13 + $0x820] sm:$0xff]  ;;  %v7726_v1 = vld [vmem:[%s21780_s13 + $0x9f8] sm:$0xff]  ;;  %v7745_v19 = vld [vmem:[%s21780_s13 + $0xa90] sm:$0xff]  ;;  %v7193_v15 = vpop.f32.mrf.mxu2 }
0x1011   :  { %7939 = vmatpush.msra.mxu3 %v7674_v16  ;;  %7958 = vmatpush.msra.mxu0 %v7691_v22  ;;  %v20862_v16 = vadd.f32 %v19382_v34, %v6791_v24  ;;  %v7714_v22 = vld [vmem:[%s21780_s13 + $0x998] sm:$0xff]  ;;  %v6882_v34 = vadd.f32 %v19764_v35, %v19727_v14  ;;  %v7398_v33 = vrot.slane %v7397_v6, 1  ;;  %v7729_v14 = vld [vmem:[%s21780_s13 + $0xa10] sm:$0xff]  ;;  %v7527_v28 = vadd.f32 %v7526_v17, %v7525_v59  ;;  %v7727_v58 = vld [vmem:[%s21780_s13 + $0xa00] sm:$0xff] }
0x1012   :  { %7923 = vmatpush.msra.mxu2 %v7654_v31  ;;  %7904 = vmatpush.msrb.mxu1 %v7637_v39  ;;  %v7620_v53 = vsel %vm677_vm1, %v7392_v10, %v7520_v54  ;;  %v7713_v31 = vld [vmem:[%s21780_s13 + $0x990] sm:$0xff]  ;;  %v7496_v39 = vmul.f32 %v20865_v62, %v20865_v62  ;;  %v7405_v63 = vrot.slane %v7404_v56, 1  ;;  %v7534_v59 = vadd.f32 %v7533_v29, %v7532_v12  ;;  %v7744_v12 = vld [vmem:[%s21780_s13 + $0xa88] sm:$0xff]  ;;  %v7759_v29 = vld [vmem:[%s21780_s13 + $0xb00] sm:$0xff] }
0x1013   :  { %7940 = vmatpush.msra.mxu3 %v7673_v36  ;;  %7959 = vmatpush.msra.mxu0 %v7690_v9  ;;  %v6895_v35 = vadd.f32 %v19807_v3, %v6882_v34  ;;  %v7668_v36 = vld [vmem:[%s21780_s13 + $0x828] sm:$0xff]  ;;  %v7685_v9 = vld [vmem:[%s21780_s13 + $0x8b0] sm:$0xff]  ;;  %v7495_v37 = vmul.f32 %v20862_v16, %v20862_v16  ;;  %v6934_v3 = vadd.f32 %v19968_v57, %v19931_v25  ;;  %v7180_v57 = vpop.f32.mrf.mxu1 }
0x1014   :  { %7924 = vmatpush.msra.mxu2 %v7653_v40  ;;  %7905 = vmatpush.msrb.mxu1 %v7636_v8  ;;  %v7712_v40 = vld [vmem:[%s21780_s13 + $0x988] sm:$0xff]  ;;  %v7399_v46 = vadd.f32 %v7398_v33, %v7397_v6  ;;  %v7542_v8 = vsel %vm616_vm0, %v7496_v39, 0.0  ;;  %v7406_v24 = vadd.f32 %v7405_v63, %v7404_v56  ;;  %v7761_v10 = vld [vmem:[%s21780_s13 + $0xb10] sm:$0xff]  ;;  %v7194_v17 = vadd.f32 %v7193_v15, %v7180_v57  ;;  %v7219_v33 = vpop.f32.mrf.mxu0  ;;  %v7719_v15 = vld [vmem:[%s21780_s13 + $0x9c0] sm:$0xff] }
0x1015   :  { %7941 = vmatpush.msra.mxu3 %v7672_v50  ;;  %7960 = vmatpush.msra.mxu0 %v7689_v51  ;;  %v7684_v25 = vld [vmem:[%s21780_s13 + $0x8a8] sm:$0xff]  ;;  %v6947_v45 = vadd.f32 %v20011_v20, %v6934_v3  ;;  %v7711_v50 = vld [vmem:[%s21780_s13 + $0x980] sm:$0xff]  ;;  %v20919_v51 = vadd.f32 %v19790_v48, %v6895_v35  ;;  %v7746_v20 = vld [vmem:[%s21780_s13 + $0xa98] sm:$0xff]  ;;  %v7535_v60 = vsel %vm616_vm0, %v7495_v37, 0.0  ;;  %v7543_v54 = vrot.slane %v7542_v8, 4  ;;  %v7206_v63 = vpop.f32.mrf.mxu3 }
0x1016   :  { %7925 = vmatpush.msra.mxu2 %v7652_v30  ;;  %7906 = vmatpush.msrb.mxu1 %v7635_v55  ;;  %v7621_v48 = vsel %vm677_vm1, %v7399_v46, %v7527_v28  ;;  %v7683_v30 = vld [vmem:[%s21780_s13 + $0x8a0] sm:$0xff]  ;;  %v7762_v55 = vld [vmem:[%s21780_s13 + $0xb18] sm:$0xff]  ;;  %v7724_v56 = vld [vmem:[%s21780_s13 + $0x9e8] sm:$0xff]  ;;  %v7207_v46 = vadd.f32 %v7206_v63, %v7194_v17 }
0x1017   :  { %7942 = vmatpush.msra.mxu3 %v7671_v0  ;;  %7961 = vmatpush.msra.mxu0 %v7688_v43  ;;  %v7407_v0 = vsel %vm616_vm0, %v20862_v16, 0.0  ;;  %v7414_v43 = vsel %vm616_vm0, %v20865_v62, 0.0  ;;  %v20944_v4 = vadd.f32 %v19994_v7, %v6947_v45  ;;  %v7497_v6 = vmul.f32 %v20919_v51, %v20919_v51  ;;  %v7709_v7 = vld [vmem:[%s21780_s13 + $0x970] sm:$0xff]  ;;  %v7742_v28 = vld [vmem:[%s21780_s13 + $0xa78] sm:$0xff]  ;;  %v7716_v63 = vld [vmem:[%s21780_s13 + $0x9a8] sm:$0xff] }
0x1018   :  { %7926 = vmatpush.msra.mxu2 %v7651_v52  ;;  %7907 = vmatmul.f32.vlgmr.msrb.gmra.mxu1 %v7619_v18  ;;  %v7536_v52 = vrot.slane %v7535_v60, 4  ;;  %v7408_v18 = vrot.slane %v7407_v0, 4  ;;  %v7421_v3 = vsel %vm616_vm0, %v20919_v51, 0.0  ;;  %v7741_v57 = vld [vmem:[%s21780_s13 + $0xa70] sm:$0xff]  ;;  %v7758_v45 = vld [vmem:[%s21780_s13 + $0xaf8] sm:$0xff] }
0x1019   :  { %7943 = vmatpush.msra.mxu3 %v7670_v13  ;;  %7962 = vmatpush.msra.mxu0 %v7687_v5  ;;  %v7622_v13 = vsel %vm677_vm1, %v7406_v24, %v7534_v59  ;;  %v7725_v5 = vld [vmem:[%s21780_s13 + $0x9f0] sm:$0xff]  ;;  %v7549_v35 = vsel %vm616_vm0, %v7497_v6, 0.0  ;;  %v21023_v24 = vadd.f32 %v7219_v33, %v7207_v46  ;;  %v7756_v6 = vld [vmem:[%s21780_s13 + $0xae8] sm:$0xff] }
0x101a   :  { %7927 = vmatmul.f32.vlgmr.msra.gmra.mxu2 %v7620_v53  ;;  %7971 = vmatpush.msra.mxu1 %v7714_v22  ;;  %v7415_v22 = vrot.slane %v7414_v43, 4  ;;  %v7498_v53 = vmul.f32 %v20944_v4, %v20944_v4  ;;  %v7409_v37 = vadd.f32 %v7408_v18, %v7407_v0  ;;  %v7721_v59 = vld [vmem:[%s21780_s13 + $0x9d0] sm:$0xff]  ;;  %v7738_v18 = vld [vmem:[%s21780_s13 + $0xa58] sm:$0xff] }
0x101b   :  { %7991 = vmatpush.msrb.mxu2 %v7730_v61  ;;  %7944 = vmatpush.msra.mxu3 %v7669_v32  ;;  %v7708_v61 = vld [vmem:[%s21780_s13 + $0x968] sm:$0xff]  ;;  %v7182_v34 = vpop.f32.mrf.mxu1  ;;  %v7743_v32 = vld [vmem:[%s21780_s13 + $0xa80] sm:$0xff] }
0x101c   :  { %7963 = vmatpush.msra.mxu0 %v7686_v26  ;;  %7972 = vmatpush.msra.mxu1 %v7713_v31  ;;  %v7760_v26 = vld [vmem:[%s21780_s13 + $0xb08] sm:$0xff]  ;;  %v7537_v31 = vadd.f32 %v7536_v52, %v7535_v60  ;;  %v7416_v39 = vadd.f32 %v7415_v22, %v7414_v43  ;;  %v7195_v60 = vpop.f32.mrf.mxu2  ;;  %v7755_v22 = vld [vmem:[%s21780_s13 + $0xae0] sm:$0xff] }
0x101d   :  { %7992 = vmatpush.msrb.mxu2 %v7729_v14  ;;  %7945 = vmatpush.msra.mxu3 %v7668_v36  ;;  %v7544_v14 = vadd.f32 %v7543_v54, %v7542_v8  ;;  %v7707_v36 = vld [vmem:[%s21780_s13 + $0x960] sm:$0xff]  ;;  %v7422_v8 = vrot.slane %v7421_v3, 4 }
0x101e   :  { %7964 = vmatpush.msra.mxu0 %v7685_v9  ;;  %7973 = vmatpush.msra.mxu1 %v7712_v40  ;;  %v7723_v9 = vld [vmem:[%s21780_s13 + $0x9e0] sm:$0xff]  ;;  %v7706_v40 = vld [vmem:[%s21780_s13 + $0x958] sm:$0xff]  ;;  %v7417_v0 = vrot.slane %v7416_v39, 2 }
0x101f   :  { %7993 = vmatpush.msrb.mxu2 %v7728_v49  ;;  %7946 = vmatpush.msra.mxu3 %v7667_v44  ;;  %v7722_v49 = vld [vmem:[%s21780_s13 + $0x9d8] sm:$0xff]  ;;  %v7550_v44 = vrot.slane %v7549_v35, 4  ;;  %v7739_v54 = vld [vmem:[%s21780_s13 + $0xa60] sm:$0xff]  ;;  %v7423_v17 = vadd.f32 %v7422_v8, %v7421_v3  ;;  %v7753_v3 = vld [vmem:[%s21780_s13 + $0xad0] sm:$0xff] }
0x1020   :  { %7965 = vmatpush.msra.mxu0 %v7684_v25  ;;  %7947 = vmatmul.f32.vlgmr.msra.gmra.mxu3 %v7621_v48  ;;  %v7556_v25 = vsel %vm616_vm0, %v7498_v53, 0.0  ;;  %v7428_v48 = vsel %vm616_vm0, %v20944_v4, 0.0  ;;  %v7702_v53 = vld [vmem:[%s21780_s13 + $0x938] sm:$0xff] }
0x1021   :  { %7974 = vmatpush.msra.mxu1 %v7711_v50  ;;  %7994 = vmatpush.msrb.mxu2 %v7727_v58  ;;  %v7538_v50 = vrot.slane %v7537_v31, 2  ;;  %v7545_v58 = vrot.slane %v7544_v14, 2  ;;  %v7557_v43 = vrot.slane %v7556_v25, 4  ;;  %v7551_v52 = vadd.f32 %v7550_v44, %v7549_v35 }
0x1022   :  { %8011 = vmatpush.msrb.mxu3 %v7746_v20  ;;  %7966 = vmatpush.msra.mxu0 %v7683_v30  ;;  %v7705_v20 = vld [vmem:[%s21780_s13 + $0x950] sm:$0xff]  ;;  %v7740_v30 = vld [vmem:[%s21780_s13 + $0xa68] sm:$0xff] }
0x1023   :  { %7975 = vmatpush.msra.mxu1 %v7710_v41  ;;  %7967 = vmatmul.f32.vlgmr.msra.gmra.mxu0 %v7622_v13  ;;  %v7757_v41 = vld [vmem:[%s21780_s13 + $0xaf0] sm:$0xff]  ;;  %v7221_v13 = vpop.f32.mrf.mxu0  ;;  %v7558_v34 = vadd.f32 %v7557_v43, %v7556_v25  ;;  %v7552_v33 = vrot.slane %v7551_v52, 2  ;;  %v7778_v43 = vld [vmem:[%s21780_s13 + $0xb98] sm:$0xff] }
0x1024   :  { %7995 = vmatpush.msrb.mxu2 %v7726_v1  ;;  %8012 = vmatpush.msrb.mxu3 %v7745_v19  ;;  %v7410_v1 = vrot.slane %v7409_v37, 2  ;;  %v7704_v19 = vld [vmem:[%s21780_s13 + $0x948] sm:$0xff]  ;;  %v7733_v13 = vld [vmem:[%s21780_s13 + $0xa30] sm:$0xff] }
0x1025   :  { %8031 = vmatpush.msrb.mxu0 %v7762_v55  ;;  %7976 = vmatpush.msra.mxu1 %v7709_v7  ;;  %v7720_v55 = vld [vmem:[%s21780_s13 + $0x9c8] sm:$0xff]  ;;  %v7429_v7 = vrot.slane %v7428_v48, 4  ;;  %v7553_v46 = vadd.f32 %v7552_v33, %v7551_v52 }
0x1026   :  { %7996 = vmatpush.msrb.mxu2 %v7725_v5  ;;  %8013 = vmatpush.msrb.mxu3 %v7744_v12  ;;  %v7703_v5 = vld [vmem:[%s21780_s13 + $0x940] sm:$0xff]  ;;  %v7539_v12 = vadd.f32 %v7538_v50, %v7537_v31  ;;  %v7737_v31 = vld [vmem:[%s21780_s13 + $0xa50] sm:$0xff]  ;;  %v7748_v33 = vld [vmem:[%s21780_s13 + $0xaa8] sm:$0xff] }
0x1027   :  { %8032 = vmatpush.msrb.mxu0 %v7761_v10  ;;  %7977 = vmatpush.msra.mxu1 %v7708_v61  ;;  %v7546_v10 = vadd.f32 %v7545_v58, %v7544_v14  ;;  %v7411_v61 = vadd.f32 %v7410_v1, %v7409_v37  ;;  %v7754_v14 = vld [vmem:[%s21780_s13 + $0xad8] sm:$0xff]  ;;  %v7430_v35 = vadd.f32 %v7429_v7, %v7428_v48  ;;  %v7424_v37 = vrot.slane %v7423_v17, 2  ;;  %v7699_v58 = vld [vmem:[%s21780_s13 + $0x920] sm:$0xff] }
0x1028   :  { %7997 = vmatpush.msrb.mxu2 %v7724_v56  ;;  %8014 = vmatpush.msrb.mxu3 %v7743_v32  ;;  %v7418_v56 = vadd.f32 %v7417_v0, %v7416_v39  ;;  %v7718_v32 = vld [vmem:[%s21780_s13 + $0x9b8] sm:$0xff]  ;;  %v7736_v39 = vld [vmem:[%s21780_s13 + $0xa48] sm:$0xff] }
0x1029   :  { %8033 = vmatpush.msrb.mxu0 %v7760_v26  ;;  %7978 = vmatpush.msra.mxu1 %v7707_v36  ;;  %v7208_v26 = vpop.f32.mrf.mxu3  ;;  %v7701_v36 = vld [vmem:[%s21780_s13 + $0x930] sm:$0xff]  ;;  %v7412_v44 = vrot.slane %v7411_v61, 1  ;;  %v7431_v50 = vrot.slane %v7430_v35, 2  ;;  %v7425_v8 = vadd.f32 %v7424_v37, %v7423_v17  ;;  %v7734_v48 = vld [vmem:[%s21780_s13 + $0xa38] sm:$0xff]  ;;  %v7732_v17 = vld [vmem:[%s21780_s13 + $0xa28] sm:$0xff] }
0x102a   :  { %7998 = vmatpush.msrb.mxu2 %v7723_v9  ;;  %8015 = vmatpush.msrb.mxu3 %v7742_v28  ;;  %v7717_v9 = vld [vmem:[%s21780_s13 + $0x9b0] sm:$0xff]  ;;  %v7540_v28 = vrot.slane %v7539_v12, 1  ;;  %v7419_v25 = vrot.slane %v7418_v56, 1  ;;  %v7750_v7 = vld [vmem:[%s21780_s13 + $0xab8] sm:$0xff]  ;;  %v7731_v26 = vld [vmem:[%s21780_s13 + $0xa20] sm:$0xff] }
0x102b   :  { %8034 = vmatpush.msrb.mxu0 %v7759_v29  ;;  %7979 = vmatpush.msra.mxu1 %v7706_v40  ;;  %v7547_v29 = vrot.slane %v7546_v10, 1  ;;  %v7559_v40 = vrot.slane %v7558_v34, 2  ;;  %v7432_v52 = vadd.f32 %v7431_v50, %v7430_v35  ;;  %v7775_v35 = vld [vmem:[%s21780_s13 + $0xb80] sm:$0xff]  ;;  %v7826_v50 = vld [vmem:[%s21780_s13 + $0xd18] sm:$0xff] }
0x102c   :  { %7999 = vmatpush.msrb.mxu2 %v7722_v49  ;;  %8016 = vmatpush.msrb.mxu3 %v7741_v57  ;;  %v7700_v49 = vld [vmem:[%s21780_s13 + $0x928] sm:$0xff]  ;;  %v7735_v57 = vld [vmem:[%s21780_s13 + $0xa40] sm:$0xff]  ;;  %v7420_v1 = vadd.f32 %v7419_v25, %v7418_v56  ;;  %v7500_v56 = vmul.f32 %v20425_v38, %v20425_v38 }
0x102d   :  { %8035 = vmatpush.msrb.mxu0 %v7758_v45  ;;  %7980 = vmatpush.msra.mxu1 %v7705_v20  ;;  %v7752_v45 = vld [vmem:[%s21780_s13 + $0xac8] sm:$0xff]  ;;  %v7715_v20 = vld [vmem:[%s21780_s13 + $0x9a0] sm:$0xff]  ;;  %v7548_v60 = vadd.f32 %v7547_v29, %v7546_v10  ;;  %v7560_v0 = vadd.f32 %v7559_v40, %v7558_v34  ;;  %v7426_v10 = vrot.slane %v7425_v8, 1 }
0x102e   :  { %8000 = vmatpush.msrb.mxu2 %v7721_v59  ;;  %8017 = vmatpush.msrb.mxu3 %v7740_v30  ;;  %v7541_v59 = vadd.f32 %v7540_v28, %v7539_v12  ;;  %v7751_v30 = vld [vmem:[%s21780_s13 + $0xac0] sm:$0xff]  ;;  %v7793_v12 = vld [vmem:[%s21780_s13 + $0xc10] sm:$0xff]  ;;  %v7776_v34 = vld [vmem:[%s21780_s13 + $0xb88] sm:$0xff]  ;;  %v21150_v29 = vpop.f32.mrf.mxu2 }
0x102f   :  { %8036 = vmatpush.msrb.mxu0 %v7757_v41  ;;  %7981 = vmatpush.msra.mxu1 %v7704_v19  ;;  %v7413_v41 = vadd.f32 %v7412_v44, %v7411_v61  ;;  %v7794_v19 = vld [vmem:[%s21780_s13 + $0xc18] sm:$0xff]  ;;  %v7499_v61 = vmul.f32 %v20227_v47, %v20227_v47  ;;  %v7747_v40 = vld [vmem:[%s21780_s13 + $0xaa0] sm:$0xff] }
0x1030   :  { %8001 = vmatpush.msrb.mxu2 %v7720_v55  ;;  %8018 = vmatpush.msrb.mxu3 %v7739_v54  ;;  %v7554_v55 = vrot.slane %v7553_v46, 1  ;;  %v7790_v44 = vld [vmem:[%s21780_s13 + $0xbf8] sm:$0xff] }
0x1031   :  { %8037 = vmatpush.msrb.mxu0 %v7756_v6  ;;  %7982 = vmatpush.msra.mxu1 %v7703_v5  ;;  %v7623_v54 = vsel %vm677_vm1, %v7413_v41, %v7541_v59  ;;  %v7624_v6 = vsel %vm677_vm1, %v7420_v1, %v7548_v60  ;;  %v21111_v5 = vpop.f32.mrf.mxu1  ;;  %v7563_v37 = vsel %vm616_vm0, %v7499_v61, 0.0  ;;  %v7501_v60 = vmul.f32 %v20617_v42, %v20617_v42  ;;  %v7808_v41 = vld [vmem:[%s21780_s13 + $0xc88] sm:$0xff]  ;;  %v7825_v1 = vld [vmem:[%s21780_s13 + $0xd10] sm:$0xff]  ;;  %v7823_v61 = vld [vmem:[%s21780_s13 + $0xd00] sm:$0xff] }
0x1032   :  { %8002 = vmatpush.msrb.mxu2 %v7719_v15  ;;  %8019 = vmatpush.msrb.mxu3 %v7738_v18  ;;  %v7777_v15 = vld [vmem:[%s21780_s13 + $0xb90] sm:$0xff] }
0x1033   :  { %8038 = vmatpush.msrb.mxu0 %v7755_v22  ;;  %7983 = vmatpush.msra.mxu1 %v7702_v53  ;;  %v7749_v18 = vld [vmem:[%s21780_s13 + $0xab0] sm:$0xff]  ;;  %v7561_v22 = vrot.slane %v7560_v0, 1  ;;  %v7792_v53 = vld [vmem:[%s21780_s13 + $0xc08] sm:$0xff] }
0x1034   :  { %8003 = vmatpush.msrb.mxu2 %v7718_v32  ;;  %8020 = vmatpush.msrb.mxu3 %v7737_v31  ;;  %v7555_v32 = vadd.f32 %v7554_v55, %v7553_v46  ;;  %v7433_v31 = vrot.slane %v7432_v52, 1  ;;  %v7809_v46 = vld [vmem:[%s21780_s13 + $0xc90] sm:$0xff]  ;;  %v7772_v55 = vld [vmem:[%s21780_s13 + $0xb68] sm:$0xff] }
0x1035   :  { %8039 = vmatpush.msrb.mxu0 %v7754_v14  ;;  %7984 = vmatpush.msra.mxu1 %v7701_v36  ;;  %v7427_v14 = vadd.f32 %v7426_v10, %v7425_v8  ;;  %v7791_v36 = vld [vmem:[%s21780_s13 + $0xc00] sm:$0xff]  ;;  %v7562_v28 = vadd.f32 %v7561_v22, %v7560_v0  ;;  %v7806_v22 = vld [vmem:[%s21780_s13 + $0xc78] sm:$0xff] }
0x1036   :  { %8004 = vmatpush.msrb.mxu2 %v7717_v9  ;;  %8021 = vmatpush.msrb.mxu3 %v7736_v39  ;;  %v7810_v9 = vld [vmem:[%s21780_s13 + $0xc98] sm:$0xff]  ;;  %v7570_v39 = vsel %vm616_vm0, %v7500_v56, 0.0  ;;  %v7771_v10 = vld [vmem:[%s21780_s13 + $0xb60] sm:$0xff] }
0x1037   :  { %8040 = vmatpush.msrb.mxu0 %v7753_v3  ;;  %7985 = vmatpush.msra.mxu1 %v7700_v49  ;;  %v7625_v3 = vsel %vm677_vm1, %v7427_v14, %v7555_v32  ;;  %v7774_v49 = vld [vmem:[%s21780_s13 + $0xb78] sm:$0xff]  ;;  %v7571_v59 = vrot.slane %v7570_v39, 4  ;;  %v7805_v14 = vld [vmem:[%s21780_s13 + $0xc70] sm:$0xff] }
0x1038   :  { %8005 = vmatpush.msrb.mxu2 %v7716_v63  ;;  %8022 = vmatpush.msrb.mxu3 %v7735_v57  ;;  %v7434_v63 = vadd.f32 %v7433_v31, %v7432_v52  ;;  %v7435_v57 = vsel %vm616_vm0, %v20227_v47, 0.0  ;;  %v7788_v52 = vld [vmem:[%s21780_s13 + $0xbe8] sm:$0xff] }
0x1039   :  { %8041 = vmatpush.msrb.mxu0 %v7752_v45  ;;  %7986 = vmatpush.msra.mxu1 %v7699_v58  ;;  %v7234_v25 = vpop.f32.mrf.mxu1  ;;  %v7442_v45 = vsel %vm616_vm0, %v20425_v38, 0.0  ;;  %v21174_v58 = vpop.f32.mrf.mxu0  ;;  %v7436_v0 = vrot.slane %v7435_v57, 4 }
0x103a   :  { %8006 = vmatpush.msrb.mxu2 %v7715_v20  ;;  %8023 = vmatpush.msrb.mxu3 %v7734_v48  ;;  %v7564_v20 = vrot.slane %v7563_v37, 4  ;;  %v7626_v8 = vsel %vm677_vm1, %v7434_v63, %v7562_v28  ;;  %v7773_v48 = vld [vmem:[%s21780_s13 + $0xb70] sm:$0xff]  ;;  %v7804_v63 = vld [vmem:[%s21780_s13 + $0xc68] sm:$0xff] }
0x103b   :  { %8042 = vmatpush.msrb.mxu0 %v7751_v30  ;;  %7987 = vmatmul.f32.vlgmr.msra.gmra.mxu1 %v7623_v54  ;;  %v7789_v30 = vld [vmem:[%s21780_s13 + $0xbf0] sm:$0xff]  ;;  %v21199_v54 = vpop.f32.mrf.mxu3  ;;  %v7437_v56 = vadd.f32 %v7436_v0, %v7435_v57 }
0x103c   :  { %8007 = vmatmul.f32.vlgmr.msrb.gmra.mxu2 %v7624_v6  ;;  %8051 = vmatpush.msrb.mxu1 %v7778_v43  ;;  %v7443_v43 = vrot.slane %v7442_v45, 4  ;;  %v7807_v6 = vld [vmem:[%s21780_s13 + $0xc80] sm:$0xff] }
0x103d   :  { %8071 = vmatpush.msra.mxu2 %v7794_v19  ;;  %8024 = vmatpush.msrb.mxu3 %v7733_v13  ;;  %v7502_v19 = vmul.f32 %v20805_v23, %v20805_v23  ;;  %v7824_v13 = vld [vmem:[%s21780_s13 + $0xd08] sm:$0xff]  ;;  %v7438_v25 = vrot.slane %v7437_v56, 2 }
0x103e   :  { %8043 = vmatpush.msrb.mxu0 %v7750_v7  ;;  %8052 = vmatpush.msrb.mxu1 %v7777_v15  ;;  %v7565_v7 = vadd.f32 %v7564_v20, %v7563_v37  ;;  %v7572_v15 = vadd.f32 %v7571_v59, %v7570_v39  ;;  %v7456_v37 = vsel %vm616_vm0, %v20805_v23, 0.0  ;;  %v7769_v39 = vld [vmem:[%s21780_s13 + $0xb50] sm:$0xff] }
0x103f   :  { %8072 = vmatpush.msra.mxu2 %v7793_v12  ;;  %8025 = vmatpush.msrb.mxu3 %v7732_v17  ;;  %v7577_v12 = vsel %vm616_vm0, %v7501_v60, 0.0  ;;  %v7787_v17 = vld [vmem:[%s21780_s13 + $0xbe0] sm:$0xff]  ;;  %v7584_v32 = vsel %vm616_vm0, %v7502_v19, 0.0  ;;  %v7457_v59 = vrot.slane %v7456_v37, 4  ;;  %v7802_v19 = vld [vmem:[%s21780_s13 + $0xc58] sm:$0xff] }
0x1040   :  { %8044 = vmatpush.msrb.mxu0 %v7749_v18  ;;  %8053 = vmatpush.msrb.mxu1 %v7776_v34  ;;  %v7247_v18 = vpop.f32.mrf.mxu2  ;;  %v7444_v34 = vadd.f32 %v7443_v43, %v7442_v45  ;;  %v7578_v31 = vrot.slane %v7577_v12, 4  ;;  %v7573_v28 = vrot.slane %v7572_v15, 2  ;;  %v7768_v45 = vld [vmem:[%s21780_s13 + $0xb48] sm:$0xff]  ;;  %v7803_v60 = vld [vmem:[%s21780_s13 + $0xc60] sm:$0xff] }
0x1041   :  { %8073 = vmatpush.msra.mxu2 %v7792_v53  ;;  %8026 = vmatpush.msrb.mxu3 %v7731_v26  ;;  %v7449_v53 = vsel %vm616_vm0, %v20617_v42, 0.0  ;;  %v7770_v26 = vld [vmem:[%s21780_s13 + $0xb58] sm:$0xff]  ;;  %v7246_v18 = vadd.f32 %v21150_v29, %v21111_v5  ;;  %v7800_v5 = vld [vmem:[%s21780_s13 + $0xc48] sm:$0xff]  ;;  %v7817_v29 = vld [vmem:[%s21780_s13 + $0xcd0] sm:$0xff] }
0x1042   :  { %8045 = vmatpush.msrb.mxu0 %v7748_v33  ;;  %8027 = vmatmul.f32.vlgmr.msrb.gmra.mxu3 %v7625_v3  ;;  %v7786_v33 = vld [vmem:[%s21780_s13 + $0xbd8] sm:$0xff]  ;;  %v7785_v3 = vld [vmem:[%s21780_s13 + $0xbd0] sm:$0xff]  ;;  %v7445_v57 = vrot.slane %v7444_v34, 2  ;;  %v7579_v20 = vadd.f32 %v7578_v31, %v7577_v12  ;;  %v7458_v12 = vadd.f32 %v7457_v59, %v7456_v37  ;;  %v7763_v37 = vld [vmem:[%s21780_s13 + $0xb20] sm:$0xff] }
0x1043   :  { %8054 = vmatpush.msrb.mxu1 %v7775_v35  ;;  %8074 = vmatpush.msra.mxu2 %v7791_v36  ;;  %v7822_v35 = vld [vmem:[%s21780_s13 + $0xcf8] sm:$0xff]  ;;  %v7273_v36 = vpop.f32.mrf.mxu0  ;;  %v7259_v31 = vadd.f32 %v21199_v54, %v7246_v18  ;;  %v7816_v54 = vld [vmem:[%s21780_s13 + $0xcc8] sm:$0xff]  ;;  %v7795_v18 = vld [vmem:[%s21780_s13 + $0xc20] sm:$0xff] }
0x1044   :  { %8091 = vmatpush.msra.mxu3 %v7810_v9  ;;  %8046 = vmatpush.msrb.mxu0 %v7747_v40  ;;  %v7566_v9 = vrot.slane %v7565_v7, 2  ;;  %v7450_v40 = vrot.slane %v7449_v53, 4  ;;  %v7842_v59 = vld [vmem:[%s21780_s13 + $0xd98] sm:$0xff] }
0x1045   :  { %8055 = vmatpush.msrb.mxu1 %v7774_v49  ;;  %8047 = vmatmul.f32.vlgmr.msrb.gmra.mxu0 %v7626_v8  ;;  %v7585_v49 = vrot.slane %v7584_v32, 4  ;;  %v7820_v8 = vld [vmem:[%s21780_s13 + $0xce8] sm:$0xff] }
0x1046   :  { %8075 = vmatpush.msra.mxu2 %v7790_v44  ;;  %8092 = vmatpush.msra.mxu3 %v7809_v46  ;;  %v7821_v44 = vld [vmem:[%s21780_s13 + $0xcf0] sm:$0xff]  ;;  %v7784_v46 = vld [vmem:[%s21780_s13 + $0xbc8] sm:$0xff]  ;;  %v7451_v0 = vadd.f32 %v7450_v40, %v7449_v53 }
0x1047   :  { %8111 = vmatpush.msra.mxu0 %v7826_v50  ;;  %8056 = vmatpush.msrb.mxu1 %v7773_v48  ;;  %v7260_v50 = vpop.f32.mrf.mxu3  ;;  %v7567_v48 = vadd.f32 %v7566_v9, %v7565_v7  ;;  %v7586_v43 = vadd.f32 %v7585_v49, %v7584_v32  ;;  %v7782_v7 = vld [vmem:[%s21780_s13 + $0xbb8] sm:$0xff]  ;;  %v7459_v9 = vrot.slane %v7458_v12, 2 }
0x1048   :  { %8076 = vmatpush.msra.mxu2 %v7789_v30  ;;  %8093 = vmatpush.msra.mxu3 %v7808_v41  ;;  %v7574_v30 = vadd.f32 %v7573_v28, %v7572_v15  ;;  %v7767_v41 = vld [vmem:[%s21780_s13 + $0xb40] sm:$0xff]  ;;  %v7580_v15 = vrot.slane %v7579_v20, 2  ;;  %v7452_v53 = vrot.slane %v7451_v0, 2 }
0x1049   :  { %8112 = vmatpush.msra.mxu0 %v7825_v1  ;;  %8057 = vmatpush.msrb.mxu1 %v7772_v55  ;;  %v7783_v1 = vld [vmem:[%s21780_s13 + $0xbc0] sm:$0xff]  ;;  %v7587_v32 = vrot.slane %v7586_v43, 2 }
0x104a   :  { %8077 = vmatpush.msra.mxu2 %v7788_v52  ;;  %8094 = vmatpush.msra.mxu3 %v7807_v6  ;;  %v7819_v55 = vld [vmem:[%s21780_s13 + $0xce0] sm:$0xff]  ;;  %v7439_v52 = vadd.f32 %v7438_v25, %v7437_v56  ;;  %v7446_v6 = vadd.f32 %v7445_v57, %v7444_v34  ;;  %v7568_v56 = vrot.slane %v7567_v48, 1  ;;  %v7575_v34 = vrot.slane %v7574_v30, 1  ;;  %v7798_v25 = vld [vmem:[%s21780_s13 + $0xc38] sm:$0xff] }
0x104b   :  { %8113 = vmatpush.msra.mxu0 %v7824_v13  ;;  %8058 = vmatpush.msrb.mxu1 %v7771_v10  ;;  %v7766_v13 = vld [vmem:[%s21780_s13 + $0xb38] sm:$0xff]  ;;  %v7801_v10 = vld [vmem:[%s21780_s13 + $0xc50] sm:$0xff]  ;;  %v7581_v36 = vadd.f32 %v7580_v15, %v7579_v20  ;;  %v7799_v28 = vld [vmem:[%s21780_s13 + $0xc40] sm:$0xff]  ;;  %v21318_v49 = vpop.f32.mrf.mxu1  ;;  %v7460_v20 = vadd.f32 %v7459_v9, %v7458_v12  ;;  %v7463_v9 = vsel %vm616_vm0, %v21023_v24, 0.0 }
0x104c   :  { %8078 = vmatpush.msra.mxu2 %v7787_v17  ;;  %8095 = vmatpush.msra.mxu3 %v7806_v22  ;;  %v7818_v17 = vld [vmem:[%s21780_s13 + $0xcd8] sm:$0xff]  ;;  %v7765_v22 = vld [vmem:[%s21780_s13 + $0xb30] sm:$0xff]  ;;  %v7576_v40 = vadd.f32 %v7575_v34, %v7574_v30  ;;  %v7815_v57 = vld [vmem:[%s21780_s13 + $0xcc0] sm:$0xff] }
0x104d   :  { %8114 = vmatpush.msra.mxu0 %v7823_v61  ;;  %8059 = vmatpush.msrb.mxu1 %v7770_v26  ;;  %v7781_v61 = vld [vmem:[%s21780_s13 + $0xbb0] sm:$0xff]  ;;  %v7440_v26 = vrot.slane %v7439_v52, 1  ;;  %v7461_v15 = vrot.slane %v7460_v20, 1  ;;  %v7840_v12 = vld [vmem:[%s21780_s13 + $0xd88] sm:$0xff]  ;;  %v7839_v34 = vld [vmem:[%s21780_s13 + $0xd80] sm:$0xff] }
0x104e   :  { %8079 = vmatpush.msra.mxu2 %v7786_v33  ;;  %8096 = vmatpush.msra.mxu3 %v7805_v14  ;;  %v7447_v33 = vrot.slane %v7446_v6, 1  ;;  %v7764_v14 = vld [vmem:[%s21780_s13 + $0xb28] sm:$0xff]  ;;  %v7797_v30 = vld [vmem:[%s21780_s13 + $0xc30] sm:$0xff] }
0x104f   :  { %8115 = vmatpush.msra.mxu0 %v7822_v35  ;;  %8060 = vmatpush.msrb.mxu1 %v7769_v39  ;;  %v7780_v35 = vld [vmem:[%s21780_s13 + $0xba8] sm:$0xff]  ;;  %v7779_v39 = vld [vmem:[%s21780_s13 + $0xba0] sm:$0xff] }
0x1050   :  { %8080 = vmatpush.msra.mxu2 %v7785_v3  ;;  %8097 = vmatpush.msra.mxu3 %v7804_v63  ;;  %v7569_v3 = vadd.f32 %v7568_v56, %v7567_v48  ;;  %v7453_v63 = vadd.f32 %v7452_v53, %v7451_v0  ;;  %v7448_v50 = vadd.f32 %v7447_v33, %v7446_v6  ;;  %v7841_v0 = vld [vmem:[%s21780_s13 + $0xd90] sm:$0xff]  ;;  %v7796_v6 = vld [vmem:[%s21780_s13 + $0xc28] sm:$0xff]  ;;  %v7811_v33 = vld [vmem:[%s21780_s13 + $0xca0] sm:$0xff] }
0x1051   :  { %8116 = vmatpush.msra.mxu0 %v7821_v44  ;;  %8061 = vmatpush.msrb.mxu1 %v7768_v45  ;;  %v7588_v44 = vadd.f32 %v7587_v32, %v7586_v43  ;;  %v21327_v45 = vadd.f32 %v21174_v58, %v7259_v31  ;;  %v7857_v43 = vld [vmem:[%s21780_s13 + $0xe10] sm:$0xff] }
0x1052   :  { %8081 = vmatpush.msra.mxu2 %v7784_v46  ;;  %8098 = vmatpush.msra.mxu3 %v7803_v60  ;;  %v7441_v46 = vadd.f32 %v7440_v26, %v7439_v52  ;;  %v7858_v60 = vld [vmem:[%s21780_s13 + $0xe18] sm:$0xff]  ;;  %v7628_v48 = vsel %vm677_vm1, %v7448_v50, %v7576_v40  ;;  %v7855_v26 = vld [vmem:[%s21780_s13 + $0xe00] sm:$0xff] }
0x1053   :  { %8117 = vmatpush.msra.mxu0 %v7820_v8  ;;  %8062 = vmatpush.msrb.mxu1 %v7767_v41  ;;  %v7582_v8 = vrot.slane %v7581_v36, 1  ;;  %v7814_v41 = vld [vmem:[%s21780_s13 + $0xcb8] sm:$0xff]  ;;  %v7504_v52 = vmul.f32 %v21327_v45, %v21327_v45 }
0x1054   :  { %8082 = vmatpush.msra.mxu2 %v7783_v1  ;;  %8099 = vmatpush.msra.mxu3 %v7802_v19  ;;  %v7627_v58 = vsel %vm677_vm1, %v7441_v46, %v7569_v3  ;;  %v7454_v1 = vrot.slane %v7453_v63, 1  ;;  %v7589_v19 = vrot.slane %v7588_v44, 1  ;;  %v7853_v46 = vld [vmem:[%s21780_s13 + $0xdf0] sm:$0xff] }
0x1055   :  { %8118 = vmatpush.msra.mxu0 %v7819_v55  ;;  %8063 = vmatpush.msrb.mxu1 %v7766_v13  ;;  %v7503_v55 = vmul.f32 %v21023_v24, %v21023_v24  ;;  %v7813_v13 = vld [vmem:[%s21780_s13 + $0xcb0] sm:$0xff] }
0x1056   :  { %8083 = vmatpush.msra.mxu2 %v7782_v7  ;;  %8100 = vmatpush.msra.mxu3 %v7801_v10  ;;  %v7297_v7 = vpop.f32.mrf.mxu2  ;;  %v7856_v10 = vld [vmem:[%s21780_s13 + $0xe08] sm:$0xff]  ;;  %v7455_v56 = vadd.f32 %v7454_v1, %v7453_v63  ;;  %v7590_v53 = vadd.f32 %v7589_v19, %v7588_v44  ;;  %v7873_v63 = vld [vmem:[%s21780_s13 + $0xe90] sm:$0xff] }
0x1057   :  { %8119 = vmatpush.msra.mxu0 %v7818_v17  ;;  %8064 = vmatpush.msrb.mxu1 %v7765_v22  ;;  %v7583_v17 = vadd.f32 %v7582_v8, %v7581_v36  ;;  %v7812_v22 = vld [vmem:[%s21780_s13 + $0xca8] sm:$0xff]  ;;  %v7323_v32 = vpop.f32.mrf.mxu0  ;;  %v7298_v36 = vadd.f32 %v7297_v7, %v21318_v49 }
0x1058   :  { %8084 = vmatpush.msra.mxu2 %v7781_v61  ;;  %8101 = vmatpush.msra.mxu3 %v7800_v5  ;;  %v7286_v61 = vpop.f32.mrf.mxu1  ;;  %v7591_v5 = vsel %vm616_vm0, %v7503_v55, 0.0  ;;  %v7888_v55 = vld [vmem:[%s21780_s13 + $0xf08] sm:$0xff] }
0x1059   :  { %8120 = vmatpush.msra.mxu0 %v7817_v29  ;;  %8065 = vmatpush.msrb.mxu1 %v7764_v14  ;;  %v7598_v29 = vsel %vm616_vm0, %v7504_v52, 0.0  ;;  %v7629_v31 = vsel %vm677_vm1, %v7455_v56, %v7583_v17  ;;  %v7874_v14 = vld [vmem:[%s21780_s13 + $0xe98] sm:$0xff]  ;;  %v7592_v3 = vrot.slane %v7591_v5, 4  ;;  %v7835_v52 = vld [vmem:[%s21780_s13 + $0xd60] sm:$0xff] }
0x105a   :  { %8085 = vmatpush.msra.mxu2 %v7780_v35  ;;  %8102 = vmatpush.msra.mxu3 %v7799_v28  ;;  %v7462_v35 = vadd.f32 %v7461_v15, %v7460_v20  ;;  %v7470_v28 = vsel %vm616_vm0, %v21327_v45, 0.0  ;;  %v7599_v40 = vrot.slane %v7598_v29, 4  ;;  %v7464_v20 = vrot.slane %v7463_v9, 4  ;;  %v7887_v17 = vld [vmem:[%s21780_s13 + $0xf00] sm:$0xff] }
0x105b   :  { %8121 = vmatpush.msra.mxu0 %v7816_v54  ;;  %8066 = vmatpush.msrb.mxu1 %v7763_v37  ;;  %v7838_v54 = vld [vmem:[%s21780_s13 + $0xd78] sm:$0xff] }
0x105c   :  { %8086 = vmatpush.msra.mxu2 %v7779_v39  ;;  %8103 = vmatpush.msra.mxu3 %v7798_v25  ;;  %v7854_v37 = vld [vmem:[%s21780_s13 + $0xdf8] sm:$0xff]  ;;  %v7310_v39 = vpop.f32.mrf.mxu3  ;;  %v7630_v49 = vsel %vm677_vm1, %v7462_v35, %v7590_v53  ;;  %v7600_v1 = vadd.f32 %v7599_v40, %v7598_v29  ;;  %v7465_v7 = vadd.f32 %v7464_v20, %v7463_v9  ;;  %v7885_v9 = vld [vmem:[%s21780_s13 + $0xef0] sm:$0xff]  ;;  %v7867_v40 = vld [vmem:[%s21780_s13 + $0xe60] sm:$0xff] }
0x105d   :  { %8122 = vmatpush.msra.mxu0 %v7815_v57  ;;  %8067 = vmatmul.f32.vlgmr.msrb.gmra.mxu1 %v7627_v58  ;;  %v7311_v44 = vadd.f32 %v7310_v39, %v7298_v36  ;;  %v7890_v25 = vld [vmem:[%s21780_s13 + $0xf18] sm:$0xff]  ;;  %v7837_v57 = vld [vmem:[%s21780_s13 + $0xd70] sm:$0xff]  ;;  %v7868_v36 = vld [vmem:[%s21780_s13 + $0xe68] sm:$0xff] }
0x105e   :  { %8087 = vmatmul.f32.vlgmr.msra.gmra.mxu2 %v7628_v48  ;;  %8131 = vmatpush.msra.mxu1 %v7842_v59  ;;  %v7299_v50 = vpop.f32.mrf.mxu2  ;;  %v7471_v59 = vrot.slane %v7470_v28, 4  ;;  %v7889_v58 = vld [vmem:[%s21780_s13 + $0xf10] sm:$0xff]  ;;  %v7836_v48 = vld [vmem:[%s21780_s13 + $0xd68] sm:$0xff]  ;;  %v7601_v53 = vrot.slane %v7600_v1, 2  ;;  %v7886_v29 = vld [vmem:[%s21780_s13 + $0xef8] sm:$0xff] }
0x105f   :  { %8151 = vmatpush.msrb.mxu2 %v7858_v60  ;;  %8104 = vmatpush.msra.mxu3 %v7797_v30  ;;  %v7872_v60 = vld [vmem:[%s21780_s13 + $0xe88] sm:$0xff]  ;;  %v21413_v8 = vadd.f32 %v7323_v32, %v7311_v44  ;;  %v7325_v19 = vpop.f32.mrf.mxu0  ;;  %v7847_v44 = vld [vmem:[%s21780_s13 + $0xdc0] sm:$0xff]  ;;  %v7866_v50 = vld [vmem:[%s21780_s13 + $0xe58] sm:$0xff] }
0x1060   :  { %8123 = vmatpush.msra.mxu0 %v7814_v41  ;;  %8132 = vmatpush.msra.mxu1 %v7841_v0  ;;  %v7852_v30 = vld [vmem:[%s21780_s13 + $0xde8] sm:$0xff]  ;;  %v7593_v41 = vadd.f32 %v7592_v3, %v7591_v5  ;;  %v7871_v0 = vld [vmem:[%s21780_s13 + $0xe80] sm:$0xff]  ;;  %v7472_v15 = vadd.f32 %v7471_v59, %v7470_v28  ;;  %v7869_v5 = vld [vmem:[%s21780_s13 + $0xe70] sm:$0xff]  ;;  %v7602_v39 = vadd.f32 %v7601_v53, %v7600_v1 }
0x1061   :  { %8152 = vmatpush.msrb.mxu2 %v7857_v43  ;;  %8105 = vmatpush.msra.mxu3 %v7796_v6  ;;  %v7505_v43 = vmul.f32 %v21413_v8, %v21413_v8  ;;  %v7851_v6 = vld [vmem:[%s21780_s13 + $0xde0] sm:$0xff]  ;;  %v7832_v28 = vld [vmem:[%s21780_s13 + $0xd48] sm:$0xff]  ;;  %v7830_v59 = vld [vmem:[%s21780_s13 + $0xd38] sm:$0xff] }
0x1062   :  { %8124 = vmatpush.msra.mxu0 %v7813_v13  ;;  %8133 = vmatpush.msra.mxu1 %v7840_v12  ;;  %v7477_v13 = vsel %vm616_vm0, %v21413_v8, 0.0  ;;  %v7870_v12 = vld [vmem:[%s21780_s13 + $0xe78] sm:$0xff]  ;;  %v7883_v20 = vld [vmem:[%s21780_s13 + $0xee0] sm:$0xff] }
0x1063   :  { %8153 = vmatpush.msrb.mxu2 %v7856_v10  ;;  %8106 = vmatpush.msra.mxu3 %v7795_v18  ;;  %v7605_v10 = vsel %vm616_vm0, %v7505_v43, 0.0  ;;  %v7834_v18 = vld [vmem:[%s21780_s13 + $0xd58] sm:$0xff]  ;;  %v7478_v32 = vrot.slane %v7477_v13, 4  ;;  %v7845_v43 = vld [vmem:[%s21780_s13 + $0xdb0] sm:$0xff] }
0x1064   :  { %8125 = vmatpush.msra.mxu0 %v7812_v22  ;;  %8107 = vmatmul.f32.vlgmr.msra.gmra.mxu3 %v7629_v31  ;;  %v7850_v22 = vld [vmem:[%s21780_s13 + $0xdd8] sm:$0xff]  ;;  %v7606_v61 = vrot.slane %v7605_v10, 4  ;;  %v7312_v56 = vpop.f32.mrf.mxu3  ;;  %v7466_v31 = vrot.slane %v7465_v7, 2 }
0x1065   :  { %8134 = vmatpush.msra.mxu1 %v7839_v34  ;;  %8154 = vmatpush.msrb.mxu2 %v7855_v26  ;;  %v7594_v34 = vrot.slane %v7593_v41, 2  ;;  %v7833_v26 = vld [vmem:[%s21780_s13 + $0xd50] sm:$0xff]  ;;  %v7479_v3 = vadd.f32 %v7478_v32, %v7477_v13  ;;  %v7882_v1 = vld [vmem:[%s21780_s13 + $0xed8] sm:$0xff]  ;;  %v7864_v13 = vld [vmem:[%s21780_s13 + $0xe48] sm:$0xff] }
0x1066   :  { %8126 = vmatpush.msra.mxu0 %v7811_v33  ;;  %8171 = vmatpush.msrb.mxu3 %v7874_v14  ;;  %v7849_v33 = vld [vmem:[%s21780_s13 + $0xdd0] sm:$0xff]  ;;  %v7473_v14 = vrot.slane %v7472_v15, 2  ;;  %v7607_v35 = vadd.f32 %v7606_v61, %v7605_v10  ;;  %v7880_v61 = vld [vmem:[%s21780_s13 + $0xec8] sm:$0xff]  ;;  %v7827_v56 = vld [vmem:[%s21780_s13 + $0xd20] sm:$0xff] }
0x1067   :  { %8127 = vmatmul.f32.vlgmr.msra.gmra.mxu0 %v7630_v49  ;;  %8135 = vmatpush.msra.mxu1 %v7838_v54  ;;  %v7848_v54 = vld [vmem:[%s21780_s13 + $0xdc8] sm:$0xff] }
0x1068   :  { %8155 = vmatpush.msrb.mxu2 %v7854_v37  ;;  %8172 = vmatpush.msrb.mxu3 %v7873_v63  ;;  %v7595_v37 = vadd.f32 %v7594_v34, %v7593_v41  ;;  %v7884_v49 = vld [vmem:[%s21780_s13 + $0xee8] sm:$0xff]  ;;  %v7831_v63 = vld [vmem:[%s21780_s13 + $0xd40] sm:$0xff]  ;;  %v7603_v41 = vrot.slane %v7602_v39, 1 }
0x1069   :  { %8191 = vmatpush.msrb.mxu0 %v7890_v25  ;;  %8136 = vmatpush.msra.mxu1 %v7837_v57  ;;  %v7467_v25 = vadd.f32 %v7466_v31, %v7465_v7  ;;  %v7474_v57 = vadd.f32 %v7473_v14, %v7472_v15  ;;  %v7881_v7 = vld [vmem:[%s21780_s13 + $0xed0] sm:$0xff]  ;;  %v7828_v15 = vld [vmem:[%s21780_s13 + $0xd28] sm:$0xff]  ;;  %v7843_v34 = vld [vmem:[%s21780_s13 + $0xda0] sm:$0xff] }
0x106a   :  { %8156 = vmatpush.msrb.mxu2 %v7853_v46  ;;  %8173 = vmatpush.msrb.mxu3 %v7872_v60  ;;  %v7608_v46 = vrot.slane %v7607_v35, 2  ;;  %v7846_v60 = vld [vmem:[%s21780_s13 + $0xdb8] sm:$0xff] }
0x106b   :  { %8192 = vmatpush.msrb.mxu0 %v7889_v58  ;;  %8137 = vmatpush.msra.mxu1 %v7836_v48  ;;  %v7480_v58 = vrot.slane %v7479_v3, 2  ;;  %v7865_v48 = vld [vmem:[%s21780_s13 + $0xe50] sm:$0xff] }
0x106c   :  { %8157 = vmatpush.msrb.mxu2 %v7852_v30  ;;  %8174 = vmatpush.msrb.mxu3 %v7871_v0  ;;  %v7596_v30 = vrot.slane %v7595_v37, 1  ;;  %v7829_v0 = vld [vmem:[%s21780_s13 + $0xd30] sm:$0xff] }
0x106d   :  { %8193 = vmatpush.msrb.mxu0 %v7888_v55  ;;  %8138 = vmatpush.msra.mxu1 %v7835_v52  ;;  %v7468_v55 = vrot.slane %v7467_v25, 1  ;;  %v7475_v52 = vrot.slane %v7474_v57, 1  ;;  %v7481_v10 = vadd.f32 %v7480_v58, %v7479_v3  ;;  %v7877_v3 = vld [vmem:[%s21780_s13 + $0xeb0] sm:$0xff] }
0x106e   :  { %8158 = vmatpush.msrb.mxu2 %v7851_v6  ;;  %8175 = vmatpush.msrb.mxu3 %v7870_v12  ;;  %v7609_v6 = vadd.f32 %v7608_v46, %v7607_v35  ;;  %v7844_v12 = vld [vmem:[%s21780_s13 + $0xda8] sm:$0xff] }
0x106f   :  { %8194 = vmatpush.msrb.mxu0 %v7887_v17  ;;  %8139 = vmatpush.msra.mxu1 %v7834_v18  ;;  %v7863_v17 = vld [vmem:[%s21780_s13 + $0xe40] sm:$0xff]  ;;  %v7597_v18 = vadd.f32 %v7596_v30, %v7595_v37  ;;  %v7469_v53 = vadd.f32 %v7468_v55, %v7467_v25  ;;  %v7476_v32 = vadd.f32 %v7475_v52, %v7474_v57  ;;  %v7482_v31 = vrot.slane %v7481_v10, 1  ;;  %v7860_v37 = vld [vmem:[%s21780_s13 + $0xe28] sm:$0xff] }
0x1070   :  { %8159 = vmatpush.msrb.mxu2 %v7850_v22  ;;  %8176 = vmatpush.msrb.mxu3 %v7869_v5  ;;  %v7604_v22 = vadd.f32 %v7603_v41, %v7602_v39  ;;  %v7610_v5 = vrot.slane %v7609_v6, 1 }
0x1071   :  { %8195 = vmatpush.msrb.mxu0 %v7886_v29  ;;  %8140 = vmatpush.msra.mxu1 %v7833_v26  ;;  %v7336_v19 = vpop.f32.mrf.mxu1  ;;  %v7862_v29 = vld [vmem:[%s21780_s13 + $0xe38] sm:$0xff]  ;;  %v7631_v14 = vsel %vm677_vm1, %v7469_v53, %v7597_v18 }
0x1072   :  { %8160 = vmatpush.msrb.mxu2 %v7849_v33  ;;  %8177 = vmatpush.msrb.mxu3 %v7868_v36  ;;  %v7879_v33 = vld [vmem:[%s21780_s13 + $0xec0] sm:$0xff]  ;;  %v7632_v35 = vsel %vm677_vm1, %v7476_v32, %v7604_v22  ;;  %v7861_v36 = vld [vmem:[%s21780_s13 + $0xe30] sm:$0xff] }
0x1073   :  { %8196 = vmatpush.msrb.mxu0 %v7885_v9  ;;  %8141 = vmatpush.msra.mxu1 %v7832_v28  ;;  %v7878_v28 = vld [vmem:[%s21780_s13 + $0xeb8] sm:$0xff] }
0x1074   :  { %8161 = vmatpush.msrb.mxu2 %v7848_v54  ;;  %8178 = vmatpush.msrb.mxu3 %v7867_v40  ;;  %v7611_v54 = vadd.f32 %v7610_v5, %v7609_v6  ;;  %v7483_v40 = vadd.f32 %v7482_v31, %v7481_v10 }
0x1075   :  { %8197 = vmatpush.msrb.mxu0 %v7884_v49  ;;  %8142 = vmatpush.msra.mxu1 %v7831_v63  ;;  %v7859_v49 = vld [vmem:[%s21780_s13 + $0xe20] sm:$0xff] }
0x1076   :  { %8162 = vmatpush.msrb.mxu2 %v7847_v44  ;;  %8179 = vmatpush.msrb.mxu3 %v7866_v50  ;;  %v7876_v44 = vld [vmem:[%s21780_s13 + $0xea8] sm:$0xff]  ;;  %v7633_v25 = vsel %vm677_vm1, %v7483_v40, %v7611_v54 }
0x1077   :  { %8198 = vmatpush.msrb.mxu0 %v7883_v20  ;;  %8143 = vmatpush.msra.mxu1 %v7830_v59  ;;  %v7875_v20 = vld [vmem:[%s21780_s13 + $0xea0] sm:$0xff] }
0x1078   :  { %8163 = vmatpush.msrb.mxu2 %v7846_v60  ;;  %8180 = vmatpush.msrb.mxu3 %v7865_v48 }
0x1079   :  { %8199 = vmatpush.msrb.mxu0 %v7882_v1  ;;  %8144 = vmatpush.msra.mxu1 %v7829_v0  ;;  %v7349_v26 = vpop.f32.mrf.mxu2  ;;  %v7338_v9 = vpop.f32.mrf.mxu1 }
0x107a   :  { %8164 = vmatpush.msrb.mxu2 %v7845_v43  ;;  %8181 = vmatpush.msrb.mxu3 %v7864_v13  ;;  %v7350_v63 = vadd.f32 %v7349_v26, %v7336_v19 }
0x107b   :  { %8200 = vmatpush.msrb.mxu0 %v7881_v7  ;;  %8145 = vmatpush.msra.mxu1 %v7828_v15 }
0x107c   :  { %8165 = vmatpush.msrb.mxu2 %v7844_v12  ;;  %8182 = vmatpush.msrb.mxu3 %v7863_v17 }
0x107d   :  { %8201 = vmatpush.msrb.mxu0 %v7880_v61  ;;  %8146 = vmatpush.msra.mxu1 %v7827_v56 }
0x107e   :  { %8166 = vmatpush.msrb.mxu2 %v7843_v34  ;;  %8147 = vmatmul.f32.vlgmr.msra.gmra.mxu1 %v7631_v14 }
0x107f   :  { %8167 = vmatmul.f32.vlgmr.msrb.gmra.mxu2 %v7632_v35  ;;  %8183 = vmatpush.msrb.mxu3 %v7862_v29  ;;  %v7375_v39 = vpop.f32.mrf.mxu0 }
0x1080   :  { %8202 = vmatpush.msrb.mxu0 %v7879_v33 }
0x1081   :  { %8184 = vmatpush.msrb.mxu3 %v7861_v36  ;;  %v7351_v50 = vpop.f32.mrf.mxu2 }
0x1082   :  { %8203 = vmatpush.msrb.mxu0 %v7878_v28 }
0x1083   :  { %8185 = vmatpush.msrb.mxu3 %v7860_v37  ;;  %v7362_v57 = vpop.f32.mrf.mxu3 }
0x1084   :  { %8204 = vmatpush.msrb.mxu0 %v7877_v3  ;;  %v7363_v46 = vadd.f32 %v7362_v57, %v7350_v63 }
0x1085   :  { %8186 = vmatpush.msrb.mxu3 %v7859_v49 }
0x1086   :  { %8205 = vmatpush.msrb.mxu0 %v7876_v44  ;;  %8187 = vmatmul.f32.vlgmr.msrb.gmra.mxu3 %v7633_v25  ;;  %v21567_v59 = vadd.f32 %v7375_v39, %v7363_v46 }
0x1087   :  { %v7377_v48 = vpop.f32.mrf.mxu0 }
0x1088   :  { %8206 = vmatpush.msrb.mxu0 %v7875_v20  ;;  %v7484_v60 = vsel %vm616_vm0, %v21567_v59, 0.0  ;;  %v7506_v58 = vmul.f32 %v21567_v59, %v21567_v59 }
0x1089   :  { %v7485_v30 = vrot.slane %v7484_v60, 4 }
0x108a   :  { %v7612_v41 = vsel %vm616_vm0, %v7506_v58, 0.0 }
0x108b   :  { %v7486_v1 = vadd.f32 %v7485_v30, %v7484_v60  ;;  %v7613_v0 = vrot.slane %v7612_v41, 4  ;;  %v7364_v43 = vpop.f32.mrf.mxu3 }
0x108c   :  { %v8242_v43 = vld [vmem:[#allocation7 + $0x908] sm:$0xff] }
0x108d   :  { %v7487_v19 = vrot.slane %v7486_v1, 2  ;;  %v7614_v55 = vadd.f32 %v7613_v0, %v7612_v41  ;;  %v8241_v0 = vld [vmem:[#allocation7 + $0x900] sm:$0xff]  ;;  %8295 = vmatpush.msra.mxu2 %v8242_v43 }
0x108e   :  { %8275 = vmatpush.msrb.mxu1 %v8241_v0  ;;  %v15510_v0 = vld [vmem:[#allocation6 + $0xe4] sm:$0xf0]  ;;  %v13889_v43 = vld [vmem:[#allocation6 + $0x160] sm:$0xf] }
0x108f   :  { %v7488_v52 = vadd.f32 %v7487_v19, %v7486_v1  ;;  %v7615_v6 = vrot.slane %v7614_v55, 2  ;;  %v8243_v19 = vld [vmem:[#allocation7 + $0x910] sm:$0xff] }
0x1090   :  { %8315 = vmatpush.msra.mxu3 %v8243_v19  ;;  %v15526_v19 = vld [vmem:[#allocation6 + $0x164] sm:$0xf0] }
0x1091   :  { %v7489_v13 = vrot.slane %v7488_v52, 1  ;;  %v7616_v7 = vadd.f32 %v7615_v6, %v7614_v55  ;;  %v8244_v55 = vld [vmem:[#allocation7 + $0x918] sm:$0xff]  ;;  %v8245_v6 = vld [vmem:[#allocation7 + $0x920] sm:$0xff] }
0x1092   :  { %8335 = vmatpush.msra.mxu0 %v8244_v55  ;;  %8355 = vmatpush.msra.mxu1 %v8245_v6  ;;  %v13753_v6 = vld [vmem:[#allocation6 + $0x50] sm:$0xf] }
0x1093   :  { %v7617_v15 = vrot.slane %v7616_v7, 1  ;;  %v7490_v12 = vadd.f32 %v7489_v13, %v7488_v52  ;;  %v8246_v13 = vld [vmem:[#allocation7 + $0x928] sm:$0xff] }
0x1094   :  { %8375 = vmatpush.msrb.mxu2 %v8246_v13  ;;  %v15492_v13 = vld [vmem:[#allocation6 + $0x54] sm:$0xf0] }
0x1095   :  { %v7618_v10 = vadd.f32 %v7617_v15, %v7616_v7  ;;  %v7908_v18 = vpop.f32.mrf.mxu1  ;;  %v8247_v7 = vld [vmem:[#allocation7 + $0x930] sm:$0xff]  ;;  %v8248_v15 = vld [vmem:[#allocation7 + $0x938] sm:$0xff] }
0x1096   :  { %8395 = vmatpush.msrb.mxu3 %v8247_v7  ;;  %v13945_v7 = vld [vmem:[#allocation6 + $0x1d0] sm:$0xf] }
0x1097   :  { %v7634_v17 = vsel %vm677_vm1, %v7490_v12, %v7618_v10 }
0x1098   :  { %8207 = vmatmul.f32.vlgmr.msrb.gmra.mxu0 %v7634_v17 }
0x1099   :  { %8415 = vmatpush.msrb.mxu0 %v8248_v15  ;;  %v15540_v15 = vld [vmem:[#allocation6 + $0x1d4] sm:$0xf0] }
0x109d   :  { %v7928_v22 = vpop.f32.mrf.mxu2 }
0x109e   :  { %v7929_v56 = vadd.f32 %v7928_v22, %v7908_v18 }
0x10a0   :  { %v7968_v53 = vpop.f32.mrf.mxu0 }
0x10a3   :  { %v7948_v61 = vpop.f32.mrf.mxu3 }
0x10a4   :  { %v7949_v34 = vadd.f32 %v7948_v61, %v7929_v56  ;;  %v8218_v56 = vld [vmem:[%s21779_s12 + $0xe] sm:$0x3] }
0x10a6   :  { %v7969_v5 = vadd.f32 %v7968_v53, %v7949_v34 }
0x10b8   :  { %v7988_v32 = vpop.f32.mrf.mxu1 }
0x10b9   :  { %v7989_v26 = vadd.f32 %v7988_v32, %v7969_v5 }
0x10bf   :  { %v8008_v29 = vpop.f32.mrf.mxu2 }
0x10c0   :  { %v8009_v31 = vadd.f32 %v8008_v29, %v7989_v26 }
0x10c2   :  { %v8048_v35 = vpop.f32.mrf.mxu0 }
0x10c5   :  { %v8028_v33 = vpop.f32.mrf.mxu3 }
0x10c6   :  { %v8029_v14 = vadd.f32 %v8028_v33, %v8009_v31  ;;  %v8249_v31 = vld [vmem:[#allocation7 + $0x940] sm:$0xff] }
0x10c8   :  { %v8049_v9 = vadd.f32 %v8048_v35, %v8029_v14  ;;  %v8250_v14 = vld [vmem:[#allocation7 + $0x948] sm:$0xff]  ;;  %v8251_v35 = vld [vmem:[#allocation7 + $0x950] sm:$0xff] }
0x10da   :  { %v8068_v36 = vpop.f32.mrf.mxu1 }
0x10db   :  { %v8069_v54 = vadd.f32 %v8068_v36, %v8049_v9  ;;  %v8252_v36 = vld [vmem:[#allocation7 + $0x958] sm:$0xff]  ;;  %v8253_v9 = vld [vmem:[#allocation7 + $0x960] sm:$0xff] }
0x10e1   :  { %v8088_v28 = vpop.f32.mrf.mxu2 }
0x10e2   :  { %v8089_v39 = vadd.f32 %v8088_v28, %v8069_v54  ;;  %v8254_v28 = vld [vmem:[#allocation7 + $0x968] sm:$0xff]  ;;  %v8255_v54 = vld [vmem:[#allocation7 + $0x970] sm:$0xff] }
0x10e4   :  { %v8128_v40 = vpop.f32.mrf.mxu0 }
0x10e7   :  { %v8108_v37 = vpop.f32.mrf.mxu3 }
0x10e8   :  { %v8109_v3 = vadd.f32 %v8108_v37, %v8089_v39  ;;  %v8256_v37 = vld [vmem:[#allocation7 + $0x978] sm:$0xff]  ;;  %v13769_v39 = vld [vmem:[#allocation6 + $0x70] sm:$0xf] }
0x10ea   :  { %v8129_v63 = vadd.f32 %v8128_v40, %v8109_v3  ;;  %v15496_v3 = vld [vmem:[#allocation6 + $0x74] sm:$0xf0]  ;;  %v13961_v40 = vld [vmem:[#allocation6 + $0x1f0] sm:$0xf] }
0x10fb   :  { %v8148_v49 = vpop.f32.mrf.mxu1 }
0x10fc   :  { %v8149_v25 = vadd.f32 %v8148_v49, %v8129_v63  ;;  %v15544_v49 = vld [vmem:[#allocation6 + $0x1f4] sm:$0xf0]  ;;  %v13833_v63 = vld [vmem:[#allocation6 + $0xf0] sm:$0xf] }
0x1102   :  { %v8168_v44 = vpop.f32.mrf.mxu2 }
0x1103   :  { %v8169_v46 = vadd.f32 %v8168_v44, %v8149_v25  ;;  %v15512_v44 = vld [vmem:[#allocation6 + $0xf4] sm:$0xf0]  ;;  %v13897_v25 = vld [vmem:[#allocation6 + $0x170] sm:$0xf] }
0x1109   :  { %v8188_v57 = vpop.f32.mrf.mxu3 }
0x110a   :  { %v8189_v50 = vadd.f32 %v8188_v57, %v8169_v46  ;;  %v15528_v57 = vld [vmem:[#allocation6 + $0x174] sm:$0xf0]  ;;  %v13770_v46 = vor.u32 %v15496_v3, %v13769_v39  ;;  %v13929_v3 = vld [vmem:[#allocation6 + $0x1b0] sm:$0xf] }
0x110b   :  { %v15488_v39 = vld [vmem:[#allocation6 + $0x34] sm:$0xf0] }
0x1115   :  { %v8208_v20 = vpop.f32.mrf.mxu0 }
0x1116   :  { %v8209_v60 = vadd.f32 %v8208_v20, %v8189_v50  ;;  %v13962_v50 = vor.u32 %v15544_v49, %v13961_v40  ;;  %v13761_v20 = vld [vmem:[#allocation6 + $0x60] sm:$0xf]  ;;  %v15536_v40 = vld [vmem:[#allocation6 + $0x1b4] sm:$0xf0] }
0x1118   :  { %v8211_v58 = vmul.f32 0.001953125, %v8209_v60  ;;  %v15494_v60 = vld [vmem:[#allocation6 + $0x64] sm:$0xf0] }
0x1119   :  { %v13762_v55 = vor.u32 %v15494_v60, %v13761_v20  ;;  %v13729_v20 = vld [vmem:[#allocation6 + $0x20] sm:$0xf]  ;;  %v15486_v60 = vld [vmem:[#allocation6 + $0x24] sm:$0xf0] }
0x111a   :  { %v8212_v48 = vmul.f32 %v8211_v58, %v8211_v58 }
0x111c   :  { %v8214_v30 = vrot.slane %v8212_v48, 7  ;;  %v15542_v48 = vld [vmem:[#allocation6 + $0x1e4] sm:$0xf0] }
0x111e   :  { %v8216_v41 = vsub.f32 %v8211_v58, %v8214_v30  ;;  %v13834_v30 = vor.u32 %v15512_v44, %v13833_v63  ;;  %v13801_v44 = vld [vmem:[#allocation6 + $0xb0] sm:$0xf] }
0x1120   :  { %v8217_v1 = vmax.f32 %v8216_v41, 0.0  ;;  %v13898_v41 = vor.u32 %v15528_v57, %v13897_v25  ;;  %v15504_v25 = vld [vmem:[#allocation6 + $0xb4] sm:$0xf0]  ;;  %v13865_v57 = vld [vmem:[#allocation6 + $0x130] sm:$0xf] }
0x1122   :  { %v8219_v52 = vadd.f32 1e-05, %v8217_v1  ;;  %v13825_v1 = vld [vmem:[#allocation6 + $0xe0] sm:$0xf] }
0x1124   :  { %15765 = vrsqrt.f32 %v8219_v52  ;;  %vm8226_vm7 = vweird.f32 %v8219_v52 }
0x112a   :  { %v15766_v12 = vpop.eup %15765 }
0x112b   :  { %v8221_v10 = vmul.f32 %v15766_v12, %v8219_v52  ;;  %vm8227_vm6 = vweird.f32 %v15766_v12 }
0x112c   :  { %vm8228_vm8 = vmor %vm8226_vm7, %vm8227_vm6 }
0x112d   :  { %v8222_v17 = vmul.f32 %v15766_v12, %v8221_v10  ;;  %v13890_v10 = vor.u32 %v15526_v19, %v13889_v43  ;;  %v13857_v43 = vld [vmem:[#allocation6 + $0x120] sm:$0xf]  ;;  %v15518_v19 = vld [vmem:[#allocation6 + $0x124] sm:$0xf0] }
0x112f   :  { %v8223_v18 = vmul.f32 0.5, %v8222_v17  ;;  %v13817_v17 = vld [vmem:[#allocation6 + $0xd0] sm:$0xf] }
0x1131   :  { %v8224_v22 = vsub.f32 1.5, %v8223_v18  ;;  %v15508_v18 = vld [vmem:[#allocation6 + $0xd4] sm:$0xf0] }
0x1133   :  { %v8225_v61 = vmul.f32 %v15766_v12, %v8224_v22  ;;  %v13881_v22 = vld [vmem:[#allocation6 + $0x150] sm:$0xf] }
0x1135   :  { %v8229_v34 = vsel %vm8228_vm8, %v15766_v12, %v8225_v61  ;;  %v13826_v12 = vor.u32 %v15510_v0, %v13825_v1  ;;  %v15524_v61 = vld [vmem:[#allocation6 + $0x154] sm:$0xf0]  ;;  %v13793_v1 = vld [vmem:[#allocation6 + $0xa0] sm:$0xf]  ;;  %v15502_v0 = vld [vmem:[#allocation6 + $0xa4] sm:$0xf0] }
0x1136   :  { %v13694_v53 = vrot.slane %v8229_v34, 9  ;;  %v13946_v34 = vor.u32 %v15540_v15, %v13945_v7  ;;  %v13913_v7 = vld [vmem:[#allocation6 + $0x190] sm:$0xf]  ;;  %v15532_v15 = vld [vmem:[#allocation6 + $0x194] sm:$0xf0] }
0x1138   :  { %v8234_v32 = vmul.f32 %v13694_v53, %v8218_v56  ;;  %v13745_v53 = vld [vmem:[#allocation6 + $0x40] sm:$0xf] }
0x113a   :  { %v8235_v5 = vmul.f32 %v8234_v32, %v8211_v58  ;;  %v13953_v58 = vld [vmem:[#allocation6 + $0x1e0] sm:$0xf] }
0x113b   :  { %v13954_v52 = vor.u32 %v15542_v48, %v13953_v58  ;;  %v13921_v58 = vld [vmem:[#allocation6 + $0x1a0] sm:$0xf]  ;;  %v15534_v48 = vld [vmem:[#allocation6 + $0x1a4] sm:$0xf0] }
0x113c   :  { %v8237_v29 = vrot.slane %v8235_v5, 7  ;;  %v13937_v5 = vld [vmem:[#allocation6 + $0x1c0] sm:$0xf] }
0x113e   :  { %v8239_v26 = vsub.f32 %v8218_v56, %v8237_v29  ;;  %v13754_v56 = vor.u32 %v15492_v13, %v13753_v6  ;;  %v15538_v29 = vld [vmem:[#allocation6 + $0x1c4] sm:$0xf0]  ;;  %v13721_v6 = vld [vmem:[#allocation6 + $0x10] sm:$0xf]  ;;  %v15484_v13 = vld [vmem:[#allocation6 + $0x14] sm:$0xf0] }
0x1140   :  { %v21579_v33 = vsel %vm677_vm1, %v8234_v32, %v8239_v26  ;;  %v15490_v32 = vld [vmem:[#allocation6 + $0x44] sm:$0xf0]  ;;  %v13818_v26 = vor.u32 %v15508_v18, %v13817_v17  ;;  %v13785_v17 = vld [vmem:[#allocation6 + $0x90] sm:$0xf]  ;;  %v15500_v18 = vld [vmem:[#allocation6 + $0x94] sm:$0xf0] }
0x1141   :  { %13695 = vmatmul.msk.f32.vlgmr.msrb.gmra.mxu1 %vm860_vm5, %v21579_v33  ;;  %13696 = vmatmul.msk.f32.vlgmr.msra.gmra.mxu2 %vm860_vm5, %v21579_v33 }
0x1142   :  { %13697 = vmatmul.msk.f32.vlgmr.msra.gmra.mxu3 %vm860_vm5, %v21579_v33  ;;  %13698 = vmatmul.msk.f32.vlgmr.msra.gmra.mxu0 %vm860_vm5, %v21579_v33 }
0x1143   :  { %8435 = vmatpush.msrb.mxu1 %v8249_v31  ;;  %8455 = vmatpush.msra.mxu2 %v8250_v14  ;;  %v13882_v31 = vor.u32 %v15524_v61, %v13881_v22  ;;  %v13809_v14 = vld [vmem:[#allocation6 + $0xc0] sm:$0xf]  ;;  %v13849_v22 = vld [vmem:[#allocation6 + $0x110] sm:$0xf]  ;;  %v15516_v61 = vld [vmem:[#allocation6 + $0x114] sm:$0xf0] }
0x1144   :  { %8475 = vmatpush.msra.mxu3 %v8251_v35  ;;  %8495 = vmatpush.msra.mxu0 %v8252_v36  ;;  %v15506_v35 = vld [vmem:[#allocation6 + $0xc4] sm:$0xf0]  ;;  %v13873_v36 = vld [vmem:[#allocation6 + $0x140] sm:$0xf] }
0x1145   :  { %v13810_v49 = vor.u32 %v15506_v35, %v13809_v14  ;;  %v14217_v14 = vld [vmem:[#allocation6 + $0x3f0] sm:$0xf]  ;;  %v13786_v35 = vor.u32 %v15500_v18, %v13785_v17  ;;  %v15572_v18 = vld [vmem:[#allocation6 + $0x2d4] sm:$0xf0] }
0x1146   :  { %v14073_v17 = vld [vmem:[#allocation6 + $0x2d0] sm:$0xf] }
0x1149   :  { %13699 = vmatmul.msk.f32.vlgmr.msra.gmra.mxu1 %vm860_vm5, %v21579_v33  ;;  %13700 = vmatmul.msk.f32.vlgmr.msrb.gmra.mxu2 %vm860_vm5, %v21579_v33 }
0x114a   :  { %13701 = vmatmul.msk.f32.vlgmr.msrb.gmra.mxu3 %vm860_vm5, %v21579_v33  ;;  %13702 = vmatmul.msk.f32.vlgmr.msrb.gmra.mxu0 %vm860_vm5, %v21579_v33 }
0x114b   :  { %8515 = vmatpush.msra.mxu1 %v8253_v9  ;;  %8535 = vmatpush.msrb.mxu2 %v8254_v28  ;;  %v15522_v9 = vld [vmem:[#allocation6 + $0x144] sm:$0xf0]  ;;  %v13746_v28 = vor.u32 %v15490_v32, %v13745_v53  ;;  %v13914_v53 = vor.u32 %v15532_v15, %v13913_v7  ;;  %v14201_v7 = vld [vmem:[#allocation6 + $0x3d0] sm:$0xf]  ;;  %v15604_v15 = vld [vmem:[#allocation6 + $0x3d4] sm:$0xf0] }
0x114c   :  { %8555 = vmatpush.msrb.mxu3 %v8255_v54  ;;  %8575 = vmatpush.msrb.mxu0 %v8256_v37  ;;  %v13938_v54 = vor.u32 %v15538_v29, %v13937_v5  ;;  %v13737_v37 = vld [vmem:[#allocation6 + $0x30] sm:$0xf]  ;;  %v13874_v63 = vor.u32 %v15522_v9, %v13873_v36  ;;  %v15482_v32 = vld [vmem:[#allocation6 + $0x4] sm:$0xf0]  ;;  %v13905_v5 = vld [vmem:[#allocation6 + $0x180] sm:$0xf]  ;;  %v13850_v36 = vor.u32 %v15516_v61, %v13849_v22 }
0x114d   :  { %v15530_v29 = vld [vmem:[#allocation6 + $0x184] sm:$0xf0]  ;;  %v15608_v9 = vld [vmem:[#allocation6 + $0x3f4] sm:$0xf0]  ;;  %v14137_v22 = vld [vmem:[#allocation6 + $0x350] sm:$0xf] }
0x114e   :  { %v15588_v61 = vld [vmem:[#allocation6 + $0x354] sm:$0xf0] }
0x1151   :  { %13703 = vmatmul.msk.f32.vlgmr.msrb.gmra.mxu1 %vm860_vm5, %v21579_v33  ;;  %13704 = vmatmul.msk.f32.vlgmr.msra.gmra.mxu2 %vm860_vm5, %v21579_v33 }
0x1152   :  { %13705 = vmatmul.msk.f32.vlgmr.msra.gmra.mxu3 %vm860_vm5, %v21579_v33  ;;  %13706 = vmatmul.msk.f32.vlgmr.msra.gmra.mxu0 %vm860_vm5, %v21579_v33 }
0x1153   :  { %10250 = vmatpush.bf16.msrb.mxu1 %v13770_v46  ;;  %10289 = vmatpush.bf16.msra.mxu0 %v13962_v50  ;;  %v15520_v46 = vld [vmem:[#allocation6 + $0x134] sm:$0xf0]  ;;  %v13738_v50 = vor.u32 %v15488_v39, %v13737_v37  ;;  %v13841_v37 = vld [vmem:[#allocation6 + $0x100] sm:$0xf]  ;;  %v15514_v39 = vld [vmem:[#allocation6 + $0x104] sm:$0xf0] }
0x1154   :  { %10263 = vmatpush.bf16.msra.mxu2 %v13834_v30  ;;  %10276 = vmatpush.bf16.msra.mxu3 %v13898_v41  ;;  %v13802_v30 = vor.u32 %v15504_v25, %v13801_v44  ;;  %v13866_v41 = vor.u32 %v15520_v46, %v13865_v57  ;;  %v14153_v44 = vld [vmem:[#allocation6 + $0x370] sm:$0xf]  ;;  %v15592_v25 = vld [vmem:[#allocation6 + $0x374] sm:$0xf0]  ;;  %v14218_v46 = vor.u32 %v15608_v9, %v14217_v14 }
0x1155   :  { %v15552_v9 = vld [vmem:[#allocation6 + $0x234] sm:$0xf0] }
0x1157   :  { %10251 = vmatpush.bf16.msrb.mxu1 %v13762_v55  ;;  %10290 = vmatpush.bf16.msra.mxu0 %v13954_v52  ;;  %v13730_v55 = vor.u32 %v15486_v60, %v13729_v20  ;;  %v13922_v52 = vor.u32 %v15534_v48, %v13921_v58  ;;  %v14209_v20 = vld [vmem:[#allocation6 + $0x3e0] sm:$0xf]  ;;  %v15606_v60 = vld [vmem:[#allocation6 + $0x3e4] sm:$0xf0]  ;;  %v13842_v48 = vor.u32 %v15514_v39, %v13841_v37 }
0x1158   :  { %10264 = vmatpush.bf16.msra.mxu2 %v13826_v12  ;;  %10277 = vmatpush.bf16.msra.mxu3 %v13890_v10  ;;  %v13794_v12 = vor.u32 %v15502_v0, %v13793_v1  ;;  %v13858_v10 = vor.u32 %v15518_v19, %v13857_v43  ;;  %v14081_v1 = vld [vmem:[#allocation6 + $0x2e0] sm:$0xf]  ;;  %v15574_v0 = vld [vmem:[#allocation6 + $0x2e4] sm:$0xf0] }
0x1159   :  { %13707 = vmatmul.msk.f32.vlgmr.msra.gmra.mxu1 %vm860_vm5, %v21579_v33  ;;  %13708 = vmatmul.msk.f32.vlgmr.msrb.gmra.mxu2 %vm860_vm5, %v21579_v33  ;;  %v14145_v43 = vld [vmem:[#allocation6 + $0x360] sm:$0xf]  ;;  %v15590_v19 = vld [vmem:[#allocation6 + $0x364] sm:$0xf0] }
0x115a   :  { %13709 = vmatmul.msk.f32.vlgmr.msrb.gmra.mxu3 %vm860_vm5, %v21579_v33  ;;  %13710 = vmatmul.msk.f32.vlgmr.msrb.gmra.mxu0 %vm860_vm5, %v21579_v33  ;;  %v13930_v33 = vor.u32 %v15536_v40, %v13929_v3  ;;  %v14089_v3 = vld [vmem:[#allocation6 + $0x2f0] sm:$0xf] }
0x115b   :  { %10252 = vmatpush.bf16.msrb.mxu1 %v13754_v56  ;;  %10291 = vmatpush.bf16.msra.mxu0 %v13946_v34  ;;  %v13713_v56 = vld [vmem:[#allocation6] sm:$0xf]  ;;  %v13722_v34 = vor.u32 %v15484_v13, %v13721_v6  ;;  %v14009_v6 = vld [vmem:[#allocation6 + $0x250] sm:$0xf]  ;;  %v15556_v13 = vld [vmem:[#allocation6 + $0x254] sm:$0xf0] }
0x115c   :  { %10265 = vmatpush.bf16.msra.mxu2 %v13818_v26  ;;  %10278 = vmatpush.bf16.msra.mxu3 %v13882_v31  ;;  %v14025_v26 = vld [vmem:[#allocation6 + $0x270] sm:$0xf]  ;;  %v15560_v31 = vld [vmem:[#allocation6 + $0x274] sm:$0xf0]  ;;  %v13714_v40 = vor.u32 %v15482_v32, %v13713_v56  ;;  %v14010_v56 = vor.u32 %v15556_v13, %v14009_v6  ;;  %v15554_v32 = vld [vmem:[#allocation6 + $0x244] sm:$0xf0] }
0x115d   :  { %v14026_v57 = vor.u32 %v15560_v31, %v14025_v26  ;;  %v14074_v26 = vor.u32 %v15572_v18, %v14073_v17  ;;  %v14138_v31 = vor.u32 %v15588_v61, %v14137_v22  ;;  %v15596_v6 = vld [vmem:[#allocation6 + $0x394] sm:$0xf0]  ;;  %v15582_v17 = vld [vmem:[#allocation6 + $0x324] sm:$0xf0]  ;;  %v13969_v22 = vld [vmem:[#allocation6 + $0x200] sm:$0xf] }
0x115e   :  { %v15546_v61 = vld [vmem:[#allocation6 + $0x204] sm:$0xf0] }
0x115f   :  { %10253 = vmatpush.bf16.msrb.mxu1 %v13746_v28  ;;  %10292 = vmatpush.bf16.msra.mxu0 %v13938_v54  ;;  %v13777_v28 = vld [vmem:[#allocation6 + $0x80] sm:$0xf]  ;;  %v15498_v54 = vld [vmem:[#allocation6 + $0x84] sm:$0xf0] }
0x1160   :  { %10266 = vmatpush.bf16.msra.mxu2 %v13810_v49  ;;  %10279 = vmatpush.bf16.msra.mxu3 %v13874_v63  ;;  %v13906_v49 = vor.u32 %v15530_v29, %v13905_v5  ;;  %v15576_v63 = vld [vmem:[#allocation6 + $0x2f4] sm:$0xf0]  ;;  %v13778_v58 = vor.u32 %v15498_v54, %v13777_v28  ;;  %v14193_v5 = vld [vmem:[#allocation6 + $0x3c0] sm:$0xf]  ;;  %v15602_v29 = vld [vmem:[#allocation6 + $0x3c4] sm:$0xf0] }
0x1161   :  { %v14185_v28 = vld [vmem:[#allocation6 + $0x3b0] sm:$0xf]  ;;  %v15600_v54 = vld [vmem:[#allocation6 + $0x3b4] sm:$0xf0] }
0x1162   :  { %v14186_v39 = vor.u32 %v15600_v54, %v14185_v28  ;;  %v14097_v54 = vld [vmem:[#allocation6 + $0x300] sm:$0xf] }
0x1163   :  { %10254 = vmatpush.bf16.msrb.mxu1 %v13738_v50  ;;  %10293 = vmatpush.bf16.msra.mxu0 %v13930_v33  ;;  %v14017_v50 = vld [vmem:[#allocation6 + $0x260] sm:$0xf]  ;;  %v15558_v33 = vld [vmem:[#allocation6 + $0x264] sm:$0xf0] }
0x1164   :  { %10267 = vmatpush.bf16.msra.mxu2 %v13802_v30  ;;  %10280 = vmatpush.bf16.msra.mxu3 %v13866_v41  ;;  %v14090_v30 = vor.u32 %v15576_v63, %v14089_v3  ;;  %v14154_v41 = vor.u32 %v15592_v25, %v14153_v44  ;;  %v14065_v3 = vld [vmem:[#allocation6 + $0x2c0] sm:$0xf]  ;;  %v15586_v44 = vld [vmem:[#allocation6 + $0x344] sm:$0xf0] }
0x1167   :  { %10255 = vmatpush.bf16.msrb.mxu1 %v13730_v55  ;;  %10294 = vmatpush.bf16.msra.mxu0 %v13922_v52  ;;  %v14018_v55 = vor.u32 %v15558_v33, %v14017_v50  ;;  %v14210_v52 = vor.u32 %v15606_v60, %v14209_v20  ;;  %v14177_v50 = vld [vmem:[#allocation6 + $0x3a0] sm:$0xf]  ;;  %v15598_v20 = vld [vmem:[#allocation6 + $0x3a4] sm:$0xf0]  ;;  %v14057_v60 = vld [vmem:[#allocation6 + $0x2b0] sm:$0xf] }
0x1168   :  { %10268 = vmatpush.bf16.msra.mxu2 %v13794_v12  ;;  %10281 = vmatpush.bf16.msra.mxu3 %v13858_v10  ;;  %v14082_v12 = vor.u32 %v15574_v0, %v14081_v1  ;;  %v14146_v10 = vor.u32 %v15590_v19, %v14145_v43  ;;  %v15584_v1 = vld [vmem:[#allocation6 + $0x334] sm:$0xf0]  ;;  %v13977_v43 = vld [vmem:[#allocation6 + $0x210] sm:$0xf] }
0x1169   :  { %v15548_v19 = vld [vmem:[#allocation6 + $0x214] sm:$0xf0] }
0x116b   :  { %10256 = vmatpush.bf16.msrb.mxu1 %v13722_v34  ;;  %10295 = vmatpush.bf16.msra.mxu0 %v13914_v53  ;;  %v14202_v34 = vor.u32 %v15604_v15, %v14201_v7  ;;  %v14001_v53 = vld [vmem:[#allocation6 + $0x240] sm:$0xf]  ;;  %v15566_v15 = vld [vmem:[#allocation6 + $0x2a4] sm:$0xf0] }
0x116c   :  { %10269 = vmatpush.bf16.msra.mxu2 %v13786_v35  ;;  %10282 = vmatpush.bf16.msra.mxu3 %v13850_v36  ;;  %v14002_v14 = vor.u32 %v15554_v32, %v14001_v53  ;;  %v14194_v35 = vor.u32 %v15602_v29, %v14193_v5  ;;  %v13993_v36 = vld [vmem:[#allocation6 + $0x230] sm:$0xf]  ;;  %v14049_v7 = vld [vmem:[#allocation6 + $0x2a0] sm:$0xf]  ;;  %v15594_v53 = vld [vmem:[#allocation6 + $0x384] sm:$0xf0] }
0x116d   :  { %v13994_v37 = vor.u32 %v15552_v9, %v13993_v36  ;;  %v14041_v5 = vld [vmem:[#allocation6 + $0x290] sm:$0xf]  ;;  %v15564_v29 = vld [vmem:[#allocation6 + $0x294] sm:$0xf0]  ;;  %v14033_v36 = vld [vmem:[#allocation6 + $0x280] sm:$0xf] }
0x116e   :  { %v15562_v9 = vld [vmem:[#allocation6 + $0x284] sm:$0xf0] }
0x116f   :  { %10257 = vmatpush.bf16.msrb.mxu1 %v13714_v40  ;;  %10296 = vmatpush.bf16.msra.mxu0 %v13906_v49  ;;  %v15570_v40 = vld [vmem:[#allocation6 + $0x2c4] sm:$0xf0]  ;;  %v14129_v49 = vld [vmem:[#allocation6 + $0x340] sm:$0xf]  ;;  %v14034_v28 = vor.u32 %v15562_v9, %v14033_v36  ;;  %v15656_v36 = vld [vmem:[#allocation6 + $0x574] sm:$0xf0] }
0x1170   :  { %10270 = vmatpush.bf16.msra.mxu2 %v13778_v58  ;;  %10283 = vmatpush.bf16.msra.mxu3 %v13842_v48  ;;  %v14066_v63 = vor.u32 %v15570_v40, %v14065_v3  ;;  %v14130_v25 = vor.u32 %v15586_v44, %v14129_v49  ;;  %v15568_v58 = vld [vmem:[#allocation6 + $0x2b4] sm:$0xf0]  ;;  %v14178_v48 = vor.u32 %v15598_v20, %v14177_v50  ;;  %v14473_v20 = vld [vmem:[#allocation6 + $0x5f0] sm:$0xf] }
0x1171   :  { %v14265_v9 = vld [vmem:[#allocation6 + $0x450] sm:$0xf] }
0x1173   :  { %10302 = vmatpush.bf16.msra.mxu1 %v14026_v57  ;;  %10341 = vmatpush.bf16.msrb.mxu0 %v14218_v46  ;;  %v13985_v57 = vld [vmem:[#allocation6 + $0x220] sm:$0xf]  ;;  %v15550_v46 = vld [vmem:[#allocation6 + $0x224] sm:$0xf0] }
0x1174   :  { %10315 = vmatpush.bf16.msrb.mxu2 %v14090_v30  ;;  %10328 = vmatpush.bf16.msrb.mxu3 %v14154_v41  ;;  %v13986_v33 = vor.u32 %v15550_v46, %v13985_v57  ;;  %v14058_v30 = vor.u32 %v15568_v58, %v14057_v60  ;;  %v14121_v41 = vld [vmem:[#allocation6 + $0x330] sm:$0xf]  ;;  %v15624_v46 = vld [vmem:[#allocation6 + $0x474] sm:$0xf0] }
0x1175   :  { %v14122_v0 = vor.u32 %v15584_v1, %v14121_v41  ;;  %v14281_v57 = vld [vmem:[#allocation6 + $0x470] sm:$0xf]  ;;  %v15672_v60 = vld [vmem:[#allocation6 + $0x5f4] sm:$0xf0] }
0x1176   :  { %v14282_v41 = vor.u32 %v15624_v46, %v14281_v57  ;;  %v15668_v46 = vld [vmem:[#allocation6 + $0x5d4] sm:$0xf0] }
0x1177   :  { %10303 = vmatpush.bf16.msra.mxu1 %v14018_v55  ;;  %10342 = vmatpush.bf16.msrb.mxu0 %v14210_v52  ;;  %v14169_v55 = vld [vmem:[#allocation6 + $0x390] sm:$0xf]  ;;  %v13978_v52 = vor.u32 %v15548_v19, %v13977_v43  ;;  %v14474_v19 = vor.u32 %v15672_v60, %v14473_v20 }
0x1178   :  { %10316 = vmatpush.bf16.msrb.mxu2 %v14082_v12  ;;  %10329 = vmatpush.bf16.msrb.mxu3 %v14146_v10  ;;  %v14170_v13 = vor.u32 %v15596_v6, %v14169_v55  ;;  %v14113_v12 = vld [vmem:[#allocation6 + $0x320] sm:$0xf]  ;;  %v14050_v10 = vor.u32 %v15566_v15, %v14049_v7 }
0x1179   :  { %v14114_v18 = vor.u32 %v15582_v17, %v14113_v12 }
0x117b   :  { %10304 = vmatpush.bf16.msra.mxu1 %v14010_v56  ;;  %10343 = vmatpush.bf16.msrb.mxu0 %v14202_v34  ;;  %v14161_v56 = vld [vmem:[#allocation6 + $0x380] sm:$0xf]  ;;  %v13970_v34 = vor.u32 %v15546_v61, %v13969_v22 }
0x117c   :  { %10317 = vmatpush.bf16.msrb.mxu2 %v14074_v26  ;;  %10330 = vmatpush.bf16.msrb.mxu3 %v14138_v31  ;;  %v14162_v32 = vor.u32 %v15594_v53, %v14161_v56  ;;  %v14105_v26 = vld [vmem:[#allocation6 + $0x310] sm:$0xf]  ;;  %v15580_v31 = vld [vmem:[#allocation6 + $0x314] sm:$0xf0]  ;;  %v15622_v56 = vld [vmem:[#allocation6 + $0x464] sm:$0xf0] }
0x117f   :  { %10305 = vmatpush.bf16.msra.mxu1 %v14002_v14  ;;  %10344 = vmatpush.bf16.msrb.mxu0 %v14194_v35  ;;  %v14042_v14 = vor.u32 %v15564_v29, %v14041_v5  ;;  %v14106_v35 = vor.u32 %v15580_v31, %v14105_v26  ;;  %v15670_v29 = vld [vmem:[#allocation6 + $0x5e4] sm:$0xf0]  ;;  %v14345_v26 = vld [vmem:[#allocation6 + $0x4f0] sm:$0xf] }
0x1180   :  { %10318 = vmatpush.bf16.msrb.mxu2 %v14066_v63  ;;  %10331 = vmatpush.bf16.msrb.mxu3 %v14130_v25 }
0x1183   :  { %10306 = vmatpush.bf16.msra.mxu1 %v13994_v37  ;;  %10345 = vmatpush.bf16.msrb.mxu0 %v14186_v39  ;;  %v15578_v37 = vld [vmem:[#allocation6 + $0x304] sm:$0xf0] }
0x1184   :  { %10319 = vmatpush.bf16.msrb.mxu2 %v14058_v30  ;;  %10332 = vmatpush.bf16.msrb.mxu3 %v14122_v0  ;;  %v14098_v39 = vor.u32 %v15578_v37, %v14097_v54  ;;  %v15620_v37 = vld [vmem:[#allocation6 + $0x454] sm:$0xf0] }
0x1187   :  { %10307 = vmatpush.bf16.msra.mxu1 %v13986_v33  ;;  %10346 = vmatpush.bf16.msrb.mxu0 %v14178_v48 }
0x1188   :  { %10320 = vmatpush.bf16.msrb.mxu2 %v14050_v10  ;;  %10333 = vmatpush.bf16.msrb.mxu3 %v14114_v18  ;;  %v14273_v10 = vld [vmem:[#allocation6 + $0x460] sm:$0xf] }
0x1189   :  { %v14274_v54 = vor.u32 %v15622_v56, %v14273_v10 }
0x118b   :  { %10308 = vmatpush.bf16.msra.mxu1 %v13978_v52  ;;  %10347 = vmatpush.bf16.msrb.mxu0 %v14170_v13 }
0x118c   :  { %10321 = vmatpush.bf16.msrb.mxu2 %v14042_v14  ;;  %10334 = vmatpush.bf16.msrb.mxu3 %v14106_v35  ;;  %v14409_v35 = vld [vmem:[#allocation6 + $0x570] sm:$0xf] }
0x118f   :  { %10309 = vmatpush.bf16.msra.mxu1 %v13970_v34  ;;  %10348 = vmatpush.bf16.msrb.mxu0 %v14162_v32  ;;  %v14465_v34 = vld [vmem:[#allocation6 + $0x5e0] sm:$0xf] }
0x1190   :  { %10322 = vmatpush.bf16.msrb.mxu2 %v14034_v28  ;;  %10335 = vmatpush.bf16.msrb.mxu3 %v14098_v39 }
0x11be   :  { %v8277_v3 = vpop.f32.mrf.mxu1 }
0x11bf   :  { %v8580_v40 = vperm.slane %v8277_v3, 0  ;;  %v8337_v49 = vpop.f32.mrf.mxu0  ;;  %v8612_v25 = vperm.slane %v8277_v3, 1 }
0x11c0   :  { %v8583_v63 = vperm.slane %v8337_v49, 0  ;;  %v8615_v33 = vperm.slane %v8337_v49, 1 }
0x11c1   :  { %v8596_v44 = vmul.f32 %v8580_v40, %v18806_v2  ;;  %v14466_v40 = vor.u32 %v15670_v29, %v14465_v34 }
0x11c2   :  { %v8599_v50 = vmul.f32 %v8583_v63, %v19213_v11 }
0x11c3   :  { %v8628_v58 = vadd.f32 %v8612_v25, %v8596_v44 }
0x11c4   :  { %v8631_v48 = vadd.f32 %v8615_v33, %v8599_v50  ;;  %v8297_v30 = vpop.f32.mrf.mxu2  ;;  %v14337_v50 = vld [vmem:[#allocation6 + $0x4e0] sm:$0xf] }
0x11c5   :  { %vm8644_vm1 = vcmp.ge.f32.partialorder %v8628_v58, 0.0  ;;  %v8660_v1 = vmul.f32 0.01, %v8628_v58  ;;  %v8581_v0 = vperm.slane %v8297_v30, 0  ;;  %v8317_v43 = vpop.f32.mrf.mxu3  ;;  %v8613_v2 = vperm.slane %v8297_v30, 1 }
0x11c6   :  { %vm8647_vm5 = vcmp.ge.f32.partialorder %v8631_v48, 0.0  ;;  %v8663_v55 = vmul.f32 0.01, %v8631_v48  ;;  %v8582_v52 = vperm.slane %v8317_v43, 0  ;;  %v8357_v6 = vpop.f32.mrf.mxu1  ;;  %v8614_v7 = vperm.slane %v8317_v43, 1 }
0x11c7   :  { %v8676_v13 = vsel %vm8644_vm1, %v8628_v58, %v8660_v1  ;;  %v8597_v11 = vmul.f32 %v8581_v0, %v18921_v21  ;;  %v8584_v15 = vperm.slane %v8357_v6, 0  ;;  %v8417_v12 = vpop.f32.mrf.mxu0  ;;  %v15640_v21 = vld [vmem:[#allocation6 + $0x4f4] sm:$0xf0]  ;;  %v8616_v28 = vperm.slane %v8357_v6, 1  ;;  %v14401_v30 = vld [vmem:[#allocation6 + $0x560] sm:$0xf] }
0x11c8   :  { %v21616_v17 = vpack.c.bf16 %v8676_v13, %v8676_v13  ;;  %v8679_v18 = vsel %vm8647_vm5, %v8631_v48, %v8663_v55  ;;  %v8598_v22 = vmul.f32 %v8582_v52, %v19033_v27  ;;  %v8587_v61 = vperm.slane %v8417_v12, 0  ;;  %v15638_v48 = vld [vmem:[#allocation6 + $0x4e4] sm:$0xf0] }
0x11c9   :  { %v21619_v53 = vpack.c.bf16 %v8679_v18, %v8679_v18  ;;  %v8629_v32 = vadd.f32 %v8613_v2, %v8597_v11  ;;  %v8600_v5 = vmul.f32 %v8584_v15, %v20862_v16  ;;  %v8619_v39 = vperm.slane %v8417_v12, 1  ;;  %v15618_v55 = vld [vmem:[#allocation6 + $0x444] sm:$0xf0]  ;;  %v14449_v2 = vld [vmem:[#allocation6 + $0x5c0] sm:$0xf] }
0x11ca   :  { %v8630_v31 = vadd.f32 %v8614_v7, %v8598_v22  ;;  %v8603_v14 = vmul.f32 %v8587_v61, %v20944_v4  ;;  %10258 = vmatmul.bf16.vlgmr.msrb.gmra.mxu1 %v21616_v17  ;;  %v14457_v4 = vld [vmem:[#allocation6 + $0x5d0] sm:$0xf]  ;;  %v14346_v57 = vor.u32 %v15640_v21, %v14345_v26  ;;  %v14410_v58 = vor.u32 %v15656_v36, %v14409_v35  ;;  %v15666_v13 = vld [vmem:[#allocation6 + $0x5c4] sm:$0xf0]  ;;  %v15652_v26 = vld [vmem:[#allocation6 + $0x554] sm:$0xf0] }
0x11cb   :  { %vm8645_vm9 = vcmp.ge.f32.partialorder %v8629_v32, 0.0  ;;  %v8661_v27 = vmul.f32 0.01, %v8629_v32  ;;  %10297 = vmatmul.bf16.vlgmr.msra.gmra.mxu0 %v21619_v53  ;;  %10354 = vmatpush.bf16.msrb.mxu1 %v14282_v41  ;;  %v8632_v63 = vadd.f32 %v8616_v28, %v8600_v5  ;;  %v15654_v41 = vld [vmem:[#allocation6 + $0x564] sm:$0xf0]  ;;  %v14266_v43 = vor.u32 %v15620_v37, %v14265_v9 }
0x11cc   :  { %vm8646_vm13 = vcmp.ge.f32.partialorder %v8630_v31, 0.0  ;;  %v8662_v16 = vmul.f32 0.01, %v8630_v31  ;;  %10393 = vmatpush.bf16.msra.mxu0 %v14474_v19  ;;  %v8377_v3 = vpop.f32.mrf.mxu2  ;;  %v8635_v60 = vadd.f32 %v8619_v39, %v8603_v14  ;;  %v14257_v19 = vld [vmem:[#allocation6 + $0x440] sm:$0xf]  ;;  %v14458_v6 = vor.u32 %v15668_v46, %v14457_v4 }
0x11cd   :  { %v8677_v49 = vsel %vm8645_vm9, %v8629_v32, %v8661_v27  ;;  %v8585_v44 = vperm.slane %v8377_v3, 0  ;;  %v8397_v25 = vpop.f32.mrf.mxu3  ;;  %v14329_v11 = vld [vmem:[#allocation6 + $0x4d0] sm:$0xf]  ;;  %v8664_v7 = vmul.f32 0.01, %v8632_v63  ;;  %v8617_v15 = vperm.slane %v8377_v3, 1 }
0x11ce   :  { %v21625_v33 = vpack.c.bf16 %v8677_v49, %v8677_v49  ;;  %v8678_v20 = vsel %vm8646_vm13, %v8630_v31, %v8662_v16  ;;  %v8586_v52 = vperm.slane %v8397_v25, 0  ;;  %v14338_v12 = vor.u32 %v15638_v48, %v14337_v50  ;;  %v21633_v56 = vpop.f32.mrf.mxu1  ;;  %v14393_v32 = vld [vmem:[#allocation6 + $0x550] sm:$0xf]  ;;  %v15616_v35 = vld [vmem:[#allocation6 + $0x434] sm:$0xf0] }
0x11cf   :  { %v21627_v1 = vpack.c.bf16 %v8678_v20, %v8678_v20  ;;  %v8601_v0 = vmul.f32 %v8585_v44, %v20865_v62  ;;  %10355 = vmatpush.bf16.msrb.mxu1 %v14274_v54  ;;  %v14402_v10 = vor.u32 %v15654_v41, %v14401_v30  ;;  %v15636_v62 = vld [vmem:[#allocation6 + $0x4d4] sm:$0xf0]  ;;  %vm8648_vm10 = vcmp.ge.f32.partialorder %v8632_v63, 0.0  ;;  %v21635_v34 = vpop.f32.mrf.mxu0  ;;  %v14249_v21 = vld [vmem:[#allocation6 + $0x430] sm:$0xf] }
0x11d0   :  { %10394 = vmatpush.bf16.msra.mxu0 %v14466_v40  ;;  %10271 = vmatmul.bf16.vlgmr.msra.gmra.mxu2 %v21625_v33  ;;  %v8667_v18 = vmul.f32 0.01, %v8635_v60  ;;  %v8602_v22 = vmul.f32 %v8586_v52, %v20919_v51  ;;  %v8618_v61 = vperm.slane %v8397_v25, 1  ;;  %vm8651_vm11 = vcmp.ge.f32.partialorder %v8635_v60, 0.0  ;;  %v14441_v36 = vld [vmem:[#allocation6 + $0x5b0] sm:$0xf] }
0x11d1   :  { %10284 = vmatmul.bf16.vlgmr.msra.gmra.mxu3 %v21627_v1  ;;  %10367 = vmatpush.bf16.msra.mxu2 %v14346_v57  ;;  %v8633_v5 = vadd.f32 %v8617_v15, %v8601_v0  ;;  %v14258_v29 = vor.u32 %v15618_v55, %v14257_v19  ;;  %v14450_v14 = vor.u32 %v15666_v13, %v14449_v2  ;;  %v15664_v9 = vld [vmem:[#allocation6 + $0x5b4] sm:$0xf0]  ;;  %v8588_v27 = vperm.slane %v21633_v56, 0  ;;  %v14321_v37 = vld [vmem:[#allocation6 + $0x4c0] sm:$0xf] }
0x11d2   :  { %10380 = vmatpush.bf16.msra.mxu3 %v14410_v58  ;;  %v8634_v31 = vadd.f32 %v8618_v61, %v8602_v22  ;;  %v8680_v51 = vsel %vm8648_vm10, %v8632_v63, %v8664_v7  ;;  %v8591_v28 = vperm.slane %v21635_v34, 0  ;;  %v14330_v54 = vor.u32 %v15636_v62, %v14329_v11  ;;  %v15634_v16 = vld [vmem:[#allocation6 + $0x4c4] sm:$0xf0]  ;;  %v14385_v40 = vld [vmem:[#allocation6 + $0x540] sm:$0xf] }
0x11d3   :  { %10356 = vmatpush.bf16.msrb.mxu1 %v14266_v43  ;;  %v8683_v39 = vsel %vm8651_vm11, %v8635_v60, %v8667_v18  ;;  %v14394_v3 = vor.u32 %v15652_v26, %v14393_v32  ;;  %v15650_v4 = vld [vmem:[#allocation6 + $0x544] sm:$0xf0]  ;;  %v14241_v49 = vld [vmem:[#allocation6 + $0x420] sm:$0xf]  ;;  %v8665_v44 = vmul.f32 0.01, %v8633_v5  ;;  %v14250_v63 = vor.u32 %v15616_v35, %v14249_v21 }
0x11d4   :  { %10395 = vmatpush.bf16.msra.mxu0 %v14458_v6  ;;  %v21641_v25 = vpop.f32.mrf.mxu2  ;;  %v14442_v57 = vor.u32 %v15664_v9, %v14441_v36  ;;  %v15614_v46 = vld [vmem:[#allocation6 + $0x424] sm:$0xf0]  ;;  %v14433_v50 = vld [vmem:[#allocation6 + $0x5a0] sm:$0xf]  ;;  %v21643_v20 = vpack.c.bf16 %v8680_v51, %v8680_v51  ;;  %vm8649_vm12 = vcmp.ge.f32.partialorder %v8633_v5, 0.0  ;;  %v14322_v48 = vor.u32 %v15634_v16, %v14321_v37 }
0x11d5   :  { %10368 = vmatpush.bf16.msra.mxu2 %v14338_v12  ;;  %v8666_v58 = vmul.f32 0.01, %v8634_v31  ;;  %v15662_v60 = vld [vmem:[#allocation6 + $0x5a4] sm:$0xf0]  ;;  %v21645_v30 = vpack.c.bf16 %v8683_v39, %v8683_v39  ;;  %vm8650_vm14 = vcmp.ge.f32.partialorder %v8634_v31, 0.0  ;;  %v8604_v41 = vmul.f32 %v8588_v27, %v20227_v47  ;;  %v21649_v43 = vpop.f32.mrf.mxu3 }
0x11d6   :  { %10381 = vmatpush.bf16.msra.mxu3 %v14402_v10  ;;  %v8607_v0 = vmul.f32 %v8591_v28, %v20805_v23  ;;  %v14313_v19 = vld [vmem:[#allocation6 + $0x4b0] sm:$0xf]  ;;  %v15632_v55 = vld [vmem:[#allocation6 + $0x4b4] sm:$0xf0]  ;;  %v8589_v2 = vperm.slane %v21641_v25, 0  ;;  %v14386_v52 = vor.u32 %v15650_v4, %v14385_v40  ;;  %v8681_v11 = vsel %vm8649_vm12, %v8633_v5, %v8665_v44 }
0x11d7   :  { %10357 = vmatpush.bf16.msrb.mxu1 %v14258_v29  ;;  %v14377_v6 = vld [vmem:[#allocation6 + $0x530] sm:$0xf]  ;;  %v15648_v13 = vld [vmem:[#allocation6 + $0x534] sm:$0xf0]  ;;  %v8620_v7 = vperm.slane %v21633_v56, 1  ;;  %v8623_v47 = vperm.slane %v21635_v34, 1  ;;  %v14242_v23 = vor.u32 %v15614_v46, %v14241_v49  ;;  %v8682_v10 = vsel %vm8650_vm14, %v8634_v31, %v8666_v58 }
0x11d8   :  { %10396 = vmatpush.bf16.msra.mxu0 %v14450_v14  ;;  %v14233_v15 = vld [vmem:[#allocation6 + $0x410] sm:$0xf]  ;;  %v15612_v12 = vld [vmem:[#allocation6 + $0x414] sm:$0xf0]  ;;  %v8590_v62 = vperm.slane %v21649_v43, 0  ;;  %v14434_v18 = vor.u32 %v15662_v60, %v14433_v50  ;;  %v14314_v56 = vor.u32 %v15632_v55, %v14313_v19  ;;  %v21659_v21 = vpack.c.bf16 %v8681_v11, %v8681_v11 }
0x11d9   :  { %10369 = vmatpush.bf16.msra.mxu2 %v14330_v54  ;;  %v14425_v22 = vld [vmem:[#allocation6 + $0x590] sm:$0xf]  ;;  %v15660_v61 = vld [vmem:[#allocation6 + $0x594] sm:$0xf0]  ;;  %v8636_v32 = vadd.f32 %v8620_v7, %v8604_v41  ;;  %v8639_v5 = vadd.f32 %v8623_v47, %v8607_v0  ;;  %v14305_v29 = vld [vmem:[#allocation6 + $0x4a0] sm:$0xf]  ;;  %v8605_v14 = vmul.f32 %v8589_v2, %v20425_v38  ;;  %v14378_v35 = vor.u32 %v15648_v13, %v14377_v6 }
0x11da   :  { %10382 = vmatpush.bf16.msra.mxu3 %v14394_v3  ;;  %10310 = vmatmul.bf16.vlgmr.msra.gmra.mxu1 %v21643_v20  ;;  %v15630_v34 = vld [vmem:[#allocation6 + $0x4a4] sm:$0xf0]  ;;  %v14369_v26 = vld [vmem:[#allocation6 + $0x520] sm:$0xf]  ;;  %v21662_v51 = vpack.c.bf16 %v8682_v10, %v8682_v10  ;;  %v14234_v27 = vor.u32 %v15612_v12, %v14233_v15  ;;  %v14537_v37 = vld [vmem:[#allocation6 + $0x670] sm:$0xf]  ;;  %v8606_v39 = vmul.f32 %v8590_v62, %v20617_v42 }
0x11db   :  { %10349 = vmatmul.bf16.vlgmr.msrb.gmra.mxu0 %v21645_v30  ;;  %10358 = vmatpush.bf16.msrb.mxu1 %v14250_v63  ;;  %v15646_v31 = vld [vmem:[#allocation6 + $0x524] sm:$0xf0]  ;;  %v14225_v36 = vld [vmem:[#allocation6 + $0x400] sm:$0xf]  ;;  %v8621_v16 = vperm.slane %v21641_v25, 1  ;;  %v14426_v38 = vor.u32 %v15660_v61, %v14425_v22  ;;  %vm8652_vm15 = vcmp.ge.f32.partialorder %v8636_v32, 0.0  ;;  %v14306_v44 = vor.u32 %v15630_v34, %v14305_v29 }
0x11dc   :  { %10397 = vmatpush.bf16.msra.mxu0 %v14442_v57  ;;  %v15610_v9 = vld [vmem:[#allocation6 + $0x404] sm:$0xf0]  ;;  %v14417_v28 = vld [vmem:[#allocation6 + $0x580] sm:$0xf]  ;;  %v15688_v3 = vld [vmem:[#allocation6 + $0x674] sm:$0xf0]  ;;  %v14370_v25 = vor.u32 %v15646_v31, %v14369_v26 }
0x11dd   :  { %10370 = vmatpush.bf16.msra.mxu2 %v14322_v48  ;;  %v15658_v54 = vld [vmem:[#allocation6 + $0x584] sm:$0xf0]  ;;  %v14729_v40 = vld [vmem:[#allocation6 + $0x7f0] sm:$0xf]  ;;  %v8668_v4 = vmul.f32 0.01, %v8636_v32  ;;  %v8637_v63 = vadd.f32 %v8621_v16, %v8605_v14  ;;  %v14226_v50 = vor.u32 %v15610_v9, %v14225_v36  ;;  %v14538_v19 = vor.u32 %v15688_v3, %v14537_v37  ;;  %v21675_v36 = vpop.f32.mrf.mxu1 }
0x11de   :  { %10383 = vmatpush.bf16.msra.mxu3 %v14386_v52  ;;  %v8671_v49 = vmul.f32 0.01, %v8639_v5  ;;  %vm8655_vm2 = vcmp.ge.f32.partialorder %v8639_v5, 0.0  ;;  %v8622_v57 = vperm.slane %v21649_v43, 1  ;;  %v15736_v42 = vld [vmem:[#allocation6 + $0x7f4] sm:$0xf0]  ;;  %v14418_v0 = vor.u32 %v15658_v54, %v14417_v28 }
0x11df   :  { %10359 = vmatpush.bf16.msrb.mxu1 %v14242_v23  ;;  %v14297_v46 = vld [vmem:[#allocation6 + $0x490] sm:$0xf]  ;;  %v15628_v58 = vld [vmem:[#allocation6 + $0x494] sm:$0xf0]  ;;  %v14529_v55 = vld [vmem:[#allocation6 + $0x660] sm:$0xf]  ;;  %v8684_v6 = vsel %vm8652_vm15, %v8636_v32, %v8668_v4  ;;  %v14730_v13 = vor.u32 %v15736_v42, %v14729_v40  ;;  %v8577_v40 = vpop.f32.mrf.mxu0 }
0x11e0   :  { %10398 = vmatpush.bf16.msra.mxu0 %v14434_v18  ;;  %10323 = vmatmul.bf16.vlgmr.msrb.gmra.mxu2 %v21659_v21  ;;  %v14361_v48 = vld [vmem:[#allocation6 + $0x510] sm:$0xf]  ;;  %v15644_v60 = vld [vmem:[#allocation6 + $0x514] sm:$0xf0]  ;;  %v8638_v41 = vadd.f32 %v8622_v57, %v8606_v39  ;;  %v15686_v2 = vld [vmem:[#allocation6 + $0x664] sm:$0xf0]  ;;  %v8687_v43 = vsel %vm8655_vm2, %v8639_v5, %v8671_v49  ;;  %v14298_v15 = vor.u32 %v15628_v58, %v14297_v46 }
0x11e1   :  { %10336 = vmatmul.bf16.vlgmr.msrb.gmra.mxu3 %v21662_v51  ;;  %10371 = vmatpush.bf16.msra.mxu2 %v14314_v56  ;;  %v14721_v52 = vld [vmem:[#allocation6 + $0x7e0] sm:$0xf]  ;;  %v15734_v11 = vld [vmem:[#allocation6 + $0x7e4] sm:$0xf0]  ;;  %vm8653_vm3 = vcmp.ge.f32.partialorder %v8637_v63, 0.0  ;;  %v14362_v12 = vor.u32 %v15644_v60, %v14361_v48  ;;  %v21671_v61 = vpack.c.bf16 %v8684_v6, %v8684_v6  ;;  %v14530_v5 = vor.u32 %v15686_v2, %v14529_v55 }
0x11e2   :  { %10384 = vmatpush.bf16.msra.mxu3 %v14378_v35  ;;  %v14289_v7 = vld [vmem:[#allocation6 + $0x480] sm:$0xf]  ;;  %v15626_v47 = vld [vmem:[#allocation6 + $0x484] sm:$0xf0]  ;;  %v8669_v23 = vmul.f32 0.01, %v8637_v63  ;;  %v21673_v34 = vpack.c.bf16 %v8687_v43, %v8687_v43  ;;  %v14722_v26 = vor.u32 %v15734_v11, %v14721_v52 }
0x11e3   :  { %10360 = vmatpush.bf16.msrb.mxu1 %v14234_v27  ;;  %v14353_v10 = vld [vmem:[#allocation6 + $0x500] sm:$0xf]  ;;  %v15642_v62 = vld [vmem:[#allocation6 + $0x504] sm:$0xf0]  ;;  %v14601_v18 = vld [vmem:[#allocation6 + $0x6f0] sm:$0xf]  ;;  %v14290_v14 = vor.u32 %v15626_v47, %v14289_v7 }
0x11e4   :  { %10399 = vmatpush.bf16.msra.mxu0 %v14426_v38  ;;  %v15704_v22 = vld [vmem:[#allocation6 + $0x6f4] sm:$0xf0]  ;;  %v8670_v32 = vmul.f32 0.01, %v8638_v41  ;;  %v14665_v56 = vld [vmem:[#allocation6 + $0x770] sm:$0xf]  ;;  %v14354_v9 = vor.u32 %v15642_v62, %v14353_v10  ;;  %v8685_v37 = vsel %vm8653_vm3, %v8637_v63, %v8669_v23 }
0x11e5   :  { %10372 = vmatpush.bf16.msra.mxu2 %v14306_v44  ;;  %v15720_v29 = vld [vmem:[#allocation6 + $0x774] sm:$0xf0]  ;;  %vm8654_vm4 = vcmp.ge.f32.partialorder %v8638_v41, 0.0  ;;  %v14521_v35 = vld [vmem:[#allocation6 + $0x650] sm:$0xf]  ;;  %v14602_v27 = vor.u32 %v15704_v22, %v14601_v18  ;;  %v8592_v57 = vperm.slane %v21675_v36, 0  ;;  %v21682_v63 = vpack.c.bf16 %v8685_v37, %v8685_v37 }
0x11e6   :  { %10385 = vmatpush.bf16.msra.mxu3 %v14370_v25  ;;  %v15684_v31 = vld [vmem:[#allocation6 + $0x654] sm:$0xf0]  ;;  %v14713_v28 = vld [vmem:[#allocation6 + $0x7d0] sm:$0xf]  ;;  %v14666_v16 = vor.u32 %v15720_v29, %v14665_v56  ;;  %v14593_v39 = vld [vmem:[#allocation6 + $0x6e0] sm:$0xf]  ;;  %v8686_v3 = vsel %vm8654_vm4, %v8638_v41, %v8670_v32 }
0x11e7   :  { %10361 = vmatpush.bf16.msrb.mxu1 %v14226_v50  ;;  %v15732_v54 = vld [vmem:[#allocation6 + $0x7d4] sm:$0xf0]  ;;  %v15702_v38 = vld [vmem:[#allocation6 + $0x6e4] sm:$0xf0]  ;;  %v14522_v4 = vor.u32 %v15684_v31, %v14521_v35  ;;  %v14657_v49 = vld [vmem:[#allocation6 + $0x760] sm:$0xf]  ;;  %v21684_v60 = vpack.c.bf16 %v8686_v3, %v8686_v3  ;;  %v8608_v43 = vmul.f32 %v8592_v57, %v21023_v24  ;;  %v21693_v35 = vpop.f32.mrf.mxu3 }
0x11e8   :  { %10400 = vmatpush.bf16.msra.mxu0 %v14418_v0  ;;  %v15718_v44 = vld [vmem:[#allocation6 + $0x764] sm:$0xf0]  ;;  %v14714_v25 = vor.u32 %v15732_v54, %v14713_v28  ;;  %v14513_v42 = vld [vmem:[#allocation6 + $0x640] sm:$0xf]  ;;  %v14594_v50 = vor.u32 %v15702_v38, %v14593_v39  ;;  %v8595_v41 = vperm.slane %v8577_v40, 0  ;;  %v8624_v10 = vperm.slane %v21675_v36, 1 }
0x11e9   :  { %10373 = vmatpush.bf16.msra.mxu2 %v14298_v15  ;;  %v15682_v46 = vld [vmem:[#allocation6 + $0x644] sm:$0xf0]  ;;  %v14705_v58 = vld [vmem:[#allocation6 + $0x7c0] sm:$0xf]  ;;  %v14658_v0 = vor.u32 %v15718_v44, %v14657_v49  ;;  %v15700_v55 = vld [vmem:[#allocation6 + $0x6d4] sm:$0xf0] }
0x11ea   :  { %10386 = vmatpush.bf16.msra.mxu3 %v14362_v12  ;;  %10362 = vmatmul.bf16.vlgmr.msrb.gmra.mxu1 %v21671_v61  ;;  %v15730_v48 = vld [vmem:[#allocation6 + $0x7c4] sm:$0xf0]  ;;  %v14514_v2 = vor.u32 %v15682_v46, %v14513_v42  ;;  %v14649_v52 = vld [vmem:[#allocation6 + $0x750] sm:$0xf]  ;;  %v15716_v6 = vld [vmem:[#allocation6 + $0x754] sm:$0xf0]  ;;  %v8611_v62 = vmul.f32 %v8595_v41, %v21567_v59 }
0x11eb   :  { %10406 = vmatpush.bf16.msra.mxu1 %v14538_v19  ;;  %10401 = vmatmul.bf16.vlgmr.msra.gmra.mxu0 %v21673_v34  ;;  %v14585_v19 = vld [vmem:[#allocation6 + $0x6d0] sm:$0xf]  ;;  %v14706_v11 = vor.u32 %v15730_v48, %v14705_v58  ;;  %v15680_v47 = vld [vmem:[#allocation6 + $0x634] sm:$0xf0]  ;;  %v14650_v18 = vor.u32 %v15716_v6, %v14649_v52  ;;  %v14577_v22 = vld [vmem:[#allocation6 + $0x6c0] sm:$0xf] }
0x11ec   :  { %10445 = vmatpush.bf16.msrb.mxu0 %v14730_v13  ;;  %v8537_v13 = vpop.f32.mrf.mxu2  ;;  %v14505_v7 = vld [vmem:[#allocation6 + $0x630] sm:$0xf]  ;;  %v14586_v23 = vor.u32 %v15700_v55, %v14585_v19  ;;  %v15728_v12 = vld [vmem:[#allocation6 + $0x7b4] sm:$0xf0]  ;;  %v15698_v32 = vld [vmem:[#allocation6 + $0x6c4] sm:$0xf0] }
0x11ed   :  { %10374 = vmatpush.bf16.msra.mxu2 %v14290_v14  ;;  %v14697_v15 = vld [vmem:[#allocation6 + $0x7b0] sm:$0xf]  ;;  %v8593_v24 = vperm.slane %v8537_v13, 0  ;;  %v14641_v56 = vld [vmem:[#allocation6 + $0x740] sm:$0xf]  ;;  %v8627_v14 = vperm.slane %v8577_v40, 1  ;;  %v14578_v59 = vor.u32 %v15698_v32, %v14577_v22 }
0x11ee   :  { %10387 = vmatpush.bf16.msra.mxu3 %v14354_v9  ;;  %v15714_v29 = vld [vmem:[#allocation6 + $0x744] sm:$0xf0]  ;;  %v14698_v31 = vor.u32 %v15728_v12, %v14697_v15  ;;  %v14497_v9 = vld [vmem:[#allocation6 + $0x620] sm:$0xf]  ;;  %v15696_v39 = vld [vmem:[#allocation6 + $0x6b4] sm:$0xf0] }
0x11ef   :  { %10407 = vmatpush.bf16.msra.mxu1 %v14530_v5  ;;  %v14506_v5 = vor.u32 %v15680_v47, %v14505_v7  ;;  %v15678_v36 = vld [vmem:[#allocation6 + $0x624] sm:$0xf0]  ;;  %v21695_v54 = vadd.f32 %v8627_v14, %v8611_v62  ;;  %v14642_v37 = vor.u32 %v15714_v29, %v14641_v56  ;;  %v8609_v38 = vmul.f32 %v8593_v24, %v21327_v45  ;;  %v14633_v49 = vld [vmem:[#allocation6 + $0x730] sm:$0xf]  ;;  %v15712_v44 = vld [vmem:[#allocation6 + $0x734] sm:$0xf0] }
0x11f0   :  { %10446 = vmatpush.bf16.msrb.mxu0 %v14722_v26  ;;  %10375 = vmatmul.bf16.vlgmr.msra.gmra.mxu2 %v21682_v63  ;;  %v21691_v26 = vadd.f32 %v8624_v10, %v8608_v43  ;;  %v15726_v28 = vld [vmem:[#allocation6 + $0x7a4] sm:$0xf0]  ;;  %v8625_v3 = vperm.slane %v8537_v13, 1  ;;  %v8594_v40 = vperm.slane %v21693_v35, 0  ;;  %v8626_v57 = vperm.slane %v21693_v35, 1 }
0x11f1   :  { %10419 = vmatpush.bf16.msrb.mxu2 %v14602_v27  ;;  %10388 = vmatmul.bf16.vlgmr.msra.gmra.mxu3 %v21684_v60  ;;  %v14689_v27 = vld [vmem:[#allocation6 + $0x7a0] sm:$0xf]  ;;  %v14489_v42 = vld [vmem:[#allocation6 + $0x610] sm:$0xf]  ;;  %v15676_v46 = vld [vmem:[#allocation6 + $0x614] sm:$0xf0] }
0x11f2   :  { %10432 = vmatpush.bf16.msrb.mxu3 %v14666_v16  ;;  %v14569_v16 = vld [vmem:[#allocation6 + $0x6b0] sm:$0xf]  ;;  %vm8656_vm6 = vcmp.ge.f32.partialorder %v21691_v26, 0.0  ;;  %v15724_v48 = vld [vmem:[#allocation6 + $0x794] sm:$0xf0]  ;;  %v14490_v52 = vor.u32 %v15676_v46, %v14489_v42  ;;  %vm8659_vm7 = vcmp.ge.f32.partialorder %v21695_v54, 0.0 }
0x11f3   :  { %10408 = vmatpush.bf16.msra.mxu1 %v14522_v4  ;;  %v14498_v4 = vor.u32 %v15678_v36, %v14497_v9  ;;  %v14570_v58 = vor.u32 %v15696_v39, %v14569_v16  ;;  %v14681_v45 = vld [vmem:[#allocation6 + $0x790] sm:$0xf]  ;;  %v8675_v41 = vmul.f32 0.01, %v21695_v54  ;;  %v14561_v19 = vld [vmem:[#allocation6 + $0x6a0] sm:$0xf] }
0x11f4   :  { %10447 = vmatpush.bf16.msrb.mxu0 %v14714_v25  ;;  %v14690_v25 = vor.u32 %v15726_v28, %v14689_v27  ;;  %v15694_v55 = vld [vmem:[#allocation6 + $0x6a4] sm:$0xf0]  ;;  %v14625_v6 = vld [vmem:[#allocation6 + $0x720] sm:$0xf]  ;;  %v14682_v7 = vor.u32 %v15724_v48, %v14681_v45  ;;  %v15495_v10 = vld [vmem:[#allocation6 + $0x74] sm:$0xf] }
0x11f5   :  { %10420 = vmatpush.bf16.msrb.mxu2 %v14594_v50  ;;  %v8672_v50 = vmul.f32 0.01, %v21691_v26  ;;  %v15710_v43 = vld [vmem:[#allocation6 + $0x724] sm:$0xf0]  ;;  %v14481_v13 = vld [vmem:[#allocation6 + $0x600] sm:$0xf]  ;;  %v14562_v12 = vor.u32 %v15694_v55, %v14561_v19 }
0x11f6   :  { %10433 = vmatpush.bf16.msrb.mxu3 %v14658_v0  ;;  %v14634_v0 = vor.u32 %v15712_v44, %v14633_v49  ;;  %v15674_v47 = vld [vmem:[#allocation6 + $0x604] sm:$0xf0]  ;;  %v13771_v62 = vld [vmem:[#allocation6 + $0x78] sm:$0xf0]  ;;  %v14626_v22 = vor.u32 %v15710_v43, %v14625_v6  ;;  %v14553_v24 = vld [vmem:[#allocation6 + $0x690] sm:$0xf] }
0x11f7   :  { %10409 = vmatpush.bf16.msra.mxu1 %v14514_v2  ;;  %v21703_v2 = vadd.f32 %v8625_v3, %v8609_v38  ;;  %v15722_v15 = vld [vmem:[#allocation6 + $0x784] sm:$0xf0]  ;;  %v13963_v32 = vld [vmem:[#allocation6 + $0x1f8] sm:$0xf0]  ;;  %v14617_v56 = vld [vmem:[#allocation6 + $0x710] sm:$0xf]  ;;  %v13774_v9 = vor.u32 %v15495_v10, %v13771_v62  ;;  %v8691_v38 = vsel %vm8659_vm7, %v21695_v54, %v8675_v41 }
0x11f8   :  { %10448 = vmatpush.bf16.msrb.mxu0 %v14706_v11  ;;  %v8610_v11 = vmul.f32 %v8594_v40, %v21413_v8  ;;  %v14482_v8 = vor.u32 %v15674_v47, %v14481_v13  ;;  %v15708_v29 = vld [vmem:[#allocation6 + $0x714] sm:$0xf0]  ;;  %v15493_v36 = vld [vmem:[#allocation6 + $0x64] sm:$0xf]  ;;  %v13955_v39 = vld [vmem:[#allocation6 + $0x1e8] sm:$0xf0]  ;;  %v21717_v45 = vpack.c.bf16 %v8691_v38, %v8691_v38 }
0x11f9   :  { %10421 = vmatpush.bf16.msrb.mxu2 %v14586_v23  ;;  %v14673_v23 = vld [vmem:[#allocation6 + $0x780] sm:$0xf]  ;;  %vm8657_vm8 = vcmp.ge.f32.partialorder %v21703_v2, 0.0  ;;  %v8673_v14 = vmul.f32 0.01, %v21703_v2  ;;  %v14618_v3 = vor.u32 %v15708_v29, %v14617_v56 }
0x11fa   :  { %10434 = vmatpush.bf16.msrb.mxu3 %v14650_v18  ;;  %v15543_v18 = vld [vmem:[#allocation6 + $0x1f4] sm:$0xf]  ;;  %v8642_v35 = vadd.f32 %v8626_v57, %v8610_v11  ;;  %v15541_v16 = vld [vmem:[#allocation6 + $0x1e4] sm:$0xf]  ;;  %v14545_v40 = vld [vmem:[#allocation6 + $0x680] sm:$0xf] }
0x11fb   :  { %10410 = vmatpush.bf16.msra.mxu1 %v14506_v5  ;;  %v15692_v5 = vld [vmem:[#allocation6 + $0x694] sm:$0xf0]  ;;  %v13966_v27 = vor.u32 %v15543_v18, %v13963_v32  ;;  %v14609_v49 = vld [vmem:[#allocation6 + $0x700] sm:$0xf]  ;;  %v15706_v44 = vld [vmem:[#allocation6 + $0x704] sm:$0xf0]  ;;  %v13958_v54 = vor.u32 %v15541_v16, %v13955_v39  ;;  %v8689_v43 = vsel %vm8657_vm8, %v21703_v2, %v8673_v14 }
0x11fc   :  { %10449 = vmatpush.bf16.msrb.mxu0 %v14698_v31  ;;  %v14674_v31 = vor.u32 %v15722_v15, %v14673_v23  ;;  %v14554_v28 = vor.u32 %v15692_v5, %v14553_v24  ;;  %v15511_v57 = vld [vmem:[#allocation6 + $0xf4] sm:$0xf]  ;;  %v8674_v42 = vmul.f32 0.01, %v8642_v35  ;;  %vm8658_vm1 = vcmp.ge.f32.partialorder %v8642_v35, 0.0 }
0x11fd   :  { %10422 = vmatpush.bf16.msrb.mxu2 %v14578_v59  ;;  %v8688_v59 = vsel %vm8656_vm6, %v21691_v26, %v8672_v50  ;;  %v15527_v50 = vld [vmem:[#allocation6 + $0x174] sm:$0xf]  ;;  %v14610_v19 = vor.u32 %v15706_v44, %v14609_v49  ;;  %v13947_v6 = vld [vmem:[#allocation6 + $0x1d8] sm:$0xf0]  ;;  %v15509_v11 = vld [vmem:[#allocation6 + $0xe4] sm:$0xf] }
0x11fe   :  { %10435 = vmatpush.bf16.msrb.mxu3 %v14642_v37  ;;  %v13763_v37 = vld [vmem:[#allocation6 + $0x68] sm:$0xf0]  ;;  %v21715_v26 = vpack.c.bf16 %v8688_v59, %v8688_v59  ;;  %v15491_v41 = vld [vmem:[#allocation6 + $0x54] sm:$0xf]  ;;  %v8690_v47 = vsel %vm8658_vm1, %v8642_v35, %v8674_v42  ;;  %v15525_v15 = vld [vmem:[#allocation6 + $0x164] sm:$0xf] }
0x11ff   :  { %10411 = vmatpush.bf16.msra.mxu1 %v14498_v4  ;;  %v15690_v4 = vld [vmem:[#allocation6 + $0x684] sm:$0xf0]  ;;  %v13766_v46 = vor.u32 %v15493_v36, %v13763_v37  ;;  %v15489_v62 = vld [vmem:[#allocation6 + $0x44] sm:$0xf]  ;;  %v13747_v18 = vld [vmem:[#allocation6 + $0x48] sm:$0xf0]  ;;  %v21727_v5 = vpack.c.bf16 %v8690_v47, %v8690_v47 }
0x1200   :  { %10450 = vmatpush.bf16.msrb.mxu0 %v14690_v25  ;;  %v13835_v25 = vld [vmem:[#allocation6 + $0xf8] sm:$0xf0]  ;;  %v14546_v48 = vor.u32 %v15690_v4, %v14545_v40  ;;  %v15537_v32 = vld [vmem:[#allocation6 + $0x1c4] sm:$0xf]  ;;  %v13939_v24 = vld [vmem:[#allocation6 + $0x1c8] sm:$0xf0]  ;;  %v13750_v14 = vor.u32 %v15489_v62, %v13747_v18 }
0x1201   :  { %10423 = vmatpush.bf16.msrb.mxu2 %v14570_v58  ;;  %v13899_v58 = vld [vmem:[#allocation6 + $0x178] sm:$0xf0]  ;;  %v13838_v55 = vor.u32 %v15511_v57, %v13835_v25  ;;  %v15507_v56 = vld [vmem:[#allocation6 + $0xd4] sm:$0xf]  ;;  %v15505_v39 = vld [vmem:[#allocation6 + $0xc4] sm:$0xf] }
0x1202   :  { %10436 = vmatpush.bf16.msrb.mxu3 %v14634_v0  ;;  %v13755_v0 = vld [vmem:[#allocation6 + $0x58] sm:$0xf0]  ;;  %v13902_v13 = vor.u32 %v15527_v50, %v13899_v58  ;;  %v15523_v35 = vld [vmem:[#allocation6 + $0x154] sm:$0xf]  ;;  %v13811_v38 = vld [vmem:[#allocation6 + $0xc8] sm:$0xf0] }
0x1203   :  { %10412 = vmatpush.bf16.msra.mxu1 %v14490_v52  ;;  %v15539_v52 = vld [vmem:[#allocation6 + $0x1d4] sm:$0xf]  ;;  %v13758_v23 = vor.u32 %v15491_v41, %v13755_v0  ;;  %v13819_v29 = vld [vmem:[#allocation6 + $0xd8] sm:$0xf0]  ;;  %v15521_v40 = vld [vmem:[#allocation6 + $0x144] sm:$0xf]  ;;  %v13814_v25 = vor.u32 %v15505_v39, %v13811_v38 }
0x1204   :  { %10451 = vmatpush.bf16.msrb.mxu0 %v14682_v7  ;;  %v13827_v7 = vld [vmem:[#allocation6 + $0xe8] sm:$0xf0]  ;;  %v13950_v10 = vor.u32 %v15539_v52, %v13947_v6  ;;  %v15487_v36 = vld [vmem:[#allocation6 + $0x34] sm:$0xf]  ;;  %v13739_v59 = vld [vmem:[#allocation6 + $0x38] sm:$0xf0] }
0x1205   :  { %10424 = vmatpush.bf16.msrb.mxu2 %v14562_v12  ;;  %v13891_v12 = vld [vmem:[#allocation6 + $0x168] sm:$0xf0]  ;;  %v13830_v2 = vor.u32 %v15509_v11, %v13827_v7  ;;  %v13931_v37 = vld [vmem:[#allocation6 + $0x1b8] sm:$0xf0]  ;;  %v15485_v44 = vld [vmem:[#allocation6 + $0x24] sm:$0xf] }
0x1206   :  { %10437 = vmatpush.bf16.msrb.mxu3 %v14626_v22  ;;  %v21725_v22 = vpack.c.bf16 %v8689_v43, %v8689_v43  ;;  %v13875_v4 = vld [vmem:[#allocation6 + $0x148] sm:$0xf0]  ;;  %v15533_v42 = vld [vmem:[#allocation6 + $0x1a4] sm:$0xf]  ;;  %v15503_v58 = vld [vmem:[#allocation6 + $0xb4] sm:$0xf] }
0x1207   :  { %10413 = vmatpush.bf16.msra.mxu1 %v14482_v8  ;;  %v13894_v8 = vor.u32 %v15525_v15, %v13891_v12  ;;  %v13731_v57 = vld [vmem:[#allocation6 + $0x28] sm:$0xf0]  ;;  %v13878_v50 = vor.u32 %v15521_v40, %v13875_v4  ;;  %v15519_v41 = vld [vmem:[#allocation6 + $0x134] sm:$0xf]  ;;  %v13867_v0 = vld [vmem:[#allocation6 + $0x138] sm:$0xf0] }
0x1208   :  { %10452 = vmatpush.bf16.msrb.mxu0 %v14674_v31  ;;  %v13883_v31 = vld [vmem:[#allocation6 + $0x158] sm:$0xf0]  ;;  %v15531_v43 = vld [vmem:[#allocation6 + $0x194] sm:$0xf]  ;;  %v13870_v11 = vor.u32 %v15519_v41, %v13867_v0  ;;  %v15501_v7 = vld [vmem:[#allocation6 + $0xa4] sm:$0xf] }
0x1209   :  { %10425 = vmatpush.bf16.msrb.mxu2 %v14554_v28  ;;  %v15535_v28 = vld [vmem:[#allocation6 + $0x1b4] sm:$0xf]  ;;  %v13886_v16 = vor.u32 %v15523_v35, %v13883_v31  ;;  %v13723_v52 = vld [vmem:[#allocation6 + $0x18] sm:$0xf0]  ;;  %v13795_v47 = vld [vmem:[#allocation6 + $0xa8] sm:$0xf0] }
0x120a   :  { %10438 = vmatpush.bf16.msrb.mxu3 %v14618_v3  ;;  %10414 = vmatmul.bf16.vlgmr.msra.gmra.mxu1 %v21715_v26  ;;  %v13742_v3 = vor.u32 %v15487_v36, %v13739_v59  ;;  %v13934_v49 = vor.u32 %v15535_v28, %v13931_v37  ;;  %v15517_v15 = vld [vmem:[#allocation6 + $0x124] sm:$0xf]  ;;  %v13859_v12 = vld [vmem:[#allocation6 + $0x128] sm:$0xf0]  ;;  %v14219_v35 = vld [vmem:[#allocation6 + $0x3f8] sm:$0xf0] }
0x120b   :  { %10458 = vmatpush.bf16.msrb.mxu1 %v13774_v9  ;;  %10453 = vmatmul.bf16.vlgmr.msrb.gmra.mxu0 %v21717_v45  ;;  %v13942_v9 = vor.u32 %v15537_v32, %v13939_v24  ;;  %v13715_v18 = vld [vmem:[#allocation6 + $0x8] sm:$0xf0]  ;;  %v13798_v24 = vor.u32 %v15501_v7, %v13795_v47  ;;  %v15499_v31 = vld [vmem:[#allocation6 + $0x94] sm:$0xf]  ;;  %v15605_v40 = vld [vmem:[#allocation6 + $0x3e4] sm:$0xf] }
0x120c   :  { %10497 = vmatpush.bf16.msra.mxu0 %v13966_v27  ;;  %v13822_v27 = vor.u32 %v15507_v56, %v13819_v29  ;;  %v13907_v32 = vld [vmem:[#allocation6 + $0x188] sm:$0xf0]  ;;  %v14027_v56 = vld [vmem:[#allocation6 + $0x278] sm:$0xf0]  ;;  %v15607_v29 = vld [vmem:[#allocation6 + $0x3f4] sm:$0xf] }
0x120d   :  { %10426 = vmatpush.bf16.msrb.mxu2 %v14546_v48  ;;  %v13734_v48 = vor.u32 %v15485_v44, %v13731_v57  ;;  %v15515_v59 = vld [vmem:[#allocation6 + $0x114] sm:$0xf]  ;;  %v14222_v39 = vor.u32 %v15607_v29, %v14219_v35  ;;  %v14211_v4 = vld [vmem:[#allocation6 + $0x3e8] sm:$0xf0]  ;;  %v15497_v44 = vld [vmem:[#allocation6 + $0x84] sm:$0xf] }
0x120e   :  { %10439 = vmatpush.bf16.msrb.mxu3 %v14610_v19  ;;  %v13779_v57 = vld [vmem:[#allocation6 + $0x88] sm:$0xf0]  ;;  %v14214_v41 = vor.u32 %v15605_v40, %v14211_v4  ;;  %v15573_v7 = vld [vmem:[#allocation6 + $0x2e4] sm:$0xf]  ;;  %v15587_v29 = vld [vmem:[#allocation6 + $0x354] sm:$0xf] }
0x120f   :  { %10459 = vmatpush.bf16.msrb.mxu1 %v13766_v46  ;;  %v13923_v46 = vld [vmem:[#allocation6 + $0x1a8] sm:$0xf0]  ;;  %v13782_v0 = vor.u32 %v15497_v44, %v13779_v57  ;;  %v15549_v40 = vld [vmem:[#allocation6 + $0x224] sm:$0xf] }
0x1210   :  { %10498 = vmatpush.bf16.msra.mxu0 %v13958_v54  ;;  %10427 = vmatmul.bf16.vlgmr.msrb.gmra.mxu2 %v21725_v22  ;;  %v13803_v54 = vld [vmem:[#allocation6 + $0xb8] sm:$0xf0]  ;;  %v13926_v19 = vor.u32 %v15533_v42, %v13923_v46  ;;  %v13843_v42 = vld [vmem:[#allocation6 + $0x108] sm:$0xf0]  ;;  %v15575_v46 = vld [vmem:[#allocation6 + $0x2f4] sm:$0xf] }
0x1211   :  { %10471 = vmatpush.bf16.msra.mxu2 %v13838_v55  ;;  %10440 = vmatmul.bf16.vlgmr.msrb.gmra.mxu3 %v21727_v5  ;;  %v15483_v55 = vld [vmem:[#allocation6 + $0x14] sm:$0xf]  ;;  %v13806_v6 = vor.u32 %v15503_v58, %v13803_v54  ;;  %v14083_v47 = vld [vmem:[#allocation6 + $0x2e8] sm:$0xf0] }
0x1212   :  { %10484 = vmatpush.bf16.msra.mxu3 %v13902_v13  ;;  %v13915_v13 = vld [vmem:[#allocation6 + $0x198] sm:$0xf0]  ;;  %v15591_v54 = vld [vmem:[#allocation6 + $0x374] sm:$0xf]  ;;  %v14179_v44 = vld [vmem:[#allocation6 + $0x3a8] sm:$0xf0] }
0x1213   :  { %10460 = vmatpush.bf16.msrb.mxu1 %v13758_v23  ;;  %v13726_v23 = vor.u32 %v15483_v55, %v13723_v52  ;;  %v13918_v62 = vor.u32 %v15531_v43, %v13915_v13  ;;  %v14011_v55 = vld [vmem:[#allocation6 + $0x258] sm:$0xf0]  ;;  %v15603_v43 = vld [vmem:[#allocation6 + $0x3d4] sm:$0xf] }
0x1214   :  { %10499 = vmatpush.bf16.msra.mxu0 %v13950_v10  ;;  %v15481_v10 = vld [vmem:[#allocation6 + $0x4] sm:$0xf]  ;;  %v14203_v13 = vld [vmem:[#allocation6 + $0x3d8] sm:$0xf0] }
0x1215   :  { %10472 = vmatpush.bf16.msra.mxu2 %v13830_v2  ;;  %v15529_v2 = vld [vmem:[#allocation6 + $0x184] sm:$0xf]  ;;  %v13718_v36 = vor.u32 %v15481_v10, %v13715_v18  ;;  %v14206_v10 = vor.u32 %v15603_v43, %v14203_v13  ;;  %v14003_v18 = vld [vmem:[#allocation6 + $0x248] sm:$0xf0] }
0x1216   :  { %10485 = vmatpush.bf16.msra.mxu3 %v13894_v8  ;;  %v15559_v8 = vld [vmem:[#allocation6 + $0x274] sm:$0xf]  ;;  %v13910_v28 = vor.u32 %v15529_v2, %v13907_v32  ;;  %v15601_v2 = vld [vmem:[#allocation6 + $0x3c4] sm:$0xf]  ;;  %v14195_v32 = vld [vmem:[#allocation6 + $0x3c8] sm:$0xf0] }
0x1217   :  { %10461 = vmatpush.bf16.msrb.mxu1 %v13750_v14  ;;  %v13862_v14 = vor.u32 %v15517_v15, %v13859_v12  ;;  %v14030_v37 = vor.u32 %v15559_v8, %v14027_v56  ;;  %v15589_v15 = vld [vmem:[#allocation6 + $0x364] sm:$0xf]  ;;  %v14147_v12 = vld [vmem:[#allocation6 + $0x368] sm:$0xf0]  ;;  %v14075_v8 = vld [vmem:[#allocation6 + $0x2d8] sm:$0xf0]  ;;  %v14198_v35 = vor.u32 %v15601_v2, %v14195_v32 }
0x1218   :  { %10500 = vmatpush.bf16.msra.mxu0 %v13942_v9  ;;  %v13787_v9 = vld [vmem:[#allocation6 + $0x98] sm:$0xf0]  ;;  %v14051_v43 = vld [vmem:[#allocation6 + $0x2a8] sm:$0xf0]  ;;  %v15671_v2 = vld [vmem:[#allocation6 + $0x5f4] sm:$0xf] }
0x1219   :  { %10473 = vmatpush.bf16.msra.mxu2 %v13822_v27  ;;  %v13851_v27 = vld [vmem:[#allocation6 + $0x118] sm:$0xf0]  ;;  %v13790_v38 = vor.u32 %v15499_v31, %v13787_v9  ;;  %v15551_v31 = vld [vmem:[#allocation6 + $0x234] sm:$0xf] }
0x121a   :  { %10486 = vmatpush.bf16.msra.mxu3 %v13886_v16  ;;  %v15557_v16 = vld [vmem:[#allocation6 + $0x264] sm:$0xf]  ;;  %v13995_v9 = vld [vmem:[#allocation6 + $0x238] sm:$0xf0] }
0x121b   :  { %10462 = vmatpush.bf16.msrb.mxu1 %v13742_v3  ;;  %v14019_v3 = vld [vmem:[#allocation6 + $0x268] sm:$0xf0] }
0x121c   :  { %10501 = vmatpush.bf16.msra.mxu0 %v13934_v49  ;;  %v13854_v49 = vor.u32 %v15515_v59, %v13851_v27  ;;  %v14022_v58 = vor.u32 %v15557_v16, %v14019_v3  ;;  %v15599_v59 = vld [vmem:[#allocation6 + $0x3b4] sm:$0xf]  ;;  %v14187_v27 = vld [vmem:[#allocation6 + $0x3b8] sm:$0xf0]  ;;  %v14067_v16 = vld [vmem:[#allocation6 + $0x2c8] sm:$0xf0] }
0x121d   :  { %10474 = vmatpush.bf16.msra.mxu2 %v13814_v25  ;;  %v15513_v25 = vld [vmem:[#allocation6 + $0x104] sm:$0xf]  ;;  %v14190_v3 = vor.u32 %v15599_v59, %v14187_v27  ;;  %v14275_v27 = vld [vmem:[#allocation6 + $0x468] sm:$0xf0] }
0x121e   :  { %10487 = vmatpush.bf16.msra.mxu3 %v13878_v50  ;;  %v14091_v50 = vld [vmem:[#allocation6 + $0x2f8] sm:$0xf0]  ;;  %v13846_v52 = vor.u32 %v15513_v25, %v13843_v42  ;;  %v15567_v25 = vld [vmem:[#allocation6 + $0x2b4] sm:$0xf] }
0x121f   :  { %10463 = vmatpush.bf16.msrb.mxu1 %v13734_v48  ;;  %v14155_v48 = vld [vmem:[#allocation6 + $0x378] sm:$0xf0] }
0x1220   :  { %10502 = vmatpush.bf16.msra.mxu0 %v13926_v19  ;;  %v15555_v19 = vld [vmem:[#allocation6 + $0x254] sm:$0xf]  ;;  %v14059_v42 = vld [vmem:[#allocation6 + $0x2b8] sm:$0xf0] }
0x1221   :  { %10475 = vmatpush.bf16.msra.mxu2 %v13806_v6  ;;  %v14094_v6 = vor.u32 %v15575_v46, %v14091_v50  ;;  %v15583_v50 = vld [vmem:[#allocation6 + $0x334] sm:$0xf] }
0x1222   :  { %10488 = vmatpush.bf16.msra.mxu3 %v13870_v11  ;;  %v14158_v11 = vor.u32 %v15591_v54, %v14155_v48  ;;  %v15547_v48 = vld [vmem:[#allocation6 + $0x214] sm:$0xf] }
0x1223   :  { %10464 = vmatpush.bf16.msrb.mxu1 %v13726_v23  ;;  %v14014_v23 = vor.u32 %v15555_v19, %v14011_v55  ;;  %v15595_v19 = vld [vmem:[#allocation6 + $0x394] sm:$0xf]  ;;  %v14171_v55 = vld [vmem:[#allocation6 + $0x398] sm:$0xf0] }
0x1224   :  { %10503 = vmatpush.bf16.msra.mxu0 %v13918_v62  ;;  %v15553_v62 = vld [vmem:[#allocation6 + $0x244] sm:$0xf] }
0x1225   :  { %10476 = vmatpush.bf16.msra.mxu2 %v13798_v24  ;;  %v14150_v24 = vor.u32 %v15589_v15, %v14147_v12  ;;  %v14006_v56 = vor.u32 %v15553_v62, %v14003_v18  ;;  %v13971_v15 = vld [vmem:[#allocation6 + $0x208] sm:$0xf0]  ;;  %v15593_v12 = vld [vmem:[#allocation6 + $0x384] sm:$0xf]  ;;  %v15623_v18 = vld [vmem:[#allocation6 + $0x474] sm:$0xf] }
0x1226   :  { %10489 = vmatpush.bf16.msra.mxu3 %v13862_v14  ;;  %v14139_v14 = vld [vmem:[#allocation6 + $0x358] sm:$0xf0] }
0x1227   :  { %10465 = vmatpush.bf16.msrb.mxu1 %v13718_v36 }
0x1228   :  { %10504 = vmatpush.bf16.msra.mxu0 %v13910_v28  ;;  %v14142_v28 = vor.u32 %v15587_v29, %v14139_v14  ;;  %v15579_v29 = vld [vmem:[#allocation6 + $0x314] sm:$0xf]  ;;  %v14107_v14 = vld [vmem:[#allocation6 + $0x318] sm:$0xf0] }
0x1229   :  { %10477 = vmatpush.bf16.msra.mxu2 %v13790_v38  ;;  %v14131_v38 = vld [vmem:[#allocation6 + $0x348] sm:$0xf0] }
0x122a   :  { %10490 = vmatpush.bf16.msra.mxu3 %v13854_v49  ;;  %10466 = vmatmul.bf16.vlgmr.msrb.gmra.mxu1 %v21616_v17  ;;  %v14086_v17 = vor.u32 %v15573_v7, %v14083_v47  ;;  %v15597_v49 = vld [vmem:[#allocation6 + $0x3a4] sm:$0xf]  ;;  %v14115_v7 = vld [vmem:[#allocation6 + $0x328] sm:$0xf0] }
0x122b   :  { %10510 = vmatpush.bf16.msra.mxu1 %v14030_v37  ;;  %10505 = vmatmul.bf16.vlgmr.msra.gmra.mxu0 %v21619_v53  ;;  %v15571_v53 = vld [vmem:[#allocation6 + $0x2d4] sm:$0xf]  ;;  %v15569_v37 = vld [vmem:[#allocation6 + $0x2c4] sm:$0xf]  ;;  %v14182_v54 = vor.u32 %v15597_v49, %v14179_v44  ;;  %v14411_v44 = vld [vmem:[#allocation6 + $0x578] sm:$0xf0] }
0x122c   :  { %10549 = vmatpush.bf16.msrb.mxu0 %v14222_v39  ;;  %v14078_v36 = vor.u32 %v15571_v53, %v14075_v8  ;;  %v15585_v39 = vld [vmem:[#allocation6 + $0x344] sm:$0xf]  ;;  %v14070_v4 = vor.u32 %v15569_v37, %v14067_v16  ;;  %v15563_v53 = vld [vmem:[#allocation6 + $0x294] sm:$0xf]  ;;  %v14043_v8 = vld [vmem:[#allocation6 + $0x298] sm:$0xf0]  ;;  %v14110_v16 = vor.u32 %v15579_v29, %v14107_v14 }
0x122d   :  { %10478 = vmatpush.bf16.msra.mxu2 %v13782_v0  ;;  %v14134_v57 = vor.u32 %v15585_v39, %v14131_v38  ;;  %v14062_v0 = vor.u32 %v15567_v25, %v14059_v42  ;;  %v15545_v47 = vld [vmem:[#allocation6 + $0x204] sm:$0xf]  ;;  %v14046_v59 = vor.u32 %v15563_v53, %v14043_v8  ;;  %v14467_v37 = vld [vmem:[#allocation6 + $0x5e8] sm:$0xf0]  ;;  %v15655_v49 = vld [vmem:[#allocation6 + $0x574] sm:$0xf] }
0x122e   :  { %10491 = vmatpush.bf16.msra.mxu3 %v13846_v52  ;;  %v14035_v39 = vld [vmem:[#allocation6 + $0x288] sm:$0xf0]  ;;  %v15577_v38 = vld [vmem:[#allocation6 + $0x304] sm:$0xf]  ;;  %v15619_v42 = vld [vmem:[#allocation6 + $0x454] sm:$0xf] }
0x122f   :  { %10511 = vmatpush.bf16.msra.mxu1 %v14022_v58  ;;  %v14123_v58 = vld [vmem:[#allocation6 + $0x338] sm:$0xf0]  ;;  %v15663_v8 = vld [vmem:[#allocation6 + $0x5b4] sm:$0xf]  ;;  %v14323_v14 = vld [vmem:[#allocation6 + $0x4c8] sm:$0xf0] }
0x1230   :  { %10550 = vmatpush.bf16.msrb.mxu0 %v14214_v41  ;;  %10479 = vmatmul.bf16.vlgmr.msra.gmra.mxu2 %v21625_v33  ;;  %v13998_v33 = vor.u32 %v15551_v31, %v13995_v9  ;;  %v13979_v41 = vld [vmem:[#allocation6 + $0x218] sm:$0xf0]  ;;  %v14126_v52 = vor.u32 %v15583_v50, %v14123_v58  ;;  %v15621_v9 = vld [vmem:[#allocation6 + $0x464] sm:$0xf] }
0x1231   :  { %10523 = vmatpush.bf16.msrb.mxu2 %v14094_v6  ;;  %10492 = vmatmul.bf16.vlgmr.msra.gmra.mxu3 %v21627_v1  ;;  %v13987_v1 = vld [vmem:[#allocation6 + $0x228] sm:$0xf0]  ;;  %v15565_v6 = vld [vmem:[#allocation6 + $0x2a4] sm:$0xf]  ;;  %v13982_v13 = vor.u32 %v15547_v48, %v13979_v41  ;;  %v14459_v48 = vld [vmem:[#allocation6 + $0x5d8] sm:$0xf0]  ;;  %v14414_v41 = vor.u32 %v15655_v49, %v14411_v44 }
0x1232   :  { %10536 = vmatpush.bf16.msrb.mxu3 %v14158_v11  ;;  %v13990_v46 = vor.u32 %v15549_v40, %v13987_v1  ;;  %v15581_v11 = vld [vmem:[#allocation6 + $0x324] sm:$0xf]  ;;  %v14054_v62 = vor.u32 %v15565_v6, %v14051_v43  ;;  %v15639_v40 = vld [vmem:[#allocation6 + $0x4f4] sm:$0xf]  ;;  %v14347_v1 = vld [vmem:[#allocation6 + $0x4f8] sm:$0xf0] }
0x1233   :  { %10512 = vmatpush.bf16.msra.mxu1 %v14014_v23  ;;  %v14174_v23 = vor.u32 %v15595_v19, %v14171_v55  ;;  %v14118_v32 = vor.u32 %v15581_v11, %v14115_v7  ;;  %v14350_v58 = vor.u32 %v15639_v40, %v14347_v1  ;;  %v14339_v19 = vld [vmem:[#allocation6 + $0x4e8] sm:$0xf0]  ;;  %v15665_v7 = vld [vmem:[#allocation6 + $0x5c4] sm:$0xf]  ;;  %v14379_v49 = vld [vmem:[#allocation6 + $0x538] sm:$0xf0] }
0x1234   :  { %10551 = vmatpush.bf16.msrb.mxu0 %v14206_v10  ;;  %v14163_v10 = vld [vmem:[#allocation6 + $0x388] sm:$0xf0] }
0x1235   :  { %10524 = vmatpush.bf16.msrb.mxu2 %v14086_v17  ;;  %v14283_v17 = vld [vmem:[#allocation6 + $0x478] sm:$0xf0]  ;;  %v14403_v6 = vld [vmem:[#allocation6 + $0x568] sm:$0xf0] }
0x1236   :  { %10537 = vmatpush.bf16.msrb.mxu3 %v14150_v24  ;;  %v14475_v24 = vld [vmem:[#allocation6 + $0x5f8] sm:$0xf0]  ;;  %v14286_v31 = vor.u32 %v15623_v18, %v14283_v17  ;;  %v14259_v11 = vld [vmem:[#allocation6 + $0x448] sm:$0xf0] }
0x1237   :  { %10513 = vmatpush.bf16.msra.mxu1 %v14006_v56  ;;  %v13974_v56 = vor.u32 %v15545_v47, %v13971_v15  ;;  %v14451_v47 = vld [vmem:[#allocation6 + $0x5c8] sm:$0xf0]  ;;  %v14331_v15 = vld [vmem:[#allocation6 + $0x4d8] sm:$0xf0] }
0x1238   :  { %10552 = vmatpush.bf16.msrb.mxu0 %v14198_v35  ;;  %v14166_v35 = vor.u32 %v15593_v12, %v14163_v10  ;;  %v14395_v18 = vld [vmem:[#allocation6 + $0x558] sm:$0xf0] }
0x1239   :  { %10525 = vmatpush.bf16.msrb.mxu2 %v14078_v36  ;;  %v14478_v36 = vor.u32 %v15671_v2, %v14475_v24  ;;  %v14454_v2 = vor.u32 %v15665_v7, %v14451_v47  ;;  %v14251_v24 = vld [vmem:[#allocation6 + $0x438] sm:$0xf0]  ;;  %v14227_v7 = vld [vmem:[#allocation6 + $0x408] sm:$0xf0]  ;;  %v15657_v47 = vld [vmem:[#allocation6 + $0x584] sm:$0xf] }
0x123a   :  { %10538 = vmatpush.bf16.msrb.mxu3 %v14142_v28  ;;  %v15669_v28 = vld [vmem:[#allocation6 + $0x5e4] sm:$0xf] }
0x123b   :  { %10514 = vmatpush.bf16.msra.mxu1 %v13998_v33  ;;  %v15561_v33 = vld [vmem:[#allocation6 + $0x284] sm:$0xf] }
0x123c   :  { %10553 = vmatpush.bf16.msrb.mxu0 %v14190_v3  ;;  %v14099_v3 = vld [vmem:[#allocation6 + $0x308] sm:$0xf0]  ;;  %v14038_v25 = vor.u32 %v15561_v33, %v14035_v39 }
0x123d   :  { %10526 = vmatpush.bf16.msrb.mxu2 %v14070_v4  ;;  %v14278_v4 = vor.u32 %v15621_v9, %v14275_v27  ;;  %v14102_v50 = vor.u32 %v15577_v38, %v14099_v3  ;;  %v14387_v9 = vld [vmem:[#allocation6 + $0x548] sm:$0xf0]  ;;  %v15631_v38 = vld [vmem:[#allocation6 + $0x4b4] sm:$0xf]  ;;  %v14315_v3 = vld [vmem:[#allocation6 + $0x4b8] sm:$0xf0] }
0x123e   :  { %10539 = vmatpush.bf16.msrb.mxu3 %v14134_v57  ;;  %v14470_v57 = vor.u32 %v15669_v28, %v14467_v37  ;;  %v14243_v27 = vld [vmem:[#allocation6 + $0x428] sm:$0xf0]  ;;  %v15661_v37 = vld [vmem:[#allocation6 + $0x5a4] sm:$0xf] }
0x123f   :  { %10515 = vmatpush.bf16.msra.mxu1 %v13990_v46  ;;  %v14267_v46 = vld [vmem:[#allocation6 + $0x458] sm:$0xf0] }
0x1240   :  { %10554 = vmatpush.bf16.msrb.mxu0 %v14182_v54  ;;  %v15667_v54 = vld [vmem:[#allocation6 + $0x5d4] sm:$0xf]  ;;  %v14270_v55 = vor.u32 %v15619_v42, %v14267_v46  ;;  %v14235_v42 = vld [vmem:[#allocation6 + $0x418] sm:$0xf0]  ;;  %v14318_v46 = vor.u32 %v15631_v38, %v14315_v3  ;;  %v14291_v38 = vld [vmem:[#allocation6 + $0x488] sm:$0xf0] }
0x1241   :  { %10527 = vmatpush.bf16.msrb.mxu2 %v14062_v0  ;;  %v15637_v0 = vld [vmem:[#allocation6 + $0x4e4] sm:$0xf]  ;;  %v14462_v43 = vor.u32 %v15667_v54, %v14459_v48 }
0x1242   :  { %10540 = vmatpush.bf16.msrb.mxu3 %v14126_v52  ;;  %v15653_v52 = vld [vmem:[#allocation6 + $0x564] sm:$0xf] }
0x1243   :  { %10516 = vmatpush.bf16.msra.mxu1 %v13982_v13  ;;  %v15617_v13 = vld [vmem:[#allocation6 + $0x444] sm:$0xf] }
0x1244   :  { %10555 = vmatpush.bf16.msrb.mxu0 %v14174_v23  ;;  %v14406_v23 = vor.u32 %v15653_v52, %v14403_v6  ;;  %v14262_v10 = vor.u32 %v15617_v13, %v14259_v11  ;;  %v15645_v52 = vld [vmem:[#allocation6 + $0x524] sm:$0xf]  ;;  %v14371_v6 = vld [vmem:[#allocation6 + $0x528] sm:$0xf0] }
0x1245   :  { %10528 = vmatpush.bf16.msrb.mxu2 %v14054_v62  ;;  %v15651_v62 = vld [vmem:[#allocation6 + $0x554] sm:$0xf]  ;;  %v15641_v3 = vld [vmem:[#allocation6 + $0x504] sm:$0xf] }
0x1246   :  { %10541 = vmatpush.bf16.msrb.mxu3 %v14118_v32  ;;  %v15615_v32 = vld [vmem:[#allocation6 + $0x434] sm:$0xf]  ;;  %v14398_v29 = vor.u32 %v15651_v62, %v14395_v18  ;;  %v14374_v18 = vor.u32 %v15645_v52, %v14371_v6  ;;  %v15701_v52 = vld [vmem:[#allocation6 + $0x6e4] sm:$0xf]  ;;  %v14595_v6 = vld [vmem:[#allocation6 + $0x6e8] sm:$0xf0] }
0x1247   :  { %10517 = vmatpush.bf16.msra.mxu1 %v13974_v56  ;;  %v10259_v12 = vpop.f32.mrf.mxu1  ;;  %v14443_v56 = vld [vmem:[#allocation6 + $0x5b8] sm:$0xf0] }
0x1248   :  { %10556 = vmatpush.bf16.msrb.mxu0 %v14166_v35  ;;  %v21739_v17 = vpop.f32.mrf.mxu0  ;;  %v21744_v35 = vld [vmem:[%s21782_s15 + $0x2] sm:$0x3] }
0x1249   :  { %10529 = vmatpush.bf16.msrb.mxu2 %v14046_v59  ;;  %v15613_v59 = vld [vmem:[#allocation6 + $0x424] sm:$0xf]  ;;  %v8966_v33 = vperm.slane %v21744_v35, 0 }
0x124a   :  { %10542 = vmatpush.bf16.msrb.mxu3 %v14110_v16  ;;  %10518 = vmatmul.bf16.vlgmr.msra.gmra.mxu1 %v21643_v20  ;;  %v14342_v20 = vor.u32 %v15637_v0, %v14339_v19  ;;  %v14435_v16 = vld [vmem:[#allocation6 + $0x5a8] sm:$0xf0]  ;;  %v14246_v1 = vor.u32 %v15613_v59, %v14243_v27 }
0x124b   :  { %10562 = vmatpush.bf16.msrb.mxu1 %v14286_v31  ;;  %10557 = vmatmul.bf16.vlgmr.msrb.gmra.mxu0 %v21645_v30  ;;  %v15635_v30 = vld [vmem:[#allocation6 + $0x4d4] sm:$0xf]  ;;  %v15649_v31 = vld [vmem:[#allocation6 + $0x544] sm:$0xf]  ;;  %v10260_v54 = vadd.f32 %v10259_v12, %v8966_v33  ;;  %v14307_v0 = vld [vmem:[#allocation6 + $0x4a8] sm:$0xf0] }
0x124c   :  { %10601 = vmatpush.bf16.msra.mxu0 %v14478_v36  ;;  %v14334_v53 = vor.u32 %v15635_v30, %v14331_v15  ;;  %v14446_v36 = vor.u32 %v15663_v8, %v14443_v56  ;;  %v14390_v39 = vor.u32 %v15649_v31, %v14387_v9  ;;  %v15687_v15 = vld [vmem:[#allocation6 + $0x674] sm:$0xf]  ;;  %v14539_v12 = vld [vmem:[#allocation6 + $0x678] sm:$0xf0]  ;;  %v15685_v9 = vld [vmem:[#allocation6 + $0x664] sm:$0xf] }
0x124d   :  { %10530 = vmatpush.bf16.msrb.mxu2 %v14038_v25  ;;  %v15611_v25 = vld [vmem:[#allocation6 + $0x414] sm:$0xf]  ;;  %v14542_v31 = vor.u32 %v15687_v15, %v14539_v12  ;;  %v14531_v27 = vld [vmem:[#allocation6 + $0x668] sm:$0xf0] }
0x124e   :  { %10543 = vmatpush.bf16.msrb.mxu3 %v14102_v50  ;;  %v15659_v50 = vld [vmem:[#allocation6 + $0x594] sm:$0xf]  ;;  %v14707_v15 = vld [vmem:[#allocation6 + $0x7c8] sm:$0xf0] }
0x124f   :  { %10563 = vmatpush.bf16.msrb.mxu1 %v14278_v4  ;;  %v10261_v40 = vpop.f32.mrf.mxu1  ;;  %v15647_v4 = vld [vmem:[#allocation6 + $0x534] sm:$0xf] }
0x1250   :  { %10602 = vmatpush.bf16.msra.mxu0 %v14470_v57  ;;  %10531 = vmatmul.bf16.vlgmr.msrb.gmra.mxu2 %v21659_v21  ;;  %v15633_v21 = vld [vmem:[#allocation6 + $0x4c4] sm:$0xf]  ;;  %v10300_v44 = vpop.f32.mrf.mxu0  ;;  %v14438_v57 = vor.u32 %v15661_v37, %v14435_v16  ;;  %v14382_v48 = vor.u32 %v15647_v4, %v14379_v49  ;;  %v15643_v56 = vld [vmem:[#allocation6 + $0x514] sm:$0xf]  ;;  %v14723_v37 = vld [vmem:[#allocation6 + $0x7e8] sm:$0xf0] }
0x1251   :  { %10575 = vmatpush.bf16.msra.mxu2 %v14350_v58  ;;  %10544 = vmatmul.bf16.vlgmr.msrb.gmra.mxu3 %v21662_v51  ;;  %v14254_v51 = vor.u32 %v15615_v32, %v14251_v24  ;;  %v14326_v28 = vor.u32 %v15633_v21, %v14323_v14  ;;  %v14427_v58 = vld [vmem:[#allocation6 + $0x598] sm:$0xf0]  ;;  %v15627_v32 = vld [vmem:[#allocation6 + $0x494] sm:$0xf]  ;;  %v14534_v44 = vor.u32 %v15685_v9, %v14531_v27  ;;  %v15697_v27 = vld [vmem:[#allocation6 + $0x6c4] sm:$0xf] }
0x1252   :  { %10588 = vmatpush.bf16.msra.mxu3 %v14414_v41  ;;  %v15629_v41 = vld [vmem:[#allocation6 + $0x4a4] sm:$0xf]  ;;  %v14299_v24 = vld [vmem:[#allocation6 + $0x498] sm:$0xf0] }
0x1253   :  { %10564 = vmatpush.bf16.msrb.mxu1 %v14270_v55  ;;  %v10272_v19 = vpop.f32.mrf.mxu2  ;;  %v14238_v55 = vor.u32 %v15611_v25, %v14235_v42  ;;  %v14310_v30 = vor.u32 %v15629_v41, %v14307_v0  ;;  %v14302_v59 = vor.u32 %v15627_v32, %v14299_v24  ;;  %v14603_v4 = vld [vmem:[#allocation6 + $0x6f8] sm:$0xf0]  ;;  %v15731_v41 = vld [vmem:[#allocation6 + $0x7d4] sm:$0xf] }
0x1254   :  { %10603 = vmatpush.bf16.msra.mxu0 %v14462_v43  ;;  %v15609_v43 = vld [vmem:[#allocation6 + $0x404] sm:$0xf]  ;;  %v10273_v13 = vadd.f32 %v10272_v19, %v10260_v54  ;;  %v10285_v11 = vpop.f32.mrf.mxu3  ;;  %v14667_v25 = vld [vmem:[#allocation6 + $0x778] sm:$0xf0]  ;;  %v15715_v24 = vld [vmem:[#allocation6 + $0x754] sm:$0xf] }
0x1255   :  { %10576 = vmatpush.bf16.msra.mxu2 %v14342_v20  ;;  %v14430_v20 = vor.u32 %v15659_v50, %v14427_v58  ;;  %v14230_v8 = vor.u32 %v15609_v43, %v14227_v7  ;;  %v15683_v50 = vld [vmem:[#allocation6 + $0x654] sm:$0xf]  ;;  %v14523_v58 = vld [vmem:[#allocation6 + $0x658] sm:$0xf0] }
0x1256   :  { %10589 = vmatpush.bf16.msra.mxu3 %v14406_v23  ;;  %v14419_v23 = vld [vmem:[#allocation6 + $0x588] sm:$0xf0]  ;;  %v10286_v62 = vadd.f32 %v10285_v11, %v10273_v13  ;;  %v14715_v0 = vld [vmem:[#allocation6 + $0x7d8] sm:$0xf0]  ;;  %v14526_v13 = vor.u32 %v15683_v50, %v14523_v58  ;;  %v15717_v11 = vld [vmem:[#allocation6 + $0x764] sm:$0xf] }
0x1257   :  { %10565 = vmatpush.bf16.msrb.mxu1 %v14262_v10  ;;  %v15735_v10 = vld [vmem:[#allocation6 + $0x7f4] sm:$0xf]  ;;  %v14718_v7 = vor.u32 %v15731_v41, %v14715_v0  ;;  %v14699_v9 = vld [vmem:[#allocation6 + $0x7b8] sm:$0xf0] }
0x1258   :  { %10604 = vmatpush.bf16.msra.mxu0 %v14454_v2  ;;  %v14731_v2 = vld [vmem:[#allocation6 + $0x7f8] sm:$0xf0]  ;;  %v10299_v21 = vadd.f32 %v21739_v17, %v10286_v62  ;;  %v21748_v14 = vpop.f32.mrf.mxu0  ;;  %v14355_v17 = vld [vmem:[#allocation6 + $0x508] sm:$0xf0]  ;;  %v15723_v0 = vld [vmem:[#allocation6 + $0x794] sm:$0xf] }
0x1259   :  { %10577 = vmatpush.bf16.msra.mxu2 %v14334_v53  ;;  %v10311_v53 = vpop.f32.mrf.mxu1  ;;  %v14358_v54 = vor.u32 %v15641_v3, %v14355_v17  ;;  %v14587_v62 = vld [vmem:[#allocation6 + $0x6d8] sm:$0xf0]  ;;  %v14499_v3 = vld [vmem:[#allocation6 + $0x628] sm:$0xf0] }
0x125a   :  { %10590 = vmatpush.bf16.msra.mxu3 %v14398_v29  ;;  %v14363_v29 = vld [vmem:[#allocation6 + $0x518] sm:$0xf0]  ;;  %v10312_v16 = vadd.f32 %v10311_v53, %v10299_v21 }
0x125b   :  { %10566 = vmatpush.bf16.msrb.mxu1 %v14254_v51  ;;  %v14422_v51 = vor.u32 %v15657_v47, %v14419_v23  ;;  %v14366_v33 = vor.u32 %v15643_v56, %v14363_v29  ;;  %v10274_v40 = vpop.f32.mrf.mxu2  ;;  %v15681_v47 = vld [vmem:[#allocation6 + $0x644] sm:$0xf]  ;;  %v14598_v23 = vor.u32 %v15701_v52, %v14595_v6  ;;  %v14651_v53 = vld [vmem:[#allocation6 + $0x758] sm:$0xf0]  ;;  %v15679_v56 = vld [vmem:[#allocation6 + $0x634] sm:$0xf] }
0x125c   :  { %10605 = vmatpush.bf16.msra.mxu0 %v14446_v36  ;;  %v14734_v36 = vor.u32 %v15735_v10, %v14731_v2  ;;  %v10287_v49 = vpop.f32.mrf.mxu3  ;;  %v15699_v10 = vld [vmem:[#allocation6 + $0x6d4] sm:$0xf]  ;;  %v14507_v29 = vld [vmem:[#allocation6 + $0x638] sm:$0xf0]  ;;  %v15693_v6 = vld [vmem:[#allocation6 + $0x6a4] sm:$0xf] }
0x125d   :  { %10578 = vmatpush.bf16.msra.mxu2 %v14326_v28  ;;  %v15733_v28 = vld [vmem:[#allocation6 + $0x7e4] sm:$0xf]  ;;  %v14635_v50 = vld [vmem:[#allocation6 + $0x738] sm:$0xf0] }
0x125e   :  { %10591 = vmatpush.bf16.msra.mxu3 %v14390_v39  ;;  %v15625_v39 = vld [vmem:[#allocation6 + $0x484] sm:$0xf]  ;;  %v14726_v42 = vor.u32 %v15733_v28, %v14723_v37 }
0x125f   :  { %10567 = vmatpush.bf16.msrb.mxu1 %v14246_v1  ;;  %v15703_v1 = vld [vmem:[#allocation6 + $0x6f4] sm:$0xf] }
0x1260   :  { %10606 = vmatpush.bf16.msra.mxu0 %v14438_v57  ;;  %v15719_v57 = vld [vmem:[#allocation6 + $0x774] sm:$0xf]  ;;  %v10352_v43 = vpop.f32.mrf.mxu0 }
0x1261   :  { %10579 = vmatpush.bf16.msra.mxu2 %v14318_v46  ;;  %v14294_v46 = vor.u32 %v15625_v39, %v14291_v38  ;;  %v10313_v19 = vpop.f32.mrf.mxu1  ;;  %v15677_v38 = vld [vmem:[#allocation6 + $0x624] sm:$0xf]  ;;  %v14563_v43 = vld [vmem:[#allocation6 + $0x6a8] sm:$0xf0] }
0x1262   :  { %10592 = vmatpush.bf16.msra.mxu3 %v14382_v48  ;;  %v14606_v48 = vor.u32 %v15703_v1, %v14603_v4  ;;  %v15725_v1 = vld [vmem:[#allocation6 + $0x7a4] sm:$0xf]  ;;  %v14691_v4 = vld [vmem:[#allocation6 + $0x7a8] sm:$0xf0]  ;;  %v14683_v19 = vld [vmem:[#allocation6 + $0x798] sm:$0xf0] }
0x1263   :  { %10568 = vmatpush.bf16.msrb.mxu1 %v14238_v55  ;;  %v14670_v55 = vor.u32 %v15719_v57, %v14667_v25  ;;  %v15695_v57 = vld [vmem:[#allocation6 + $0x6b4] sm:$0xf]  ;;  %v14694_v58 = vor.u32 %v15725_v1, %v14691_v4 }
0x1264   :  { %10607 = vmatpush.bf16.msra.mxu0 %v14430_v20  ;;  %v14659_v20 = vld [vmem:[#allocation6 + $0x768] sm:$0xf0]  ;;  %v10337_v2 = vpop.f32.mrf.mxu3 }
0x1265   :  { %10580 = vmatpush.bf16.msra.mxu2 %v14310_v30  ;;  %v15729_v30 = vld [vmem:[#allocation6 + $0x7c4] sm:$0xf]  ;;  %v14662_v12 = vor.u32 %v15717_v11, %v14659_v20 }
0x1266   :  { %10593 = vmatpush.bf16.msra.mxu3 %v14374_v18  ;;  %v15709_v20 = vld [vmem:[#allocation6 + $0x724] sm:$0xf] }
0x1267   :  { %10569 = vmatpush.bf16.msrb.mxu1 %v14230_v8  ;;  %v14710_v8 = vor.u32 %v15729_v30, %v14707_v15  ;;  %v14566_v30 = vor.u32 %v15693_v6, %v14563_v43  ;;  %v15721_v15 = vld [vmem:[#allocation6 + $0x784] sm:$0xf] }
0x1268   :  { %10608 = vmatpush.bf16.msra.mxu0 %v14422_v51  ;;  %v14590_v51 = vor.u32 %v15699_v10, %v14587_v62  ;;  %v21755_v37 = vpop.f32.mrf.mxu0  ;;  %v15691_v62 = vld [vmem:[#allocation6 + $0x694] sm:$0xf] }
0x1269   :  { %10581 = vmatpush.bf16.msra.mxu2 %v14302_v59  ;;  %v14654_v59 = vor.u32 %v15715_v24, %v14651_v53  ;;  %v15707_v53 = vld [vmem:[#allocation6 + $0x714] sm:$0xf] }
0x126a   :  { %10594 = vmatpush.bf16.msra.mxu3 %v14366_v33  ;;  %10570 = vmatmul.bf16.vlgmr.msrb.gmra.mxu1 %v21671_v61  ;;  %v14515_v61 = vld [vmem:[#allocation6 + $0x648] sm:$0xf0] }
0x126b   :  { %10614 = vmatpush.bf16.msra.mxu1 %v14542_v31  ;;  %10609 = vmatmul.bf16.vlgmr.msra.gmra.mxu0 %v21673_v34  ;;  %v10324_v34 = vpop.f32.mrf.mxu2  ;;  %v14518_v32 = vor.u32 %v15681_v47, %v14515_v61  ;;  %v15727_v31 = vld [vmem:[#allocation6 + $0x7b4] sm:$0xf]  ;;  %v14643_v33 = vld [vmem:[#allocation6 + $0x748] sm:$0xf0]  ;;  %v14686_v47 = vor.u32 %v15723_v0, %v14683_v19  ;;  %v15673_v61 = vld [vmem:[#allocation6 + $0x604] sm:$0xf] }
0x126c   :  { %10653 = vmatpush.bf16.msrb.mxu0 %v14734_v36  ;;  %v10325_v18 = vadd.f32 %v10324_v34, %v10312_v16  ;;  %v10363_v36 = vpop.f32.mrf.mxu1  ;;  %v15713_v16 = vld [vmem:[#allocation6 + $0x744] sm:$0xf]  ;;  %v14702_v39 = vor.u32 %v15727_v31, %v14699_v9  ;;  %v10339_v25 = vpop.f32.mrf.mxu3  ;;  %v14675_v34 = vld [vmem:[#allocation6 + $0x788] sm:$0xf0] }
0x126d   :  { %10582 = vmatpush.bf16.msra.mxu2 %v14294_v46  ;;  %v15711_v46 = vld [vmem:[#allocation6 + $0x734] sm:$0xf]  ;;  %v15689_v31 = vld [vmem:[#allocation6 + $0x684] sm:$0xf]  ;;  %v14547_v9 = vld [vmem:[#allocation6 + $0x688] sm:$0xf0] }
0x126e   :  { %10595 = vmatpush.bf16.msra.mxu3 %v14358_v54  ;;  %v10338_v21 = vadd.f32 %v10337_v2, %v10325_v18  ;;  %v15675_v54 = vld [vmem:[#allocation6 + $0x614] sm:$0xf]  ;;  %v14638_v52 = vor.u32 %v15711_v46, %v14635_v50  ;;  %v14555_v18 = vld [vmem:[#allocation6 + $0x698] sm:$0xf0] }
0x126f   :  { %10615 = vmatpush.bf16.msra.mxu1 %v14534_v44  ;;  %v14646_v44 = vor.u32 %v15713_v16, %v14643_v33 }
0x1270   :  { %10654 = vmatpush.bf16.msrb.mxu0 %v14726_v42  ;;  %10583 = vmatmul.bf16.vlgmr.msra.gmra.mxu2 %v21682_v63  ;;  %v14579_v63 = vld [vmem:[#allocation6 + $0x6c8] sm:$0xf0]  ;;  %v10351_v28 = vadd.f32 %v21748_v14, %v10338_v21  ;;  %v14571_v14 = vld [vmem:[#allocation6 + $0x6b8] sm:$0xf0]  ;;  %v14502_v42 = vor.u32 %v15677_v38, %v14499_v3  ;;  %v14558_v21 = vor.u32 %v15691_v62, %v14555_v18 }
0x1271   :  { %10627 = vmatpush.bf16.msrb.mxu2 %v14606_v48  ;;  %10596 = vmatmul.bf16.vlgmr.msra.gmra.mxu3 %v21684_v60  ;;  %v14510_v60 = vor.u32 %v15679_v56, %v14507_v29  ;;  %v14582_v17 = vor.u32 %v15697_v27, %v14579_v63  ;;  %v14491_v48 = vld [vmem:[#allocation6 + $0x618] sm:$0xf0]  ;;  %v14574_v41 = vor.u32 %v15695_v57, %v14571_v14  ;;  %v8967_v14 = vperm.slane %v21744_v35, 1 }
0x1272   :  { %10640 = vmatpush.bf16.msrb.mxu3 %v14670_v55  ;;  %v10364_v40 = vadd.f32 %v10363_v36, %v10351_v28  ;;  %v14494_v11 = vor.u32 %v15675_v54, %v14491_v48  ;;  %v14678_v56 = vor.u32 %v15721_v15, %v14675_v34  ;;  %v15705_v36 = vld [vmem:[#allocation6 + $0x704] sm:$0xf]  ;;  %v14550_v63 = vor.u32 %v15689_v31, %v14547_v9 }
0x1273   :  { %10616 = vmatpush.bf16.msra.mxu1 %v14526_v13  ;;  %v10326_v49 = vpop.f32.mrf.mxu2  ;;  %v10404_v13 = vpop.f32.mrf.mxu0 }
0x1274   :  { %10655 = vmatpush.bf16.msrb.mxu0 %v14718_v7  ;;  %v10365_v55 = vpop.f32.mrf.mxu1  ;;  %v14627_v7 = vld [vmem:[#allocation6 + $0x728] sm:$0xf0] }
0x1275   :  { %10628 = vmatpush.bf16.msrb.mxu2 %v14598_v23  ;;  %v14483_v23 = vld [vmem:[#allocation6 + $0x608] sm:$0xf0]  ;;  %v14630_v10 = vor.u32 %v15709_v20, %v14627_v7 }
0x1276   :  { %10641 = vmatpush.bf16.msrb.mxu3 %v14662_v12  ;;  %v14486_v24 = vor.u32 %v15673_v61, %v14483_v23 }
0x1277   :  { %10617 = vmatpush.bf16.msra.mxu1 %v14518_v32  ;;  %v10389_v32 = vpop.f32.mrf.mxu3 }
0x1278   :  { %10656 = vmatpush.bf16.msrb.mxu0 %v14710_v8  ;;  %v14619_v8 = vld [vmem:[#allocation6 + $0x718] sm:$0xf0] }
0x1279   :  { %10629 = vmatpush.bf16.msrb.mxu2 %v14590_v51  ;;  %v14622_v51 = vor.u32 %v15707_v53, %v14619_v8 }
0x127a   :  { %10642 = vmatpush.bf16.msrb.mxu3 %v14654_v59  ;;  %v14611_v59 = vld [vmem:[#allocation6 + $0x708] sm:$0xf0] }
0x127b   :  { %10618 = vmatpush.bf16.msra.mxu1 %v14510_v60  ;;  %v10376_v12 = vpop.f32.mrf.mxu2  ;;  %v14614_v60 = vor.u32 %v15705_v36, %v14611_v59 }
0x127c   :  { %10657 = vmatpush.bf16.msrb.mxu0 %v14702_v39  ;;  %v10377_v2 = vadd.f32 %v10376_v12, %v10364_v40 }
0x127d   :  { %10630 = vmatpush.bf16.msrb.mxu2 %v14582_v17 }
0x127e   :  { %10643 = vmatpush.bf16.msrb.mxu3 %v14646_v44  ;;  %v10390_v29 = vadd.f32 %v10389_v32, %v10377_v2 }
0x127f   :  { %10619 = vmatpush.bf16.msra.mxu1 %v14502_v42  ;;  %v10391_v16 = vpop.f32.mrf.mxu3 }
0x1280   :  { %10658 = vmatpush.bf16.msrb.mxu0 %v14694_v58  ;;  %v10403_v27 = vadd.f32 %v21755_v37, %v10390_v29 }
0x1281   :  { %10631 = vmatpush.bf16.msrb.mxu2 %v14574_v41 }
0x1282   :  { %10644 = vmatpush.bf16.msrb.mxu3 %v14638_v52 }
0x1283   :  { %10620 = vmatpush.bf16.msra.mxu1 %v14494_v11  ;;  %v10378_v28 = vpop.f32.mrf.mxu2 }
0x1284   :  { %10659 = vmatpush.bf16.msrb.mxu0 %v14686_v47 }
0x1285   :  { %10632 = vmatpush.bf16.msrb.mxu2 %v14566_v30 }
0x1286   :  { %10645 = vmatpush.bf16.msrb.mxu3 %v14630_v10 }
0x1287   :  { %10621 = vmatpush.bf16.msra.mxu1 %v14486_v24  ;;  %v10415_v33 = vpop.f32.mrf.mxu1 }
0x1288   :  { %10660 = vmatpush.bf16.msrb.mxu0 %v14678_v56  ;;  %v10416_v39 = vadd.f32 %v10415_v33, %v10403_v27  ;;  %v10454_v37 = vpop.f32.mrf.mxu0 }
0x1289   :  { %10633 = vmatpush.bf16.msrb.mxu2 %v14558_v21 }
0x128a   :  { %10646 = vmatpush.bf16.msrb.mxu3 %v14622_v51  ;;  %10622 = vmatmul.bf16.vlgmr.msra.gmra.mxu1 %v21715_v26 }
0x128b   :  { %10661 = vmatmul.bf16.vlgmr.msrb.gmra.mxu0 %v21717_v45 }
0x128d   :  { %10634 = vmatpush.bf16.msrb.mxu2 %v14550_v63 }
0x128e   :  { %10647 = vmatpush.bf16.msrb.mxu3 %v14614_v60 }
0x128f   :  { %v10417_v38 = vpop.f32.mrf.mxu1 }
0x1290   :  { %10635 = vmatmul.bf16.vlgmr.msrb.gmra.mxu2 %v21725_v22  ;;  %v10456_v3 = vpop.f32.mrf.mxu0 }
0x1291   :  { %10648 = vmatmul.bf16.vlgmr.msrb.gmra.mxu3 %v21727_v5 }
0x1293   :  { %v10428_v40 = vpop.f32.mrf.mxu2 }
0x1294   :  { %v10429_v17 = vadd.f32 %v10428_v40, %v10416_v39  ;;  %v10441_v1 = vpop.f32.mrf.mxu3 }
0x1296   :  { %v10442_v26 = vadd.f32 %v10441_v1, %v10429_v17 }
0x1298   :  { %v10455_v4 = vadd.f32 %v10454_v37, %v10442_v26 }
0x129b   :  { %v10430_v49 = vpop.f32.mrf.mxu2 }
0x129c   :  { %v10443_v44 = vpop.f32.mrf.mxu3 }
0x12a7   :  { %v10467_v45 = vpop.f32.mrf.mxu1 }
0x12a8   :  { %v10506_v57 = vpop.f32.mrf.mxu0  ;;  %v10468_v42 = vadd.f32 %v10467_v45, %v8967_v14 }
0x12af   :  { %v10469_v25 = vpop.f32.mrf.mxu1 }
0x12b0   :  { %v10508_v22 = vpop.f32.mrf.mxu0 }
0x12b3   :  { %v10480_v5 = vpop.f32.mrf.mxu2 }
0x12b4   :  { %v10481_v46 = vadd.f32 %v10480_v5, %v10468_v42  ;;  %v10493_v50 = vpop.f32.mrf.mxu3 }
0x12b6   :  { %v10494_v58 = vadd.f32 %v10493_v50, %v10481_v46 }
0x12b8   :  { %v10507_v54 = vadd.f32 %v10506_v57, %v10494_v58 }
0x12bb   :  { %v10482_v48 = vpop.f32.mrf.mxu2 }
0x12bc   :  { %v10495_v41 = vpop.f32.mrf.mxu3 }
0x12c7   :  { %v10519_v0 = vpop.f32.mrf.mxu1 }
0x12c8   :  { %v10558_v19 = vpop.f32.mrf.mxu0  ;;  %v10520_v30 = vadd.f32 %v10519_v0, %v10507_v54 }
0x12cf   :  { %v10521_v55 = vpop.f32.mrf.mxu1 }
0x12d0   :  { %v10560_v52 = vpop.f32.mrf.mxu0 }
0x12d3   :  { %v10532_v6 = vpop.f32.mrf.mxu2 }
0x12d4   :  { %v10545_v43 = vpop.f32.mrf.mxu3  ;;  %v10533_v15 = vadd.f32 %v10532_v6, %v10520_v30 }
0x12d6   :  { %v10546_v10 = vadd.f32 %v10545_v43, %v10533_v15 }
0x12d8   :  { %v10559_v62 = vadd.f32 %v10558_v19, %v10546_v10 }
0x12db   :  { %v10534_v13 = vpop.f32.mrf.mxu2 }
0x12dc   :  { %v10547_v11 = vpop.f32.mrf.mxu3 }
0x12e7   :  { %v10571_v20 = vpop.f32.mrf.mxu1 }
0x12e8   :  { %v10610_v35 = vpop.f32.mrf.mxu0  ;;  %v10572_v18 = vadd.f32 %v10571_v20, %v10559_v62 }
0x12ef   :  { %v10573_v7 = vpop.f32.mrf.mxu1 }
0x12f0   :  { %v10612_v47 = vpop.f32.mrf.mxu0 }
0x12f3   :  { %v10584_v61 = vpop.f32.mrf.mxu2 }
0x12f4   :  { %v10597_v23 = vpop.f32.mrf.mxu3  ;;  %v10585_v32 = vadd.f32 %v10584_v61, %v10572_v18 }
0x12f6   :  { %v10598_v53 = vadd.f32 %v10597_v23, %v10585_v32 }
0x12f8   :  { %v10611_v56 = vadd.f32 %v10610_v35, %v10598_v53 }
0x12fb   :  { %v10586_v34 = vpop.f32.mrf.mxu2 }
0x12fc   :  { %v10599_v12 = vpop.f32.mrf.mxu3 }
0x1307   :  { %v10623_v2 = vpop.f32.mrf.mxu1 }
0x1308   :  { %v10662_v24 = vpop.f32.mrf.mxu0  ;;  %v10624_v21 = vadd.f32 %v10623_v2, %v10611_v56 }
0x130f   :  { %v10625_v8 = vpop.f32.mrf.mxu1 }
0x1310   :  { %v10664_v29 = vpop.f32.mrf.mxu0 }
0x1313   :  { %v10636_v51 = vpop.f32.mrf.mxu2 }
0x1314   :  { %v10637_v31 = vadd.f32 %v10636_v51, %v10624_v21  ;;  %v10649_v9 = vpop.f32.mrf.mxu3 }
0x1316   :  { %v10650_v36 = vadd.f32 %v10649_v9, %v10637_v31 }
0x1318   :  { %v10663_v59 = vadd.f32 %v10662_v24, %v10650_v36 }
0x131a   :  { %15767 = vtanh.f32 %v10663_v59 }
0x131b   :  { %v10638_v27 = vpop.f32.mrf.mxu2  ;;  %15769 = vtanh.f32 %v10455_v4 }
0x131c   :  { %v10651_v63 = vpop.f32.mrf.mxu3 }
0x1320   :  { %v15768_v28 = vpop.eup %15767 }
0x1321   :  { %v10670_v60 = vrot.slane %v15768_v28, 6  ;;  %v15770_v16 = vpop.eup %15769 }
0x1323   :  { %v10671_v33 = vsel %vm616_vm0, %v15770_v16, %v10670_v60 }
0x1324   :  { %10673 = vst [vmem:[%s21783_s16] sm:$0xf] %v10671_v33 }
0x1325   :  { %10682 = vsyncpa [#allocation3], 1 }
0x1326   :  { %10683 = vsyncpa [#allocation5], 1 }
0x1327   :  { %10684 = vsyncpa [#allocation8], 1 }

</bundles_post_ra>
